<compile_context>
chip_gen: v5e
topology: v5e:2x2
jax: 0.10.0
libtpu: 0.0.40
codegen_flags: <defaults>
</compile_context>

<pallas_src>
import functools

import jax
import jax.numpy as jnp
from jax.experimental import pallas as pl
from jax.experimental.pallas import tpu as pltpu


# ---------------------------------------------------------------------------
# Fused Bottleneck kernel
# ---------------------------------------------------------------------------
def _bottleneck_kernel(
    xc_ref,      # (TH, W, Cin)   bf16  center rows of the input (auto-pipelined)
    x_any,       # (N, H, W, Cin) bf16  same tensor, raw HBM ref (halo rows)
    w1_ref,      # (Cin, P)   bf16  conv1 1x1 weight, BN1 scale folded in
    b1_ref,      # (1, P)     f32
    w2_ref,      # (9*P, P)   bf16  conv2 3x3 weight (row block = tap), BN2 scale folded
    b2_ref,      # (1, P)     f32
    w3_ref,      # (P, Cout)  bf16  conv3 1x1 weight, BN3 scale folded in
    b3_ref,      # (1, Cout)  f32
    o_ref,       # (TH, W, Cout) bf16
    h1_ref,      # VMEM scratch (TH+2, W+2, P) bf16 : conv1 tile incl. row halo + W pad
    hbuf,        # VMEM scratch (2, W, Cin) bf16    : top/bottom halo input rows
    col_ref,     # VMEM scratch (TH, W, 9*P) bf16   : im2col tile for conv2
    sem,         # DMA semaphores (2,)
    *, TH, H, W, Cin, P, Cout,
):
    n = pl.program_id(0)
    hb = pl.program_id(1)
    row0 = hb * TH                      # first image row of this tile

    # Kick off the (tiny) halo-row DMAs so they overlap the conv1 matmul below.
    # Row indices are clamped in-bounds; out-of-image halo rows are zeroed later.
    top_row = jnp.maximum(row0 - 1, 0)
    bot_row = jnp.minimum(row0 + TH, H - 1)
    cp_top = pltpu.make_async_copy(x_any.at[n, top_row], hbuf.at[0], sem.at[0])
    cp_bot = pltpu.make_async_copy(x_any.at[n, bot_row], hbuf.at[1], sem.at[1])
    cp_top.start()
    cp_bot.start()

    w1 = w1_ref[...]
    b1 = b1_ref[...]

    # Zero the two W-pad columns of h1 (they provide the 3x3 conv's zero padding).
    zcol = jnp.zeros((TH + 2, 1, P), h1_ref.dtype)
    h1_ref[:, 0:1, :] = zcol
    h1_ref[:, W + 1:W + 2, :] = zcol

    # ---- conv1 (1x1) + bn1 + relu on the TH center rows ----------------------------
    xc = xc_ref[...]                                          # (TH, W, Cin) bf16
    h1c = jnp.dot(xc.reshape(TH * W, Cin), w1,
                  preferred_element_type=jnp.float32)
    h1c = jnp.maximum(h1c + b1, 0.0).reshape(TH, W, P)
    h1_ref[1:TH + 1, 1:W + 1, :] = h1c.astype(h1_ref.dtype)

    # ---- conv1 on the two halo rows (after their DMA lands) ------------------------
    cp_top.wait()
    cp_bot.wait()
    xh = hbuf[...]                                            # (2, W, Cin) bf16
    h1h = jnp.dot(xh.reshape(2 * W, Cin), w1,
                  preferred_element_type=jnp.float32)
    h1h = jnp.maximum(h1h + b1, 0.0).reshape(2, W, P)
    top_valid = row0 > 0                 # halo row inside image -> real h1, else zero
    bot_valid = row0 + TH < H
    h1_ref[0:1, 1:W + 1, :] = jnp.where(top_valid, h1h[0:1], 0.0).astype(h1_ref.dtype)
    h1_ref[TH + 1:TH + 2, 1:W + 1, :] = (
        jnp.where(bot_valid, h1h[1:2], 0.0).astype(h1_ref.dtype))

    # ---- conv2 (3x3, pad=1): im2col in VMEM, one matmul with K = 9*P + bn2 + relu ---
    for ky in range(3):
        for kx in range(3):
            tap = ky * 3 + kx
            col_ref[:, :, tap * P:(tap + 1) * P] = h1_ref[ky:ky + TH, kx:kx + W, :]
    h2 = jnp.dot(col_ref[...].reshape(TH * W, 9 * P), w2_ref[...],
                 preferred_element_type=jnp.float32)
    h2 = jnp.maximum(h2 + b2_ref[...], 0.0).astype(jnp.bfloat16)

    # ---- conv3 (1x1) + bn3 + residual add + relu ------------------------------------
    acc3 = jnp.dot(h2, w3_ref[...], preferred_element_type=jnp.float32)
    res = xc.reshape(TH * W, Cin).astype(jnp.float32)
    out = jnp.maximum(acc3 + b3_ref[...] + res, 0.0)
    o_ref[...] = out.reshape(TH, W, Cout).astype(o_ref.dtype)


# ---------------------------------------------------------------------------
# Helpers
# ---------------------------------------------------------------------------
def _round_up(x, m):
    return (x + m - 1) // m * m


def _pick_row_tile(H, W):
    """Smallest divisor of H with TH*W >= 256, preferring multiples of 8."""
    divisors = [d for d in range(1, H + 1) if H % d == 0]
    for d in divisors:
        if d % 8 == 0 and d * W >= 256:
            return d
    for d in divisors:
        if d * W >= 256:
            return d
    return H


def _vmem_estimate(TH, W, Cin, P, Cout):
    bf, f32 = 2, 4
    io = 2 * (TH * W * Cin * bf) + 2 * (TH * W * Cout * bf)            # pipelined blocks
    wts = 2 * ((Cin * P + 9 * P * P + P * Cout) * bf + (2 * P + Cout) * f32)
    scr = ((TH + 2) * (W + 8) * P + 2 * (W + 8) * Cin + TH * W * 9 * P) * bf
    return io + wts + scr


# ---------------------------------------------------------------------------
# Wrapper: NCHW in, NCHW out (stride=1, downsample=None)
# ---------------------------------------------------------------------------
def bottleneck_forward(x_nchw, p):
    N, Cin, H, W = x_nchw.shape
    P = p["w1"].shape[1]
    Cout = p["w3"].shape[1]
    assert Cout == Cin, "identity shortcut requires inplanes == planes * 4"

    # Lane-dense channel padding (multiples of 128).
    Cin_p = _round_up(Cin, 128)
    P_p = _round_up(P, 128)
    Cout_p = _round_up(Cout, 128)
    assert Cin_p == Cout_p

    TH = _pick_row_tile(H, W)
    n_hb = H // TH

    # NCHW -> NHWC, pad channels, cast to bf16.  No spatial padding (handled in-kernel).
    x_nhwc = jnp.transpose(x_nchw, (0, 2, 3, 1)).astype(jnp.bfloat16)
    x_pad = jnp.pad(x_nhwc, ((0, 0), (0, 0), (0, 0), (0, Cin_p - Cin)))

    w1 = jnp.pad(p["w1"], ((0, Cin_p - Cin), (0, P_p - P))).astype(jnp.bfloat16)
    w2 = jnp.pad(p["w2"], ((0, 0), (0, 0), (0, P_p - P), (0, P_p - P)))
    w2 = w2.reshape(9 * P_p, P_p).astype(jnp.bfloat16)       # HWIO -> (tap*P + ci, co)
    w3 = jnp.pad(p["w3"], ((0, P_p - P), (0, Cout_p - Cout))).astype(jnp.bfloat16)
    b1 = jnp.pad(p["b1"], (0, P_p - P)).reshape(1, P_p).astype(jnp.float32)
    b2 = jnp.pad(p["b2"], (0, P_p - P)).reshape(1, P_p).astype(jnp.float32)
    b3 = jnp.pad(p["b3"], (0, Cout_p - Cout)).reshape(1, Cout_p).astype(jnp.float32)

    kernel = functools.partial(
        _bottleneck_kernel, TH=TH, H=H, W=W, Cin=Cin_p, P=P_p, Cout=Cout_p)

    vmem_limit = int(min(100 * 2 ** 20,
                         _vmem_estimate(TH, W, Cin_p, P_p, Cout_p) + 16 * 2 ** 20))

    out_nhwc = pl.pallas_call(
        kernel,
        out_shape=jax.ShapeDtypeStruct((N, H, W, Cout_p), jnp.bfloat16),
        grid=(N, n_hb),
        in_specs=[
            pl.BlockSpec((None, TH, W, Cin_p), lambda n, hb: (n, hb, 0, 0)),
            pl.BlockSpec(memory_space=pl.ANY),   # same array, raw HBM ref for halo DMA
            pl.BlockSpec((Cin_p, P_p), lambda n, hb: (0, 0)),
            pl.BlockSpec((1, P_p), lambda n, hb: (0, 0)),
            pl.BlockSpec((9 * P_p, P_p), lambda n, hb: (0, 0)),
            pl.BlockSpec((1, P_p), lambda n, hb: (0, 0)),
            pl.BlockSpec((P_p, Cout_p), lambda n, hb: (0, 0)),
            pl.BlockSpec((1, Cout_p), lambda n, hb: (0, 0)),
        ],
        out_specs=pl.BlockSpec((None, TH, W, Cout_p), lambda n, hb: (n, hb, 0, 0)),
        scratch_shapes=[
            pltpu.VMEM((TH + 2, W + 2, P_p), jnp.bfloat16),   # h1 tile (halo + W pad)
            pltpu.VMEM((2, W, Cin_p), jnp.bfloat16),          # halo input rows
            pltpu.VMEM((TH, W, 9 * P_p), jnp.bfloat16),       # im2col tile
            pltpu.SemaphoreType.DMA((2,)),
        ],
        compiler_params=pltpu.CompilerParams(
            dimension_semantics=("parallel", "parallel"),
            vmem_limit_bytes=vmem_limit,
        ),
    )(x_pad, x_pad, w1, b1, w2, b2, w3, b3)

    out_nhwc = out_nhwc[..., :Cout]
    return jnp.transpose(out_nhwc, (0, 3, 1, 2)).astype(jnp.float32)


# ---------------------------------------------------------------------------
# Pure-JAX reference (same folded-BN semantics, f32 math on bf16-rounded inputs)
# ---------------------------------------------------------------------------
def reference_forward(x_nchw, p):
    x = jnp.transpose(x_nchw, (0, 2, 3, 1)).astype(jnp.bfloat16).astype(jnp.float32)
    w1 = p["w1"].astype(jnp.bfloat16).astype(jnp.float32)
    w2 = p["w2"].astype(jnp.bfloat16).astype(jnp.float32)
    w3 = p["w3"].astype(jnp.bfloat16).astype(jnp.float32)

    def conv(inp, w_hwio, pad):
        return jax.lax.conv_general_dilated(
            inp, w_hwio, (1, 1), pad,
            dimension_numbers=("NHWC", "HWIO", "NHWC"),
            precision=jax.lax.Precision.HIGHEST)

    h = jnp.maximum(conv(x, w1[None, None], "VALID") + p["b1"], 0.0)
    h = jnp.maximum(conv(h, w2, "SAME") + p["b2"], 0.0)
    o = jnp.maximum(conv(h, w3[None, None], "VALID") + p["b3"] + x, 0.0)
    return jnp.transpose(o, (0, 3, 1, 2))


# ---------------------------------------------------------------------------
if __name__ == "__main__":
    key = jax.random.PRNGKey(0)
    N, planes, H, W = 2, 32, 16, 16
    inplanes = planes * 4            # identity path requires inplanes == planes * 4
    keys = jax.random.split(key, 16)

    def nrm(k, shape, s=0.1):
        return jax.random.normal(k, shape, jnp.float32) * s

    eps = 1e-5

    def bn_fold(kg, kb, km, kv, c):
        gamma = 1.0 + nrm(kg, (c,))
        beta = nrm(kb, (c,))
        mean = nrm(km, (c,))
        var = 1.0 + jnp.abs(nrm(kv, (c,)))
        s = gamma / jnp.sqrt(var + eps)
        b = beta - mean * s
        return s, b

    w1 = nrm(keys[0], (inplanes, planes))             # 1x1 conv1
    s1, b1 = bn_fold(keys[1], keys[2], keys[3], keys[4], planes)
    w2 = nrm(keys[5], (3, 3, planes, planes))         # 3x3 conv2 (HWIO)
    s2, b2 = bn_fold(keys[6], keys[7], keys[8], keys[9], planes)
    w3 = nrm(keys[10], (planes, planes * 4))          # 1x1 conv3
    s3, b3 = bn_fold(keys[11], keys[12], keys[13], keys[14], planes * 4)

    # Fold BN scales into the conv weights once (eval-mode parameters are static).
    params = {
        "w1": w1 * s1[None, :], "b1": b1,
        "w2": w2 * s2,          "b2": b2,      # s2 broadcasts over HWIO out-channel dim
        "w3": w3 * s3[None, :], "b3": b3,
    }

    x = jax.random.normal(keys[15], (N, inplanes, H, W), jnp.float32)

    out = jax.block_until_ready(jax.jit(bottleneck_forward)(x, params))
    ref = jax.block_until_ready(reference_forward(x, params))

    assert out.shape == (N, inplanes, H, W), out.shape
    max_err = float(jnp.max(jnp.abs(out - ref)))
    # bf16 activations/intermediates/output in the kernel vs f32 reference math on
    # bf16-rounded inputs -> use a magnitude-aware tolerance.
    tol = 3e-2 * (1.0 + float(jnp.max(jnp.abs(ref))))
    assert max_err < tol, f"mismatch vs reference: {max_err} (tol {tol})"
    print("KERNEL_OK")
</pallas_src>

<mosaic_0001>
module attributes {stable_mosaic.version = 11 : i64} {
  func.func @_bottleneck_kernel(%arg0: i32, %arg1: i32, %arg2: memref<1x16x16x128xbf16, #tpu.memory_space<vmem>>, %arg3: memref<2x16x16x128xbf16, #tpu.memory_space<any>>, %arg4: memref<128x128xbf16, #tpu.memory_space<vmem>>, %arg5: memref<1x128xf32, #tpu.memory_space<vmem>>, %arg6: memref<1152x128xbf16, #tpu.memory_space<vmem>>, %arg7: memref<1x128xf32, #tpu.memory_space<vmem>>, %arg8: memref<128x128xbf16, #tpu.memory_space<vmem>>, %arg9: memref<1x128xf32, #tpu.memory_space<vmem>>, %arg10: memref<1x16x16x128xbf16, #tpu.memory_space<vmem>>, %arg11: memref<18x18x128xbf16, #tpu.memory_space<vmem>>, %arg12: memref<2x16x128xbf16, #tpu.memory_space<vmem>>, %arg13: memref<16x16x1152xbf16, #tpu.memory_space<vmem>>, %arg14: memref<2x!tpu.dma_semaphore, #tpu.memory_space<semaphore_mem>>) attributes {dimension_semantics = [#tpu.dimension_semantics<parallel>, #tpu.dimension_semantics<parallel>], iteration_bounds = array<i64: 2, 1>, scalar_prefetch = 0 : i64, scratch_operands = 4 : i64, tpu.core_type = #tpu.core_type<tc>, window_params = [{transform_indices = @transform_0, window_bounds = array<i64: 1, 16, 16, 128>}, {}, {pipeline_mode = #tpu.pipeline_mode<synchronous>, transform_indices = @transform_2, window_bounds = array<i64: 128, 128>}, {pipeline_mode = #tpu.pipeline_mode<synchronous>, transform_indices = @transform_3, window_bounds = array<i64: 1, 128>}, {pipeline_mode = #tpu.pipeline_mode<synchronous>, transform_indices = @transform_4, window_bounds = array<i64: 1152, 128>}, {pipeline_mode = #tpu.pipeline_mode<synchronous>, transform_indices = @transform_5, window_bounds = array<i64: 1, 128>}, {pipeline_mode = #tpu.pipeline_mode<synchronous>, transform_indices = @transform_6, window_bounds = array<i64: 128, 128>}, {pipeline_mode = #tpu.pipeline_mode<synchronous>, transform_indices = @transform_7, window_bounds = array<i64: 1, 128>}, {transform_indices = @transform_8, window_bounds = array<i64: 1, 16, 16, 128>}]} {
    %c16_i32 = arith.constant 16 : i32
    %0 = arith.muli %arg1, %c16_i32 : i32
    %c1_i32 = arith.constant 1 : i32
    %1 = arith.subi %0, %c1_i32 : i32
    %c0_i32 = arith.constant 0 : i32
    %2 = arith.maxsi %1, %c0_i32 : i32
    %c16_i32_0 = arith.constant 16 : i32
    %3 = arith.addi %0, %c16_i32_0 : i32
    %c15_i32 = arith.constant 15 : i32
    %4 = arith.minsi %3, %c15_i32 : i32
    %c0_i32_1 = arith.constant 0 : i32
    %c0_i32_2 = arith.constant 0 : i32
    %c0_i32_3 = arith.constant 0 : i32
    %c0_i32_4 = arith.constant 0 : i32
    %5 = tpu.memref_slice %arg3[%arg0, %2, %c0_i32_3, %c0_i32_4] : memref<2x16x16x128xbf16, #tpu.memory_space<any>> -> memref<1x1x16x128xbf16, #tpu.memory_space<any>>
    %6 = tpu.memref_squeeze %5 : memref<1x1x16x128xbf16, #tpu.memory_space<any>> -> memref<16x128xbf16, #tpu.memory_space<any>>
    %c0_i32_5 = arith.constant 0 : i32
    %c0_i32_6 = arith.constant 0 : i32
    %7 = tpu.memref_slice %arg12[%c0_i32_1, %c0_i32_5, %c0_i32_6] : memref<2x16x128xbf16, #tpu.memory_space<vmem>> -> memref<1x16x128xbf16, #tpu.memory_space<vmem>>
    %8 = tpu.memref_squeeze %7 : memref<1x16x128xbf16, #tpu.memory_space<vmem>> -> memref<16x128xbf16, #tpu.memory_space<vmem>>
    %9 = tpu.memref_slice %arg14[%c0_i32_2] : memref<2x!tpu.dma_semaphore, #tpu.memory_space<semaphore_mem>> -> memref<1x!tpu.dma_semaphore, #tpu.memory_space<semaphore_mem>>
    %10 = tpu.memref_squeeze %9 : memref<1x!tpu.dma_semaphore, #tpu.memory_space<semaphore_mem>> -> memref<!tpu.dma_semaphore, #tpu.memory_space<semaphore_mem>>
    tpu.enqueue_dma source(%6 : memref<16x128xbf16, #tpu.memory_space<any>>) target(%8 : memref<16x128xbf16, #tpu.memory_space<vmem>>) target_semaphore(%10 : memref<!tpu.dma_semaphore, #tpu.memory_space<semaphore_mem>>)
    %c1_i32_7 = arith.constant 1 : i32
    %c1_i32_8 = arith.constant 1 : i32
    %c0_i32_9 = arith.constant 0 : i32
    %c0_i32_10 = arith.constant 0 : i32
    %11 = tpu.memref_slice %arg3[%arg0, %4, %c0_i32_9, %c0_i32_10] : memref<2x16x16x128xbf16, #tpu.memory_space<any>> -> memref<1x1x16x128xbf16, #tpu.memory_space<any>>
    %12 = tpu.memref_squeeze %11 : memref<1x1x16x128xbf16, #tpu.memory_space<any>> -> memref<16x128xbf16, #tpu.memory_space<any>>
    %c0_i32_11 = arith.constant 0 : i32
    %c0_i32_12 = arith.constant 0 : i32
    %13 = tpu.memref_slice %arg12[%c1_i32_7, %c0_i32_11, %c0_i32_12] : memref<2x16x128xbf16, #tpu.memory_space<vmem>> -> memref<1x16x128xbf16, #tpu.memory_space<vmem>>
    %14 = tpu.memref_squeeze %13 : memref<1x16x128xbf16, #tpu.memory_space<vmem>> -> memref<16x128xbf16, #tpu.memory_space<vmem>>
    %15 = tpu.memref_slice %arg14[%c1_i32_8] : memref<2x!tpu.dma_semaphore, #tpu.memory_space<semaphore_mem>> -> memref<1x!tpu.dma_semaphore, #tpu.memory_space<semaphore_mem>>
    %16 = tpu.memref_squeeze %15 : memref<1x!tpu.dma_semaphore, #tpu.memory_space<semaphore_mem>> -> memref<!tpu.dma_semaphore, #tpu.memory_space<semaphore_mem>>
    tpu.enqueue_dma source(%12 : memref<16x128xbf16, #tpu.memory_space<any>>) target(%14 : memref<16x128xbf16, #tpu.memory_space<vmem>>) target_semaphore(%16 : memref<!tpu.dma_semaphore, #tpu.memory_space<semaphore_mem>>)
    %c0 = arith.constant 0 : index
    %c0_13 = arith.constant 0 : index
    %17 = vector.load %arg4[%c0, %c0_13] : memref<128x128xbf16, #tpu.memory_space<vmem>>, vector<128x128xbf16>
    %c0_14 = arith.constant 0 : index
    %c0_15 = arith.constant 0 : index
    %18 = vector.load %arg5[%c0_14, %c0_15] : memref<1x128xf32, #tpu.memory_space<vmem>>, vector<1x128xf32>
    %cst = arith.constant 0.000000e+00 : bf16
    %19 = vector.broadcast %cst : bf16 to vector<18x1x128xbf16>
    %c0_16 = arith.constant 0 : index
    %c0_17 = arith.constant 0 : index
    %c0_18 = arith.constant 0 : index
    %20 = vector.load %arg11[%c0_16, %c0_17, %c0_18] : memref<18x18x128xbf16, #tpu.memory_space<vmem>>, vector<18x1x128xbf16>
    tpu.vector_store %arg11[%c0_16, %c0_17, %c0_18], %19 {strides = array<i32>} : memref<18x18x128xbf16, #tpu.memory_space<vmem>>, vector<18x1x128xbf16>,
    %c0_19 = arith.constant 0 : index
    %c17 = arith.constant 17 : index
    %c0_20 = arith.constant 0 : index
    %21 = vector.load %arg11[%c0_19, %c17, %c0_20] : memref<18x18x128xbf16, #tpu.memory_space<vmem>>, vector<18x1x128xbf16>
    tpu.vector_store %arg11[%c0_19, %c17, %c0_20], %19 {strides = array<i32>} : memref<18x18x128xbf16, #tpu.memory_space<vmem>>, vector<18x1x128xbf16>,
    %c0_21 = arith.constant 0 : index
    %c0_22 = arith.constant 0 : index
    %c0_23 = arith.constant 0 : index
    %c0_24 = arith.constant 0 : index
    %22 = vector.load %arg2[%c0_21, %c0_22, %c0_23, %c0_24] : memref<1x16x16x128xbf16, #tpu.memory_space<vmem>>, vector<1x16x16x128xbf16>
    %23 = vector.shape_cast %22 : vector<1x16x16x128xbf16> to vector<16x16x128xbf16>
    %24 = vector.shape_cast %23 : vector<16x16x128xbf16> to vector<256x128xbf16>
    %cst_25 = arith.constant dense<0.000000e+00> : vector<256x128xf32>
    %25 = tpu.matmul %24, %17, %cst_25 {dimension_numbers = #tpu.dot_dimension_numbers<[1], [0], [0], [1], [0, 0, 1, 1], [], []>} : vector<256x128xbf16>, vector<128x128xbf16>, vector<256x128xf32> -> vector<256x128xf32>
    %26 = vector.broadcast %18 : vector<1x128xf32> to vector<256x128xf32>
    %27 = arith.addf %25, %26 : vector<256x128xf32>
    %cst_26 = arith.constant 0.000000e+00 : f32
    %28 = vector.broadcast %cst_26 : f32 to vector<256x128xf32>
    %29 = arith.maximumf %27, %28 : vector<256x128xf32>
    %30 = vector.shape_cast %29 : vector<256x128xf32> to vector<16x16x128xf32>
    %31 = arith.truncf %30 : vector<16x16x128xf32> to vector<16x16x128xbf16>
    %c1 = arith.constant 1 : index
    %c1_27 = arith.constant 1 : index
    %c0_28 = arith.constant 0 : index
    %32 = vector.load %arg11[%c1, %c1_27, %c0_28] : memref<18x18x128xbf16, #tpu.memory_space<vmem>>, vector<16x16x128xbf16>
    tpu.vector_store %arg11[%c1, %c1_27, %c0_28], %31 {strides = array<i32>} : memref<18x18x128xbf16, #tpu.memory_space<vmem>>, vector<16x16x128xbf16>,
    %c0_i32_29 = arith.constant 0 : i32
    %c0_i32_30 = arith.constant 0 : i32
    %c0_i32_31 = arith.constant 0 : i32
    %c0_i32_32 = arith.constant 0 : i32
    %33 = tpu.memref_slice %arg3[%arg0, %2, %c0_i32_31, %c0_i32_32] : memref<2x16x16x128xbf16, #tpu.memory_space<any>> -> memref<1x1x16x128xbf16, #tpu.memory_space<any>>
    %34 = tpu.memref_squeeze %33 : memref<1x1x16x128xbf16, #tpu.memory_space<any>> -> memref<16x128xbf16, #tpu.memory_space<any>>
    %c0_i32_33 = arith.constant 0 : i32
    %c0_i32_34 = arith.constant 0 : i32
    %35 = tpu.memref_slice %arg12[%c0_i32_29, %c0_i32_33, %c0_i32_34] : memref<2x16x128xbf16, #tpu.memory_space<vmem>> -> memref<1x16x128xbf16, #tpu.memory_space<vmem>>
    %36 = tpu.memref_squeeze %35 : memref<1x16x128xbf16, #tpu.memory_space<vmem>> -> memref<16x128xbf16, #tpu.memory_space<vmem>>
    %37 = tpu.memref_slice %arg14[%c0_i32_30] : memref<2x!tpu.dma_semaphore, #tpu.memory_space<semaphore_mem>> -> memref<1x!tpu.dma_semaphore, #tpu.memory_space<semaphore_mem>>
    %38 = tpu.memref_squeeze %37 : memref<1x!tpu.dma_semaphore, #tpu.memory_space<semaphore_mem>> -> memref<!tpu.dma_semaphore, #tpu.memory_space<semaphore_mem>>
    tpu.wait_dma2 semaphore(%38 : memref<!tpu.dma_semaphore, #tpu.memory_space<semaphore_mem>>) src(%34 : memref<16x128xbf16, #tpu.memory_space<any>>) dst(%36 : memref<16x128xbf16, #tpu.memory_space<vmem>>)
    %c1_i32_35 = arith.constant 1 : i32
    %c1_i32_36 = arith.constant 1 : i32
    %c0_i32_37 = arith.constant 0 : i32
    %c0_i32_38 = arith.constant 0 : i32
    %39 = tpu.memref_slice %arg3[%arg0, %4, %c0_i32_37, %c0_i32_38] : memref<2x16x16x128xbf16, #tpu.memory_space<any>> -> memref<1x1x16x128xbf16, #tpu.memory_space<any>>
    %40 = tpu.memref_squeeze %39 : memref<1x1x16x128xbf16, #tpu.memory_space<any>> -> memref<16x128xbf16, #tpu.memory_space<any>>
    %c0_i32_39 = arith.constant 0 : i32
    %c0_i32_40 = arith.constant 0 : i32
    %41 = tpu.memref_slice %arg12[%c1_i32_35, %c0_i32_39, %c0_i32_40] : memref<2x16x128xbf16, #tpu.memory_space<vmem>> -> memref<1x16x128xbf16, #tpu.memory_space<vmem>>
    %42 = tpu.memref_squeeze %41 : memref<1x16x128xbf16, #tpu.memory_space<vmem>> -> memref<16x128xbf16, #tpu.memory_space<vmem>>
    %43 = tpu.memref_slice %arg14[%c1_i32_36] : memref<2x!tpu.dma_semaphore, #tpu.memory_space<semaphore_mem>> -> memref<1x!tpu.dma_semaphore, #tpu.memory_space<semaphore_mem>>
    %44 = tpu.memref_squeeze %43 : memref<1x!tpu.dma_semaphore, #tpu.memory_space<semaphore_mem>> -> memref<!tpu.dma_semaphore, #tpu.memory_space<semaphore_mem>>
    tpu.wait_dma2 semaphore(%44 : memref<!tpu.dma_semaphore, #tpu.memory_space<semaphore_mem>>) src(%40 : memref<16x128xbf16, #tpu.memory_space<any>>) dst(%42 : memref<16x128xbf16, #tpu.memory_space<vmem>>)
    %c0_41 = arith.constant 0 : index
    %c0_42 = arith.constant 0 : index
    %c0_43 = arith.constant 0 : index
    %45 = vector.load %arg12[%c0_41, %c0_42, %c0_43] : memref<2x16x128xbf16, #tpu.memory_space<vmem>>, vector<2x16x128xbf16>
    %46 = vector.shape_cast %45 : vector<2x16x128xbf16> to vector<32x128xbf16>
    %cst_44 = arith.constant dense<0.000000e+00> : vector<32x128xf32>
    %47 = tpu.matmul %46, %17, %cst_44 {dimension_numbers = #tpu.dot_dimension_numbers<[1], [0], [0], [1], [0, 0, 1, 1], [], []>} : vector<32x128xbf16>, vector<128x128xbf16>, vector<32x128xf32> -> vector<32x128xf32>
    %48 = vector.broadcast %18 : vector<1x128xf32> to vector<32x128xf32>
    %49 = arith.addf %47, %48 : vector<32x128xf32>
    %cst_45 = arith.constant 0.000000e+00 : f32
    %50 = vector.broadcast %cst_45 : f32 to vector<32x128xf32>
    %51 = arith.maximumf %49, %50 : vector<32x128xf32>
    %52 = vector.shape_cast %51 : vector<32x128xf32> to vector<2x16x128xf32>
    %c0_i32_46 = arith.constant 0 : i32
    %53 = arith.cmpi sgt, %0, %c0_i32_46 : i32
    %c16_i32_47 = arith.constant 16 : i32
    %54 = arith.addi %0, %c16_i32_47 : i32
    %c16_i32_48 = arith.constant 16 : i32
    %55 = arith.cmpi slt, %54, %c16_i32_48 : i32
    %56 = vector.extract_strided_slice %52 {offsets = [0, 0, 0], sizes = [1, 16, 128], strides = [1, 1, 1]} : vector<2x16x128xf32> to vector<1x16x128xf32>
    %cst_49 = arith.constant 0.000000e+00 : f32
    %57 = vector.broadcast %cst_49 : f32 to vector<1x16x128xf32>
    %58 = arith.select %53, %56, %57 : vector<1x16x128xf32>
    %59 = arith.truncf %58 : vector<1x16x128xf32> to vector<1x16x128xbf16>
    %c0_50 = arith.constant 0 : index
    %c1_51 = arith.constant 1 : index
    %c0_52 = arith.constant 0 : index
    %60 = vector.load %arg11[%c0_50, %c1_51, %c0_52] : memref<18x18x128xbf16, #tpu.memory_space<vmem>>, vector<1x16x128xbf16>
    tpu.vector_store %arg11[%c0_50, %c1_51, %c0_52], %59 {strides = array<i32>} : memref<18x18x128xbf16, #tpu.memory_space<vmem>>, vector<1x16x128xbf16>,
    %61 = vector.extract_strided_slice %52 {offsets = [1, 0, 0], sizes = [1, 16, 128], strides = [1, 1, 1]} : vector<2x16x128xf32> to vector<1x16x128xf32>
    %cst_53 = arith.constant 0.000000e+00 : f32
    %62 = vector.broadcast %cst_53 : f32 to vector<1x16x128xf32>
    %63 = arith.select %55, %61, %62 : vector<1x16x128xf32>
    %64 = arith.truncf %63 : vector<1x16x128xf32> to vector<1x16x128xbf16>
    %c17_54 = arith.constant 17 : index
    %c1_55 = arith.constant 1 : index
    %c0_56 = arith.constant 0 : index
    %65 = vector.load %arg11[%c17_54, %c1_55, %c0_56] : memref<18x18x128xbf16, #tpu.memory_space<vmem>>, vector<1x16x128xbf16>
    tpu.vector_store %arg11[%c17_54, %c1_55, %c0_56], %64 {strides = array<i32>} : memref<18x18x128xbf16, #tpu.memory_space<vmem>>, vector<1x16x128xbf16>,
    %c0_57 = arith.constant 0 : index
    %c0_58 = arith.constant 0 : index
    %c0_59 = arith.constant 0 : index
    %66 = vector.load %arg11[%c0_57, %c0_58, %c0_59] : memref<18x18x128xbf16, #tpu.memory_space<vmem>>, vector<16x16x128xbf16>
    %c0_60 = arith.constant 0 : index
    %c0_61 = arith.constant 0 : index
    %c0_62 = arith.constant 0 : index
    %67 = vector.load %arg13[%c0_60, %c0_61, %c0_62] : memref<16x16x1152xbf16, #tpu.memory_space<vmem>>, vector<16x16x128xbf16>
    tpu.vector_store %arg13[%c0_60, %c0_61, %c0_62], %66 {strides = array<i32>} : memref<16x16x1152xbf16, #tpu.memory_space<vmem>>, vector<16x16x128xbf16>,
    %c0_63 = arith.constant 0 : index
    %c1_64 = arith.constant 1 : index
    %c0_65 = arith.constant 0 : index
    %68 = vector.load %arg11[%c0_63, %c1_64, %c0_65] : memref<18x18x128xbf16, #tpu.memory_space<vmem>>, vector<16x16x128xbf16>
    %c0_66 = arith.constant 0 : index
    %c0_67 = arith.constant 0 : index
    %c128 = arith.constant 128 : index
    %69 = vector.load %arg13[%c0_66, %c0_67, %c128] : memref<16x16x1152xbf16, #tpu.memory_space<vmem>>, vector<16x16x128xbf16>
    tpu.vector_store %arg13[%c0_66, %c0_67, %c128], %68 {strides = array<i32>} : memref<16x16x1152xbf16, #tpu.memory_space<vmem>>, vector<16x16x128xbf16>,
    %c0_68 = arith.constant 0 : index
    %c2 = arith.constant 2 : index
    %c0_69 = arith.constant 0 : index
    %70 = vector.load %arg11[%c0_68, %c2, %c0_69] : memref<18x18x128xbf16, #tpu.memory_space<vmem>>, vector<16x16x128xbf16>
    %c0_70 = arith.constant 0 : index
    %c0_71 = arith.constant 0 : index
    %c256 = arith.constant 256 : index
    %71 = vector.load %arg13[%c0_70, %c0_71, %c256] : memref<16x16x1152xbf16, #tpu.memory_space<vmem>>, vector<16x16x128xbf16>
    tpu.vector_store %arg13[%c0_70, %c0_71, %c256], %70 {strides = array<i32>} : memref<16x16x1152xbf16, #tpu.memory_space<vmem>>, vector<16x16x128xbf16>,
    %c1_72 = arith.constant 1 : index
    %c0_73 = arith.constant 0 : index
    %c0_74 = arith.constant 0 : index
    %72 = vector.load %arg11[%c1_72, %c0_73, %c0_74] : memref<18x18x128xbf16, #tpu.memory_space<vmem>>, vector<16x16x128xbf16>
    %c0_75 = arith.constant 0 : index
    %c0_76 = arith.constant 0 : index
    %c384 = arith.constant 384 : index
    %73 = vector.load %arg13[%c0_75, %c0_76, %c384] : memref<16x16x1152xbf16, #tpu.memory_space<vmem>>, vector<16x16x128xbf16>
    tpu.vector_store %arg13[%c0_75, %c0_76, %c384], %72 {strides = array<i32>} : memref<16x16x1152xbf16, #tpu.memory_space<vmem>>, vector<16x16x128xbf16>,
    %c1_77 = arith.constant 1 : index
    %c1_78 = arith.constant 1 : index
    %c0_79 = arith.constant 0 : index
    %74 = vector.load %arg11[%c1_77, %c1_78, %c0_79] : memref<18x18x128xbf16, #tpu.memory_space<vmem>>, vector<16x16x128xbf16>
    %c0_80 = arith.constant 0 : index
    %c0_81 = arith.constant 0 : index
    %c512 = arith.constant 512 : index
    %75 = vector.load %arg13[%c0_80, %c0_81, %c512] : memref<16x16x1152xbf16, #tpu.memory_space<vmem>>, vector<16x16x128xbf16>
    tpu.vector_store %arg13[%c0_80, %c0_81, %c512], %74 {strides = array<i32>} : memref<16x16x1152xbf16, #tpu.memory_space<vmem>>, vector<16x16x128xbf16>,
    %c1_82 = arith.constant 1 : index
    %c2_83 = arith.constant 2 : index
    %c0_84 = arith.constant 0 : index
    %76 = vector.load %arg11[%c1_82, %c2_83, %c0_84] : memref<18x18x128xbf16, #tpu.memory_space<vmem>>, vector<16x16x128xbf16>
    %c0_85 = arith.constant 0 : index
    %c0_86 = arith.constant 0 : index
    %c640 = arith.constant 640 : index
    %77 = vector.load %arg13[%c0_85, %c0_86, %c640] : memref<16x16x1152xbf16, #tpu.memory_space<vmem>>, vector<16x16x128xbf16>
    tpu.vector_store %arg13[%c0_85, %c0_86, %c640], %76 {strides = array<i32>} : memref<16x16x1152xbf16, #tpu.memory_space<vmem>>, vector<16x16x128xbf16>,
    %c2_87 = arith.constant 2 : index
    %c0_88 = arith.constant 0 : index
    %c0_89 = arith.constant 0 : index
    %78 = vector.load %arg11[%c2_87, %c0_88, %c0_89] : memref<18x18x128xbf16, #tpu.memory_space<vmem>>, vector<16x16x128xbf16>
    %c0_90 = arith.constant 0 : index
    %c0_91 = arith.constant 0 : index
    %c768 = arith.constant 768 : index
    %79 = vector.load %arg13[%c0_90, %c0_91, %c768] : memref<16x16x1152xbf16, #tpu.memory_space<vmem>>, vector<16x16x128xbf16>
    tpu.vector_store %arg13[%c0_90, %c0_91, %c768], %78 {strides = array<i32>} : memref<16x16x1152xbf16, #tpu.memory_space<vmem>>, vector<16x16x128xbf16>,
    %c2_92 = arith.constant 2 : index
    %c1_93 = arith.constant 1 : index
    %c0_94 = arith.constant 0 : index
    %80 = vector.load %arg11[%c2_92, %c1_93, %c0_94] : memref<18x18x128xbf16, #tpu.memory_space<vmem>>, vector<16x16x128xbf16>
    %c0_95 = arith.constant 0 : index
    %c0_96 = arith.constant 0 : index
    %c896 = arith.constant 896 : index
    %81 = vector.load %arg13[%c0_95, %c0_96, %c896] : memref<16x16x1152xbf16, #tpu.memory_space<vmem>>, vector<16x16x128xbf16>
    tpu.vector_store %arg13[%c0_95, %c0_96, %c896], %80 {strides = array<i32>} : memref<16x16x1152xbf16, #tpu.memory_space<vmem>>, vector<16x16x128xbf16>,
    %c2_97 = arith.constant 2 : index
    %c2_98 = arith.constant 2 : index
    %c0_99 = arith.constant 0 : index
    %82 = vector.load %arg11[%c2_97, %c2_98, %c0_99] : memref<18x18x128xbf16, #tpu.memory_space<vmem>>, vector<16x16x128xbf16>
    %c0_100 = arith.constant 0 : index
    %c0_101 = arith.constant 0 : index
    %c1024 = arith.constant 1024 : index
    %83 = vector.load %arg13[%c0_100, %c0_101, %c1024] : memref<16x16x1152xbf16, #tpu.memory_space<vmem>>, vector<16x16x128xbf16>
    tpu.vector_store %arg13[%c0_100, %c0_101, %c1024], %82 {strides = array<i32>} : memref<16x16x1152xbf16, #tpu.memory_space<vmem>>, vector<16x16x128xbf16>,
    %c0_102 = arith.constant 0 : index
    %c0_103 = arith.constant 0 : index
    %c0_104 = arith.constant 0 : index
    %84 = vector.load %arg13[%c0_102, %c0_103, %c0_104] : memref<16x16x1152xbf16, #tpu.memory_space<vmem>>, vector<16x16x1152xbf16>
    %85 = vector.shape_cast %84 : vector<16x16x1152xbf16> to vector<256x1152xbf16>
    %c0_105 = arith.constant 0 : index
    %c0_106 = arith.constant 0 : index
    %86 = vector.load %arg6[%c0_105, %c0_106] : memref<1152x128xbf16, #tpu.memory_space<vmem>>, vector<1152x128xbf16>
    %cst_107 = arith.constant dense<0.000000e+00> : vector<256x128xf32>
    %87 = tpu.matmul %85, %86, %cst_107 {dimension_numbers = #tpu.dot_dimension_numbers<[1], [0], [0], [1], [0, 0, 1, 1], [], []>} : vector<256x1152xbf16>, vector<1152x128xbf16>, vector<256x128xf32> -> vector<256x128xf32>
    %c0_108 = arith.constant 0 : index
    %c0_109 = arith.constant 0 : index
    %88 = vector.load %arg7[%c0_108, %c0_109] : memref<1x128xf32, #tpu.memory_space<vmem>>, vector<1x128xf32>
    %89 = vector.broadcast %88 : vector<1x128xf32> to vector<256x128xf32>
    %90 = arith.addf %87, %89 : vector<256x128xf32>
    %cst_110 = arith.constant 0.000000e+00 : f32
    %91 = vector.broadcast %cst_110 : f32 to vector<256x128xf32>
    %92 = arith.maximumf %90, %91 : vector<256x128xf32>
    %93 = arith.truncf %92 : vector<256x128xf32> to vector<256x128xbf16>
    %c0_111 = arith.constant 0 : index
    %c0_112 = arith.constant 0 : index
    %94 = vector.load %arg8[%c0_111, %c0_112] : memref<128x128xbf16, #tpu.memory_space<vmem>>, vector<128x128xbf16>
    %cst_113 = arith.constant dense<0.000000e+00> : vector<256x128xf32>
    %95 = tpu.matmul %93, %94, %cst_113 {dimension_numbers = #tpu.dot_dimension_numbers<[1], [0], [0], [1], [0, 0, 1, 1], [], []>} : vector<256x128xbf16>, vector<128x128xbf16>, vector<256x128xf32> -> vector<256x128xf32>
    %96 = vector.shape_cast %23 : vector<16x16x128xbf16> to vector<256x128xbf16>
    %97 = arith.extf %96 : vector<256x128xbf16> to vector<256x128xf32>
    %c0_114 = arith.constant 0 : index
    %c0_115 = arith.constant 0 : index
    %98 = vector.load %arg9[%c0_114, %c0_115] : memref<1x128xf32, #tpu.memory_space<vmem>>, vector<1x128xf32>
    %99 = vector.broadcast %98 : vector<1x128xf32> to vector<256x128xf32>
    %100 = arith.addf %95, %99 : vector<256x128xf32>
    %101 = arith.addf %100, %97 : vector<256x128xf32>
    %cst_116 = arith.constant 0.000000e+00 : f32
    %102 = vector.broadcast %cst_116 : f32 to vector<256x128xf32>
    %103 = arith.maximumf %101, %102 : vector<256x128xf32>
    %104 = vector.shape_cast %103 : vector<256x128xf32> to vector<16x16x128xf32>
    %105 = arith.truncf %104 : vector<16x16x128xf32> to vector<16x16x128xbf16>
    %c0_117 = arith.constant 0 : index
    %c0_118 = arith.constant 0 : index
    %c0_119 = arith.constant 0 : index
    %c0_120 = arith.constant 0 : index
    %106 = vector.load %arg10[%c0_117, %c0_118, %c0_119, %c0_120] : memref<1x16x16x128xbf16, #tpu.memory_space<vmem>>, vector<1x16x16x128xbf16>
    %107 = vector.shape_cast %106 : vector<1x16x16x128xbf16> to vector<16x16x128xbf16>
    %108 = vector.shape_cast %105 : vector<16x16x128xbf16> to vector<1x16x16x128xbf16>
    tpu.vector_store %arg10[%c0_117, %c0_118, %c0_119, %c0_120], %108 {strides = array<i32>} : memref<1x16x16x128xbf16, #tpu.memory_space<vmem>>, vector<1x16x16x128xbf16>,
    return
  }
  func.func @transform_0(%arg0: i32, %arg1: i32) -> (i32, i32, i32, i32) {
    %c0_i32 = arith.constant 0 : i32
    %c0_i32_0 = arith.constant 0 : i32
    %c0_i32_1 = arith.constant 0 : i32
    return %arg0, %arg1, %c0_i32, %c0_i32_0 : i32, i32, i32, i32
  }
  func.func @transform_2(%arg0: i32, %arg1: i32) -> (i32, i32) {
    %c0_i32 = arith.constant 0 : i32
    %c0_i32_0 = arith.constant 0 : i32
    %c0_i32_1 = arith.constant 0 : i32
    return %c0_i32, %c0_i32_0 : i32, i32
  }
  func.func @transform_3(%arg0: i32, %arg1: i32) -> (i32, i32) {
    %c0_i32 = arith.constant 0 : i32
    %c0_i32_0 = arith.constant 0 : i32
    %c0_i32_1 = arith.constant 0 : i32
    return %c0_i32, %c0_i32_0 : i32, i32
  }
  func.func @transform_4(%arg0: i32, %arg1: i32) -> (i32, i32) {
    %c0_i32 = arith.constant 0 : i32
    %c0_i32_0 = arith.constant 0 : i32
    %c0_i32_1 = arith.constant 0 : i32
    return %c0_i32, %c0_i32_0 : i32, i32
  }
  func.func @transform_5(%arg0: i32, %arg1: i32) -> (i32, i32) {
    %c0_i32 = arith.constant 0 : i32
    %c0_i32_0 = arith.constant 0 : i32
    %c0_i32_1 = arith.constant 0 : i32
    return %c0_i32, %c0_i32_0 : i32, i32
  }
  func.func @transform_6(%arg0: i32, %arg1: i32) -> (i32, i32) {
    %c0_i32 = arith.constant 0 : i32
    %c0_i32_0 = arith.constant 0 : i32
    %c0_i32_1 = arith.constant 0 : i32
    return %c0_i32, %c0_i32_0 : i32, i32
  }
  func.func @transform_7(%arg0: i32, %arg1: i32) -> (i32, i32) {
    %c0_i32 = arith.constant 0 : i32
    %c0_i32_0 = arith.constant 0 : i32
    %c0_i32_1 = arith.constant 0 : i32
    return %c0_i32, %c0_i32_0 : i32, i32
  }
  func.func @transform_8(%arg0: i32, %arg1: i32) -> (i32, i32, i32, i32) {
    %c0_i32 = arith.constant 0 : i32
    %c0_i32_0 = arith.constant 0 : i32
    %c0_i32_1 = arith.constant 0 : i32
    return %arg0, %arg1, %c0_i32, %c0_i32_0 : i32, i32, i32, i32
  }
}

</mosaic_0001>

<bundles_post_ra>
// kernel: bottleneck_forward.1
= control target key start
LH: loop header
LB: loop body
LE: loop exit
PB: predicated region body
PF: predicated region fallthrough
CT: control target
= control target key end

     0   :  { %s8240_s27 = smov 0   ;;  %s8242_s28 = smov 0   ;;  %s9986_s0 = inlined_call_operand.vmem [shape: bf16[2,16,16,128], index: 0, kind: input, shape index: {}, may-alias: {0,1}]   ;;  %s9987_s1 = inlined_call_operand.vmem [shape: bf16[2,16,16,128], index: 1, kind: input, shape index: {}, may-alias: {0,1}]   ;;  %s9988_s2 = inlined_call_operand.vmem [shape: bf16[128,128], index: 2, kind: input, shape index: {}]   ;;  %s9989_s3 = inlined_call_operand.vmem [shape: f32[1,128], index: 3, kind: input, shape index: {}]   ;;  %s9990_s4 = inlined_call_operand.vmem [shape: bf16[1152,128], index: 4, kind: input, shape index: {}]   ;;  %s9991_s5 = inlined_call_operand.vmem [shape: f32[1,128], index: 5, kind: input, shape index: {}]   ;;  %s9992_s6 = inlined_call_operand.vmem [shape: bf16[128,128], index: 6, kind: input, shape index: {}]   ;;  %s9993_s7 = inlined_call_operand.vmem [shape: f32[1,128], index: 7, kind: input, shape index: {}]   ;;  %s9994_s8 = inlined_call_operand.vmem [shape: bf16[2,16,16,128], index: 8, kind: output, shape index: {}]  }
   0x1   :  { %s8244_s29 = smov 0  }
   0x2 LB: > { %s30_s30 = sadd.s32 1, %s8188_s28  ;;  %p6702_p0 = scmp.ge.s32.totalorder %s8192_s29, 1  ;;  %s8192_s29 = sphi %s8244_s29, %s18_s29   ;;  %s8188_s28 = sphi %s8242_s28, %s10094_s28   ;;  %s8184_s27 = sphi %s8240_s27, %s10093_s27  }
   0x3   : > { %p32_p1 = scmp.ge.s32.totalorder %s30_s30, 2  ;;  %p260_p2 = scmp.lt.s32.totalorder %s8192_s29, 3 }
   0x5   : > { %s10096_s30 = smov (%p32_p1, %s30_s30), 0  ;;  %p261_p3 = pnand %p6702_p0, %p260_p2 }
   0x7   : > { %264 = sbr.rel (%p261_p3) target bundleno = 1434 (0x59a), region = 48 }
   0xc   : > { %p303_p4 = scmp.lt.s32.totalorder %s8184_s27, 1  ;;  %s7764_s9 = sshll.u32 %s8184_s27, 7 }
   0xd   : > { %s336_s12 = scalar_lea.vmem %s9987_s1, %s7764_s9 }
   0xe   : > { %s10098_s27 = smov (!%p303_p4, %s8184_s27), 1  ;;  %v363_v0 = vld [vmem:[%s336_s12] sm:$0xff] }
   0xf   : > { %364 = vst [vmem:[#allocation3] sm:$0xff] %v363_v0  ;;  %s7762_s13 = sshll.u32 %s10098_s27, 7 }
  0x10   : > { %s8264_s16 = scalar_lea.vmem %s9986_s0, %s7762_s13  ;;  %s8269_s19 = scalar_lea.vmem %s9994_s8, %s7762_s13 }
  0x11   : > { %370 = vsyncadd [#allocation5], 128  ;;  %s7766_s20 = sadd.s32 120, %s7764_s9 }
  0x12   : > { %s374_s23 = scalar_lea.vmem %s9987_s1, %s7766_s20 }
  0x13   : > { %v403_v1 = vld [vmem:[%s374_s23] sm:$0xff] }
  0x14   : > { %404 = vst [vmem:[#allocation3 + $0x8] sm:$0xff] %v403_v1 }
  0x15   : > { %410 = vsyncadd [#allocation5 + $0x1], 128  ;;  %v8277_v2 = vld [vmem:[%s9988_s2 + $0x38] sm:$0xff]  ;;  %v8280_v3 = vld [vmem:[%s8264_s16] sm:$0xff]   ;;  %vm428_vm0 = vcmask 1040384   ;;  %v10031_v33 = vmov 0 }
  0x16   : > { %10015 = vst [vmem:[#allocation10_spill] sm:$0xff] %v8280_v3  ;;  %v8283_v4 = vld [vmem:[%s8264_s16 + $0x8] sm:$0xff]   ;;  %v8286_v5 = vld [vmem:[%s8264_s16 + $0x10] sm:$0xff]   ;;  %720 = vmatpush.bf16.msra.mxu0 %v8277_v2  ;;  %8113 = vmatpush.bf16.msra.mxu1 %v8277_v2  ;;  %v8291_v6 = vld [vmem:[%s8264_s16 + $0x18] sm:$0xff]   ;;  %vm429_vm1 = vsmask.f32 256 }
  0x17   : > { %10016 = vst [vmem:[#allocation11_spill] sm:$0xff] %v8283_v4  ;;  %v8294_v7 = vld [vmem:[%s8264_s16 + $0x20] sm:$0xff]   ;;  %v8297_v8 = vld [vmem:[%s8264_s16 + $0x28] sm:$0xff]   ;;  %v8300_v9 = vld [vmem:[%s8264_s16 + $0x30] sm:$0xff]   ;;  %vm485_vm3 = vsmask.f32 7938 }
  0x18   : > { %10017 = vst [vmem:[#allocation12_spill] sm:$0xff] %v8286_v5  ;;  %v8303_v10 = vld [vmem:[%s8264_s16 + $0x38] sm:$0xff]   ;;  %v8306_v11 = vld [vmem:[%s8264_s16 + $0x40] sm:$0xff]   ;;  %v8309_v12 = vld [vmem:[%s8264_s16 + $0x48] sm:$0xff]   ;;  %vm1196_vm5 = vcmask 1043456  }
  0x19   : > { %10018 = vst [vmem:[#allocation13_spill] sm:$0xff] %v8291_v6  ;;  %v8312_v13 = vld [vmem:[%s8264_s16 + $0x50] sm:$0xff]   ;;  %v8315_v14 = vld [vmem:[%s8264_s16 + $0x58] sm:$0xff]   ;;  %v8318_v15 = vld [vmem:[%s8264_s16 + $0x60] sm:$0xff]   ;;  %vm873_vm7 = vsmask.f32 4368 }
  0x1a   : > { %10019 = vst [vmem:[#allocation14_spill] sm:$0xff] %v8294_v7  ;;  %v8321_v16 = vld [vmem:[%s8264_s16 + $0x68] sm:$0xff]   ;;  %v8324_v17 = vld [vmem:[%s8264_s16 + $0x70] sm:$0xff]   ;;  %v8327_v18 = vld [vmem:[%s8264_s16 + $0x78] sm:$0xff]  }
  0x1b   : > { %10020 = vst [vmem:[#allocation15_spill] sm:$0xff] %v8297_v8  ;;  %v8332_v19 = vld [vmem:[%s9988_s2 + $0x30] sm:$0xff]  ;;  %v8338_v20 = vld [vmem:[%s9988_s2 + $0x28] sm:$0xff]  ;;  %v8345_v21 = vld [vmem:[%s9988_s2 + $0x20] sm:$0xff] }
  0x1c   : > { %10021 = vst [vmem:[#allocation16_spill] sm:$0xff] %v8300_v9  ;;  %721 = vmatpush.bf16.msra.mxu0 %v8332_v19  ;;  %8114 = vmatpush.bf16.msra.mxu1 %v8332_v19  ;;  %v8352_v22 = vld [vmem:[%s9988_s2 + $0x18] sm:$0xff]  ;;  %v8359_v23 = vld [vmem:[%s9988_s2 + $0x10] sm:$0xff]  ;;  %v8366_v24 = vld [vmem:[%s9988_s2 + $0x8] sm:$0xff] }
  0x1d   : > { %10022 = vst [vmem:[#allocation17_spill] sm:$0xff] %v8303_v10  ;;  %v8373_v25 = vld [vmem:[%s9988_s2] sm:$0xff]  ;;  %v7776_v27 = vld [vmem:[%s8264_s16 + $0x8] sm:$0xff]  ;;  %v7777_v28 = vld [vmem:[%s8264_s16 + $0x10] sm:$0xff] }
  0x1e   : > { %10023 = vst [vmem:[#allocation18_spill] sm:$0xff] %v8306_v11  ;;  %v7775_v26 = vld [vmem:[%s8264_s16] sm:$0xff]  ;;  %v7778_v29 = vld [vmem:[%s8264_s16 + $0x18] sm:$0xff]  ;;  %v7780_v31 = vld [vmem:[%s8264_s16 + $0x28] sm:$0xff] }
  0x1f   : > { %10024 = vst [vmem:[#allocation19_spill] sm:$0xff] %v8309_v12  ;;  %v7779_v30 = vld [vmem:[%s8264_s16 + $0x20] sm:$0xff]  ;;  %v434_v32 = vld [vmem:[#allocation2 + $0xc] sm:$0x1]  ;;  %vm8385_vm2 = vmand %vm428_vm0, %vm429_vm1 }
  0x20   : > { %10025 = vst [vmem:[#allocation20_spill] sm:$0xff] %v8312_v13  ;;  %722 = vmatpush.bf16.msra.mxu0 %v8338_v20  ;;  %8115 = vmatpush.bf16.msra.mxu1 %v8338_v20  ;;  %v10032_v33 = vsel %vm8385_vm2, 4294967295, %v10031_v33  ;;  %v435_v34 = vsel %vm8385_vm2, 0, %v434_v32  ;;  %v7781_v35 = vld [vmem:[%s8264_s16 + $0x30] sm:$0xff]  ;;  %vm8393_vm4 = vmand %vm428_vm0, %vm485_vm3  ;;  %v431_v37 = vld [vmem:[#allocation2] sm:$0x1] }
  0x21   : > { %10026 = vst [vmem:[#allocation21_spill] sm:$0xff] %v8315_v14  ;;  %v482_v38 = vld [vmem:[#allocation2 + $0xcc] sm:$0x1]  ;;  %v487_v39 = vld [vmem:[#allocation2 + $0x8] sm:$0x1]  ;;  %v432_v43 = vsel %vm8385_vm2, 0, %v431_v37  ;;  %vm8425_vm6 = vmand %vm1196_vm5, %vm485_vm3 }
  0x22   : > { %10027 = vst [vmem:[#allocation22_spill] sm:$0xff] %v8318_v15  ;;  %v490_v40 = vld [vmem:[#allocation2 + $0x14] sm:$0x1]  ;;  %v483_v44 = vsel %vm8385_vm2, 0, %v482_v38  ;;  %v488_v45 = vsel %vm8393_vm4, 0, %v487_v39  ;;  %v7782_v46 = vld [vmem:[%s8264_s16 + $0x38] sm:$0xff]  ;;  %vm8436_vm8 = vmor %vm429_vm1, %vm873_vm7 }
  0x23   : > { %10028 = vst [vmem:[#allocation23_spill] sm:$0xff] %v8321_v16  ;;  %v538_v41 = vld [vmem:[#allocation2 + $0xd4] sm:$0x1]  ;;  %v491_v42 = vsel %vm8393_vm4, 0, %v490_v40  ;;  %v437_v48 = vld [vmem:[#allocation2 + $0x18] sm:$0x1] }
  0x24   : > { %10029 = vst [vmem:[#allocation24_spill] sm:$0xff] %v8324_v17  ;;  %723 = vmatpush.bf16.msra.mxu0 %v8345_v21  ;;  %8116 = vmatpush.bf16.msra.mxu1 %v8345_v21  ;;  %v539_v47 = vsel %vm8393_vm4, 0, %v538_v41  ;;  %v438_v49 = vsel %vm8385_vm2, 0, %v437_v48  ;;  %v7788_v50 = vld [vmem:[%s8264_s16 + $0x68] sm:$0xff]  ;;  %v493_v51 = vld [vmem:[#allocation2 + $0x20] sm:$0x1] }
  0x25   : > { %10030 = vst [vmem:[#allocation25_spill] sm:$0xff] %v8327_v18  ;;  %v8414_v52 = vld [vmem:[%s9989_s3] ss:$0 sm:$0xff]  ;;  %v494_v53 = vsel %vm8393_vm4, 0, %v493_v51  ;;  %v440_v58 = vld [vmem:[#allocation2 + $0x24] sm:$0x1] }
  0x26   : > { %10033 = vst [vmem:[#allocation26_spill] sm:$0xff] %v10032_v33  ;;  %v7783_v54 = vld [vmem:[%s8264_s16 + $0x40] sm:$0xff]  ;;  %v441_v60 = vsel %vm8385_vm2, 0, %v440_v58  ;;  %v7789_v63 = vld [vmem:[%s8264_s16 + $0x70] sm:$0xff]  ;;  %v7784_v38 = vld [vmem:[%s8264_s16 + $0x48] sm:$0xff] }
  0x27   : > { %436 = vst [vmem:[#allocation2 + $0xc] sm:$0x1] %v435_v34 }
  0x28   : > { %724 = vmatpush.bf16.msra.mxu0 %v8352_v22  ;;  %8117 = vmatpush.bf16.msra.mxu1 %v8352_v22  ;;  %492 = vst [vmem:[#allocation2 + $0x14] sm:$0x1] %v491_v42 }
  0x29   : > { %433 = vst [vmem:[#allocation2] sm:$0x1] %v432_v43 }
  0x2a   : > { %484 = vst [vmem:[#allocation2 + $0xcc] sm:$0x1] %v483_v44 }
  0x2b   : > { %489 = vst [vmem:[#allocation2 + $0x8] sm:$0x1] %v488_v45 }
  0x2c   : > { %725 = vmatpush.bf16.msra.mxu0 %v8359_v23  ;;  %8118 = vmatpush.bf16.msra.mxu1 %v8359_v23  ;;  %540 = vst [vmem:[#allocation2 + $0xd4] sm:$0x1] %v539_v47 }
  0x2d   : > { %439 = vst [vmem:[#allocation2 + $0x18] sm:$0x1] %v438_v49  ;;  %v443_v49 = vld [vmem:[#allocation2 + $0x30] sm:$0x1] }
  0x2e   : > { %495 = vst [vmem:[#allocation2 + $0x20] sm:$0x1] %v494_v53 }
  0x2f   : > { %442 = vst [vmem:[#allocation2 + $0x24] sm:$0x1] %v441_v60  ;;  %v1202_v44 = vld [vmem:[#allocation2 + $0x14] sm:$0x1] }
  0x30   : > { %726 = vmatpush.bf16.msra.mxu0 %v8366_v24  ;;  %8119 = vmatpush.bf16.msra.mxu1 %v8366_v24 }
  0x34   : > { %727 = vmatpush.bf16.msra.mxu0 %v8373_v25  ;;  %8120 = vmatpush.bf16.msra.mxu1 %v8373_v25 }
  0x37   : > { %728 = vmatmul.bf16.vlgmr.msra.gmra.mxu0 %v7775_v26  ;;  %793 = vmatmul.bf16.vlgmr.msra.gmra.mxu1 %v7788_v50 }
  0x47   : > { %733 = vmatmul.bf16.gmra.mxu0 %v7776_v27  ;;  %v10036_v27 = vmov 0  ;;  %798 = vmatmul.bf16.gmra.mxu1 %v7789_v63 }
  0x48   : > { %v10037_v27 = vsel %vm8425_vm6, 4294967295, %v10036_v27 }
  0x49   : > { %10038 = vst [vmem:[#allocation27_spill] sm:$0xff] %v10037_v27 }
  0x57   : > { %738 = vmatmul.bf16.gmra.mxu0 %v7777_v28  ;;  %v1198_v28 = vld [vmem:[#allocation2 + $0xc] sm:$0xf] }
  0x67   : > { %743 = vmatmul.bf16.gmra.mxu0 %v7778_v29 }
  0x77   : > { %748 = vmatmul.bf16.gmra.mxu0 %v7779_v30 }
  0x87   : > { %753 = vmatmul.bf16.gmra.mxu0 %v7780_v31  ;;  %v496_v31 = vld [vmem:[#allocation2 + $0x2c] sm:$0x1] }
  0x97   : > { %758 = vmatmul.bf16.gmra.mxu0 %v7781_v35  ;;  %v497_v35 = vsel %vm8393_vm4, 0, %v496_v31 }
  0x98   : > { %498 = vst [vmem:[#allocation2 + $0x2c] sm:$0x1] %v497_v35 }
  0xa7   : > { %763 = vmatmul.bf16.gmra.mxu0 %v7782_v46 }
  0xb4   : > { %v729_v55 = vpop.f32.mrf.mxu0 }
  0xb5   : > { %v730_v56 = vadd.f32 %v8414_v52, %v729_v55 }
  0xb7   : > { %v809_v57 = vmax.f32 %v730_v56, 0.0  ;;  %768 = vmatmul.bf16.gmra.mxu0 %v7783_v54  ;;  %v444_v54 = vsel %vm8385_vm2, 0, %v443_v49 }
  0xb8   : > { %445 = vst [vmem:[#allocation2 + $0x30] sm:$0x1] %v444_v54  ;;  %v1212_v54 = vld [vmem:[#allocation2 + $0x24] sm:$0xf] }
  0xb9   : > { %v841_v59 = vpack.c.bf16 %v809_v57, %v809_v57  ;;  %v7790_v57 = vld [vmem:[%s8264_s16 + $0x78] sm:$0xff] }
  0xba   : > { %803 = vmatmul.bf16.gmra.mxu1 %v7790_v57  ;;  %v502_v57 = vld [vmem:[#allocation2 + $0x44] sm:$0x1] }
  0xbb   : > { %v876_v61 = vshrl.u32 %v841_v59, 16  ;;  %v879_v1 = vshll.u32 %v841_v59, 16 }
  0xbc   : > { %v731_v62 = vpop.f32.mrf.mxu0 }
  0xbd   : > { %v878_v0 = vrot.slane %v876_v61, 7  ;;  %v732_v26 = vadd.f32 %v8414_v52, %v731_v62  ;;  %v1205_v61 = vld [vmem:[#allocation2 + $0x18] sm:$0xf] }
  0xbf   : > { %v881_v29 = vor.u32 %v879_v1, %v878_v0  ;;  %v810_v30 = vmax.f32 %v732_v26, 0.0  ;;  %v882_v45 = vrot.slane %v878_v0, 4  ;;  %v499_v0 = vld [vmem:[#allocation2 + $0x38] sm:$0x1] }
  0xc1   : > { %v1199_v32 = vsel %vm8425_vm6, %v881_v29, %v1198_v28  ;;  %v842_v34 = vpack.c.bf16 %v810_v30, %v810_v30  ;;  %v500_v28 = vsel %vm8393_vm4, 0, %v499_v0  ;;  %v7785_v30 = vld [vmem:[%s8264_s16 + $0x50] sm:$0xff] }
  0xc2   : > { %1200 = vst [vmem:[#allocation2 + $0xc] sm:$0xf] %v1199_v32 }
  0xc3   : > { %v884_v37 = vshrl.u32 %v842_v34, 16  ;;  %v887_v41 = vshll.u32 %v842_v34, 16  ;;  %501 = vst [vmem:[#allocation2 + $0x38] sm:$0x1] %v500_v28  ;;  %v1216_v28 = vld [vmem:[#allocation2 + $0x2c] sm:$0x1] }
  0xc4   : > { %v734_v39 = vpop.f32.mrf.mxu0 }
  0xc5   : > { %v886_v40 = vrot.slane %v884_v37, 7  ;;  %v735_v42 = vadd.f32 %v8414_v52, %v734_v39  ;;  %v1209_v37 = vld [vmem:[#allocation2 + $0x20] sm:$0x1] }
  0xc7   : > { %v889_v46 = vor.u32 %v887_v41, %v886_v40  ;;  %v891_v47 = vrot.slane %v886_v40, 4  ;;  %v811_v48 = vmax.f32 %v735_v42, 0.0  ;;  %773 = vmatmul.bf16.gmra.mxu0 %v7784_v38  ;;  %v446_v42 = vld [vmem:[#allocation2 + $0x3c] sm:$0x1] }
  0xc9   : > { %v890_v50 = vsel %vm8436_vm8, %v882_v45, %v889_v46  ;;  %v1203_v51 = vsel %vm8385_vm2, %v891_v47, %v1202_v44  ;;  %v843_v53 = vpack.c.bf16 %v811_v48, %v811_v48  ;;  %v447_v47 = vsel %vm8385_vm2, 0, %v446_v42 }
  0xca   : > { %1201 = vst [vmem:[#allocation2 + $0x10] sm:$0xf] %v890_v50 }
  0xcb   : > { %1204 = vst [vmem:[#allocation2 + $0x14] sm:$0x1] %v1203_v51  ;;  %v893_v55 = vshrl.u32 %v843_v53, 16  ;;  %v896_v59 = vshll.u32 %v843_v53, 16 }
  0xcc   : > { %v736_v56 = vpop.f32.mrf.mxu0  ;;  %448 = vst [vmem:[#allocation2 + $0x3c] sm:$0x1] %v447_v47 }
  0xcd   : > { %v895_v58 = vrot.slane %v893_v55, 7  ;;  %v737_v60 = vadd.f32 %v8414_v52, %v736_v56 }
  0xcf   : > { %v898_v62 = vor.u32 %v896_v59, %v895_v58  ;;  %v812_v63 = vmax.f32 %v737_v60, 0.0  ;;  %v899_v38 = vrot.slane %v895_v58, 4  ;;  %v503_v60 = vsel %vm8393_vm4, 0, %v502_v57 }
  0xd0   : > { %504 = vst [vmem:[#allocation2 + $0x44] sm:$0x1] %v503_v60  ;;  %v1223_v60 = vld [vmem:[#allocation2 + $0x38] sm:$0x1] }
  0xd1   : > { %v1206_v1 = vsel %vm8425_vm6, %v898_v62, %v1205_v61  ;;  %v844_v26 = vpack.c.bf16 %v812_v63, %v812_v63  ;;  %v7786_v62 = vld [vmem:[%s8264_s16 + $0x58] sm:$0xff] }
  0xd2   : > { %1207 = vst [vmem:[#allocation2 + $0x18] sm:$0xf] %v1206_v1 }
  0xd3   : > { %v901_v29 = vshrl.u32 %v844_v26, 16  ;;  %v904_v34 = vshll.u32 %v844_v26, 16 }
  0xd4   : > { %v739_v31 = vpop.f32.mrf.mxu0 }
  0xd5   : > { %v903_v32 = vrot.slane %v901_v29, 7  ;;  %v740_v35 = vadd.f32 %v8414_v52, %v739_v31 }
  0xd7   : > { %v906_v39 = vor.u32 %v904_v34, %v903_v32  ;;  %v908_v40 = vrot.slane %v903_v32, 4  ;;  %v813_v41 = vmax.f32 %v740_v35, 0.0  ;;  %778 = vmatmul.bf16.gmra.mxu0 %v7785_v30  ;;  %v449_v34 = vld [vmem:[#allocation2 + $0x48] sm:$0x1] }
  0xd9   : > { %v907_v44 = vsel %vm8436_vm8, %v899_v38, %v906_v39  ;;  %v1210_v45 = vsel %vm8385_vm2, %v908_v40, %v1209_v37  ;;  %v845_v46 = vpack.c.bf16 %v813_v41, %v813_v41  ;;  %v450_v39 = vsel %vm8385_vm2, 0, %v449_v34 }
  0xda   : > { %1208 = vst [vmem:[#allocation2 + $0x1c] sm:$0xf] %v907_v44 }
  0xdb   : > { %1211 = vst [vmem:[#allocation2 + $0x20] sm:$0x1] %v1210_v45  ;;  %v910_v48 = vshrl.u32 %v845_v46, 16  ;;  %v913_v51 = vshll.u32 %v845_v46, 16  ;;  %v1219_v46 = vld [vmem:[#allocation2 + $0x30] sm:$0xf] }
  0xdc   : > { %v741_v49 = vpop.f32.mrf.mxu0  ;;  %451 = vst [vmem:[#allocation2 + $0x48] sm:$0x1] %v450_v39 }
  0xdd   : > { %v912_v50 = vrot.slane %v910_v48, 7  ;;  %v742_v53 = vadd.f32 %v8414_v52, %v741_v49  ;;  %v505_v49 = vld [vmem:[#allocation2 + $0x50] sm:$0x1] }
  0xdf   : > { %v915_v55 = vor.u32 %v913_v51, %v912_v50  ;;  %v814_v56 = vmax.f32 %v742_v53, 0.0  ;;  %v916_v29 = vrot.slane %v912_v50, 4  ;;  %v506_v53 = vsel %vm8393_vm4, 0, %v505_v49 }
  0xe0   : > { %507 = vst [vmem:[#allocation2 + $0x50] sm:$0x1] %v506_v53 }
  0xe1   : > { %v1213_v58 = vsel %vm8425_vm6, %v915_v55, %v1212_v54  ;;  %v846_v59 = vpack.c.bf16 %v814_v56, %v814_v56  ;;  %v7787_v55 = vld [vmem:[%s8264_s16 + $0x60] sm:$0xff] }
  0xe2   : > { %1214 = vst [vmem:[#allocation2 + $0x24] sm:$0xf] %v1213_v58 }
  0xe3   : > { %v918_v61 = vshrl.u32 %v846_v59, 16  ;;  %v921_v1 = vshll.u32 %v846_v59, 16 }
  0xe4   : > { %v744_v63 = vpop.f32.mrf.mxu0 }
  0xe5   : > { %v920_v0 = vrot.slane %v918_v61, 7  ;;  %v745_v26 = vadd.f32 %v8414_v52, %v744_v63 }
  0xe7   : > { %v923_v30 = vor.u32 %v921_v1, %v920_v0  ;;  %v925_v31 = vrot.slane %v920_v0, 4  ;;  %v815_v32 = vmax.f32 %v745_v26, 0.0  ;;  %783 = vmatmul.bf16.gmra.mxu0 %v7786_v62  ;;  %v452_v1 = vld [vmem:[#allocation2 + $0x54] sm:$0x1] }
  0xe9   : > { %v924_v35 = vsel %vm8436_vm8, %v916_v29, %v923_v30  ;;  %v1217_v37 = vsel %vm8385_vm2, %v925_v31, %v1216_v28  ;;  %v847_v38 = vpack.c.bf16 %v815_v32, %v815_v32  ;;  %v453_v30 = vsel %vm8385_vm2, 0, %v452_v1 }
  0xea   : > { %1215 = vst [vmem:[#allocation2 + $0x28] sm:$0xf] %v924_v35 }
  0xeb   : > { %1218 = vst [vmem:[#allocation2 + $0x2c] sm:$0x1] %v1217_v37  ;;  %v927_v40 = vshrl.u32 %v847_v38, 16  ;;  %v930_v44 = vshll.u32 %v847_v38, 16  ;;  %v1226_v38 = vld [vmem:[#allocation2 + $0x3c] sm:$0xf] }
  0xec   : > { %v746_v41 = vpop.f32.mrf.mxu0  ;;  %454 = vst [vmem:[#allocation2 + $0x54] sm:$0x1] %v453_v30 }
  0xed   : > { %v929_v42 = vrot.slane %v927_v40, 7  ;;  %v747_v45 = vadd.f32 %v8414_v52, %v746_v41  ;;  %v508_v41 = vld [vmem:[#allocation2 + $0x5c] sm:$0x1] }
  0xef   : > { %v932_v47 = vor.u32 %v930_v44, %v929_v42  ;;  %v816_v48 = vmax.f32 %v747_v45, 0.0  ;;  %v933_v61 = vrot.slane %v929_v42, 4  ;;  %v509_v45 = vsel %vm8393_vm4, 0, %v508_v41 }
  0xf0   : > { %510 = vst [vmem:[#allocation2 + $0x5c] sm:$0x1] %v509_v45 }
  0xf1   : > { %v1220_v50 = vsel %vm8425_vm6, %v932_v47, %v1219_v46  ;;  %v848_v51 = vpack.c.bf16 %v816_v48, %v816_v48 }
  0xf2   : > { %1221 = vst [vmem:[#allocation2 + $0x30] sm:$0xf] %v1220_v50 }
  0xf3   : > { %v935_v54 = vshrl.u32 %v848_v51, 16  ;;  %v938_v58 = vshll.u32 %v848_v51, 16  ;;  %v1230_v51 = vld [vmem:[#allocation2 + $0x44] sm:$0x1] }
  0xf4   : > { %v749_v56 = vpop.f32.mrf.mxu0 }
  0xf5   : > { %v937_v57 = vrot.slane %v935_v54, 7  ;;  %v750_v59 = vadd.f32 %v8414_v52, %v749_v56 }
  0xf7   : > { %v940_v62 = vor.u32 %v938_v58, %v937_v57  ;;  %v942_v63 = vrot.slane %v937_v57, 4  ;;  %v817_v0 = vmax.f32 %v750_v59, 0.0  ;;  %788 = vmatmul.bf16.gmra.mxu0 %v7787_v55  ;;  %v455_v57 = vld [vmem:[#allocation2 + $0x60] sm:$0x1] }
  0xf9   : > { %v941_v26 = vsel %vm8436_vm8, %v933_v61, %v940_v62  ;;  %v1224_v28 = vsel %vm8385_vm2, %v942_v63, %v1223_v60  ;;  %v849_v29 = vpack.c.bf16 %v817_v0, %v817_v0  ;;  %v456_v61 = vsel %vm8385_vm2, 0, %v455_v57 }
  0xfa   : > { %1222 = vst [vmem:[#allocation2 + $0x34] sm:$0xf] %v941_v26 }
  0xfb   : > { %1225 = vst [vmem:[#allocation2 + $0x38] sm:$0x1] %v1224_v28  ;;  %v944_v31 = vshrl.u32 %v849_v29, 16  ;;  %v947_v35 = vshll.u32 %v849_v29, 16  ;;  %v1233_v28 = vld [vmem:[#allocation2 + $0x48] sm:$0xf] }
  0xfc   : > { %v751_v32 = vpop.f32.mrf.mxu0  ;;  %457 = vst [vmem:[#allocation2 + $0x60] sm:$0x1] %v456_v61 }
  0xfd   : > { %v946_v34 = vrot.slane %v944_v31, 7  ;;  %v752_v37 = vadd.f32 %v8414_v52, %v751_v32  ;;  %v511_v31 = vld [vmem:[#allocation2 + $0x68] sm:$0x1] }
  0xff   : > { %v949_v39 = vor.u32 %v947_v35, %v946_v34  ;;  %v818_v40 = vmax.f32 %v752_v37, 0.0  ;;  %v950_v53 = vrot.slane %v946_v34, 4  ;;  %v512_v35 = vsel %vm8393_vm4, 0, %v511_v31 }
 0x100   : > { %513 = vst [vmem:[#allocation2 + $0x68] sm:$0x1] %v512_v35 }
 0x101   : > { %v1227_v42 = vsel %vm8425_vm6, %v949_v39, %v1226_v38  ;;  %v850_v44 = vpack.c.bf16 %v818_v40, %v818_v40 }
 0x102   : > { %1228 = vst [vmem:[#allocation2 + $0x3c] sm:$0xf] %v1227_v42  ;;  %v1237_v42 = vld [vmem:[#allocation2 + $0x50] sm:$0x1] }
 0x103   : > { %v952_v46 = vshrl.u32 %v850_v44, 16  ;;  %v955_v49 = vshll.u32 %v850_v44, 16 }
 0x104   : > { %v754_v47 = vpop.f32.mrf.mxu0 }
 0x105   : > { %v954_v48 = vrot.slane %v952_v46, 7  ;;  %v755_v50 = vadd.f32 %v8414_v52, %v754_v47 }
 0x107   : > { %v957_v54 = vor.u32 %v955_v49, %v954_v48  ;;  %v959_v55 = vrot.slane %v954_v48, 4  ;;  %v819_v56 = vmax.f32 %v755_v50, 0.0  ;;  %v458_v48 = vld [vmem:[#allocation2 + $0x6c] sm:$0x1] }
 0x109   : > { %v958_v58 = vsel %vm8436_vm8, %v950_v53, %v957_v54  ;;  %v1231_v59 = vsel %vm8385_vm2, %v959_v55, %v1230_v51  ;;  %v851_v60 = vpack.c.bf16 %v819_v56, %v819_v56  ;;  %v459_v53 = vsel %vm8385_vm2, 0, %v458_v48 }
 0x10a   : > { %1229 = vst [vmem:[#allocation2 + $0x40] sm:$0xf] %v958_v58 }
 0x10b   : > { %1232 = vst [vmem:[#allocation2 + $0x44] sm:$0x1] %v1231_v59  ;;  %v961_v62 = vshrl.u32 %v851_v60, 16  ;;  %v964_v1 = vshll.u32 %v851_v60, 16  ;;  %v1240_v59 = vld [vmem:[#allocation2 + $0x54] sm:$0xf] }
 0x10c   : > { %v756_v63 = vpop.f32.mrf.mxu0  ;;  %460 = vst [vmem:[#allocation2 + $0x6c] sm:$0x1] %v459_v53 }
 0x10d   : > { %v963_v0 = vrot.slane %v961_v62, 7  ;;  %v757_v26 = vadd.f32 %v8414_v52, %v756_v63  ;;  %v514_v62 = vld [vmem:[#allocation2 + $0x74] sm:$0x1] }
 0x10f   : > { %v966_v29 = vor.u32 %v964_v1, %v963_v0  ;;  %v820_v30 = vmax.f32 %v757_v26, 0.0  ;;  %v967_v44 = vrot.slane %v963_v0, 4  ;;  %v515_v1 = vsel %vm8393_vm4, 0, %v514_v62 }
 0x110   : > { %516 = vst [vmem:[#allocation2 + $0x74] sm:$0x1] %v515_v1 }
 0x111   : > { %v1234_v32 = vsel %vm8425_vm6, %v966_v29, %v1233_v28  ;;  %v852_v34 = vpack.c.bf16 %v820_v30, %v820_v30 }
 0x112   : > { %1235 = vst [vmem:[#allocation2 + $0x48] sm:$0xf] %v1234_v32  ;;  %v1244_v32 = vld [vmem:[#allocation2 + $0x5c] sm:$0x1] }
 0x113   : > { %v969_v37 = vshrl.u32 %v852_v34, 16  ;;  %v972_v40 = vshll.u32 %v852_v34, 16 }
 0x114   : > { %v759_v38 = vpop.f32.mrf.mxu0 }
 0x115   : > { %v971_v39 = vrot.slane %v969_v37, 7  ;;  %v760_v41 = vadd.f32 %v8414_v52, %v759_v38 }
 0x117   : > { %v974_v45 = vor.u32 %v972_v40, %v971_v39  ;;  %v976_v46 = vrot.slane %v971_v39, 4  ;;  %v821_v47 = vmax.f32 %v760_v41, 0.0  ;;  %v461_v39 = vld [vmem:[#allocation2 + $0x78] sm:$0x1] }
 0x119   : > { %v975_v49 = vsel %vm8436_vm8, %v967_v44, %v974_v45  ;;  %v1238_v50 = vsel %vm8385_vm2, %v976_v46, %v1237_v42  ;;  %v853_v51 = vpack.c.bf16 %v821_v47, %v821_v47  ;;  %v462_v44 = vsel %vm8385_vm2, 0, %v461_v39  ;;  %v794_v46 = vpop.f32.mrf.mxu1 }
 0x11a   : > { %1236 = vst [vmem:[#allocation2 + $0x4c] sm:$0xf] %v975_v49 }
 0x11b   : > { %1239 = vst [vmem:[#allocation2 + $0x50] sm:$0x1] %v1238_v50  ;;  %v978_v54 = vshrl.u32 %v853_v51, 16  ;;  %v981_v57 = vshll.u32 %v853_v51, 16  ;;  %v1247_v51 = vld [vmem:[#allocation2 + $0x60] sm:$0xf] }
 0x11c   : > { %v761_v55 = vpop.f32.mrf.mxu0  ;;  %463 = vst [vmem:[#allocation2 + $0x78] sm:$0x1] %v462_v44 }
 0x11d   : > { %v980_v56 = vrot.slane %v978_v54, 7  ;;  %v762_v58 = vadd.f32 %v8414_v52, %v761_v55  ;;  %v517_v55 = vld [vmem:[#allocation2 + $0x80] sm:$0x1] }
 0x11f   : > { %v983_v60 = vor.u32 %v981_v57, %v980_v56  ;;  %v822_v61 = vmax.f32 %v762_v58, 0.0  ;;  %v984_v34 = vrot.slane %v980_v56, 4  ;;  %v473_v58 = vld [vmem:[#allocation2 + $0xa8] sm:$0x1] }
 0x120   : > { %v474_v62 = vsel %vm8385_vm2, 0, %v473_v58 }
 0x121   : > { %v1241_v63 = vsel %vm8425_vm6, %v983_v60, %v1240_v59  ;;  %v854_v0 = vpack.c.bf16 %v822_v61, %v822_v61  ;;  %v795_v59 = vadd.f32 %v8414_v52, %v794_v46  ;;  %v518_v60 = vsel %vm8393_vm4, 0, %v517_v55  ;;  %475 = vst [vmem:[#allocation2 + $0xa8] sm:$0x1] %v474_v62 }
 0x122   : > { %1242 = vst [vmem:[#allocation2 + $0x54] sm:$0xf] %v1241_v63  ;;  %v796_v63 = vpop.f32.mrf.mxu1 }
 0x123   : > { %v986_v26 = vshrl.u32 %v854_v0, 16  ;;  %v989_v30 = vshll.u32 %v854_v0, 16  ;;  %v835_v1 = vmax.f32 %v795_v59, 0.0  ;;  %519 = vst [vmem:[#allocation2 + $0x80] sm:$0x1] %v518_v60 }
 0x124   : > { %v764_v28 = vpop.f32.mrf.mxu0 }
 0x125   : > { %v988_v29 = vrot.slane %v986_v26, 7  ;;  %v765_v31 = vadd.f32 %v8414_v52, %v764_v28  ;;  %v797_v26 = vadd.f32 %v8414_v52, %v796_v63 }
 0x127   : > { %v991_v35 = vor.u32 %v989_v30, %v988_v29  ;;  %v993_v37 = vrot.slane %v988_v29, 4  ;;  %v823_v38 = vmax.f32 %v765_v31, 0.0  ;;  %v1251_v31 = vld [vmem:[#allocation2 + $0x68] sm:$0x1] }
 0x128   : > { %v1289_v55 = vld [vmem:[#allocation2 + $0xa8] sm:$0xf] }
 0x129   : > { %v992_v40 = vsel %vm8436_vm8, %v984_v34, %v991_v35  ;;  %v1245_v41 = vsel %vm8385_vm2, %v993_v37, %v1244_v32  ;;  %v855_v42 = vpack.c.bf16 %v823_v38, %v823_v38  ;;  %v867_v32 = vpack.c.bf16 %v835_v1, %v835_v1  ;;  %v1254_v1 = vld [vmem:[#allocation2 + $0x6c] sm:$0xf] }
 0x12a   : > { %1243 = vst [vmem:[#allocation2 + $0x58] sm:$0xf] %v992_v40  ;;  %v836_v34 = vmax.f32 %v797_v26, 0.0 }
 0x12b   : > { %1246 = vst [vmem:[#allocation2 + $0x5c] sm:$0x1] %v1245_v41  ;;  %v995_v45 = vshrl.u32 %v855_v42, 16  ;;  %v998_v49 = vshll.u32 %v855_v42, 16  ;;  %v1097_v40 = vshrl.u32 %v867_v32, 16  ;;  %v1100_v41 = vshll.u32 %v867_v32, 16 }
 0x12c   : > { %v766_v47 = vpop.f32.mrf.mxu0  ;;  %v529_v42 = vld [vmem:[#allocation2 + $0xb0] sm:$0x1]  ;;  %v868_v44 = vpack.c.bf16 %v836_v34, %v836_v34  ;;  %v520_v32 = vld [vmem:[#allocation2 + $0x8c] sm:$0x1] }
 0x12d   : > { %v997_v48 = vrot.slane %v995_v45, 7  ;;  %v767_v50 = vadd.f32 %v8414_v52, %v766_v47  ;;  %v464_v45 = vld [vmem:[#allocation2 + $0x84] sm:$0x1] }
 0x12f   : > { %v1000_v53 = vor.u32 %v998_v49, %v997_v48  ;;  %v824_v54 = vmax.f32 %v767_v50, 0.0  ;;  %v1001_v35 = vrot.slane %v997_v48, 4  ;;  %v530_v50 = vsel %vm8393_vm4, 0, %v529_v42 }
 0x130   : > { %v1099_v48 = vrot.slane %v1097_v40, 7  ;;  %531 = vst [vmem:[#allocation2 + $0xb0] sm:$0x1] %v530_v50 }
 0x131   : > { %v1248_v56 = vsel %vm8425_vm6, %v1000_v53, %v1247_v51  ;;  %v856_v57 = vpack.c.bf16 %v824_v54, %v824_v54  ;;  %v1105_v51 = vshrl.u32 %v868_v44, 16  ;;  %v465_v53 = vsel %vm8385_vm2, 0, %v464_v45 }
 0x132   : > { %1249 = vst [vmem:[#allocation2 + $0x60] sm:$0xf] %v1248_v56  ;;  %v799_v56 = vpop.f32.mrf.mxu1  ;;  %v1102_v59 = vor.u32 %v1100_v41, %v1099_v48  ;;  %v1103_v63 = vrot.slane %v1099_v48, 4 }
 0x133   : > { %v1003_v61 = vshrl.u32 %v856_v57, 16  ;;  %v1006_v29 = vshll.u32 %v856_v57, 16  ;;  %v1107_v60 = vrot.slane %v1105_v51, 7  ;;  %466 = vst [vmem:[#allocation2 + $0x84] sm:$0x1] %v465_v53  ;;  %v800_v40 = vadd.f32 %v8414_v52, %v799_v56 }
 0x134   : > { %v769_v0 = vpop.f32.mrf.mxu0  ;;  %v1290_v26 = vsel %vm8425_vm6, %v1102_v59, %v1289_v55 }
 0x135   : > { %v1005_v28 = vrot.slane %v1003_v61, 7  ;;  %v770_v30 = vadd.f32 %v8414_v52, %v769_v0  ;;  %v1108_v0 = vshll.u32 %v868_v44, 16  ;;  %1291 = vst [vmem:[#allocation2 + $0xa8] sm:$0xf] %v1290_v26  ;;  %v467_v26 = vld [vmem:[#allocation2 + $0x90] sm:$0x1] }
 0x137   : > { %v1008_v37 = vor.u32 %v1006_v29, %v1005_v28  ;;  %v1010_v38 = vrot.slane %v1005_v28, 4  ;;  %v825_v39 = vmax.f32 %v770_v30, 0.0  ;;  %v1110_v30 = vor.u32 %v1108_v0, %v1107_v60  ;;  %v1293_v42 = vld [vmem:[#allocation2 + $0xb0] sm:$0x1]  ;;  %v532_v0 = vld [vmem:[#allocation2 + $0xbc] sm:$0x1] }
 0x139   : > { %v1009_v46 = vsel %vm8436_vm8, %v1001_v35, %v1008_v37  ;;  %v1252_v47 = vsel %vm8385_vm2, %v1010_v38, %v1251_v31  ;;  %v857_v49 = vpack.c.bf16 %v825_v39, %v825_v39  ;;  %v1112_v31 = vrot.slane %v1107_v60, 4  ;;  %v476_v39 = vld [vmem:[#allocation2 + $0xb4] sm:$0x1] }
 0x13a   : > { %1250 = vst [vmem:[#allocation2 + $0x64] sm:$0xf] %v1009_v46  ;;  %v1111_v37 = vsel %vm8436_vm8, %v1103_v63, %v1110_v30  ;;  %v521_v38 = vsel %vm8393_vm4, 0, %v520_v32  ;;  %v801_v44 = vpop.f32.mrf.mxu1 }
 0x13b   : > { %1253 = vst [vmem:[#allocation2 + $0x68] sm:$0x1] %v1252_v47  ;;  %v1012_v54 = vshrl.u32 %v857_v49, 16  ;;  %v1015_v57 = vshll.u32 %v857_v49, 16  ;;  %v1294_v46 = vsel %vm8385_vm2, %v1112_v31, %v1293_v42  ;;  %v477_v47 = vsel %vm8385_vm2, 0, %v476_v39 }
 0x13c   : > { %v771_v58 = vpop.f32.mrf.mxu0  ;;  %1292 = vst [vmem:[#allocation2 + $0xac] sm:$0xf] %v1111_v37  ;;  %v837_v49 = vmax.f32 %v800_v40, 0.0  ;;  %v802_v50 = vadd.f32 %v8414_v52, %v801_v44  ;;  %v533_v31 = vsel %vm8393_vm4, 0, %v532_v0 }
 0x13d   : > { %v1014_v61 = vrot.slane %v1012_v54, 7  ;;  %v772_v62 = vadd.f32 %v8414_v52, %v771_v58  ;;  %522 = vst [vmem:[#allocation2 + $0x8c] sm:$0x1] %v521_v38  ;;  %v1258_v54 = vld [vmem:[#allocation2 + $0x74] sm:$0x1] }
 0x13e   : > { %1295 = vst [vmem:[#allocation2 + $0xb0] sm:$0x1] %v1294_v46  ;;  %v869_v55 = vpack.c.bf16 %v837_v49, %v837_v49  ;;  %v838_v56 = vmax.f32 %v802_v50, 0.0  ;;  %v1261_v49 = vld [vmem:[#allocation2 + $0x78] sm:$0xf] }
 0x13f   : > { %v1017_v28 = vor.u32 %v1015_v57, %v1014_v61  ;;  %v826_v29 = vmax.f32 %v772_v62, 0.0  ;;  %478 = vst [vmem:[#allocation2 + $0xb4] sm:$0x1] %v477_v47  ;;  %v1018_v57 = vrot.slane %v1014_v61, 4 }
 0x140   : > { %v1114_v62 = vshrl.u32 %v869_v55, 16  ;;  %v1117_v63 = vshll.u32 %v869_v55, 16  ;;  %534 = vst [vmem:[#allocation2 + $0xbc] sm:$0x1] %v533_v31 }
 0x141   : > { %v1255_v34 = vsel %vm8425_vm6, %v1017_v28, %v1254_v1  ;;  %v858_v35 = vpack.c.bf16 %v826_v29, %v826_v29  ;;  %v870_v1 = vpack.c.bf16 %v838_v56, %v838_v56  ;;  %v523_v56 = vld [vmem:[#allocation2 + $0x98] sm:$0x1] }
 0x142   : > { %1256 = vst [vmem:[#allocation2 + $0x6c] sm:$0xf] %v1255_v34  ;;  %v1116_v61 = vrot.slane %v1114_v62, 7  ;;  %v468_v34 = vsel %vm8385_vm2, 0, %v467_v26  ;;  %v804_v37 = vpop.f32.mrf.mxu1 }
 0x143   : > { %v1020_v41 = vshrl.u32 %v858_v35, 16  ;;  %v1023_v51 = vshll.u32 %v858_v35, 16  ;;  %v1122_v32 = vshrl.u32 %v870_v1, 16  ;;  %v1125_v42 = vshll.u32 %v870_v1, 16  ;;  %469 = vst [vmem:[#allocation2 + $0x90] sm:$0x1] %v468_v34 }
 0x144   : > { %v774_v45 = vpop.f32.mrf.mxu0  ;;  %v1119_v39 = vor.u32 %v1117_v63, %v1116_v61  ;;  %v1120_v40 = vrot.slane %v1116_v61, 4  ;;  %v524_v1 = vsel %vm8393_vm4, 0, %v523_v56 }
 0x145   : > { %v1022_v48 = vrot.slane %v1020_v41, 7  ;;  %v775_v53 = vadd.f32 %v8414_v52, %v774_v45  ;;  %v1124_v41 = vrot.slane %v1122_v32, 7  ;;  %525 = vst [vmem:[#allocation2 + $0x98] sm:$0x1] %v524_v1 }
 0x146   : > { %v1296_v47 = vld [vmem:[#allocation2 + $0xb4] sm:$0xf] }
 0x147   : > { %v1025_v58 = vor.u32 %v1023_v51, %v1022_v48  ;;  %v1027_v59 = vrot.slane %v1022_v48, 4  ;;  %v827_v60 = vmax.f32 %v775_v53, 0.0  ;;  %v1297_v50 = vsel %vm8425_vm6, %v1119_v39, %v1296_v47  ;;  %v1300_v63 = vld [vmem:[#allocation2 + $0xbc] sm:$0x1]  ;;  %v535_v47 = vld [vmem:[#allocation2 + $0xc8] sm:$0x1] }
 0x148   : > { %v1127_v48 = vor.u32 %v1125_v42, %v1124_v41  ;;  %1298 = vst [vmem:[#allocation2 + $0xb4] sm:$0xf] %v1297_v50  ;;  %v1129_v55 = vrot.slane %v1124_v41, 4  ;;  %v470_v50 = vld [vmem:[#allocation2 + $0x9c] sm:$0x1] }
 0x149   : > { %v1026_v28 = vsel %vm8436_vm8, %v1018_v57, %v1025_v58  ;;  %v1259_v29 = vsel %vm8385_vm2, %v1027_v59, %v1258_v54  ;;  %v859_v30 = vpack.c.bf16 %v827_v60, %v827_v60  ;;  %v479_v59 = vld [vmem:[#allocation2 + $0xc0] sm:$0x1]  ;;  %v805_v60 = vadd.f32 %v8414_v52, %v804_v37 }
 0x14a   : > { %1257 = vst [vmem:[#allocation2 + $0x70] sm:$0xf] %v1026_v28  ;;  %v1128_v54 = vsel %vm8436_vm8, %v1120_v40, %v1127_v48  ;;  %v480_v0 = vsel %vm8385_vm2, 0, %v479_v59  ;;  %v806_v26 = vpop.f32.mrf.mxu1  ;;  %v471_v56 = vsel %vm8385_vm2, 0, %v470_v50 }
 0x14b   : > { %1260 = vst [vmem:[#allocation2 + $0x74] sm:$0x1] %v1259_v29  ;;  %v1029_v35 = vshrl.u32 %v859_v30, 16  ;;  %v1032_v45 = vshll.u32 %v859_v30, 16  ;;  %v1301_v29 = vsel %vm8385_vm2, %v1129_v55, %v1300_v63  ;;  %v839_v30 = vmax.f32 %v805_v60, 0.0 }
 0x14c   : > { %v776_v38 = vpop.f32.mrf.mxu0  ;;  %1299 = vst [vmem:[#allocation2 + $0xb8] sm:$0xf] %v1128_v54  ;;  %v807_v31 = vadd.f32 %v8414_v52, %v806_v26  ;;  %v536_v54 = vsel %vm8393_vm4, 0, %v535_v47 }
 0x14d   : > { %v1031_v44 = vrot.slane %v1029_v35, 7  ;;  %v777_v46 = vadd.f32 %v8414_v52, %v776_v38  ;;  %481 = vst [vmem:[#allocation2 + $0xc0] sm:$0x1] %v480_v0  ;;  %v1265_v35 = vld [vmem:[#allocation2 + $0x80] sm:$0x1]  ;;  %v871_v37 = vpack.c.bf16 %v839_v30, %v839_v30 }
 0x14e   : > { %1302 = vst [vmem:[#allocation2 + $0xbc] sm:$0x1] %v1301_v29  ;;  %v840_v38 = vmax.f32 %v807_v31, 0.0  ;;  %v1268_v29 = vld [vmem:[#allocation2 + $0x84] sm:$0xf] }
 0x14f   : > { %v1034_v51 = vor.u32 %v1032_v45, %v1031_v44  ;;  %v828_v53 = vmax.f32 %v777_v46, 0.0  ;;  %v1035_v39 = vrot.slane %v1031_v44, 4  ;;  %v1131_v45 = vshrl.u32 %v871_v37, 16  ;;  %537 = vst [vmem:[#allocation2 + $0xc8] sm:$0x1] %v536_v54 }
 0x150   : > { %v1134_v46 = vshll.u32 %v871_v37, 16  ;;  %472 = vst [vmem:[#allocation2 + $0x9c] sm:$0x1] %v471_v56  ;;  %v526_v37 = vld [vmem:[#allocation2 + $0xa4] sm:$0x1] }
 0x151   : > { %v1262_v57 = vsel %vm8425_vm6, %v1034_v51, %v1261_v49  ;;  %v860_v58 = vpack.c.bf16 %v828_v53, %v828_v53  ;;  %v872_v49 = vpack.c.bf16 %v840_v38, %v840_v38  ;;  %v1133_v44 = vrot.slane %v1131_v45, 7 }
 0x152   : > { %1263 = vst [vmem:[#allocation2 + $0x78] sm:$0xf] %v1262_v57 }
 0x153   : > { %v1037_v62 = vshrl.u32 %v860_v58, 16  ;;  %v1040_v32 = vshll.u32 %v860_v58, 16  ;;  %v1139_v55 = vshrl.u32 %v872_v49, 16  ;;  %v1136_v60 = vor.u32 %v1134_v46, %v1133_v44 }
 0x154   : > { %v779_v28 = vpop.f32.mrf.mxu0  ;;  %v1303_v58 = vld [vmem:[#allocation2 + $0xc0] sm:$0xf]  ;;  %v1142_v0 = vshll.u32 %v872_v49, 16 }
 0x155   : > { %v1039_v61 = vrot.slane %v1037_v62, 7  ;;  %v780_v34 = vadd.f32 %v8414_v52, %v779_v28  ;;  %v1137_v62 = vrot.slane %v1133_v44, 4  ;;  %v1141_v63 = vrot.slane %v1139_v55, 7 }
 0x156   : > { %v1304_v30 = vsel %vm8425_vm6, %v1136_v60, %v1303_v58 }
 0x157   : > { %v1042_v40 = vor.u32 %v1040_v32, %v1039_v61  ;;  %v1044_v41 = vrot.slane %v1039_v61, 4  ;;  %v829_v42 = vmax.f32 %v780_v34, 0.0  ;;  %v1144_v31 = vor.u32 %v1142_v0, %v1141_v63  ;;  %1305 = vst [vmem:[#allocation2 + $0xc0] sm:$0xf] %v1304_v30 }
 0x159   : > { %v1043_v48 = vsel %vm8436_vm8, %v1035_v39, %v1042_v40  ;;  %v1266_v51 = vsel %vm8385_vm2, %v1044_v41, %v1265_v35  ;;  %v861_v53 = vpack.c.bf16 %v829_v42, %v829_v42  ;;  %v1145_v34 = vsel %vm8436_vm8, %v1137_v62, %v1144_v31  ;;  %v1307_v42 = vld [vmem:[#allocation2 + $0xc8] sm:$0x1] }
 0x15a   : > { %1264 = vst [vmem:[#allocation2 + $0x7c] sm:$0xf] %v1043_v48  ;;  %v1146_v35 = vrot.slane %v1141_v63, 4  ;;  %v527_v40 = vsel %vm8393_vm4, 0, %v526_v37  ;;  %v1272_v48 = vld [vmem:[#allocation2 + $0x8c] sm:$0x1] }
 0x15b   : > { %1267 = vst [vmem:[#allocation2 + $0x80] sm:$0x1] %v1266_v51  ;;  %v1046_v57 = vshrl.u32 %v861_v53, 16  ;;  %v1049_v26 = vshll.u32 %v861_v53, 16  ;;  %v1275_v63 = vld [vmem:[#allocation2 + $0x90] sm:$0xf] }
 0x15c   : > { %v781_v59 = vpop.f32.mrf.mxu0  ;;  %1306 = vst [vmem:[#allocation2 + $0xc4] sm:$0xf] %v1145_v34  ;;  %v1308_v46 = vsel %vm8385_vm2, %v1146_v35, %v1307_v42  ;;  %v1279_v34 = vld [vmem:[#allocation2 + $0x98] sm:$0x1] }
 0x15d   : > { %v1048_v1 = vrot.slane %v1046_v57, 7  ;;  %v782_v28 = vadd.f32 %v8414_v52, %v781_v59  ;;  %528 = vst [vmem:[#allocation2 + $0xa4] sm:$0x1] %v527_v40 }
 0x15e   : > { %1309 = vst [vmem:[#allocation2 + $0xc8] sm:$0x1] %v1308_v46 }
 0x15f   : > { %v1051_v61 = vor.u32 %v1049_v26, %v1048_v1  ;;  %v830_v32 = vmax.f32 %v782_v28, 0.0  ;;  %v1052_v51 = vrot.slane %v1048_v1, 4 }
 0x161   : > { %v1269_v38 = vsel %vm8425_vm6, %v1051_v61, %v1268_v29  ;;  %v862_v39 = vpack.c.bf16 %v830_v32, %v830_v32 }
 0x162   : > { %1270 = vst [vmem:[#allocation2 + $0x84] sm:$0xf] %v1269_v38 }
 0x163   : > { %v1054_v41 = vshrl.u32 %v862_v39, 16  ;;  %v1057_v49 = vshll.u32 %v862_v39, 16 }
 0x164   : > { %v784_v45 = vpop.f32.mrf.mxu0 }
 0x165   : > { %v1056_v47 = vrot.slane %v1054_v41, 7  ;;  %v785_v50 = vadd.f32 %v8414_v52, %v784_v45 }
 0x167   : > { %v1059_v53 = vor.u32 %v1057_v49, %v1056_v47  ;;  %v1061_v54 = vrot.slane %v1056_v47, 4  ;;  %v831_v44 = vmax.f32 %v785_v50, 0.0 }
 0x169   : > { %v1060_v36 = vsel %vm8436_vm8, %v1052_v51, %v1059_v53  ;;  %v1273_v55 = vsel %vm8385_vm2, %v1061_v54, %v1272_v48  ;;  %v863_v56 = vpack.c.bf16 %v831_v44, %v831_v44  ;;  %v1282_v48 = vld [vmem:[#allocation2 + $0x9c] sm:$0xf] }
 0x16a   : > { %1271 = vst [vmem:[#allocation2 + $0x88] sm:$0xf] %v1060_v36 }
 0x16b   : > { %1274 = vst [vmem:[#allocation2 + $0x8c] sm:$0x1] %v1273_v55  ;;  %v1063_v57 = vshrl.u32 %v863_v56, 16  ;;  %v1066_v60 = vshll.u32 %v863_v56, 16 }
 0x16c   : > { %v786_v58 = vpop.f32.mrf.mxu0 }
 0x16d   : > { %v1065_v59 = vrot.slane %v1063_v57, 7  ;;  %v787_v62 = vadd.f32 %v8414_v52, %v786_v58  ;;  %v1286_v57 = vld [vmem:[#allocation2 + $0xa4] sm:$0x1] }
 0x16f   : > { %v1068_v0 = vor.u32 %v1066_v60, %v1065_v59  ;;  %v832_v1 = vmax.f32 %v787_v62, 0.0  ;;  %v1069_v35 = vrot.slane %v1065_v59, 4 }
 0x171   : > { %v1276_v26 = vsel %vm8425_vm6, %v1068_v0, %v1275_v63  ;;  %v864_v28 = vpack.c.bf16 %v832_v1, %v832_v1 }
 0x172   : > { %1277 = vst [vmem:[#allocation2 + $0x90] sm:$0xf] %v1276_v26 }
 0x173   : > { %v1071_v29 = vshrl.u32 %v864_v28, 16  ;;  %v1074_v61 = vshll.u32 %v864_v28, 16 }
 0x174   : > { %v789_v30 = vpop.f32.mrf.mxu0 }
 0x175   : > { %v1073_v31 = vrot.slane %v1071_v29, 7  ;;  %v790_v32 = vadd.f32 %v8414_v52, %v789_v30 }
 0x177   : > { %v1076_v37 = vor.u32 %v1074_v61, %v1073_v31  ;;  %v1078_v38 = vrot.slane %v1073_v31, 4  ;;  %v833_v39 = vmax.f32 %v790_v32, 0.0 }
 0x179   : > { %v1077_v40 = vsel %vm8436_vm8, %v1069_v35, %v1076_v37  ;;  %v1280_v41 = vsel %vm8385_vm2, %v1078_v38, %v1279_v34  ;;  %v865_v42 = vpack.c.bf16 %v833_v39, %v833_v39 }
 0x17a   : > { %1278 = vst [vmem:[#allocation2 + $0x94] sm:$0xf] %v1077_v40 }
 0x17b   : > { %1281 = vst [vmem:[#allocation2 + $0x98] sm:$0x1] %v1280_v41  ;;  %v1080_v45 = vshrl.u32 %v865_v42, 16  ;;  %v1083_v49 = vshll.u32 %v865_v42, 16 }
 0x17c   : > { %v791_v46 = vpop.f32.mrf.mxu0 }
 0x17d   : > { %v1082_v47 = vrot.slane %v1080_v45, 7  ;;  %v792_v50 = vadd.f32 %v8414_v52, %v791_v46 }
 0x17f   : > { %v1085_v51 = vor.u32 %v1083_v49, %v1082_v47  ;;  %v834_v53 = vmax.f32 %v792_v50, 0.0  ;;  %v1086_v58 = vrot.slane %v1082_v47, 4 }
 0x181   : > { %v1283_v54 = vsel %vm8425_vm6, %v1085_v51, %v1282_v48  ;;  %v866_v44 = vpack.c.bf16 %v834_v53, %v834_v53 }
 0x182   : > { %1284 = vst [vmem:[#allocation2 + $0x9c] sm:$0xf] %v1283_v54 }
 0x183   : > { %v1088_v36 = vshrl.u32 %v866_v44, 16  ;;  %v1091_v56 = vshll.u32 %v866_v44, 16 }
 0x185   : > { %v1090_v55 = vrot.slane %v1088_v36, 7 }
 0x187   : > { %v1093_v59 = vor.u32 %v1091_v56, %v1090_v55  ;;  %v1095_v60 = vrot.slane %v1090_v55, 4 }
 0x189   : > { %v1094_v62 = vsel %vm8436_vm8, %v1086_v58, %v1093_v59  ;;  %v1287_v52 = vsel %vm8385_vm2, %v1095_v60, %v1286_v57 }
 0x18a   : > { %1285 = vst [vmem:[#allocation2 + $0xa0] sm:$0xf] %v1094_v62 }
 0x18b   : > { %1288 = vst [vmem:[#allocation2 + $0xa4] sm:$0x1] %v1287_v52 }
 0x18c   : > { %8178 = dma.done.wait [#allocation5], 128 }
 0x18d   : > { %8179 = vsyncadd [#allocation5], 4294967168 }
 0x18e   : > { %8180 = dma.done.wait [#allocation5 + $0x1], 128 }
 0x18f   : > { %8181 = vsyncadd [#allocation5 + $0x1], 4294967168  ;;  %1332 = vmatpush.bf16.msrb.mxu1 %v8277_v2  ;;  %v8624_v63 = vld [vmem:[%s9990_s4 + $0x38] sm:$0xff]  ;;  %v8637_v2 = vld [vmem:[%s9990_s4 + $0x30] sm:$0xff]  ;;  %vm1538_vm9 = vsmask.f32 3328 }
 0x190   : > { %v8629_v0 = vld [vmem:[%s9990_s4 + $0x78] sm:$0xff]  ;;  %8121 = vmatpush.bf16.msra.mxu2 %v8624_v63  ;;  %v1432_v1 = vld [vmem:[#allocation2 + $0x24] sm:$0xf]  ;;  %vm1539_vm10 = vsmask.f32 7440  ;;  %v8652_v28 = vld [vmem:[%s9990_s4 + $0x28] sm:$0xff] }
 0x191   : > { %8129 = vmatpush.bf16.msra.mxu3 %v8629_v0  ;;  %v8657_v29 = vld [vmem:[%s9990_s4 + $0x68] sm:$0xff]  ;;  %1464 = vst [vmem:[#allocation4 + $0xd8] sm:$0xf] %v1432_v1  ;;  %v1499_v30 = vld [vmem:[#allocation2 + $0x24] sm:$0xf]  ;;  %vm8678_vm11 = vmor %vm1538_vm9, %vm1539_vm10  ;;  %vm2085_vm12 = vcmask 1042432  }
 0x192   : > { %v1500_v31 = vld [vmem:[#allocation2 + $0x28] sm:$0xf]  ;;  %v8662_v61 = vld [vmem:[%s9990_s4 + $0x20] sm:$0xff]  ;;  %v1501_v34 = vld [vmem:[#allocation2 + $0x2c] sm:$0x1]  ;;  %v1614_v35 = vshrl.u32 %v1499_v30, 16 }
 0x193   : > { %1333 = vmatpush.bf16.msrb.mxu1 %v8332_v19  ;;  %v8642_v19 = vld [vmem:[%s9990_s4 + $0x70] sm:$0xff]  ;;  %v8667_v32 = vld [vmem:[%s9990_s4 + $0x60] sm:$0xff]  ;;  %v1617_v37 = vshll.u32 %v1499_v30, 16  ;;  %v1623_v38 = vshll.u32 %v1500_v31, 16  ;;  %v1627_v39 = vshrl.u32 %v1500_v31, 16  ;;  %v1633_v40 = vshll.u32 %v1501_v34, 16 }
 0x194   : > { %8122 = vmatpush.bf16.msra.mxu2 %v8637_v2  ;;  %v1434_v41 = vld [vmem:[#allocation2 + $0x30] sm:$0xf]  ;;  %v1435_v42 = vld [vmem:[#allocation2 + $0x34] sm:$0xf]  ;;  %v1616_v46 = vrot.slane %v1614_v35, 4  ;;  %v8696_v62 = vld [vmem:[%s9990_s4 + $0x58] sm:$0xff] }
 0x195   : > { %8130 = vmatpush.bf16.msra.mxu3 %v8642_v19  ;;  %v1619_v47 = vrot.slane %v1617_v37, 5  ;;  %v1625_v49 = vrot.slane %v1623_v38, 5  ;;  %v1629_v50 = vrot.slane %v1627_v39, 4  ;;  %1466 = vst [vmem:[#allocation4 + $0x120] sm:$0xf] %v1434_v41  ;;  %v1635_v48 = vrot.slane %v1633_v40, 5 }
 0x196   : > { %1467 = vst [vmem:[#allocation4 + $0x144] sm:$0xf] %v1435_v42  ;;  %v1502_v51 = vld [vmem:[#allocation2 + $0x30] sm:$0xf]  ;;  %v1503_v54 = vld [vmem:[#allocation2 + $0x34] sm:$0xf] }
 0x197   : > { %1334 = vmatpush.bf16.msrb.mxu1 %v8338_v20  ;;  %v8194_v20 = vmov 0   ;;  %v1620_v53 = vor.u32 %v1619_v47, %v1616_v46  ;;  %v1504_v44 = vld [vmem:[#allocation2 + $0x38] sm:$0x1]  ;;  %v1638_v36 = vshrl.u32 %v1502_v51, 16  ;;  %v1641_v55 = vshll.u32 %v1502_v51, 16  ;;  %v8709_v41 = vld [vmem:[%s9990_s4 + $0x10] sm:$0xff] }
 0x198   : > { %v8645_v26 = vrot.slane %v8194_v20, 7  ;;  %8123 = vmatpush.bf16.msra.mxu2 %v8652_v28  ;;  %v1647_v57 = vshll.u32 %v1503_v54, 16  ;;  %v1651_v58 = vshrl.u32 %v1503_v54, 16  ;;  %v1657_v59 = vshll.u32 %v1504_v44, 16  ;;  %v1384_v31 = vld [vmem:[#allocation2] sm:$0xf] }
 0x199   : > { %8131 = vmatpush.bf16.msra.mxu3 %v8657_v29  ;;  %v1621_v52 = vrot.slane %v1620_v53, 4  ;;  %v1640_v20 = vrot.slane %v1638_v36, 4  ;;  %v1505_v39 = vld [vmem:[#allocation2 + $0x3c] sm:$0xf]  ;;  %v1506_v40 = vld [vmem:[#allocation2 + $0x40] sm:$0xf] }
 0x19a   : > { %10041 = vst [vmem:[#allocation28_spill] sm:$0xff] %v8645_v26  ;;  %v8671_v45 = vrot.slane %v8645_v26, 4  ;;  %v1649_v43 = vrot.slane %v1647_v57, 5  ;;  %v1653_v30 = vrot.slane %v1651_v58, 4  ;;  %v1385_v38 = vsel %vm8425_vm6, %v8645_v26, %v1384_v31  ;;  %v8721_v44 = vld [vmem:[%s9990_s4 + $0x8] sm:$0xff] }
 0x19b   : > { %1335 = vmatpush.bf16.msrb.mxu1 %v8345_v21  ;;  %v1433_v21 = vld [vmem:[#allocation2 + $0x28] sm:$0xf]  ;;  %v1626_v34 = vsel %vm8678_vm11, %v1621_v52, %v1625_v49  ;;  %v1659_v46 = vrot.slane %v1657_v59, 5  ;;  %v1662_v47 = vshrl.u32 %v1505_v39, 16  ;;  %v1671_v51 = vshll.u32 %v1506_v40, 16 }
 0x19c   : > { %1465 = vst [vmem:[#allocation4 + $0xfc] sm:$0xf] %v1433_v21  ;;  %v1379_v60 = vsel %vm8436_vm8, %v8671_v45, %v8645_v26  ;;  %8124 = vmatpush.bf16.msra.mxu2 %v8662_v61  ;;  %v1643_v21 = vrot.slane %v1641_v55, 5  ;;  %v1654_v42 = vor.u32 %v1653_v30, %v1649_v43  ;;  %v1507_v57 = vld [vmem:[#allocation2 + $0x44] sm:$0x1]  ;;  %vm2086_vm13 = vcmask 1046532  }
 0x19d   : > { %10042 = vst [vmem:[#allocation29_spill] sm:$0xff] %v8671_v45  ;;  %8132 = vmatpush.bf16.msra.mxu3 %v8667_v32  ;;  %v1664_v54 = vrot.slane %v1662_v47, 4  ;;  %v1673_v59 = vrot.slane %v1671_v51, 5  ;;  %vm8855_vm14 = vmor %vm2085_vm12, %vm2086_vm13  ;;  %v2836_v16 = vld [vmem:[#allocation2 + $0x3c] sm:$0xe] }
 0x19e   : > { %v1644_v37 = vor.u32 %v1643_v21, %v1640_v20  ;;  %1387 = vst [vmem:[#allocation2 + $0x4] sm:$0xf] %v1379_v60  ;;  %v1655_v53 = vrot.slane %v1654_v42, 4  ;;  %v1681_v20 = vshll.u32 %v1507_v57, 16  ;;  %v1436_v21 = vld [vmem:[#allocation2 + $0x3c] sm:$0xf] }
 0x19f   : > { %1336 = vmatpush.bf16.msrb.mxu1 %v8352_v22  ;;  %v1630_v22 = vor.u32 %v1629_v50, %v1625_v49  ;;  %1963 = vst [vmem:[#allocation4 + $0xdc] sm:$0xf] %v1626_v34  ;;  %v1665_v49 = vshll.u32 %v1505_v39, 16  ;;  %v7791_v50 = vld [vmem:[#allocation3] sm:$0xff]  ;;  %v8742_v34 = vld [vmem:[%s9990_s4] sm:$0xff] }
 0x1a0   : > { %1386 = vst [vmem:[#allocation2] sm:$0xf] %v1385_v38  ;;  %v1660_v52 = vsel %vm8678_vm11, %v1655_v53, %v1659_v46  ;;  %v8747_v38 = vld [vmem:[%s9990_s4 + $0x40] sm:$0xff]  ;;  %v1428_v53 = vld [vmem:[#allocation2 + $0xc] sm:$0xf] }
 0x1a1   : > { %v1631_v1 = vrot.slane %v1630_v22, 4  ;;  %8133 = vmatpush.bf16.msra.mxu3 %v8696_v62  ;;  %v1388_v22 = vld [vmem:[#allocation2 + $0x8] sm:$0x1]  ;;  %1422 = vst [vmem:[#allocation2 + $0xd0] sm:$0xf] %v1379_v60  ;;  %v1667_v58 = vrot.slane %v1665_v49, 5 }
 0x1a2   : > { %v1389_v55 = vsel %vm8385_vm2, %v8671_v45, %v1388_v22  ;;  %1966 = vst [vmem:[#allocation4 + $0x148] sm:$0xf] %v1660_v52  ;;  %v7976_v49 = vld [vmem:[%s9990_s4 + $0x138] sm:$0xff]  ;;  %v1429_v22 = vld [vmem:[#allocation2 + $0x10] sm:$0xf] }
 0x1a3   : > { %1337 = vmatpush.bf16.msrb.mxu1 %v8359_v23  ;;  %v8691_v23 = vld [vmem:[%s9990_s4 + $0x18] sm:$0xff]  ;;  %v1636_v35 = vsel %vm8678_vm11, %v1631_v1, %v1635_v48  ;;  %v8716_v48 = vld [vmem:[%s9990_s4 + $0x50] sm:$0xff]  ;;  %v1675_v1 = vshrl.u32 %v1506_v40, 16  ;;  %v1668_v30 = vor.u32 %v1667_v58, %v1664_v54  ;;  %1390 = vst [vmem:[#allocation2 + $0x8] sm:$0x1] %v1389_v55  ;;  %v1683_v40 = vrot.slane %v1681_v20, 5 }
 0x1a4   : > { %8125 = vmatpush.bf16.msra.mxu2 %v8691_v23  ;;  %1964 = vst [vmem:[#allocation4 + $0x100] sm:$0xf] %v1636_v35  ;;  %v7824_v35 = vld [vmem:[#allocation4 + $0xf8] sm:$0xf0]  ;;  %v1508_v55 = vld [vmem:[#allocation2 + $0x48] sm:$0xf] }
 0x1a5   : > { %8134 = vmatpush.bf16.msra.mxu3 %v8716_v48  ;;  %v1427_v60 = vld [vmem:[#allocation2 + $0x4] sm:$0xf]  ;;  %v1677_v31 = vrot.slane %v1675_v1, 4  ;;  %1468 = vst [vmem:[#allocation4 + $0x168] sm:$0xf] %v1436_v21  ;;  %v1686_v58 = vshrl.u32 %v1508_v55, 16 }
 0x1a6   : > { %1459 = vst [vmem:[#allocation4 + $0x24] sm:$0xf] %v1427_v60  ;;  %v7820_v42 = vld [vmem:[#allocation4 + $0xdc] sm:$0xf]  ;;  %v1509_v57 = vld [vmem:[#allocation2 + $0x4c] sm:$0xf] }
 0x1a7   : > { %1338 = vmatpush.bf16.msrb.mxu1 %v8366_v24  ;;  %v1645_v24 = vrot.slane %v1644_v37, 4  ;;  %v1669_v37 = vrot.slane %v1668_v30, 4  ;;  %v1678_v39 = vor.u32 %v1677_v31, %v1673_v59  ;;  %v1426_v46 = vld [vmem:[#allocation2] sm:$0xf]  ;;  %1460 = vst [vmem:[#allocation4 + $0x48] sm:$0xf] %v1428_v53 }
 0x1a8   : > { %8126 = vmatpush.bf16.msra.mxu2 %v8709_v41  ;;  %1458 = vst [vmem:[#allocation4] sm:$0xf] %v1426_v46  ;;  %v1695_v52 = vshll.u32 %v1509_v57, 16  ;;  %v1699_v1 = vshrl.u32 %v1509_v57, 16  ;;  %v1688_v20 = vrot.slane %v1686_v58, 4 }
 0x1a9   : > { %v1650_v36 = vsel %vm8678_vm11, %v1645_v24, %v1649_v43  ;;  %v1437_v43 = vld [vmem:[#allocation2 + $0x40] sm:$0xf]  ;;  %v1674_v47 = vsel %vm8678_vm11, %v1669_v37, %v1673_v59  ;;  %v1679_v24 = vrot.slane %v1678_v39, 4  ;;  %1461 = vst [vmem:[#allocation4 + $0x6c] sm:$0xf] %v1429_v22  ;;  %v1689_v59 = vshll.u32 %v1508_v55, 16 }
 0x1aa   : > { %1965 = vst [vmem:[#allocation4 + $0x124] sm:$0xf] %v1650_v36  ;;  %v7975_v36 = vld [vmem:[%s9990_s4 + $0x130] sm:$0xff]  ;;  %v1697_v30 = vrot.slane %v1695_v52, 5  ;;  %v1701_v60 = vrot.slane %v1699_v1, 4  ;;  %v7974_v1 = vld [vmem:[%s9990_s4 + $0x128] sm:$0xff] }
 0x1ab   : > { %1339 = vmatpush.bf16.msrb.mxu1 %v8373_v25  ;;  %v8737_v25 = vld [vmem:[%s9990_s4 + $0x48] sm:$0xff]  ;;  %1469 = vst [vmem:[#allocation4 + $0x18c] sm:$0xf] %v1437_v43  ;;  %v1691_v21 = vrot.slane %v1689_v59, 5  ;;  %v7792_v43 = vld [vmem:[#allocation3 + $0x8] sm:$0xff] }
 0x1ac   : > { %8127 = vmatpush.bf16.msra.mxu2 %v8721_v44  ;;  %8135 = vmatpush.bf16.msra.mxu3 %v8737_v25  ;;  %1967 = vst [vmem:[#allocation4 + $0x16c] sm:$0xf] %v1674_v47  ;;  %v1439_v37 = vld [vmem:[#allocation2 + $0x4c] sm:$0xf]  ;;  %v1702_v39 = vor.u32 %v1701_v60, %v1697_v30  ;;  %v7008_v47 = vld [vmem:[#allocation4 + $0x120] sm:$0xf] }
 0x1ad   : > { %1471 = vst [vmem:[#allocation4 + $0x1d4] sm:$0xf] %v1439_v37  ;;  %v1431_v53 = vld [vmem:[#allocation2 + $0x1c] sm:$0xf]  ;;  %v7797_v58 = vld [vmem:[#allocation4 + $0x20] sm:$0xf0] }
 0x1ae   : > { %1340 = vmatmul.bf16.vlgmr.msrb.gmra.mxu1 %v7791_v50  ;;  %v6974_v50 = vld [vmem:[#allocation4 + $0xfc] sm:$0xf0]  ;;  %1463 = vst [vmem:[#allocation4 + $0xb4] sm:$0xf] %v1431_v53  ;;  %v2842_v10 = vld [vmem:[#allocation2 + $0x54] sm:$0xe] }
 0x1af   : > { %5405 = vmatpush.bf16.msra.mxu1 %v8624_v63  ;;  %v6972_v63 = vld [vmem:[#allocation4 + $0xd8] sm:$0xf]  ;;  %v6977_v54 = vor.u32 %v7820_v42, %v6974_v50  ;;  %v6864_v57 = vld [vmem:[#allocation4] sm:$0xf]  ;;  %v2848_v6 = vld [vmem:[#allocation2 + $0x6c] sm:$0xe] }
 0x1b0   : > { %v6973_v51 = vor.u32 %v7824_v35, %v6972_v63  ;;  %8128 = vmatpush.bf16.msra.mxu2 %v8742_v34  ;;  %8136 = vmatpush.bf16.msra.mxu3 %v8747_v38  ;;  %v1692_v63 = vor.u32 %v1691_v21, %v1688_v20  ;;  %v1438_v35 = vld [vmem:[#allocation2 + $0x48] sm:$0xf]  ;;  %v1513_v20 = vld [vmem:[#allocation2 + $0x5c] sm:$0x1]  ;;  %v2845_v8 = vld [vmem:[#allocation2 + $0x60] sm:$0xe] }
 0x1b1   : > { %1470 = vst [vmem:[#allocation4 + $0x1b0] sm:$0xf] %v1438_v35  ;;  %v1491_v35 = vld [vmem:[#allocation2 + $0x4] sm:$0xf]  ;;  %v2839_v12 = vld [vmem:[#allocation2 + $0x48] sm:$0xe] }
 0x1b2   : > { %v2851_v4 = vld [vmem:[#allocation2 + $0x78] sm:$0xe]  ;;  %v3098_v27 = vld [vmem:[#allocation2 + $0x1c] sm:$0xf] }
 0x1b3   : > { %5406 = vmatpush.bf16.msra.mxu1 %v8637_v2  ;;  %v1684_v2 = vsel %vm8678_vm11, %v1679_v24, %v1683_v40  ;;  %5428 = vmatmul.bf16.vlgmr.msra.gmra.mxu2 %v6973_v51  ;;  %v1693_v40 = vrot.slane %v1692_v63, 4  ;;  %v7010_v24 = vld [vmem:[#allocation4 + $0x144] sm:$0xf0]  ;;  %v1490_v63 = vld [vmem:[#allocation2] sm:$0xf] }
 0x1b4   : > { %1968 = vst [vmem:[#allocation4 + $0x190] sm:$0xf] %v1684_v2  ;;  %5761 = vmatpush.bf16.msrb.mxu2 %v7976_v49  ;;  %5517 = vmatmul.bf16.vlgmr.msra.gmra.mxu3 %v6977_v54  ;;  %v7833_v49 = vld [vmem:[#allocation4 + $0x140] sm:$0xf0]  ;;  %v1430_v2 = vld [vmem:[#allocation2 + $0x18] sm:$0xf] }
 0x1b5   : > { %v1698_v46 = vsel %vm8678_vm11, %v1693_v40, %v1697_v30  ;;  %v7009_v51 = vor.u32 %v7833_v49, %v7008_v47  ;;  %1462 = vst [vmem:[#allocation4 + $0x90] sm:$0xf] %v1430_v2  ;;  %v1511_v54 = vld [vmem:[#allocation2 + $0x54] sm:$0xf]  ;;  %v6865_v30 = vor.u32 %v7797_v58, %v6864_v57  ;;  %v1551_v40 = vshll.u32 %v1491_v35, 16 }
 0x1b6   : > { %1969 = vst [vmem:[#allocation4 + $0x1b4] sm:$0xf] %v1698_v46  ;;  %v1713_v55 = vshll.u32 %v1511_v54, 16  ;;  %v1492_v49 = vld [vmem:[#allocation2 + $0x8] sm:$0x1] }
 0x1b7   : > { %5407 = vmatpush.bf16.msra.mxu1 %v8652_v28  ;;  %v1510_v28 = vld [vmem:[#allocation2 + $0x50] sm:$0x1]  ;;  %3130 = vst [vmem:[#allocation4 + $0x3c] sm:$0xf] %v3098_v27  ;;  %v7994_v27 = vld [vmem:[%s9990_s4 + $0x1c8] sm:$0xff] }
 0x1b8   : > { %5762 = vmatpush.bf16.msrb.mxu2 %v7975_v36  ;;  %v1705_v31 = vshll.u32 %v1510_v28, 16  ;;  %v1512_v36 = vld [vmem:[#allocation2 + $0x58] sm:$0xf]  ;;  %v1715_v28 = vrot.slane %v1713_v55, 5 }
 0x1b9   : > { %v1719_v59 = vshll.u32 %v1512_v36, 16  ;;  %v1723_v52 = vshrl.u32 %v1512_v36, 16 }
 0x1ba   : > { %v1707_v42 = vrot.slane %v1705_v31, 5  ;;  %v1729_v31 = vshll.u32 %v1513_v20, 16 }
 0x1bb   : > { %5408 = vmatpush.bf16.msra.mxu1 %v8662_v61  ;;  %v1703_v61 = vrot.slane %v1702_v39, 4  ;;  %v1721_v21 = vrot.slane %v1719_v59, 5  ;;  %v1542_v39 = vshrl.u32 %v1490_v63, 16  ;;  %v7046_v55 = vld [vmem:[#allocation4 + $0x18c] sm:$0xf0] }
 0x1bc   : > { %5763 = vmatpush.bf16.msrb.mxu2 %v7974_v1  ;;  %v1731_v47 = vrot.slane %v1729_v31, 5 }
 0x1bd   : > { %v1708_v50 = vsel %vm8678_vm11, %v1703_v61, %v1707_v42  ;;  %v1440_v42 = vld [vmem:[#allocation2 + $0x54] sm:$0xf]  ;;  %v1441_v61 = vld [vmem:[#allocation2 + $0x58] sm:$0xf] }
 0x1be   : > { %1345 = vmatmul.bf16.gmra.mxu1 %v7792_v43  ;;  %1970 = vst [vmem:[#allocation4 + $0x1d8] sm:$0xf] %v1708_v50  ;;  %v1725_v43 = vrot.slane %v1723_v52, 4  ;;  %v1544_v50 = vrot.slane %v1542_v39, 4  ;;  %v1516_v39 = vld [vmem:[#allocation2 + $0x68] sm:$0x1] }
 0x1bf   : > { %5409 = vmatpush.bf16.msra.mxu1 %v8691_v23  ;;  %v7829_v23 = vld [vmem:[#allocation4 + $0x124] sm:$0xf]  ;;  %1472 = vst [vmem:[#allocation4 + $0x1f8] sm:$0xf] %v1440_v42 }
 0x1c0   : > { %v7013_v22 = vor.u32 %v7829_v23, %v7010_v24  ;;  %v1726_v37 = vor.u32 %v1725_v43, %v1721_v21  ;;  %1473 = vst [vmem:[#allocation4 + $0x21c] sm:$0xf] %v1441_v61  ;;  %v7044_v24 = vld [vmem:[#allocation4 + $0x168] sm:$0xf]  ;;  %v1514_v43 = vld [vmem:[#allocation2 + $0x60] sm:$0xf] }
 0x1c1   : > { %v1734_v31 = vshrl.u32 %v1514_v43, 16 }
 0x1c3   : > { %5410 = vmatpush.bf16.msra.mxu1 %v8709_v41  ;;  %v1710_v41 = vshrl.u32 %v1511_v54, 16  ;;  %5433 = vmatmul.bf16.gmra.mxu2 %v7009_v51  ;;  %v7842_v51 = vld [vmem:[#allocation4 + $0x188] sm:$0xf0]  ;;  %v1555_v54 = vshrl.u32 %v1491_v35, 16 }
 0x1c4   : > { %5522 = vmatmul.bf16.gmra.mxu3 %v7013_v22  ;;  %v1553_v22 = vrot.slane %v1551_v40, 5  ;;  %v7045_v59 = vor.u32 %v7842_v51, %v7044_v24  ;;  %v1442_v51 = vld [vmem:[#allocation2 + $0x60] sm:$0xf] }
 0x1c5   : > { %v1557_v57 = vrot.slane %v1555_v54, 4  ;;  %1474 = vst [vmem:[#allocation4 + $0x240] sm:$0xf] %v1442_v51 }
 0x1c7   : > { %5411 = vmatpush.bf16.msra.mxu1 %v8721_v44  ;;  %v1712_v44 = vrot.slane %v1710_v41, 4  ;;  %v1561_v41 = vshll.u32 %v1492_v49, 16  ;;  %v1558_v52 = vor.u32 %v1557_v57, %v1553_v22  ;;  %v7080_v57 = vld [vmem:[#allocation4 + $0x1b0] sm:$0xf] }
 0x1c9   : > { %v1716_v60 = vor.u32 %v1715_v28, %v1712_v44  ;;  %v1563_v1 = vrot.slane %v1561_v41, 5  ;;  %v1559_v20 = vrot.slane %v1558_v52, 4 }
 0x1cb   : > { %5412 = vmatpush.bf16.msra.mxu1 %v8742_v34  ;;  %v1545_v34 = vshll.u32 %v1490_v63, 16  ;;  %v1717_v46 = vrot.slane %v1716_v60, 4  ;;  %v7806_v60 = vld [vmem:[#allocation4 + $0x68] sm:$0xf0]  ;;  %v1737_v63 = vshll.u32 %v1514_v43, 16 }
 0x1cd   : > { %v1547_v23 = vrot.slane %v1545_v34, 5  ;;  %v1722_v2 = vsel %vm8678_vm11, %v1717_v46, %v1721_v21  ;;  %v6900_v21 = vld [vmem:[#allocation4 + $0x48] sm:$0xf]  ;;  %v1739_v34 = vrot.slane %v1737_v63, 5  ;;  %v1753_v46 = vshll.u32 %v1516_v39, 16 }
 0x1ce   : > { %5413 = vmatmul.bf16.vlgmr.msra.gmra.mxu1 %v6865_v30  ;;  %1971 = vst [vmem:[#allocation4 + $0x1fc] sm:$0xf] %v1722_v2  ;;  %v1515_v30 = vld [vmem:[#allocation2 + $0x64] sm:$0xf]  ;;  %v6901_v42 = vor.u32 %v7806_v60, %v6900_v21  ;;  %v7082_v21 = vld [vmem:[#allocation4 + $0x1d4] sm:$0xf0] }
 0x1cf   : > { %5494 = vmatpush.bf16.msrb.mxu1 %v8629_v0  ;;  %v1727_v0 = vrot.slane %v1726_v37, 4  ;;  %v1548_v36 = vor.u32 %v1547_v23, %v1544_v50  ;;  %v1743_v35 = vshll.u32 %v1515_v30, 16  ;;  %v1747_v37 = vshrl.u32 %v1515_v30, 16  ;;  %v1443_v2 = vld [vmem:[#allocation2 + $0x64] sm:$0xf] }
 0x1d0   : > { %1475 = vst [vmem:[#allocation4 + $0x264] sm:$0xf] %v1443_v2  ;;  %v1517_v39 = vld [vmem:[#allocation2 + $0x6c] sm:$0xf] }
 0x1d1   : > { %v1732_v53 = vsel %vm8678_vm11, %v1727_v0, %v1731_v47  ;;  %v1549_v58 = vrot.slane %v1548_v36, 4  ;;  %v1745_v40 = vrot.slane %v1743_v35, 5  ;;  %v1749_v61 = vrot.slane %v1747_v37, 4  ;;  %v1493_v0 = vld [vmem:[#allocation2 + $0xc] sm:$0xf]  ;;  %v7973_v36 = vld [vmem:[%s9990_s4 + $0x120] sm:$0xff] }
 0x1d2   : > { %1972 = vst [vmem:[#allocation4 + $0x220] sm:$0xf] %v1732_v53  ;;  %v1494_v47 = vld [vmem:[#allocation2 + $0x10] sm:$0xf]  ;;  %v1566_v50 = vshrl.u32 %v1493_v0, 16  ;;  %v1569_v23 = vshll.u32 %v1493_v0, 16  ;;  %5764 = vmatpush.bf16.msrb.mxu2 %v7973_v36 }
 0x1d3   : > { %5495 = vmatpush.bf16.msrb.mxu1 %v8642_v19  ;;  %v7838_v19 = vld [vmem:[#allocation4 + $0x16c] sm:$0xf]  ;;  %v1554_v28 = vsel %vm8678_vm11, %v1549_v58, %v1553_v22  ;;  %5438 = vmatmul.bf16.gmra.mxu2 %v7045_v59  ;;  %v1575_v24 = vshll.u32 %v1494_v47, 16  ;;  %v1750_v53 = vor.u32 %v1749_v61, %v1745_v40  ;;  %v1755_v22 = vrot.slane %v1753_v46, 5  ;;  %v7851_v58 = vld [vmem:[#allocation4 + $0x1d0] sm:$0xf0] }
 0x1d4   : > { %v7049_v44 = vor.u32 %v7838_v19, %v7046_v55  ;;  %1957 = vst [vmem:[#allocation4 + $0x4] sm:$0xf] %v1554_v28  ;;  %v1568_v54 = vrot.slane %v1566_v50, 4  ;;  %v1571_v19 = vrot.slane %v1569_v23, 5  ;;  %v1495_v55 = vld [vmem:[#allocation2 + $0x14] sm:$0x1]  ;;  %v7081_v60 = vor.u32 %v7851_v58, %v7080_v57 }
 0x1d5   : > { %v1751_v41 = vrot.slane %v1750_v53, 4  ;;  %v1519_v50 = vld [vmem:[#allocation2 + $0x74] sm:$0x1]  ;;  %v1496_v53 = vld [vmem:[#allocation2 + $0x18] sm:$0xf] }
 0x1d6   : > { %5527 = vmatmul.bf16.gmra.mxu3 %v7049_v44  ;;  %v1572_v52 = vor.u32 %v1571_v19, %v1568_v54  ;;  %v7847_v44 = vld [vmem:[#allocation4 + $0x1b4] sm:$0xf]  ;;  %v1777_v2 = vshll.u32 %v1519_v50, 16  ;;  %v1590_v54 = vshrl.u32 %v1496_v53, 16  ;;  %v1593_v19 = vshll.u32 %v1496_v53, 16  ;;  %v7966_v53 = vld [vmem:[%s9990_s4 + $0xe8] sm:$0xff] }
 0x1d7   : > { %5496 = vmatpush.bf16.msrb.mxu1 %v8657_v29  ;;  %v1564_v29 = vsel %vm8678_vm11, %v1559_v20, %v1563_v1  ;;  %v1579_v1 = vshrl.u32 %v1494_v47, 16  ;;  %v1756_v28 = vsel %vm8678_vm11, %v1751_v41, %v1755_v22  ;;  %v1585_v20 = vshll.u32 %v1495_v55, 16  ;;  %v1444_v41 = vld [vmem:[#allocation2 + $0x6c] sm:$0xf]  ;;  %v1445_v55 = vld [vmem:[#allocation2 + $0x70] sm:$0xf] }
 0x1d8   : > { %1958 = vst [vmem:[#allocation4 + $0x28] sm:$0xf] %v1564_v29  ;;  %v1573_v43 = vrot.slane %v1572_v52, 4  ;;  %v7085_v35 = vor.u32 %v7847_v44, %v7082_v21  ;;  %v1779_v58 = vrot.slane %v1777_v2, 5  ;;  %v7116_v44 = vld [vmem:[#allocation4 + $0x1f8] sm:$0xf] }
 0x1d9   : > { %1974 = vst [vmem:[#allocation4 + $0x268] sm:$0xf] %v1756_v28  ;;  %v1581_v30 = vrot.slane %v1579_v1, 4  ;;  %v1587_v63 = vrot.slane %v1585_v20, 5  ;;  %v1595_v1 = vrot.slane %v1593_v19, 5  ;;  %v7968_v20 = vld [vmem:[%s9990_s4 + $0xf8] sm:$0xff] }
 0x1da   : > { %1476 = vst [vmem:[#allocation4 + $0x288] sm:$0xf] %v1444_v41  ;;  %v7860_v28 = vld [vmem:[#allocation4 + $0x218] sm:$0xf0]  ;;  %5672 = vmatpush.bf16.msrb.mxu0 %v7968_v20  ;;  %v1520_v50 = vld [vmem:[#allocation2 + $0x78] sm:$0xf] }
 0x1db   : > { %5497 = vmatpush.bf16.msrb.mxu1 %v8667_v32  ;;  %v1736_v32 = vrot.slane %v1734_v31, 4  ;;  %1477 = vst [vmem:[#allocation4 + $0x2ac] sm:$0xf] %v1445_v55  ;;  %v7957_v19 = vld [vmem:[%s9990_s4 + $0xa0] sm:$0xff]  ;;  %v1447_v20 = vld [vmem:[#allocation2 + $0x7c] sm:$0xf] }
 0x1dc   : > { %v7965_v55 = vld [vmem:[%s9990_s4 + $0xe0] sm:$0xff]  ;;  %1479 = vst [vmem:[#allocation4 + $0x2f4] sm:$0xf] %v1447_v20 }
 0x1dd   : > { %v1740_v49 = vor.u32 %v1739_v34, %v1736_v32  ;;  %v1518_v32 = vld [vmem:[#allocation2 + $0x70] sm:$0xf]  ;;  %v1758_v34 = vshrl.u32 %v1517_v39, 16 }
 0x1de   : > { %5418 = vmatmul.bf16.gmra.mxu1 %v6901_v42  ;;  %v7815_v42 = vld [vmem:[#allocation4 + $0xb0] sm:$0xf0]  ;;  %v1767_v46 = vshll.u32 %v1518_v32, 16  ;;  %v1771_v0 = vshrl.u32 %v1518_v32, 16 }
 0x1df   : > { %5498 = vmatpush.bf16.msrb.mxu1 %v8696_v62  ;;  %v1741_v62 = vrot.slane %v1740_v49, 4  ;;  %v1760_v47 = vrot.slane %v1758_v34, 4  ;;  %v6866_v2 = vld [vmem:[#allocation4 + $0x24] sm:$0xf0] }
 0x1e0   : > { %v1769_v23 = vrot.slane %v1767_v46, 5 }
 0x1e1   : > { %v1746_v59 = vsel %vm8678_vm11, %v1741_v62, %v1745_v40  ;;  %v1761_v40 = vshll.u32 %v1517_v39, 16  ;;  %v1497_v62 = vld [vmem:[#allocation2 + $0x1c] sm:$0xf]  ;;  %v7118_v39 = vld [vmem:[#allocation4 + $0x21c] sm:$0xf0] }
 0x1e2   : > { %1973 = vst [vmem:[#allocation4 + $0x244] sm:$0xf] %v1746_v59  ;;  %v1599_v36 = vshll.u32 %v1497_v62, 16  ;;  %v7960_v59 = vld [vmem:[%s9990_s4 + $0xb8] sm:$0xff] }
 0x1e3   : > { %5499 = vmatpush.bf16.msrb.mxu1 %v8716_v48  ;;  %v1577_v48 = vrot.slane %v1575_v24, 5  ;;  %5443 = vmatmul.bf16.gmra.mxu2 %v7081_v60  ;;  %v1763_v49 = vrot.slane %v1761_v40, 5 }
 0x1e5   : > { %v1578_v29 = vsel %vm8678_vm11, %v1573_v43, %v1577_v48  ;;  %v1582_v31 = vor.u32 %v1581_v30, %v1577_v48  ;;  %v1764_v51 = vor.u32 %v1763_v49, %v1760_v47  ;;  %v1592_v48 = vrot.slane %v1590_v54, 4  ;;  %v7856_v43 = vld [vmem:[#allocation4 + $0x1fc] sm:$0xf]  ;;  %v7959_v30 = vld [vmem:[%s9990_s4 + $0xb0] sm:$0xff] }
 0x1e6   : > { %1959 = vst [vmem:[#allocation4 + $0x4c] sm:$0xf] %v1578_v29  ;;  %5532 = vmatmul.bf16.gmra.mxu3 %v7085_v35  ;;  %v7967_v35 = vld [vmem:[%s9990_s4 + $0xf0] sm:$0xff]  ;;  %v7121_v47 = vor.u32 %v7856_v43, %v7118_v39 }
 0x1e7   : > { %5500 = vmatpush.bf16.msrb.mxu1 %v8737_v25  ;;  %v1583_v37 = vrot.slane %v1582_v31, 4  ;;  %v6936_v25 = vld [vmem:[#allocation4 + $0x90] sm:$0xf]  ;;  %v1765_v57 = vrot.slane %v1764_v51, 4  ;;  %v1596_v29 = vor.u32 %v1595_v1, %v1592_v48  ;;  %v1601_v31 = vrot.slane %v1599_v36, 5  ;;  %5673 = vmatpush.bf16.msrb.mxu0 %v7967_v35 }
 0x1e8   : > { %v6937_v24 = vor.u32 %v7815_v42, %v6936_v25  ;;  %v7117_v25 = vor.u32 %v7860_v28, %v7116_v44  ;;  %v7958_v42 = vld [vmem:[%s9990_s4 + $0xa8] sm:$0xff]  ;;  %v1785_v51 = vshll.u32 %v1520_v50, 16  ;;  %v1446_v28 = vld [vmem:[#allocation2 + $0x78] sm:$0xf] }
 0x1e9   : > { %v1588_v61 = vsel %vm8678_vm11, %v1583_v37, %v1587_v63  ;;  %v1770_v21 = vsel %vm8678_vm11, %v1765_v57, %v1769_v23  ;;  %v1603_v63 = vshrl.u32 %v1497_v62, 16  ;;  %v1498_v37 = vld [vmem:[#allocation2 + $0x20] sm:$0x1]  ;;  %v1597_v32 = vrot.slane %v1596_v29, 4  ;;  %1478 = vst [vmem:[#allocation4 + $0x2d0] sm:$0xf] %v1446_v28 }
 0x1ea   : > { %1960 = vst [vmem:[#allocation4 + $0x70] sm:$0xf] %v1588_v61  ;;  %v1609_v40 = vshll.u32 %v1498_v37, 16  ;;  %v1787_v41 = vrot.slane %v1785_v51, 5  ;;  %v1522_v57 = vld [vmem:[#allocation2 + $0x80] sm:$0x1] }
 0x1eb   : > { %5501 = vmatpush.bf16.msrb.mxu1 %v8747_v38  ;;  %v1773_v38 = vrot.slane %v1771_v0, 4  ;;  %1975 = vst [vmem:[#allocation4 + $0x28c] sm:$0xf] %v1770_v21  ;;  %v1605_v34 = vrot.slane %v1603_v63, 4  ;;  %v1602_v61 = vsel %vm8678_vm11, %v1597_v32, %v1601_v31  ;;  %5674 = vmatpush.bf16.msrb.mxu0 %v7966_v53  ;;  %v1801_v1 = vshll.u32 %v1522_v57, 16  ;;  %v7972_v63 = vld [vmem:[%s9990_s4 + $0x118] sm:$0xff] }
 0x1ec   : > { %v1611_v0 = vrot.slane %v1609_v40, 5  ;;  %1961 = vst [vmem:[#allocation4 + $0x94] sm:$0xf] %v1602_v61  ;;  %v7152_v29 = vld [vmem:[#allocation4 + $0x240] sm:$0xf]  ;;  %v7964_v35 = vld [vmem:[%s9990_s4 + $0xd8] sm:$0xff]  ;;  %5765 = vmatpush.bf16.msrb.mxu2 %v7972_v63 }
 0x1ed   : > { %v1774_v22 = vor.u32 %v1773_v38, %v1769_v23  ;;  %v1606_v46 = vor.u32 %v1605_v34, %v1601_v31  ;;  %v7793_v23 = vld [vmem:[#allocation4 + $0x4] sm:$0xf]  ;;  %v1521_v38 = vld [vmem:[#allocation2 + $0x7c] sm:$0xf]  ;;  %v1803_v43 = vrot.slane %v1801_v1, 5  ;;  %v7955_v34 = vld [vmem:[%s9990_s4 + $0x90] sm:$0xff] }
 0x1ee   : > { %5423 = vmatmul.bf16.gmra.mxu1 %v6937_v24  ;;  %v1782_v24 = vshrl.u32 %v1520_v50, 16  ;;  %v1795_v54 = vshrl.u32 %v1521_v38, 16  ;;  %v7869_v31 = vld [vmem:[#allocation4 + $0x260] sm:$0xf0]  ;;  %v7154_v32 = vld [vmem:[#allocation4 + $0x264] sm:$0xf0] }
 0x1ef   : > { %v1775_v52 = vrot.slane %v1774_v22, 4  ;;  %5583 = vmatpush.bf16.msra.mxu1 %v7960_v59  ;;  %v1607_v49 = vrot.slane %v1606_v46, 4  ;;  %v1791_v22 = vshll.u32 %v1521_v38, 16  ;;  %5675 = vmatpush.bf16.msrb.mxu0 %v7965_v55  ;;  %v7865_v39 = vld [vmem:[#allocation4 + $0x244] sm:$0xf]  ;;  %v7963_v40 = vld [vmem:[%s9990_s4 + $0xd0] sm:$0xff] }
 0x1f0   : > { %v1784_v36 = vrot.slane %v1782_v24, 4  ;;  %v1797_v59 = vrot.slane %v1795_v54, 4  ;;  %v1990_v61 = vld [vmem:[#allocation2 + $0x4] sm:$0xf]  ;;  %v1991_v46 = vld [vmem:[#allocation2 + $0x8] sm:$0x1] }
 0x1f1   : > { %v1780_v60 = vsel %vm8678_vm11, %v1775_v52, %v1779_v58  ;;  %v1612_v62 = vsel %vm8678_vm11, %v1607_v49, %v1611_v0  ;;  %v1793_v58 = vrot.slane %v1791_v22, 5  ;;  %v6869_v52 = vor.u32 %v7793_v23, %v6866_v2  ;;  %v7954_v38 = vld [vmem:[%s9990_s4 + $0x88] sm:$0xff]  ;;  %v2265_v22 = vld [vmem:[#allocation2 + $0x10] sm:$0xf]  ;;  %v7802_v54 = vld [vmem:[#allocation4 + $0x4c] sm:$0xf] }
 0x1f2   : > { %1976 = vst [vmem:[#allocation4 + $0x2b0] sm:$0xf] %v1780_v60  ;;  %v1788_v48 = vor.u32 %v1787_v41, %v1784_v36  ;;  %v2093_v50 = vrot.slane %v1991_v46, 5  ;;  %v7153_v23 = vor.u32 %v7869_v31, %v7152_v29  ;;  %v7157_v2 = vor.u32 %v7865_v39, %v7154_v32  ;;  %v6902_v36 = vld [vmem:[#allocation4 + $0x6c] sm:$0xf0]  ;;  %v7962_v41 = vld [vmem:[%s9990_s4 + $0xc8] sm:$0xff] }
 0x1f3   : > { %5584 = vmatpush.bf16.msra.mxu1 %v7959_v30  ;;  %5448 = vmatmul.bf16.gmra.mxu2 %v7117_v25  ;;  %1962 = vst [vmem:[#allocation4 + $0xb8] sm:$0xf] %v1612_v62  ;;  %v1798_v44 = vor.u32 %v1797_v59, %v1793_v58  ;;  %v7956_v30 = vld [vmem:[%s9990_s4 + $0x98] sm:$0xff]  ;;  %v2264_v62 = vld [vmem:[#allocation2 + $0xc] sm:$0xf]  ;;  %v7953_v59 = vld [vmem:[%s9990_s4 + $0x80] sm:$0xff]  ;;  %v6905_v28 = vor.u32 %v7802_v54, %v6902_v36 }
 0x1f4   : > { %v1789_v21 = vrot.slane %v1788_v48, 4  ;;  %5676 = vmatpush.bf16.msrb.mxu0 %v7964_v35  ;;  %2296 = vst [vmem:[#allocation4 + $0xc] sm:$0xf] %v2264_v62  ;;  %v1524_v57 = vld [vmem:[#allocation2 + $0x88] sm:$0xf] }
 0x1f5   : > { %v1799_v60 = vrot.slane %v1798_v44, 4  ;;  %2297 = vst [vmem:[#allocation4 + $0x30] sm:$0xf] %v2265_v22  ;;  %v1815_v1 = vshll.u32 %v1524_v57, 16  ;;  %v1819_v44 = vshrl.u32 %v1524_v57, 16 }
 0x1f6   : > { %5537 = vmatmul.bf16.gmra.mxu3 %v7121_v47  ;;  %v1794_v37 = vsel %vm8678_vm11, %v1789_v21, %v1793_v58  ;;  %v2090_v47 = vrot.slane %v1990_v61, 5  ;;  %v1448_v29 = vld [vmem:[#allocation2 + $0x84] sm:$0xf]  ;;  %v1449_v31 = vld [vmem:[#allocation2 + $0x88] sm:$0xf] }
 0x1f7   : > { %5585 = vmatpush.bf16.msra.mxu1 %v7958_v42  ;;  %v1804_v25 = vsel %vm8678_vm11, %v1799_v60, %v1803_v43  ;;  %1977 = vst [vmem:[#allocation4 + $0x2d4] sm:$0xf] %v1794_v37  ;;  %v1989_v42 = vld [vmem:[#allocation2] sm:$0xe]  ;;  %v1821_v60 = vrot.slane %v1819_v44, 4  ;;  %v7971_v44 = vld [vmem:[%s9990_s4 + $0x110] sm:$0xff] }
 0x1f8   : > { %1978 = vst [vmem:[#allocation4 + $0x2f8] sm:$0xf] %v1804_v25  ;;  %v6814_v0 = vrot.slane %v1989_v42, 9  ;;  %v2092_v51 = vrot.slane %v2090_v47, 4  ;;  %5677 = vmatpush.bf16.msrb.mxu0 %v7963_v40  ;;  %v7961_v43 = vld [vmem:[%s9990_s4 + $0xc0] sm:$0xff]  ;;  %5766 = vmatpush.bf16.msrb.mxu2 %v7971_v44 }
 0x1f9   : > { %1480 = vst [vmem:[#allocation4 + $0x318] sm:$0xf] %v1448_v29  ;;  %v7188_v39 = vld [vmem:[#allocation4 + $0x288] sm:$0xf]  ;;  %v7878_v32 = vld [vmem:[#allocation4 + $0x2a8] sm:$0xf0] }
 0x1fa   : > { %v2091_v24 = vsel %vm8855_vm14, %v6814_v0, %v2090_v47  ;;  %v2094_v53 = vsel %vm8855_vm14, %v2092_v51, %v2093_v50  ;;  %1481 = vst [vmem:[#allocation4 + $0x33c] sm:$0xf] %v1449_v31  ;;  %v7874_v25 = vld [vmem:[#allocation4 + $0x28c] sm:$0xf]  ;;  %v1993_v46 = vld [vmem:[#allocation2 + $0x10] sm:$0xf]  ;;  %v7189_v22 = vor.u32 %v7878_v32, %v7188_v39 }
 0x1fb   : > { %5586 = vmatpush.bf16.msra.mxu1 %v7957_v19  ;;  %2232 = vst [vmem:[#allocation4 + $0x8] sm:$0xf] %v2091_v24  ;;  %v1523_v19 = vld [vmem:[#allocation2 + $0x84] sm:$0xf]  ;;  %v1992_v50 = vld [vmem:[#allocation2 + $0xc] sm:$0xe] }
 0x1fc   : > { %2233 = vst [vmem:[#allocation4 + $0x2c] sm:$0xf] %v2094_v53  ;;  %v1806_v55 = vshrl.u32 %v1523_v19, 16  ;;  %v1809_v58 = vshll.u32 %v1523_v19, 16  ;;  %5678 = vmatpush.bf16.msrb.mxu0 %v7962_v41  ;;  %v6874_v42 = vld [vmem:[#allocation4 + $0x2c] sm:$0xf0] }
 0x1fd   : > { %v7190_v24 = vld [vmem:[#allocation4 + $0x2ac] sm:$0xf0]  ;;  %v7811_v41 = vld [vmem:[#allocation4 + $0x94] sm:$0xf]  ;;  %v1530_v44 = vld [vmem:[#allocation2 + $0xa0] sm:$0xf] }
 0x1fe   : > { %5502 = vmatmul.bf16.vlgmr.msrb.gmra.mxu1 %v6869_v52  ;;  %v1525_v52 = vld [vmem:[#allocation2 + $0x8c] sm:$0x1]  ;;  %v1808_v48 = vrot.slane %v1806_v55, 4  ;;  %v1811_v20 = vrot.slane %v1809_v58, 5  ;;  %v7193_v19 = vor.u32 %v7874_v25, %v7190_v24  ;;  %v6938_v55 = vld [vmem:[#allocation4 + $0xb4] sm:$0xf0] }
 0x1ff   : > { %5587 = vmatpush.bf16.msra.mxu1 %v7956_v30  ;;  %v1825_v21 = vshll.u32 %v1525_v52, 16  ;;  %v1817_v30 = vrot.slane %v1815_v1, 5  ;;  %v2266_v57 = vld [vmem:[#allocation2 + $0x18] sm:$0xf]  ;;  %v2267_v58 = vld [vmem:[#allocation2 + $0x1c] sm:$0xf] }
 0x200   : > { %v1812_v63 = vor.u32 %v1811_v20, %v1808_v48  ;;  %5679 = vmatpush.bf16.msrb.mxu0 %v7961_v43  ;;  %2298 = vst [vmem:[#allocation4 + $0x54] sm:$0xf] %v2266_v57  ;;  %v1527_v52 = vld [vmem:[#allocation2 + $0x94] sm:$0xf]  ;;  %v6941_v43 = vor.u32 %v7811_v41, %v6938_v55  ;;  %v7224_v25 = vld [vmem:[#allocation4 + $0x2d0] sm:$0xf] }
 0x201   : > { %v1822_v35 = vor.u32 %v1821_v60, %v1817_v30  ;;  %v1827_v37 = vrot.slane %v1825_v21, 5  ;;  %2299 = vst [vmem:[#allocation4 + $0x78] sm:$0xf] %v2267_v58  ;;  %v1843_v20 = vshrl.u32 %v1527_v52, 16  ;;  %v1528_v21 = vld [vmem:[#allocation2 + $0x98] sm:$0x1] }
 0x202   : > { %v1813_v40 = vrot.slane %v1812_v63, 4  ;;  %v1849_v63 = vshll.u32 %v1528_v21, 16  ;;  %v1995_v24 = vld [vmem:[#allocation2 + $0x18] sm:$0xe]  ;;  %v6872_v58 = vld [vmem:[#allocation4 + $0x8] sm:$0xf] }
 0x203   : > { %5588 = vmatpush.bf16.msra.mxu1 %v7955_v34  ;;  %5453 = vmatmul.bf16.gmra.mxu2 %v7153_v23  ;;  %v7794_v34 = vld [vmem:[#allocation4 + $0xc] sm:$0xf]  ;;  %v1823_v61 = vrot.slane %v1822_v35, 4  ;;  %v1845_v31 = vrot.slane %v1843_v20, 4  ;;  %v1450_v35 = vld [vmem:[#allocation2 + $0x90] sm:$0xf] }
 0x204   : > { %v6877_v0 = vor.u32 %v7794_v34, %v6874_v42  ;;  %v1818_v47 = vsel %vm8678_vm11, %v1813_v40, %v1817_v30  ;;  %v1994_v23 = vld [vmem:[#allocation2 + $0x14] sm:$0x1]  ;;  %1482 = vst [vmem:[#allocation4 + $0x360] sm:$0xf] %v1450_v35  ;;  %v1851_v40 = vrot.slane %v1849_v63, 5  ;;  %v7984_v21 = vld [vmem:[%s9990_s4 + $0x178] sm:$0xff] }
 0x205   : > { %v1828_v51 = vsel %vm8678_vm11, %v1823_v61, %v1827_v37  ;;  %1979 = vst [vmem:[#allocation4 + $0x31c] sm:$0xf] %v1818_v47  ;;  %v2100_v53 = vrot.slane %v1994_v23, 5  ;;  %v1451_v37 = vld [vmem:[#allocation2 + $0x94] sm:$0xf]  ;;  %5850 = vmatpush.bf16.msrb.mxu3 %v7984_v21 }
 0x206   : > { %5542 = vmatmul.bf16.gmra.mxu3 %v7157_v2  ;;  %v6815_v2 = vrot.slane %v1992_v50, 9  ;;  %5680 = vmatmul.bf16.vlgmr.msrb.gmra.mxu0 %v6877_v0  ;;  %1980 = vst [vmem:[#allocation4 + $0x340] sm:$0xf] %v1828_v51  ;;  %v7887_v42 = vld [vmem:[#allocation4 + $0x2f0] sm:$0xf0] }
 0x207   : > { %5589 = vmatpush.bf16.msra.mxu1 %v7954_v38  ;;  %v2097_v38 = vrot.slane %v1993_v46, 5  ;;  %v7803_v32 = vld [vmem:[#allocation4 + $0x54] sm:$0xf]  ;;  %1483 = vst [vmem:[#allocation4 + $0x384] sm:$0xf] %v1451_v37 }
 0x208   : > { %v6910_v61 = vld [vmem:[#allocation4 + $0x74] sm:$0xf0]  ;;  %v7883_v0 = vld [vmem:[#allocation4 + $0x2d4] sm:$0xf]  ;;  %v2270_v21 = vld [vmem:[#allocation2 + $0x30] sm:$0xf] }
 0x209   : > { %v2099_v62 = vrot.slane %v2097_v38, 4  ;;  %v2098_v54 = vsel %vm8855_vm14, %v6815_v2, %v2097_v38  ;;  %v6913_v47 = vor.u32 %v7803_v32, %v6910_v61  ;;  %v1996_v23 = vld [vmem:[#allocation2 + $0x1c] sm:$0xf]  ;;  %v1997_v51 = vld [vmem:[#allocation2 + $0x20] sm:$0x1] }
 0x20a   : > { %2234 = vst [vmem:[#allocation4 + $0x50] sm:$0xf] %v2098_v54  ;;  %v2104_v2 = vrot.slane %v1996_v23, 5  ;;  %v2107_v54 = vrot.slane %v1997_v51, 5 }
 0x20b   : > { %5590 = vmatpush.bf16.msra.mxu1 %v7953_v59  ;;  %v2101_v36 = vsel %vm8855_vm14, %v2099_v62, %v2100_v53  ;;  %v1526_v59 = vld [vmem:[#allocation2 + $0x90] sm:$0xf]  ;;  %v7226_v53 = vld [vmem:[#allocation4 + $0x2f4] sm:$0xf0]  ;;  %2302 = vst [vmem:[#allocation4 + $0xe4] sm:$0xf] %v2270_v21 }
 0x20c   : > { %2235 = vst [vmem:[#allocation4 + $0x74] sm:$0xf] %v2101_v36  ;;  %v1830_v48 = vshrl.u32 %v1526_v59, 16  ;;  %v1833_v1 = vshll.u32 %v1526_v59, 16  ;;  %v7225_v36 = vor.u32 %v7887_v42, %v7224_v25  ;;  %v7229_v55 = vor.u32 %v7883_v0, %v7226_v53  ;;  %v7798_v59 = vld [vmem:[#allocation4 + $0x28] sm:$0xf0] }
 0x20d   : > { %v6873_v63 = vor.u32 %v7798_v59, %v6872_v58  ;;  %v1453_v25 = vld [vmem:[#allocation2 + $0xa0] sm:$0xf]  ;;  %v7262_v51 = vld [vmem:[#allocation4 + $0x33c] sm:$0xf0] }
 0x20e   : > { %5507 = vmatmul.bf16.gmra.mxu1 %v6905_v28  ;;  %v1839_v28 = vshll.u32 %v1527_v52, 16  ;;  %v1832_v30 = vrot.slane %v1830_v48, 4  ;;  %v1835_v60 = vrot.slane %v1833_v1, 5  ;;  %v2268_v52 = vld [vmem:[#allocation2 + $0x24] sm:$0xf] }
 0x20f   : > { %v2269_v48 = vld [vmem:[#allocation2 + $0x28] sm:$0xf]  ;;  %2300 = vst [vmem:[#allocation4 + $0x9c] sm:$0xf] %v2268_v52  ;;  %v1529_v1 = vld [vmem:[#allocation2 + $0x9c] sm:$0xf] }
 0x210   : > { %v1841_v29 = vrot.slane %v1839_v28, 5  ;;  %v1836_v39 = vor.u32 %v1835_v60, %v1832_v30  ;;  %2301 = vst [vmem:[#allocation4 + $0xc0] sm:$0xf] %v2269_v48  ;;  %v1854_v28 = vshrl.u32 %v1529_v1, 16  ;;  %v1857_v20 = vshll.u32 %v1529_v1, 16  ;;  %v7970_v1 = vld [vmem:[%s9990_s4 + $0x108] sm:$0xff] }
 0x211   : > { %v1867_v30 = vshrl.u32 %v1530_v44, 16  ;;  %v1531_v60 = vld [vmem:[#allocation2 + $0xa4] sm:$0x1]  ;;  %1485 = vst [vmem:[#allocation4 + $0x3cc] sm:$0xf] %v1453_v25  ;;  %5767 = vmatpush.bf16.msrb.mxu2 %v7970_v1 }
 0x212   : > { %v1846_v34 = vor.u32 %v1845_v31, %v1841_v29  ;;  %v1837_v46 = vrot.slane %v1836_v39, 4  ;;  %v1859_v31 = vrot.slane %v1857_v20, 5  ;;  %v1873_v39 = vshll.u32 %v1531_v60, 16  ;;  %v1533_v60 = vld [vmem:[#allocation2 + $0xac] sm:$0xf] }
 0x213   : > { %5458 = vmatmul.bf16.gmra.mxu2 %v7189_v22  ;;  %v6816_v22 = vrot.slane %v1995_v24, 9  ;;  %v1869_v37 = vrot.slane %v1867_v30, 4  ;;  %v7892_v24 = vld [vmem:[#allocation4 + $0x31c] sm:$0xf]  ;;  %v1532_v30 = vld [vmem:[#allocation2 + $0xa8] sm:$0xf] }
 0x214   : > { %v1847_v50 = vrot.slane %v1846_v34, 4  ;;  %v1842_v38 = vsel %vm8678_vm11, %v1837_v46, %v1841_v29  ;;  %v1856_v29 = vrot.slane %v1854_v28, 4  ;;  %v1875_v0 = vrot.slane %v1873_v39, 5  ;;  %v6908_v28 = vld [vmem:[#allocation4 + $0x50] sm:$0xf] }
 0x215   : > { %1981 = vst [vmem:[#allocation4 + $0x364] sm:$0xf] %v1842_v38  ;;  %v2105_v41 = vsel %vm8855_vm14, %v6816_v22, %v2104_v2  ;;  %v7265_v48 = vor.u32 %v7892_v24, %v7262_v51  ;;  %v1534_v39 = vld [vmem:[#allocation2 + $0xb0] sm:$0x1]  ;;  %v1455_v24 = vld [vmem:[#allocation2 + $0xac] sm:$0xf] }
 0x216   : > { %5547 = vmatmul.bf16.gmra.mxu3 %v7193_v19  ;;  %v1852_v62 = vsel %vm8678_vm11, %v1847_v50, %v1851_v40  ;;  %5685 = vmatmul.bf16.gmra.mxu0 %v6913_v47  ;;  %v2106_v19 = vrot.slane %v2104_v2, 4  ;;  %2236 = vst [vmem:[#allocation4 + $0x98] sm:$0xf] %v2105_v41  ;;  %v1860_v34 = vor.u32 %v1859_v31, %v1856_v29  ;;  %v1452_v40 = vld [vmem:[#allocation2 + $0x9c] sm:$0xf]  ;;  %v1878_v31 = vshrl.u32 %v1532_v30, 16 }
 0x217   : > { %1982 = vst [vmem:[#allocation4 + $0x388] sm:$0xf] %v1852_v62  ;;  %v7812_v61 = vld [vmem:[#allocation4 + $0x9c] sm:$0xf]  ;;  %v7260_v47 = vld [vmem:[#allocation4 + $0x318] sm:$0xf] }
 0x218   : > { %v2108_v57 = vsel %vm8855_vm14, %v2106_v19, %v2107_v54  ;;  %1484 = vst [vmem:[#allocation4 + $0x3a8] sm:$0xf] %v1452_v40  ;;  %v1861_v46 = vrot.slane %v1860_v34, 4  ;;  %v7896_v50 = vld [vmem:[#allocation4 + $0x338] sm:$0xf0] }
 0x219   : > { %2237 = vst [vmem:[#allocation4 + $0xbc] sm:$0xf] %v2108_v57  ;;  %v6946_v23 = vld [vmem:[#allocation4 + $0xbc] sm:$0xf0]  ;;  %v1998_v54 = vld [vmem:[#allocation2 + $0x24] sm:$0xe]  ;;  %v7261_v58 = vor.u32 %v7896_v50, %v7260_v47 }
 0x21a   : > { %v6949_v2 = vor.u32 %v7812_v61, %v6946_v23  ;;  %v1999_v62 = vld [vmem:[#allocation2 + $0x28] sm:$0xf]  ;;  %v2000_v19 = vld [vmem:[#allocation2 + $0x2c] sm:$0x1]  ;;  %v7807_v29 = vld [vmem:[#allocation4 + $0x70] sm:$0xf0] }
 0x21b   : > { %v2111_v41 = vrot.slane %v1999_v62, 5  ;;  %v6909_v25 = vor.u32 %v7807_v29, %v6908_v28  ;;  %1487 = vst [vmem:[#allocation4 + $0x414] sm:$0xf] %v1455_v24  ;;  %v2001_v1 = vld [vmem:[#allocation2 + $0x30] sm:$0xe] }
 0x21c   : > { %v2003_v28 = vld [vmem:[#allocation2 + $0x38] sm:$0x1] }
 0x21d   : > { %v2113_v52 = vrot.slane %v2111_v41, 4 }
 0x21e   : > { %5512 = vmatmul.bf16.gmra.mxu1 %v6941_v43  ;;  %v1863_v43 = vshll.u32 %v1530_v44, 16  ;;  %v8909_v44 = vld [vmem:[%s9991_s5] ss:$0 sm:$0xff] }
 0x220   : > { %v1865_v35 = vrot.slane %v1863_v43, 5  ;;  %v2271_v43 = vld [vmem:[#allocation2 + $0x34] sm:$0xf] }
 0x221   : > { %2303 = vst [vmem:[#allocation4 + $0x108] sm:$0xf] %v2271_v43  ;;  %v2121_v43 = vrot.slane %v2003_v28, 5 }
 0x222   : > { %v1870_v42 = vor.u32 %v1869_v37, %v1865_v35  ;;  %v1866_v53 = vsel %vm8678_vm11, %v1861_v46, %v1865_v35  ;;  %v1887_v35 = vshll.u32 %v1533_v60, 16  ;;  %v1891_v37 = vshrl.u32 %v1533_v60, 16 }
 0x223   : > { %5463 = vmatmul.bf16.gmra.mxu2 %v7225_v36  ;;  %1983 = vst [vmem:[#allocation4 + $0x3ac] sm:$0xf] %v1866_v53  ;;  %v6817_v36 = vrot.slane %v1998_v54, 9  ;;  %v1897_v46 = vshll.u32 %v1534_v39, 16  ;;  %v7905_v54 = vld [vmem:[#allocation4 + $0x380] sm:$0xf0] }
 0x224   : > { %v1871_v38 = vrot.slane %v1870_v42, 4  ;;  %v1889_v42 = vrot.slane %v1887_v35, 5  ;;  %v1893_v61 = vrot.slane %v1891_v37, 4 }
 0x225   : > { %v2112_v59 = vsel %vm8855_vm14, %v6817_v36, %v2111_v41  ;;  %v7901_v41 = vld [vmem:[#allocation4 + $0x364] sm:$0xf] }
 0x226   : > { %5552 = vmatmul.bf16.gmra.mxu3 %v7229_v55  ;;  %v1876_v22 = vsel %vm8678_vm11, %v1871_v38, %v1875_v0  ;;  %v2114_v55 = vrot.slane %v2000_v19, 5  ;;  %5690 = vmatmul.bf16.gmra.mxu0 %v6949_v2  ;;  %2238 = vst [vmem:[#allocation4 + $0xe0] sm:$0xf] %v2112_v59  ;;  %v1454_v38 = vld [vmem:[#allocation2 + $0xa8] sm:$0xf]  ;;  %v1894_v51 = vor.u32 %v1893_v61, %v1889_v42  ;;  %v1899_v2 = vrot.slane %v1897_v46, 5 }
 0x227   : > { %1984 = vst [vmem:[#allocation4 + $0x3d0] sm:$0xf] %v1876_v22  ;;  %v7296_v22 = vld [vmem:[#allocation4 + $0x360] sm:$0xf]  ;;  %v7821_v19 = vld [vmem:[#allocation4 + $0xe4] sm:$0xf] }
 0x228   : > { %v2115_v20 = vsel %vm8855_vm14, %v2113_v52, %v2114_v55  ;;  %1486 = vst [vmem:[#allocation4 + $0x3f0] sm:$0xf] %v1454_v38  ;;  %v1895_v36 = vrot.slane %v1894_v51, 4  ;;  %v7298_v55 = vld [vmem:[#allocation4 + $0x384] sm:$0xf0] }
 0x229   : > { %2239 = vst [vmem:[#allocation4 + $0x104] sm:$0xf] %v2115_v20  ;;  %v2002_v59 = vld [vmem:[#allocation2 + $0x34] sm:$0xf]  ;;  %v6818_v20 = vrot.slane %v2001_v1, 9  ;;  %v7301_v39 = vor.u32 %v7901_v41, %v7298_v55 }
 0x22a   : > { %v2118_v21 = vrot.slane %v2002_v59, 5  ;;  %v2273_v61 = vld [vmem:[#allocation2 + $0x40] sm:$0xf]  ;;  %v1535_v46 = vld [vmem:[#allocation2 + $0xb4] sm:$0xf] }
 0x22b   : > { %v1341_v32 = vpop.f32.mrf.mxu1  ;;  %2305 = vst [vmem:[#allocation4 + $0x150] sm:$0xf] %v2273_v61  ;;  %v1537_v51 = vld [vmem:[#allocation2 + $0xbc] sm:$0x1]  ;;  %v2004_v61 = vld [vmem:[#allocation2 + $0x3c] sm:$0xe] }
 0x22c   : > { %v1880_v32 = vrot.slane %v1878_v31, 4  ;;  %v2119_v35 = vsel %vm8855_vm14, %v6818_v20, %v2118_v21  ;;  %v2120_v37 = vrot.slane %v2118_v21, 4  ;;  %v1921_v41 = vshll.u32 %v1537_v51, 16 }
 0x22d   : > { %2240 = vst [vmem:[#allocation4 + $0x128] sm:$0xf] %v2119_v35 }
 0x22e   : > { %5591 = vmatmul.bf16.vlgmr.msra.gmra.mxu1 %v6873_v63  ;;  %v1881_v63 = vshll.u32 %v1532_v30, 16  ;;  %v1923_v28 = vrot.slane %v1921_v41, 5  ;;  %v7334_v35 = vld [vmem:[#allocation4 + $0x3cc] sm:$0xf0] }
 0x230   : > { %v1883_v34 = vrot.slane %v1881_v63, 5  ;;  %v7297_v63 = vor.u32 %v7905_v54, %v7296_v22  ;;  %v7825_v41 = vld [vmem:[#allocation4 + $0x100] sm:$0xf0] }
 0x232   : > { %v1884_v23 = vor.u32 %v1883_v34, %v1880_v32  ;;  %v7983_v32 = vld [vmem:[%s9990_s4 + $0x170] sm:$0xff] }
 0x233   : > { %v1343_v57 = vpop.f32.mrf.mxu1  ;;  %5468 = vmatmul.bf16.gmra.mxu2 %v7261_v58  ;;  %5851 = vmatpush.bf16.msrb.mxu3 %v7983_v32  ;;  %v2005_v32 = vld [vmem:[#allocation2 + $0x40] sm:$0xf] }
 0x234   : > { %v1885_v62 = vrot.slane %v1884_v23, 4  ;;  %v6982_v57 = vld [vmem:[#allocation4 + $0x104] sm:$0xf0]  ;;  %v1905_v23 = vshll.u32 %v1535_v46, 16 }
 0x235   : > { %v6985_v52 = vor.u32 %v7821_v19, %v6982_v57 }
 0x236   : > { %5557 = vmatmul.bf16.gmra.mxu3 %v7265_v48  ;;  %v5429_v40 = vpop.f32.mrf.mxu2  ;;  %v1890_v58 = vsel %vm8678_vm11, %v1885_v62, %v1889_v42  ;;  %v1900_v48 = vsel %vm8678_vm11, %v1895_v36, %v1899_v2  ;;  %v2272_v42 = vld [vmem:[#allocation2 + $0x3c] sm:$0xf]  ;;  %v1907_v62 = vrot.slane %v1905_v23, 5 }
 0x237   : > { %v5430_v47 = vadd.f32 %v8909_v44, %v5429_v40  ;;  %v5518_v50 = vpop.f32.mrf.mxu3  ;;  %1985 = vst [vmem:[#allocation4 + $0x3f4] sm:$0xf] %v1890_v58  ;;  %5695 = vmatmul.bf16.gmra.mxu0 %v6985_v52  ;;  %v6944_v40 = vld [vmem:[#allocation4 + $0x98] sm:$0xf]  ;;  %v1456_v52 = vld [vmem:[#allocation2 + $0xb4] sm:$0xf] }
 0x238   : > { %1986 = vst [vmem:[#allocation4 + $0x418] sm:$0xf] %v1900_v48  ;;  %v1457_v48 = vld [vmem:[#allocation2 + $0xb8] sm:$0xf] }
 0x239   : > { %v8914_v53 = vadd.f32 %v5518_v50, %v5430_v47  ;;  %v7816_v47 = vld [vmem:[#allocation4 + $0xb8] sm:$0xf0]  ;;  %2304 = vst [vmem:[#allocation4 + $0x12c] sm:$0xf] %v2272_v42  ;;  %v1902_v50 = vshrl.u32 %v1535_v46, 16  ;;  %v2125_v46 = vrot.slane %v2005_v32, 5 }
 0x23a   : > { %v6945_v54 = vor.u32 %v7816_v47, %v6944_v40  ;;  %1488 = vst [vmem:[#allocation4 + $0x438] sm:$0xf] %v1456_v52  ;;  %v6819_v47 = vrot.slane %v2004_v61, 9 }
 0x23b   : > { %v1346_v0 = vpop.f32.mrf.mxu1  ;;  %v1904_v2 = vrot.slane %v1902_v50, 4  ;;  %1489 = vst [vmem:[#allocation4 + $0x45c] sm:$0xf] %v1457_v48  ;;  %v2127_v23 = vrot.slane %v2125_v46, 4  ;;  %v2274_v48 = vld [vmem:[#allocation2 + $0x48] sm:$0xf] }
 0x23c   : > { %v1536_v0 = vld [vmem:[#allocation2 + $0xb8] sm:$0xf]  ;;  %2306 = vst [vmem:[#allocation4 + $0x174] sm:$0xf] %v2274_v48 }
 0x23d   : > { %v1911_v38 = vshll.u32 %v1536_v0, 16  ;;  %v1915_v24 = vshrl.u32 %v1536_v0, 16  ;;  %v1908_v59 = vor.u32 %v1907_v62, %v1904_v2  ;;  %v2006_v0 = vld [vmem:[#allocation2 + $0x44] sm:$0x1] }
 0x23e   : > { %5596 = vmatmul.bf16.gmra.mxu1 %v6909_v25  ;;  %v5431_v30 = vpop.f32.mrf.mxu2  ;;  %v2122_v25 = vsel %vm8855_vm14, %v2120_v37, %v2121_v43  ;;  %v7332_v43 = vld [vmem:[#allocation4 + $0x3a8] sm:$0xf]  ;;  %v7018_v37 = vld [vmem:[#allocation4 + $0x14c] sm:$0xf0] }
 0x23f   : > { %v5432_v29 = vadd.f32 %v8909_v44, %v5431_v30  ;;  %v5520_v31 = vpop.f32.mrf.mxu3  ;;  %2241 = vst [vmem:[#allocation4 + $0x14c] sm:$0xf] %v2122_v25  ;;  %v1913_v19 = vrot.slane %v1911_v38, 5  ;;  %v1917_v36 = vrot.slane %v1915_v24, 4  ;;  %v1909_v21 = vrot.slane %v1908_v59, 4  ;;  %v7982_v25 = vld [vmem:[%s9990_s4 + $0x168] sm:$0xff] }
 0x240   : > { %v7914_v30 = vld [vmem:[#allocation4 + $0x3c8] sm:$0xf0]  ;;  %5852 = vmatpush.bf16.msrb.mxu3 %v7982_v25  ;;  %v2128_v38 = vrot.slane %v2006_v0, 5 }
 0x241   : > { %v8926_v34 = vadd.f32 %v5520_v31, %v5432_v29  ;;  %v1918_v1 = vor.u32 %v1917_v36, %v1913_v19  ;;  %v7830_v29 = vld [vmem:[#allocation4 + $0x12c] sm:$0xf]  ;;  %v7333_v62 = vor.u32 %v7914_v30, %v7332_v43  ;;  %v6980_v36 = vld [vmem:[#allocation4 + $0xe0] sm:$0xf] }
 0x242   : > { %v7021_v40 = vor.u32 %v7830_v29, %v7018_v37  ;;  %v2330_v30 = vld [vmem:[#allocation2 + $0x14] sm:$0x1] }
 0x243   : > { %v1348_v60 = vpop.f32.mrf.mxu1  ;;  %5473 = vmatmul.bf16.gmra.mxu2 %v7297_v63  ;;  %v1919_v31 = vrot.slane %v1918_v1, 4  ;;  %v7910_v63 = vld [vmem:[#allocation4 + $0x3ac] sm:$0xf]  ;;  %v2329_v1 = vld [vmem:[#allocation2 + $0x10] sm:$0xf]  ;;  %v2396_v37 = vshll.u32 %v2330_v30, 16 }
 0x244   : > { %v7969_v60 = vld [vmem:[%s9990_s4 + $0x100] sm:$0xff] }
 0x245   : > { %5768 = vmatpush.bf16.msrb.mxu2 %v7969_v60  ;;  %v1924_v42 = vsel %vm8678_vm11, %v1919_v31, %v1923_v28  ;;  %v2275_v28 = vld [vmem:[#allocation2 + $0x4c] sm:$0xf]  ;;  %v7980_v60 = vld [vmem:[%s9990_s4 + $0x158] sm:$0xff]  ;;  %v2386_v31 = vshll.u32 %v2329_v1, 16 }
 0x246   : > { %5562 = vmatmul.bf16.gmra.mxu3 %v7301_v39  ;;  %v5434_v22 = vpop.f32.mrf.mxu2  ;;  %v1914_v39 = vsel %vm8678_vm11, %v1909_v21, %v1913_v19  ;;  %1988 = vst [vmem:[#allocation4 + $0x460] sm:$0xf] %v1924_v42  ;;  %v7337_v19 = vor.u32 %v7910_v63, %v7334_v35  ;;  %v2390_v63 = vshrl.u32 %v2329_v1, 16  ;;  %v6981_v35 = vor.u32 %v7825_v41, %v6980_v36  ;;  %v7368_v41 = vld [vmem:[#allocation4 + $0x3f0] sm:$0xf] }
 0x247   : > { %v5435_v57 = vadd.f32 %v8909_v44, %v5434_v22  ;;  %v5523_v58 = vpop.f32.mrf.mxu3  ;;  %1987 = vst [vmem:[#allocation4 + $0x43c] sm:$0xf] %v1914_v39  ;;  %5700 = vmatmul.bf16.gmra.mxu0 %v7021_v40  ;;  %v2126_v22 = vsel %vm8855_vm14, %v6819_v47, %v2125_v46  ;;  %v2825_v39 = vld [vmem:[#allocation2 + $0x10] sm:$0xf]  ;;  %v2388_v25 = vrot.slane %v2386_v31, 5  ;;  %v7978_v31 = vld [vmem:[%s9990_s4 + $0x148] sm:$0xff] }
 0x248   : > { %2242 = vst [vmem:[#allocation4 + $0x170] sm:$0xf] %v2126_v22  ;;  %v2392_v42 = vrot.slane %v2390_v63, 4  ;;  %v2922_v61 = vrot.slane %v2825_v39, 5  ;;  %v2009_v39 = vld [vmem:[#allocation2 + $0x50] sm:$0x1] }
 0x249   : > { %v8933_v20 = vadd.f32 %v5523_v58, %v5435_v57  ;;  %v7981_v57 = vld [vmem:[%s9990_s4 + $0x160] sm:$0xff]  ;;  %v2129_v58 = vsel %vm8855_vm14, %v2127_v23, %v2128_v38  ;;  %2307 = vst [vmem:[#allocation4 + $0x198] sm:$0xf] %v2275_v28  ;;  %v7979_v23 = vld [vmem:[%s9990_s4 + $0x150] sm:$0xff]  ;;  %v2008_v28 = vld [vmem:[#allocation2 + $0x4c] sm:$0xf] }
 0x24a   : > { %2243 = vst [vmem:[#allocation4 + $0x194] sm:$0xf] %v2129_v58  ;;  %5853 = vmatpush.bf16.msrb.mxu3 %v7981_v57  ;;  %v2924_v36 = vrot.slane %v2922_v61, 4  ;;  %v7923_v57 = vld [vmem:[#allocation4 + $0x410] sm:$0xf0] }
 0x24b   : > { %v8930_v55 = vpop.f32.mrf.mxu1 }
 0x24e   : > { %5601 = vmatmul.bf16.gmra.mxu1 %v6945_v54  ;;  %v5436_v50 = vpop.f32.mrf.mxu2  ;;  %v2328_v54 = vld [vmem:[#allocation2 + $0xc] sm:$0xf]  ;;  %5854 = vmatpush.bf16.msrb.mxu3 %v7980_v60 }
 0x24f   : > { %v5437_v51 = vadd.f32 %v8909_v44, %v5436_v50  ;;  %v5525_v2 = vpop.f32.mrf.mxu3  ;;  %v2377_v59 = vshrl.u32 %v2328_v54, 16  ;;  %v2380_v43 = vshll.u32 %v2328_v54, 16  ;;  %v2824_v50 = vld [vmem:[#allocation2 + $0xc] sm:$0xe]  ;;  %v7839_v54 = vld [vmem:[#allocation4 + $0x174] sm:$0xf] }
 0x250   : > { %v7054_v58 = vld [vmem:[#allocation4 + $0x194] sm:$0xf0] }
 0x251   : > { %v8955_v52 = vadd.f32 %v5525_v2, %v5437_v51  ;;  %v2379_v21 = vrot.slane %v2377_v59, 4  ;;  %v2382_v29 = vrot.slane %v2380_v43, 5  ;;  %v2393_v51 = vor.u32 %v2392_v42, %v2388_v25  ;;  %v7370_v43 = vld [vmem:[#allocation4 + $0x414] sm:$0xf0] }
 0x252   : > { %v2398_v2 = vrot.slane %v2396_v37, 5  ;;  %5855 = vmatpush.bf16.msrb.mxu3 %v7979_v23  ;;  %v7057_v30 = vor.u32 %v7839_v54, %v7054_v58  ;;  %v2007_v37 = vld [vmem:[#allocation2 + $0x48] sm:$0xe]  ;;  %v2135_v42 = vrot.slane %v2009_v39, 5 }
 0x253   : > { %v8945_v24 = vpop.f32.mrf.mxu1  ;;  %5478 = vmatmul.bf16.gmra.mxu2 %v7333_v62  ;;  %v2383_v40 = vor.u32 %v2382_v29, %v2379_v21  ;;  %v2826_v62 = vld [vmem:[#allocation2 + $0x14] sm:$0x1]  ;;  %v2394_v48 = vrot.slane %v2393_v51, 4  ;;  %v7919_v21 = vld [vmem:[#allocation4 + $0x3f4] sm:$0xf]  ;;  %v2132_v29 = vrot.slane %v2008_v28, 5 }
 0x254   : > { %v2925_v1 = vrot.slane %v2826_v62, 5  ;;  %v2332_v51 = vld [vmem:[#allocation2 + $0x1c] sm:$0xf]  ;;  %v7977_v62 = vld [vmem:[%s9990_s4 + $0x140] sm:$0xff]  ;;  %v7834_v28 = vld [vmem:[#allocation4 + $0x148] sm:$0xf0] }
 0x255   : > { %v2384_v38 = vrot.slane %v2383_v40, 4  ;;  %v2399_v63 = vsel %vm8678_vm11, %v2394_v48, %v2398_v2  ;;  %v2134_v40 = vrot.slane %v2132_v29, 4  ;;  %v7373_v2 = vor.u32 %v7919_v21, %v7370_v43  ;;  %v8008_v21 = vld [vmem:[%s9990_s4 + $0x238] sm:$0xff] }
 0x256   : > { %5567 = vmatmul.bf16.gmra.mxu3 %v7337_v19  ;;  %v5439_v32 = vpop.f32.mrf.mxu2  ;;  %v6830_v19 = vrot.slane %v2824_v50, 9  ;;  %2793 = vst [vmem:[#allocation4 + $0x34] sm:$0xf] %v2399_v63  ;;  %v7369_v50 = vor.u32 %v7923_v57, %v7368_v41  ;;  %v2276_v41 = vld [vmem:[#allocation2 + $0x54] sm:$0xf]  ;;  %v2410_v43 = vshll.u32 %v2332_v51, 16  ;;  %6117 = vmatpush.bf16.msra.mxu2 %v8008_v21 }
 0x257   : > { %v5440_v0 = vadd.f32 %v8909_v44, %v5439_v32  ;;  %v2389_v59 = vsel %vm8678_vm11, %v2384_v38, %v2388_v25  ;;  %v6820_v32 = vrot.slane %v2007_v37, 9  ;;  %5705 = vmatmul.bf16.gmra.mxu0 %v7057_v30  ;;  %5856 = vmatpush.bf16.msrb.mxu3 %v7978_v31  ;;  %v2331_v38 = vld [vmem:[#allocation2 + $0x18] sm:$0xf]  ;;  %v2136_v54 = vsel %vm8855_vm14, %v2134_v40, %v2135_v42  ;;  %v2828_v37 = vld [vmem:[#allocation2 + $0x1c] sm:$0xf] }
 0x258   : > { %2792 = vst [vmem:[#allocation4 + $0x10] sm:$0xf] %v2389_v59  ;;  %v2923_v60 = vsel %vm8855_vm14, %v6830_v19, %v2922_v61  ;;  %v2401_v19 = vshrl.u32 %v2331_v38, 16  ;;  %v2277_v57 = vld [vmem:[#allocation2 + $0x58] sm:$0xf]  ;;  %v2414_v31 = vshrl.u32 %v2332_v51, 16 }
 0x259   : > { %v5528_v47 = vpop.f32.mrf.mxu3  ;;  %3064 = vst [vmem:[#allocation4 + $0x14] sm:$0xf] %v2923_v60  ;;  %v2133_v23 = vsel %vm8855_vm14, %v6820_v32, %v2132_v29  ;;  %v7016_v59 = vld [vmem:[#allocation4 + $0x128] sm:$0xf]  ;;  %v7992_v30 = vld [vmem:[%s9990_s4 + $0x1b8] sm:$0xff]  ;;  %v2412_v63 = vrot.slane %v2410_v43, 5 }
 0x25a   : > { %v8966_v22 = vadd.f32 %v5528_v47, %v5440_v0  ;;  %2244 = vst [vmem:[#allocation4 + $0x1b8] sm:$0xf] %v2133_v23  ;;  %v2403_v48 = vrot.slane %v2401_v19, 4  ;;  %v2333_v60 = vld [vmem:[#allocation2 + $0x20] sm:$0x1]  ;;  %v7017_v32 = vor.u32 %v7834_v28, %v7016_v59  ;;  %5939 = vmatpush.bf16.msrb.mxu1 %v7992_v30  ;;  %v2929_v42 = vrot.slane %v2828_v37, 5 }
 0x25b   : > { %v8960_v46 = vpop.f32.mrf.mxu1  ;;  %2245 = vst [vmem:[#allocation4 + $0x1dc] sm:$0xf] %v2136_v54  ;;  %5857 = vmatpush.bf16.msrb.mxu3 %v7977_v62  ;;  %v2827_v23 = vld [vmem:[#allocation2 + $0x18] sm:$0xe]  ;;  %v2829_v54 = vld [vmem:[#allocation2 + $0x20] sm:$0x1] }
 0x25c   : > { %2308 = vst [vmem:[#allocation4 + $0x1bc] sm:$0xf] %v2276_v41  ;;  %v6831_v19 = vrot.slane %v2827_v23, 9  ;;  %v2932_v59 = vrot.slane %v2829_v54, 5  ;;  %v2011_v30 = vld [vmem:[#allocation2 + $0x58] sm:$0xf] }
 0x25d   : > { %2309 = vst [vmem:[#allocation4 + $0x1e0] sm:$0xf] %v2277_v57  ;;  %v2931_v57 = vrot.slane %v2929_v42, 4  ;;  %v2334_v54 = vld [vmem:[#allocation2 + $0x24] sm:$0xf] }
 0x25e   : > { %5606 = vmatmul.bf16.gmra.mxu1 %v6981_v35  ;;  %v2926_v35 = vsel %vm8855_vm14, %v2924_v36, %v2925_v1  ;;  %v5441_v25 = vpop.f32.mrf.mxu2  ;;  %v2404_v36 = vshll.u32 %v2331_v38, 16  ;;  %v8000_v38 = vld [vmem:[%s9990_s4 + $0x1f8] sm:$0xff]  ;;  %v2930_v43 = vsel %vm8855_vm14, %v6831_v19, %v2929_v42 }
 0x25f   : > { %3065 = vst [vmem:[#allocation4 + $0x38] sm:$0xf] %v2926_v35  ;;  %v5442_v0 = vadd.f32 %v8909_v44, %v5441_v25  ;;  %v2420_v35 = vshll.u32 %v2333_v60, 16  ;;  %v2416_v25 = vrot.slane %v2414_v31, 4  ;;  %6028 = vmatpush.bf16.msra.mxu0 %v8000_v38  ;;  %v7928_v60 = vld [vmem:[#allocation4 + $0x43c] sm:$0xf] }
 0x260   : > { %v2406_v1 = vrot.slane %v2404_v36, 5  ;;  %3066 = vst [vmem:[#allocation4 + $0x5c] sm:$0xf] %v2930_v43  ;;  %v2278_v43 = vld [vmem:[#allocation2 + $0x60] sm:$0xf] }
 0x261   : > { %v5530_v47 = vpop.f32.mrf.mxu3  ;;  %v2422_v62 = vrot.slane %v2420_v35, 5  ;;  %v2139_v35 = vrot.slane %v2011_v30, 5  ;;  %v2279_v30 = vld [vmem:[#allocation2 + $0x64] sm:$0xf]  ;;  %2310 = vst [vmem:[#allocation4 + $0x204] sm:$0xf] %v2278_v43 }
 0x262   : > { %v8989_v58 = vadd.f32 %v5530_v47, %v5442_v0  ;;  %v2407_v29 = vor.u32 %v2406_v1, %v2403_v48  ;;  %v7404_v48 = vld [vmem:[#allocation4 + $0x438] sm:$0xf]  ;;  %v7932_v1 = vld [vmem:[#allocation4 + $0x458] sm:$0xf0]  ;;  %2311 = vst [vmem:[#allocation4 + $0x228] sm:$0xf] %v2279_v30 }
 0x263   : > { %v8979_v61 = vpop.f32.mrf.mxu1  ;;  %5483 = vmatmul.bf16.gmra.mxu2 %v7369_v50  ;;  %v7848_v41 = vld [vmem:[#allocation4 + $0x1bc] sm:$0xf] }
 0x264   : > { %v2408_v40 = vrot.slane %v2407_v29, 4  ;;  %v7090_v28 = vld [vmem:[#allocation4 + $0x1dc] sm:$0xf0] }
 0x265   : > { %v7406_v29 = vld [vmem:[#allocation4 + $0x45c] sm:$0xf0]  ;;  %v7093_v31 = vor.u32 %v7848_v41, %v7090_v28  ;;  %v7052_v41 = vld [vmem:[#allocation4 + $0x170] sm:$0xf]  ;;  %v2428_v28 = vshll.u32 %v2334_v54, 16 }
 0x266   : > { %5572 = vmatmul.bf16.gmra.mxu3 %v7373_v2  ;;  %v5444_v39 = vpop.f32.mrf.mxu2  ;;  %v2413_v51 = vsel %vm8678_vm11, %v2408_v40, %v2412_v63  ;;  %v2417_v2 = vor.u32 %v2416_v25, %v2412_v63  ;;  %v2933_v63 = vsel %vm8855_vm14, %v2931_v57, %v2932_v59  ;;  %v2141_v25 = vrot.slane %v2139_v35, 4  ;;  %v2335_v57 = vld [vmem:[#allocation2 + $0x28] sm:$0xf] }
 0x267   : > { %v5445_v47 = vadd.f32 %v8909_v44, %v5444_v39  ;;  %2794 = vst [vmem:[#allocation4 + $0x58] sm:$0xf] %v2413_v51  ;;  %v2010_v39 = vld [vmem:[#allocation2 + $0x54] sm:$0xe]  ;;  %5710 = vmatmul.bf16.gmra.mxu0 %v7093_v31  ;;  %v7405_v51 = vor.u32 %v7932_v1, %v7404_v48  ;;  %v7409_v19 = vor.u32 %v7928_v60, %v7406_v29  ;;  %v2425_v59 = vshrl.u32 %v2334_v54, 16 }
 0x268   : > { %v2418_v21 = vrot.slane %v2417_v2, 4  ;;  %3067 = vst [vmem:[#allocation4 + $0x80] sm:$0xf] %v2933_v63  ;;  %v6821_v40 = vrot.slane %v2010_v39, 9  ;;  %v7843_v31 = vld [vmem:[#allocation4 + $0x190] sm:$0xf0]  ;;  %v5415_v60 = vadd.f32 %v8909_v44, %v8930_v55 }
 0x269   : > { %v5533_v50 = vpop.f32.mrf.mxu3  ;;  %v2427_v48 = vrot.slane %v2425_v59, 4  ;;  %v2430_v1 = vrot.slane %v2428_v28, 5  ;;  %v2336_v63 = vld [vmem:[#allocation2 + $0x2c] sm:$0x1]  ;;  %v7053_v39 = vor.u32 %v7843_v31, %v7052_v41  ;;  %v2830_v59 = vld [vmem:[#allocation2 + $0x24] sm:$0xe] }
 0x26a   : > { %v9005_v36 = vadd.f32 %v5533_v50, %v5445_v47  ;;  %v2423_v37 = vsel %vm8678_vm11, %v2418_v21, %v2422_v62  ;;  %v2140_v2 = vsel %vm8855_vm14, %v6821_v40, %v2139_v35  ;;  %v2434_v35 = vshll.u32 %v2335_v57, 16  ;;  %v2831_v40 = vld [vmem:[#allocation2 + $0x28] sm:$0xf]  ;;  %v2832_v41 = vld [vmem:[#allocation2 + $0x2c] sm:$0x1] }
 0x26b   : > { %v8997_v0 = vpop.f32.mrf.mxu1  ;;  %2795 = vst [vmem:[#allocation4 + $0x7c] sm:$0xf] %v2423_v37  ;;  %v2431_v29 = vor.u32 %v2430_v1, %v2427_v48  ;;  %v2438_v37 = vshrl.u32 %v2335_v57, 16  ;;  %v6832_v57 = vrot.slane %v2830_v59, 9  ;;  %v7857_v30 = vld [vmem:[#allocation4 + $0x204] sm:$0xf] }
 0x26c   : > { %2246 = vst [vmem:[#allocation4 + $0x200] sm:$0xf] %v2140_v2  ;;  %v2939_v48 = vrot.slane %v2832_v41, 5  ;;  %v6880_v1 = vld [vmem:[#allocation4 + $0x10] sm:$0xf] }
 0x26e   : > { %5611 = vmatmul.bf16.gmra.mxu1 %v7017_v32  ;;  %v2012_v32 = vld [vmem:[#allocation2 + $0x5c] sm:$0x1]  ;;  %v5446_v42 = vpop.f32.mrf.mxu2 }
 0x26f   : > { %v2142_v47 = vrot.slane %v2012_v32, 5  ;;  %v5447_v23 = vadd.f32 %v8909_v44, %v5446_v42  ;;  %v2444_v32 = vshll.u32 %v2336_v63, 16  ;;  %v2436_v42 = vrot.slane %v2434_v35, 5  ;;  %v7799_v63 = vld [vmem:[#allocation4 + $0x30] sm:$0xf0] }
 0x271   : > { %v5535_v38 = vpop.f32.mrf.mxu3  ;;  %v2143_v62 = vsel %vm8855_vm14, %v2141_v25, %v2142_v47  ;;  %v2432_v47 = vrot.slane %v2431_v29, 4  ;;  %v2446_v54 = vrot.slane %v2444_v32, 5  ;;  %v7126_v29 = vld [vmem:[#allocation4 + $0x224] sm:$0xf0]  ;;  %v7795_v32 = vld [vmem:[#allocation4 + $0x14] sm:$0xf] }
 0x272   : > { %v9020_v21 = vadd.f32 %v5535_v38, %v5447_v23  ;;  %2247 = vst [vmem:[#allocation4 + $0x224] sm:$0xf] %v2143_v62  ;;  %v2440_v23 = vrot.slane %v2438_v37, 4  ;;  %v2936_v38 = vrot.slane %v2831_v40, 5  ;;  %v2014_v37 = vld [vmem:[#allocation2 + $0x64] sm:$0xf] }
 0x273   : > { %v9013_v50 = vpop.f32.mrf.mxu1  ;;  %5488 = vmatmul.bf16.gmra.mxu2 %v7405_v51  ;;  %v2437_v55 = vsel %vm8678_vm11, %v2432_v47, %v2436_v42  ;;  %v6882_v40 = vld [vmem:[#allocation4 + $0x34] sm:$0xf0] }
 0x274   : > { %2796 = vst [vmem:[#allocation4 + $0xa0] sm:$0xf] %v2437_v55  ;;  %v2938_v31 = vrot.slane %v2936_v38, 4 }
 0x276   : > { %5577 = vmatmul.bf16.gmra.mxu3 %v7409_v19  ;;  %v5449_v25 = vpop.f32.mrf.mxu2  ;;  %v2441_v19 = vor.u32 %v2440_v23, %v2436_v42  ;;  %v2940_v47 = vsel %vm8855_vm14, %v2938_v31, %v2939_v48  ;;  %v2146_v42 = vrot.slane %v2014_v37, 5  ;;  %v5417_v23 = vadd.f32 %v8909_v44, %v8945_v24  ;;  %v2337_v31 = vld [vmem:[#allocation2 + $0x30] sm:$0xf] }
 0x277   : > { %v5450_v2 = vadd.f32 %v8909_v44, %v5449_v25  ;;  %v7129_v25 = vor.u32 %v7857_v30, %v7126_v29  ;;  %3069 = vst [vmem:[#allocation4 + $0xc8] sm:$0xf] %v2940_v47  ;;  %v6881_v30 = vor.u32 %v7799_v63, %v6880_v1  ;;  %v6885_v29 = vor.u32 %v7795_v32, %v6882_v40  ;;  %v2280_v47 = vld [vmem:[#allocation2 + $0x6c] sm:$0xf]  ;;  %v7088_v1 = vld [vmem:[#allocation4 + $0x1b8] sm:$0xf] }
 0x278   : > { %v2442_v35 = vrot.slane %v2441_v19, 4  ;;  %v2452_v37 = vshll.u32 %v2337_v31, 16  ;;  %2312 = vst [vmem:[#allocation4 + $0x24c] sm:$0xf] %v2280_v47  ;;  %v5420_v40 = vadd.f32 %v8909_v44, %v8960_v46  ;;  %v2833_v47 = vld [vmem:[#allocation2 + $0x30] sm:$0xe] }
 0x279   : > { %v5538_v62 = vpop.f32.mrf.mxu3  ;;  %5715 = vmatmul.bf16.gmra.mxu0 %v7129_v25 }
 0x27a   : > { %v9029_v43 = vadd.f32 %v5538_v62, %v5450_v2  ;;  %v2013_v2 = vld [vmem:[#allocation2 + $0x60] sm:$0xe]  ;;  %v2148_v62 = vrot.slane %v2146_v42, 4 }
 0x27b   : > { %v5503_v51 = vpop.f32.mrf.mxu1 }
 0x27c   : > { %v9025_v28 = vadd.f32 %v5503_v51, %v5415_v60  ;;  %v2937_v60 = vsel %vm8855_vm14, %v6832_v57, %v2936_v38  ;;  %v2015_v51 = vld [vmem:[#allocation2 + $0x68] sm:$0x1]  ;;  %v6822_v38 = vrot.slane %v2013_v2, 9  ;;  %v7852_v2 = vld [vmem:[#allocation4 + $0x1d8] sm:$0xf0] }
 0x27d   : > { %3068 = vst [vmem:[#allocation4 + $0xa4] sm:$0xf] %v2937_v60  ;;  %v2149_v59 = vrot.slane %v2015_v51, 5  ;;  %v2449_v60 = vshrl.u32 %v2337_v31, 16  ;;  %v7991_v51 = vld [vmem:[%s9990_s4 + $0x1b0] sm:$0xff] }
 0x27e   : > { %5616 = vmatmul.bf16.gmra.mxu1 %v7053_v39  ;;  %v2447_v39 = vsel %vm8678_vm11, %v2442_v35, %v2446_v54  ;;  %v5451_v55 = vpop.f32.mrf.mxu2  ;;  %v2147_v24 = vsel %vm8855_vm14, %v6822_v38, %v2146_v42  ;;  %v2338_v35 = vld [vmem:[#allocation2 + $0x34] sm:$0xf]  ;;  %v2454_v42 = vrot.slane %v2452_v37, 5  ;;  %v2339_v38 = vld [vmem:[#allocation2 + $0x38] sm:$0x1] }
 0x27f   : > { %2797 = vst [vmem:[#allocation4 + $0xc4] sm:$0xf] %v2447_v39  ;;  %v5452_v19 = vadd.f32 %v8909_v44, %v5451_v55  ;;  %v2150_v54 = vsel %vm8855_vm14, %v2148_v62, %v2149_v59  ;;  %v2281_v39 = vld [vmem:[#allocation2 + $0x70] sm:$0xf]  ;;  %v2451_v63 = vrot.slane %v2449_v60, 4  ;;  %v2458_v32 = vshll.u32 %v2338_v35, 16  ;;  %5940 = vmatpush.bf16.msrb.mxu1 %v7991_v51 }
 0x280   : > { %2248 = vst [vmem:[#allocation4 + $0x248] sm:$0xf] %v2147_v24  ;;  %v2462_v59 = vshrl.u32 %v2338_v35, 16  ;;  %v7999_v35 = vld [vmem:[%s9990_s4 + $0x1f0] sm:$0xff] }
 0x281   : > { %v5540_v57 = vpop.f32.mrf.mxu3  ;;  %2249 = vst [vmem:[#allocation4 + $0x26c] sm:$0xf] %v2150_v54  ;;  %v2455_v62 = vor.u32 %v2454_v42, %v2451_v63  ;;  %v2460_v55 = vrot.slane %v2458_v32, 5  ;;  %v2835_v42 = vld [vmem:[#allocation2 + $0x38] sm:$0x1]  ;;  %6029 = vmatpush.bf16.msra.mxu0 %v7999_v35 }
 0x282   : > { %v9046_v25 = vadd.f32 %v5540_v57, %v5452_v19  ;;  %2313 = vst [vmem:[#allocation4 + $0x270] sm:$0xf] %v2281_v39  ;;  %v2468_v19 = vshll.u32 %v2339_v38, 16  ;;  %v2464_v54 = vrot.slane %v2462_v59, 4  ;;  %v7866_v32 = vld [vmem:[#allocation4 + $0x24c] sm:$0xf] }
 0x283   : > { %v5505_v41 = vpop.f32.mrf.mxu1  ;;  %5769 = vmatmul.bf16.vlgmr.msrb.gmra.mxu2 %v6881_v30  ;;  %v7089_v30 = vor.u32 %v7852_v2, %v7088_v1  ;;  %v2456_v24 = vrot.slane %v2455_v62, 4  ;;  %v6833_v2 = vrot.slane %v2833_v47, 9  ;;  %v2946_v38 = vrot.slane %v2835_v42, 5  ;;  %v6916_v62 = vld [vmem:[#allocation4 + $0x58] sm:$0xf] }
 0x284   : > { %v9044_v48 = vadd.f32 %v5505_v41, %v5417_v23  ;;  %v8007_v23 = vld [vmem:[%s9990_s4 + $0x230] sm:$0xff]  ;;  %v2470_v37 = vrot.slane %v2468_v19, 5  ;;  %v2465_v1 = vor.u32 %v2464_v54, %v2460_v55  ;;  %v9068_v54 = vpop.f32.mrf.mxu0 }
 0x285   : > { %6118 = vmatpush.bf16.msra.mxu2 %v8007_v23  ;;  %v2834_v41 = vld [vmem:[#allocation2 + $0x34] sm:$0xf]  ;;  %v2461_v63 = vsel %vm8678_vm11, %v2456_v24, %v2460_v55  ;;  %v7804_v24 = vld [vmem:[#allocation4 + $0x5c] sm:$0xf]  ;;  %v6918_v55 = vld [vmem:[#allocation4 + $0x7c] sm:$0xf0] }
 0x286   : > { %5858 = vmatmul.bf16.vlgmr.msrb.gmra.mxu3 %v6885_v29  ;;  %v5454_v57 = vpop.f32.mrf.mxu2  ;;  %v2943_v31 = vrot.slane %v2834_v41, 5  ;;  %2798 = vst [vmem:[#allocation4 + $0xe8] sm:$0xf] %v2461_v63  ;;  %v2466_v59 = vrot.slane %v2465_v1, 4  ;;  %v2017_v41 = vld [vmem:[#allocation2 + $0x70] sm:$0xf] }
 0x287   : > { %v5455_v46 = vadd.f32 %v8909_v44, %v5454_v57  ;;  %v7808_v57 = vld [vmem:[#allocation4 + $0x78] sm:$0xf0]  ;;  %v2018_v35 = vld [vmem:[#allocation2 + $0x74] sm:$0x1] }
 0x288   : > { %v2945_v51 = vrot.slane %v2943_v31, 4  ;;  %v2944_v19 = vsel %vm8855_vm14, %v6833_v2, %v2943_v31  ;;  %v2471_v47 = vsel %vm8678_vm11, %v2466_v59, %v2470_v37  ;;  %v2016_v31 = vld [vmem:[#allocation2 + $0x6c] sm:$0xe]  ;;  %v2156_v42 = vrot.slane %v2018_v35, 5  ;;  %v2340_v59 = vld [vmem:[#allocation2 + $0x3c] sm:$0xf] }
 0x289   : > { %v5543_v60 = vpop.f32.mrf.mxu3  ;;  %3070 = vst [vmem:[#allocation4 + $0xec] sm:$0xf] %v2944_v19  ;;  %v6823_v63 = vrot.slane %v2016_v31, 9  ;;  %v2473_v31 = vshrl.u32 %v2340_v59, 16 }
 0x28a   : > { %v9064_v23 = vadd.f32 %v5543_v60, %v5455_v46  ;;  %v2153_v60 = vrot.slane %v2017_v41, 5  ;;  %2799 = vst [vmem:[#allocation4 + $0x10c] sm:$0xf] %v2471_v47  ;;  %v6921_v41 = vor.u32 %v7804_v24, %v6918_v55  ;;  %v2341_v47 = vld [vmem:[#allocation2 + $0x40] sm:$0xf]  ;;  %v5425_v24 = vadd.f32 %v8909_v44, %v8997_v0 }
 0x28b   : > { %v5508_v29 = vpop.f32.mrf.mxu1 }
 0x28c   : > { %v9057_v39 = vadd.f32 %v5508_v29, %v5420_v40  ;;  %v7162_v40 = vld [vmem:[#allocation4 + $0x26c] sm:$0xf0]  ;;  %v2947_v29 = vsel %vm8855_vm14, %v2945_v51, %v2946_v38  ;;  %v2155_v1 = vrot.slane %v2153_v60, 4 }
 0x28d   : > { %v7165_v46 = vor.u32 %v7866_v32, %v7162_v40  ;;  %3071 = vst [vmem:[#allocation4 + $0x110] sm:$0xf] %v2947_v29  ;;  %v6917_v40 = vor.u32 %v7808_v57, %v6916_v62  ;;  %v7124_v29 = vld [vmem:[#allocation4 + $0x200] sm:$0xf]  ;;  %v2283_v62 = vld [vmem:[#allocation2 + $0x7c] sm:$0xf] }
 0x28e   : > { %5621 = vmatmul.bf16.gmra.mxu1 %v7089_v30  ;;  %v5422_v30 = vadd.f32 %v8909_v44, %v8979_v61  ;;  %v5456_v2 = vpop.f32.mrf.mxu2  ;;  %v2154_v61 = vsel %vm8855_vm14, %v6823_v63, %v2153_v60  ;;  %v2157_v37 = vsel %vm8855_vm14, %v2155_v1, %v2156_v42  ;;  %v7861_v57 = vld [vmem:[#allocation4 + $0x220] sm:$0xf0]  ;;  %v2475_v60 = vrot.slane %v2473_v31, 4  ;;  %v9085_v1 = vpop.f32.mrf.mxu0  ;;  %2315 = vst [vmem:[#allocation4 + $0x2b8] sm:$0xf] %v2283_v62 }
 0x28f   : > { %5720 = vmatmul.bf16.gmra.mxu0 %v7165_v46  ;;  %v5457_v32 = vadd.f32 %v8909_v44, %v5456_v2  ;;  %2250 = vst [vmem:[#allocation4 + $0x290] sm:$0xf] %v2154_v61  ;;  %v2476_v46 = vshll.u32 %v2340_v59, 16  ;;  %v2282_v2 = vld [vmem:[#allocation2 + $0x78] sm:$0xf]  ;;  %v2482_v42 = vshll.u32 %v2341_v47, 16 }
 0x290   : > { %2251 = vst [vmem:[#allocation4 + $0x2b4] sm:$0xf] %v2157_v37  ;;  %v2837_v61 = vld [vmem:[#allocation2 + $0x40] sm:$0xf] }
 0x291   : > { %v5545_v38 = vpop.f32.mrf.mxu3  ;;  %2314 = vst [vmem:[#allocation4 + $0x294] sm:$0xf] %v2282_v2  ;;  %v2478_v63 = vrot.slane %v2476_v46, 5  ;;  %v2484_v2 = vrot.slane %v2482_v42, 5  ;;  %v2950_v46 = vrot.slane %v2837_v61, 5 }
 0x292   : > { %v9083_v35 = vadd.f32 %v5545_v38, %v5457_v32  ;;  %v2486_v32 = vshrl.u32 %v2341_v47, 16  ;;  %v6834_v47 = vrot.slane %v2836_v16, 9  ;;  %v6954_v61 = vld [vmem:[#allocation4 + $0xc4] sm:$0xf0] }
 0x293   : > { %v5510_v51 = vpop.f32.mrf.mxu1  ;;  %5774 = vmatmul.bf16.gmra.mxu2 %v6917_v40  ;;  %v2479_v55 = vor.u32 %v2478_v63, %v2475_v60  ;;  %v2952_v63 = vrot.slane %v2950_v46, 4 }
 0x294   : > { %v9081_v19 = vadd.f32 %v5510_v51, %v5422_v30  ;;  %v2342_v30 = vld [vmem:[#allocation2 + $0x44] sm:$0x1]  ;;  %v7125_v51 = vor.u32 %v7861_v57, %v7124_v29  ;;  %v2488_v31 = vrot.slane %v2486_v32, 4  ;;  %v7817_v32 = vld [vmem:[#allocation4 + $0xc0] sm:$0xf0] }
 0x295   : > { %v2492_v38 = vshll.u32 %v2342_v30, 16  ;;  %v2480_v59 = vrot.slane %v2479_v55, 4  ;;  %v2838_v29 = vld [vmem:[#allocation2 + $0x44] sm:$0x1]  ;;  %v7198_v55 = vld [vmem:[#allocation4 + $0x2b4] sm:$0xf0] }
 0x296   : > { %5863 = vmatmul.bf16.gmra.mxu3 %v6921_v41  ;;  %v5459_v37 = vpop.f32.mrf.mxu2  ;;  %v2489_v41 = vor.u32 %v2488_v31, %v2484_v2  ;;  %v2953_v30 = vrot.slane %v2838_v29, 5 }
 0x297   : > { %v5460_v40 = vadd.f32 %v8909_v44, %v5459_v37  ;;  %v2494_v17 = vrot.slane %v2492_v38, 5  ;;  %v2485_v0 = vsel %vm8678_vm11, %v2480_v59, %v2484_v2  ;;  %v6952_v44 = vld [vmem:[#allocation4 + $0xa0] sm:$0xf]  ;;  %v7813_v38 = vld [vmem:[#allocation4 + $0xa4] sm:$0xf]  ;;  %v9098_v37 = vpop.f32.mrf.mxu0 }
 0x298   : > { %v7875_v60 = vld [vmem:[#allocation4 + $0x294] sm:$0xf]  ;;  %2800 = vst [vmem:[#allocation4 + $0x130] sm:$0xf] %v2485_v0  ;;  %v2490_v42 = vrot.slane %v2489_v41, 4  ;;  %v2954_v59 = vsel %vm8855_vm14, %v2952_v63, %v2953_v30 }
 0x299   : > { %v5548_v62 = vpop.f32.mrf.mxu3  ;;  %v7201_v16 = vor.u32 %v7875_v60, %v7198_v55  ;;  %3073 = vst [vmem:[#allocation4 + $0x158] sm:$0xf] %v2954_v59  ;;  %v6953_v55 = vor.u32 %v7817_v32, %v6952_v44  ;;  %v2344_v59 = vld [vmem:[#allocation2 + $0x4c] sm:$0xf]  ;;  %v7160_v44 = vld [vmem:[#allocation4 + $0x248] sm:$0xf] }
 0x29a   : > { %v9094_v57 = vadd.f32 %v5548_v62, %v5460_v40  ;;  %v2019_v40 = vld [vmem:[#allocation2 + $0x78] sm:$0xe]  ;;  %v2021_v62 = vld [vmem:[#allocation2 + $0x80] sm:$0x1] }
 0x29b   : > { %v5513_v18 = vpop.f32.mrf.mxu1  ;;  %v6824_v0 = vrot.slane %v2019_v40, 9  ;;  %v2163_v29 = vrot.slane %v2021_v62, 5  ;;  %v2284_v62 = vld [vmem:[#allocation2 + $0x84] sm:$0xf] }
 0x29c   : > { %v9090_v15 = vadd.f32 %v5513_v18, %v5425_v24  ;;  %v2951_v18 = vsel %vm8855_vm14, %v6834_v47, %v2950_v46  ;;  %v2020_v24 = vld [vmem:[#allocation2 + $0x7c] sm:$0xf]  ;;  %v2495_v46 = vsel %vm8678_vm11, %v2490_v42, %v2494_v17  ;;  %v2343_v42 = vld [vmem:[#allocation2 + $0x48] sm:$0xf]  ;;  %2316 = vst [vmem:[#allocation4 + $0x2dc] sm:$0xf] %v2284_v62 }
 0x29d   : > { %3072 = vst [vmem:[#allocation4 + $0x134] sm:$0xf] %v2951_v18  ;;  %v2160_v2 = vrot.slane %v2020_v24, 5  ;;  %v6957_v24 = vor.u32 %v7813_v38, %v6954_v61  ;;  %v2500_v40 = vshll.u32 %v2343_v42, 16  ;;  %v8006_v38 = vld [vmem:[%s9990_s4 + $0x228] sm:$0xff]  ;;  %v2506_v61 = vshll.u32 %v2344_v59, 16 }
 0x29e   : > { %5626 = vmatmul.bf16.gmra.mxu1 %v7125_v51  ;;  %v9105_v51 = vld [vmem:[%s9991_s5] ss:$0 sm:$0xff]  ;;  %2801 = vst [vmem:[#allocation4 + $0x154] sm:$0xf] %v2495_v46  ;;  %v5461_v47 = vpop.f32.mrf.mxu2  ;;  %v2497_v46 = vshrl.u32 %v2343_v42, 16  ;;  %6119 = vmatpush.bf16.msra.mxu2 %v8006_v38 }
 0x29f   : > { %v5427_v31 = vadd.f32 %v9105_v51, %v9013_v50  ;;  %v2162_v41 = vrot.slane %v2160_v2, 4  ;;  %5725 = vmatmul.bf16.gmra.mxu0 %v7201_v16  ;;  %v5462_v60 = vadd.f32 %v9105_v51, %v5461_v47  ;;  %v2161_v50 = vsel %vm8855_vm14, %v6824_v0, %v2160_v2  ;;  %v2285_v47 = vld [vmem:[#allocation2 + $0x88] sm:$0xf]  ;;  %v7870_v0 = vld [vmem:[#allocation4 + $0x268] sm:$0xf0] }
 0x2a0   : > { %2252 = vst [vmem:[#allocation4 + $0x2d8] sm:$0xf] %v2161_v50  ;;  %v2499_v32 = vrot.slane %v2497_v46, 4  ;;  %v2502_v2 = vrot.slane %v2500_v40, 5  ;;  %v2840_v50 = vld [vmem:[#allocation2 + $0x4c] sm:$0xf]  ;;  %v7161_v42 = vor.u32 %v7870_v0, %v7160_v44 }
 0x2a1   : > { %v5550_v30 = vpop.f32.mrf.mxu3  ;;  %v2164_v17 = vsel %vm8855_vm14, %v2162_v41, %v2163_v29  ;;  %v9120_v41 = vpop.f32.mrf.mxu0  ;;  %2317 = vst [vmem:[#allocation4 + $0x300] sm:$0xf] %v2285_v47  ;;  %v2345_v29 = vld [vmem:[#allocation2 + $0x50] sm:$0x1]  ;;  %v2957_v62 = vrot.slane %v2840_v50, 5  ;;  %v6835_v0 = vrot.slane %v2839_v12, 9 }
 0x2a2   : > { %v9118_v16 = vadd.f32 %v5550_v30, %v5462_v60  ;;  %2253 = vst [vmem:[#allocation4 + $0x2fc] sm:$0xf] %v2164_v17  ;;  %v2503_v60 = vor.u32 %v2502_v2, %v2499_v32  ;;  %v2508_v30 = vrot.slane %v2506_v61, 5  ;;  %v2841_v2 = vld [vmem:[#allocation2 + $0x50] sm:$0x1] }
 0x2a3   : > { %v5515_v63 = vpop.f32.mrf.mxu1  ;;  %5779 = vmatmul.bf16.gmra.mxu2 %v6953_v55  ;;  %v2516_v55 = vshll.u32 %v2345_v29, 16  ;;  %v7884_v61 = vld [vmem:[#allocation4 + $0x2dc] sm:$0xf]  ;;  %v2960_v29 = vrot.slane %v2841_v2, 5  ;;  %v2958_v50 = vsel %vm8855_vm14, %v6835_v0, %v2957_v62  ;;  %v7822_v12 = vld [vmem:[#allocation4 + $0xec] sm:$0xf] }
 0x2a4   : > { %v9116_v18 = vadd.f32 %v5515_v63, %v5427_v31  ;;  %v7990_v31 = vld [vmem:[%s9990_s4 + $0x1a8] sm:$0xff]  ;;  %v2510_v63 = vshrl.u32 %v2344_v59, 16  ;;  %v2504_v46 = vrot.slane %v2503_v60, 4  ;;  %3074 = vst [vmem:[#allocation4 + $0x17c] sm:$0xf] %v2958_v50 }
 0x2a5   : > { %5941 = vmatpush.bf16.msrb.mxu1 %v7990_v31  ;;  %v2518_v13 = vrot.slane %v2516_v55, 5  ;;  %v7998_v59 = vld [vmem:[%s9990_s4 + $0x1e8] sm:$0xff]  ;;  %v2959_v31 = vrot.slane %v2957_v62, 4 }
 0x2a6   : > { %5868 = vmatmul.bf16.gmra.mxu3 %v6957_v24  ;;  %v5464_v17 = vpop.f32.mrf.mxu2  ;;  %v2512_v40 = vrot.slane %v2510_v63, 4  ;;  %v2509_v32 = vsel %vm8678_vm11, %v2504_v46, %v2508_v30  ;;  %6030 = vmatpush.bf16.msra.mxu0 %v7998_v59 }
 0x2a7   : > { %v5465_v47 = vadd.f32 %v9105_v51, %v5464_v17  ;;  %2802 = vst [vmem:[#allocation4 + $0x178] sm:$0xf] %v2509_v32  ;;  %v7826_v17 = vld [vmem:[#allocation4 + $0x108] sm:$0xf0] }
 0x2a8   : > { %v2513_v44 = vor.u32 %v2512_v40, %v2508_v30  ;;  %v7234_v63 = vld [vmem:[#allocation4 + $0x2fc] sm:$0xf0] }
 0x2a9   : > { %v5553_v14 = vpop.f32.mrf.mxu3  ;;  %v2023_v30 = vld [vmem:[#allocation2 + $0x88] sm:$0xf]  ;;  %v9142_v46 = vpop.f32.mrf.mxu0  ;;  %v7237_v40 = vor.u32 %v7884_v61, %v7234_v63 }
 0x2aa   : > { %v9135_v38 = vadd.f32 %v5553_v14, %v5465_v47  ;;  %v2514_v55 = vrot.slane %v2513_v44, 4  ;;  %v6990_v14 = vld [vmem:[#allocation4 + $0x10c] sm:$0xf0]  ;;  %v2961_v47 = vsel %vm8855_vm14, %v2959_v31, %v2960_v29  ;;  %v2346_v29 = vld [vmem:[#allocation2 + $0x54] sm:$0xf] }
 0x2ab   : > { %v5592_v24 = vpop.f32.mrf.mxu1  ;;  %3075 = vst [vmem:[#allocation4 + $0x1a0] sm:$0xf] %v2961_v47  ;;  %v6993_v50 = vor.u32 %v7822_v12, %v6990_v14  ;;  %v2347_v47 = vld [vmem:[#allocation2 + $0x58] sm:$0xf]  ;;  %v2348_v12 = vld [vmem:[#allocation2 + $0x5c] sm:$0x1] }
 0x2ac   : > { %v5593_v11 = vadd.f32 %v5592_v24, %v9025_v28  ;;  %v6988_v28 = vld [vmem:[#allocation4 + $0xe8] sm:$0xf]  ;;  %v2024_v24 = vld [vmem:[#allocation2 + $0x8c] sm:$0x1] }
 0x2ad   : > { %v2170_v32 = vrot.slane %v2024_v24, 5  ;;  %v6989_v63 = vor.u32 %v7826_v17, %v6988_v28  ;;  %v2286_v24 = vld [vmem:[#allocation2 + $0x90] sm:$0xf]  ;;  %v2287_v28 = vld [vmem:[#allocation2 + $0x94] sm:$0xf] }
 0x2ae   : > { %v9138_v60 = vadd.f32 %v9068_v54, %v5593_v11  ;;  %5631 = vmatmul.bf16.gmra.mxu1 %v7161_v42  ;;  %v2167_v11 = vrot.slane %v2023_v30, 5  ;;  %v2519_v54 = vsel %vm8678_vm11, %v2514_v55, %v2518_v13  ;;  %v2022_v42 = vld [vmem:[#allocation2 + $0x84] sm:$0xe]  ;;  %v5466_v44 = vpop.f32.mrf.mxu2  ;;  %v7196_v30 = vld [vmem:[#allocation4 + $0x290] sm:$0xf] }
 0x2af   : > { %2803 = vst [vmem:[#allocation4 + $0x19c] sm:$0xf] %v2519_v54  ;;  %v6825_v62 = vrot.slane %v2022_v42, 9  ;;  %5730 = vmatmul.bf16.gmra.mxu0 %v7237_v40  ;;  %v5467_v2 = vadd.f32 %v9105_v51, %v5466_v44  ;;  %v2521_v54 = vshrl.u32 %v2346_v29, 16  ;;  %v2524_v40 = vshll.u32 %v2346_v29, 16 }
 0x2b0   : > { %v2169_v59 = vrot.slane %v2167_v11, 4  ;;  %2318 = vst [vmem:[#allocation4 + $0x324] sm:$0xf] %v2286_v24  ;;  %v2534_v44 = vshrl.u32 %v2347_v47, 16 }
 0x2b1   : > { %v5555_v61 = vpop.f32.mrf.mxu3  ;;  %v2168_v31 = vsel %vm8855_vm14, %v6825_v62, %v2167_v11  ;;  %v7879_v11 = vld [vmem:[#allocation4 + $0x2b0] sm:$0xf0]  ;;  %v2523_v62 = vrot.slane %v2521_v54, 4  ;;  %2319 = vst [vmem:[#allocation4 + $0x348] sm:$0xf] %v2287_v28 }
 0x2b2   : > { %v2171_v13 = vsel %vm8855_vm14, %v2169_v59, %v2170_v32  ;;  %2254 = vst [vmem:[#allocation4 + $0x320] sm:$0xf] %v2168_v31  ;;  %v9154_v42 = vadd.f32 %v5555_v61, %v5467_v2  ;;  %v2526_v59 = vrot.slane %v2524_v40, 5  ;;  %v2530_v32 = vshll.u32 %v2347_v47, 16  ;;  %v2843_v61 = vld [vmem:[#allocation2 + $0x58] sm:$0xf] }
 0x2b3   : > { %v5594_v0 = vpop.f32.mrf.mxu1  ;;  %2255 = vst [vmem:[#allocation4 + $0x344] sm:$0xf] %v2171_v13  ;;  %5784 = vmatmul.bf16.gmra.mxu2 %v6989_v63  ;;  %v7197_v2 = vor.u32 %v7879_v11, %v7196_v30  ;;  %v2536_v29 = vrot.slane %v2534_v44, 4  ;;  %v2844_v30 = vld [vmem:[#allocation2 + $0x5c] sm:$0x1]  ;;  %v6836_v11 = vrot.slane %v2842_v10, 9 }
 0x2b4   : > { %v5595_v55 = vadd.f32 %v5594_v0, %v9044_v48  ;;  %v9159_v48 = vpop.f32.mrf.mxu0  ;;  %v2527_v14 = vor.u32 %v2526_v59, %v2523_v62  ;;  %v2540_v0 = vshll.u32 %v2348_v12, 16  ;;  %v7024_v44 = vld [vmem:[#allocation4 + $0x130] sm:$0xf]  ;;  %v7026_v10 = vld [vmem:[#allocation4 + $0x154] sm:$0xf0] }
 0x2b6   : > { %v9157_v17 = vadd.f32 %v9085_v1, %v5595_v55  ;;  %5873 = vmatmul.bf16.gmra.mxu3 %v6993_v50  ;;  %v5469_v31 = vpop.f32.mrf.mxu2  ;;  %v2528_v13 = vrot.slane %v2527_v14, 4  ;;  %v2532_v1 = vrot.slane %v2530_v32, 5  ;;  %v2964_v55 = vrot.slane %v2843_v61, 5 }
 0x2b7   : > { %v5470_v54 = vadd.f32 %v9105_v51, %v5469_v31  ;;  %v2542_v24 = vrot.slane %v2540_v0, 5  ;;  %v7893_v59 = vld [vmem:[#allocation4 + $0x324] sm:$0xf]  ;;  %v2967_v14 = vrot.slane %v2844_v30, 5  ;;  %v2026_v31 = vld [vmem:[#allocation2 + $0x94] sm:$0xf] }
 0x2b8   : > { %v2533_v50 = vsel %vm8678_vm11, %v2528_v13, %v2532_v1  ;;  %v2537_v47 = vor.u32 %v2536_v29, %v2532_v1  ;;  %v2966_v12 = vrot.slane %v2964_v55, 4  ;;  %v7270_v0 = vld [vmem:[#allocation4 + $0x344] sm:$0xf0]  ;;  %v7835_v13 = vld [vmem:[#allocation4 + $0x150] sm:$0xf0] }
 0x2b9   : > { %v5558_v63 = vpop.f32.mrf.mxu3  ;;  %2804 = vst [vmem:[#allocation4 + $0x1c0] sm:$0xf] %v2533_v50  ;;  %v7831_v1 = vld [vmem:[#allocation4 + $0x134] sm:$0xf]  ;;  %v7025_v9 = vor.u32 %v7835_v13, %v7024_v44  ;;  %v7232_v13 = vld [vmem:[#allocation4 + $0x2d8] sm:$0xf] }
 0x2ba   : > { %v9165_v62 = vadd.f32 %v5558_v63, %v5470_v54  ;;  %v2538_v61 = vrot.slane %v2537_v47, 4  ;;  %v7273_v54 = vor.u32 %v7893_v59, %v7270_v0  ;;  %v2025_v63 = vld [vmem:[#allocation2 + $0x90] sm:$0xe] }
 0x2bb   : > { %v5597_v40 = vpop.f32.mrf.mxu1 }
 0x2bc   : > { %v5598_v28 = vadd.f32 %v5597_v40, %v9057_v39  ;;  %v2965_v39 = vsel %vm8855_vm14, %v6836_v11, %v2964_v55  ;;  %v9172_v29 = vpop.f32.mrf.mxu0  ;;  %v2968_v40 = vsel %vm8855_vm14, %v2966_v12, %v2967_v14  ;;  %v6826_v55 = vrot.slane %v2025_v63, 9  ;;  %v2349_v14 = vld [vmem:[#allocation2 + $0x60] sm:$0xf]  ;;  %v2288_v63 = vld [vmem:[#allocation2 + $0x9c] sm:$0xf] }
 0x2bd   : > { %3076 = vst [vmem:[#allocation4 + $0x1c4] sm:$0xf] %v2965_v39  ;;  %v7029_v39 = vor.u32 %v7831_v1, %v7026_v10  ;;  %v8005_v1 = vld [vmem:[%s9990_s4 + $0x220] sm:$0xff] }
 0x2be   : > { %v9168_v32 = vadd.f32 %v9098_v37, %v5598_v28  ;;  %5636 = vmatmul.bf16.gmra.mxu1 %v7197_v2  ;;  %v2174_v37 = vrot.slane %v2026_v31, 5  ;;  %v2543_v2 = vsel %vm8678_vm11, %v2538_v61, %v2542_v24  ;;  %3077 = vst [vmem:[#allocation4 + $0x1e8] sm:$0xf] %v2968_v40  ;;  %v2027_v28 = vld [vmem:[#allocation2 + $0x98] sm:$0x1]  ;;  %v5471_v30 = vpop.f32.mrf.mxu2  ;;  %v2545_v40 = vshrl.u32 %v2349_v14, 16  ;;  %6120 = vmatpush.bf16.msra.mxu2 %v8005_v1 }
 0x2bf   : > { %2805 = vst [vmem:[#allocation4 + $0x1e4] sm:$0xf] %v2543_v2  ;;  %v2177_v47 = vrot.slane %v2027_v28, 5  ;;  %5735 = vmatmul.bf16.gmra.mxu0 %v7273_v54  ;;  %v5472_v11 = vadd.f32 %v9105_v51, %v5471_v30  ;;  %v2350_v31 = vld [vmem:[#allocation2 + $0x64] sm:$0xf]  ;;  %v2548_v2 = vshll.u32 %v2349_v14, 16 }
 0x2c0   : > { %v2176_v50 = vrot.slane %v2174_v37, 4  ;;  %v2175_v12 = vsel %vm8855_vm14, %v6826_v55, %v2174_v37  ;;  %v2289_v28 = vld [vmem:[#allocation2 + $0xa0] sm:$0xf]  ;;  %2320 = vst [vmem:[#allocation4 + $0x36c] sm:$0xf] %v2288_v63  ;;  %v2547_v37 = vrot.slane %v2545_v40, 4 }
 0x2c1   : > { %v5560_v0 = vpop.f32.mrf.mxu3  ;;  %2256 = vst [vmem:[#allocation4 + $0x368] sm:$0xf] %v2175_v12  ;;  %v2550_v55 = vrot.slane %v2548_v2, 5  ;;  %v2554_v10 = vshll.u32 %v2350_v31, 16 }
 0x2c2   : > { %v2178_v24 = vsel %vm8855_vm14, %v2176_v50, %v2177_v47  ;;  %v9184_v54 = vadd.f32 %v5560_v0, %v5472_v11  ;;  %v7888_v50 = vld [vmem:[#allocation4 + $0x2f8] sm:$0xf0]  ;;  %2321 = vst [vmem:[#allocation4 + $0x390] sm:$0xf] %v2289_v28  ;;  %v2351_v47 = vld [vmem:[#allocation2 + $0x68] sm:$0x1] }
 0x2c3   : > { %v5599_v59 = vpop.f32.mrf.mxu1  ;;  %2257 = vst [vmem:[#allocation4 + $0x38c] sm:$0xf] %v2178_v24  ;;  %5789 = vmatmul.bf16.gmra.mxu2 %v7025_v9  ;;  %v2551_v30 = vor.u32 %v2550_v55, %v2547_v37  ;;  %v2558_v11 = vshrl.u32 %v2350_v31, 16  ;;  %v2564_v9 = vshll.u32 %v2351_v47, 16  ;;  %v2846_v0 = vld [vmem:[#allocation2 + $0x64] sm:$0xf]  ;;  %v7233_v24 = vor.u32 %v7888_v50, %v7232_v13 }
 0x2c4   : > { %v5600_v61 = vadd.f32 %v5599_v59, %v9081_v19  ;;  %v9189_v19 = vpop.f32.mrf.mxu0  ;;  %v2556_v59 = vrot.slane %v2554_v10, 5  ;;  %v2971_v40 = vrot.slane %v2846_v0, 5  ;;  %v7997_v31 = vld [vmem:[%s9990_s4 + $0x1e0] sm:$0xff]  ;;  %v2847_v55 = vld [vmem:[#allocation2 + $0x68] sm:$0x1]  ;;  %v6837_v50 = vrot.slane %v2845_v8, 9 }
 0x2c5   : > { %v2552_v14 = vrot.slane %v2551_v30, 4  ;;  %v2566_v28 = vrot.slane %v2564_v9, 5  ;;  %v2974_v47 = vrot.slane %v2847_v55, 5  ;;  %6031 = vmatpush.bf16.msra.mxu0 %v7997_v31  ;;  %v7840_v8 = vld [vmem:[#allocation4 + $0x17c] sm:$0xf] }
 0x2c6   : > { %v9187_v44 = vadd.f32 %v9120_v41, %v5600_v61  ;;  %5878 = vmatmul.bf16.gmra.mxu3 %v7029_v39  ;;  %v7989_v41 = vld [vmem:[%s9990_s4 + $0x1a0] sm:$0xff]  ;;  %v5474_v12 = vpop.f32.mrf.mxu2  ;;  %v2560_v61 = vrot.slane %v2558_v11, 4  ;;  %v2972_v0 = vsel %vm8855_vm14, %v6837_v50, %v2971_v40 }
 0x2c7   : > { %5942 = vmatpush.bf16.msrb.mxu1 %v7989_v41  ;;  %v5475_v2 = vadd.f32 %v9105_v51, %v5474_v12  ;;  %v2557_v37 = vsel %vm8678_vm11, %v2552_v14, %v2556_v59  ;;  %v7902_v10 = vld [vmem:[#allocation4 + $0x36c] sm:$0xf]  ;;  %v2973_v41 = vrot.slane %v2971_v40, 4  ;;  %v7844_v12 = vld [vmem:[#allocation4 + $0x198] sm:$0xf0] }
 0x2c8   : > { %v2561_v13 = vor.u32 %v2560_v61, %v2556_v59  ;;  %2806 = vst [vmem:[#allocation4 + $0x208] sm:$0xf] %v2557_v37  ;;  %v2029_v59 = vld [vmem:[#allocation2 + $0xa0] sm:$0xf]  ;;  %v7062_v14 = vld [vmem:[#allocation4 + $0x19c] sm:$0xf0] }
 0x2c9   : > { %v5563_v63 = vpop.f32.mrf.mxu3  ;;  %v7306_v11 = vld [vmem:[#allocation4 + $0x38c] sm:$0xf0]  ;;  %3078 = vst [vmem:[#allocation4 + $0x20c] sm:$0xf] %v2972_v0  ;;  %v7065_v0 = vor.u32 %v7840_v8, %v7062_v14  ;;  %v2354_v8 = vld [vmem:[#allocation2 + $0x74] sm:$0x1] }
 0x2ca   : > { %v9204_v1 = vadd.f32 %v5563_v63, %v5475_v2  ;;  %v2562_v9 = vrot.slane %v2561_v13, 4  ;;  %v7309_v2 = vor.u32 %v7902_v10, %v7306_v11  ;;  %v2030_v63 = vld [vmem:[#allocation2 + $0xa4] sm:$0x1] }
 0x2cb   : > { %v5602_v39 = vpop.f32.mrf.mxu1  ;;  %v2184_v37 = vrot.slane %v2030_v63, 5  ;;  %v2290_v63 = vld [vmem:[#allocation2 + $0xa8] sm:$0xf] }
 0x2cc   : > { %v5603_v7 = vadd.f32 %v5602_v39, %v9090_v15  ;;  %v7060_v15 = vld [vmem:[#allocation4 + $0x178] sm:$0xf]  ;;  %v9211_v61 = vpop.f32.mrf.mxu0  ;;  %v2975_v39 = vsel %vm8855_vm14, %v2973_v41, %v2974_v47  ;;  %v2352_v47 = vld [vmem:[#allocation2 + $0x6c] sm:$0xf]  ;;  %2322 = vst [vmem:[#allocation4 + $0x3b4] sm:$0xf] %v2290_v63 }
 0x2cd   : > { %3079 = vst [vmem:[#allocation4 + $0x230] sm:$0xf] %v2975_v39  ;;  %v7061_v11 = vor.u32 %v7844_v12, %v7060_v15  ;;  %v2353_v39 = vld [vmem:[#allocation2 + $0x70] sm:$0xf]  ;;  %v2291_v15 = vld [vmem:[#allocation2 + $0xac] sm:$0xf] }
 0x2ce   : > { %v9207_v30 = vadd.f32 %v9142_v46, %v5603_v7  ;;  %5641 = vmatmul.bf16.gmra.mxu1 %v7233_v24  ;;  %v2181_v7 = vrot.slane %v2029_v59, 5  ;;  %v2567_v46 = vsel %vm8678_vm11, %v2562_v9, %v2566_v28  ;;  %v2028_v24 = vld [vmem:[#allocation2 + $0x9c] sm:$0xe]  ;;  %v5476_v13 = vpop.f32.mrf.mxu2  ;;  %v7268_v59 = vld [vmem:[#allocation4 + $0x320] sm:$0xf] }
 0x2cf   : > { %2807 = vst [vmem:[#allocation4 + $0x22c] sm:$0xf] %v2567_v46  ;;  %v6827_v40 = vrot.slane %v2028_v24, 9  ;;  %5740 = vmatmul.bf16.gmra.mxu0 %v7309_v2  ;;  %v5477_v55 = vadd.f32 %v9105_v51, %v5476_v13  ;;  %v2569_v46 = vshrl.u32 %v2352_v47, 16  ;;  %v2572_v2 = vshll.u32 %v2352_v47, 16 }
 0x2d0   : > { %v2183_v31 = vrot.slane %v2181_v7, 4  ;;  %2323 = vst [vmem:[#allocation4 + $0x3d8] sm:$0xf] %v2291_v15  ;;  %v2582_v13 = vshrl.u32 %v2353_v39, 16 }
 0x2d1   : > { %v5565_v10 = vpop.f32.mrf.mxu3  ;;  %v2182_v41 = vsel %vm8855_vm14, %v6827_v40, %v2181_v7  ;;  %v7897_v7 = vld [vmem:[#allocation4 + $0x340] sm:$0xf0]  ;;  %v2571_v40 = vrot.slane %v2569_v46, 4 }
 0x2d2   : > { %v2185_v28 = vsel %vm8855_vm14, %v2183_v31, %v2184_v37  ;;  %2258 = vst [vmem:[#allocation4 + $0x3b0] sm:$0xf] %v2182_v41  ;;  %v9223_v24 = vadd.f32 %v5565_v10, %v5477_v55  ;;  %v2574_v31 = vrot.slane %v2572_v2, 5  ;;  %v2578_v37 = vshll.u32 %v2353_v39, 16  ;;  %v2849_v10 = vld [vmem:[#allocation2 + $0x70] sm:$0xf] }
 0x2d3   : > { %v5604_v50 = vpop.f32.mrf.mxu1  ;;  %2259 = vst [vmem:[#allocation4 + $0x3d4] sm:$0xf] %v2185_v28  ;;  %5794 = vmatmul.bf16.gmra.mxu2 %v7061_v11  ;;  %v7269_v55 = vor.u32 %v7897_v7, %v7268_v59  ;;  %v2584_v47 = vrot.slane %v2582_v13, 4  ;;  %v2850_v59 = vld [vmem:[#allocation2 + $0x74] sm:$0x1]  ;;  %v6838_v7 = vrot.slane %v2848_v6, 9 }
 0x2d4   : > { %v5605_v9 = vadd.f32 %v5604_v50, %v9116_v18  ;;  %v9228_v18 = vpop.f32.mrf.mxu0  ;;  %v2575_v14 = vor.u32 %v2574_v31, %v2571_v40  ;;  %v2588_v50 = vshll.u32 %v2354_v8, 16  ;;  %v7911_v31 = vld [vmem:[#allocation4 + $0x3b4] sm:$0xf]  ;;  %v7096_v13 = vld [vmem:[#allocation4 + $0x1c0] sm:$0xf] }
 0x2d5   : > { %v7098_v6 = vld [vmem:[#allocation4 + $0x1e4] sm:$0xf0] }
 0x2d6   : > { %v9226_v12 = vadd.f32 %v9159_v48, %v5605_v9  ;;  %5883 = vmatmul.bf16.gmra.mxu3 %v7065_v0  ;;  %v5479_v41 = vpop.f32.mrf.mxu2  ;;  %v2576_v28 = vrot.slane %v2575_v14, 4  ;;  %v2580_v48 = vrot.slane %v2578_v37, 5  ;;  %v2978_v9 = vrot.slane %v2849_v10, 5 }
 0x2d7   : > { %v5480_v46 = vadd.f32 %v9105_v51, %v5479_v41  ;;  %v2590_v63 = vrot.slane %v2588_v50, 5  ;;  %v2981_v14 = vrot.slane %v2850_v59, 5  ;;  %v7342_v50 = vld [vmem:[#allocation4 + $0x3d4] sm:$0xf0]  ;;  %v2032_v41 = vld [vmem:[#allocation2 + $0xac] sm:$0xf] }
 0x2d8   : > { %v2581_v0 = vsel %vm8678_vm11, %v2576_v28, %v2580_v48  ;;  %v2585_v39 = vor.u32 %v2584_v47, %v2580_v48  ;;  %v2980_v8 = vrot.slane %v2978_v9, 4  ;;  %v7853_v28 = vld [vmem:[#allocation4 + $0x1e0] sm:$0xf0] }
 0x2d9   : > { %v5568_v11 = vpop.f32.mrf.mxu3  ;;  %2808 = vst [vmem:[#allocation4 + $0x250] sm:$0xf] %v2581_v0  ;;  %v7849_v48 = vld [vmem:[#allocation4 + $0x1c4] sm:$0xf]  ;;  %v7097_v5 = vor.u32 %v7853_v28, %v7096_v13  ;;  %v7304_v28 = vld [vmem:[#allocation4 + $0x368] sm:$0xf] }
 0x2da   : > { %v9234_v40 = vadd.f32 %v5568_v11, %v5480_v46  ;;  %v2586_v10 = vrot.slane %v2585_v39, 4  ;;  %v7345_v46 = vor.u32 %v7911_v31, %v7342_v50  ;;  %v2031_v11 = vld [vmem:[#allocation2 + $0xa8] sm:$0xe] }
 0x2db   : > { %v5607_v2 = vpop.f32.mrf.mxu1 }
 0x2dc   : > { %v5608_v15 = vadd.f32 %v5607_v2, %v8914_v53  ;;  %v2979_v53 = vsel %vm8855_vm14, %v6838_v7, %v2978_v9  ;;  %v9241_v47 = vpop.f32.mrf.mxu0  ;;  %v2982_v2 = vsel %vm8855_vm14, %v2980_v8, %v2981_v14  ;;  %v6828_v9 = vrot.slane %v2031_v11, 9  ;;  %v2355_v14 = vld [vmem:[#allocation2 + $0x78] sm:$0xf]  ;;  %v2292_v11 = vld [vmem:[#allocation2 + $0xb4] sm:$0xf] }
 0x2dd   : > { %3080 = vst [vmem:[#allocation4 + $0x254] sm:$0xf] %v2979_v53  ;;  %v7101_v53 = vor.u32 %v7849_v48, %v7098_v6  ;;  %v8004_v48 = vld [vmem:[%s9990_s4 + $0x218] sm:$0xff] }
 0x2de   : > { %v9237_v37 = vadd.f32 %v9172_v29, %v5608_v15  ;;  %5646 = vmatmul.bf16.gmra.mxu1 %v7269_v55  ;;  %v2188_v29 = vrot.slane %v2032_v41, 5  ;;  %v2591_v55 = vsel %vm8678_vm11, %v2586_v10, %v2590_v63  ;;  %3081 = vst [vmem:[#allocation4 + $0x278] sm:$0xf] %v2982_v2  ;;  %v2033_v15 = vld [vmem:[#allocation2 + $0xb0] sm:$0x1]  ;;  %v5481_v59 = vpop.f32.mrf.mxu2  ;;  %v2593_v2 = vshrl.u32 %v2355_v14, 16  ;;  %6121 = vmatpush.bf16.msra.mxu2 %v8004_v48 }
 0x2df   : > { %2809 = vst [vmem:[#allocation4 + $0x274] sm:$0xf] %v2591_v55  ;;  %v2191_v39 = vrot.slane %v2033_v15, 5  ;;  %5745 = vmatmul.bf16.gmra.mxu0 %v7345_v46  ;;  %v5482_v7 = vadd.f32 %v9105_v51, %v5481_v59  ;;  %v2356_v41 = vld [vmem:[#allocation2 + $0x7c] sm:$0xf]  ;;  %v2596_v55 = vshll.u32 %v2355_v14, 16 }
 0x2e0   : > { %v2190_v0 = vrot.slane %v2188_v29, 4  ;;  %v2189_v8 = vsel %vm8855_vm14, %v6828_v9, %v2188_v29  ;;  %v2293_v15 = vld [vmem:[#allocation2 + $0xb8] sm:$0xf]  ;;  %2324 = vst [vmem:[#allocation4 + $0x3fc] sm:$0xf] %v2292_v11  ;;  %v2595_v29 = vrot.slane %v2593_v2, 4 }
 0x2e1   : > { %v5570_v50 = vpop.f32.mrf.mxu3  ;;  %2260 = vst [vmem:[#allocation4 + $0x3f8] sm:$0xf] %v2189_v8  ;;  %v2598_v9 = vrot.slane %v2596_v55, 5  ;;  %v2602_v6 = vshll.u32 %v2356_v41, 16 }
 0x2e2   : > { %v2192_v63 = vsel %vm8855_vm14, %v2190_v0, %v2191_v39  ;;  %v9253_v46 = vadd.f32 %v5570_v50, %v5482_v7  ;;  %v7906_v0 = vld [vmem:[#allocation4 + $0x388] sm:$0xf0]  ;;  %2325 = vst [vmem:[#allocation4 + $0x420] sm:$0xf] %v2293_v15  ;;  %v2357_v39 = vld [vmem:[#allocation2 + $0x80] sm:$0x1] }
 0x2e3   : > { %v5609_v31 = vpop.f32.mrf.mxu1  ;;  %2261 = vst [vmem:[#allocation4 + $0x41c] sm:$0xf] %v2192_v63  ;;  %5799 = vmatmul.bf16.gmra.mxu2 %v7097_v5  ;;  %v2599_v59 = vor.u32 %v2598_v9, %v2595_v29  ;;  %v2606_v7 = vshrl.u32 %v2356_v41, 16  ;;  %v2612_v5 = vshll.u32 %v2357_v39, 16  ;;  %v2852_v50 = vld [vmem:[#allocation2 + $0x7c] sm:$0xf]  ;;  %v7305_v63 = vor.u32 %v7906_v0, %v7304_v28 }
 0x2e4   : > { %v5610_v10 = vadd.f32 %v5609_v31, %v8926_v34  ;;  %v9258_v34 = vpop.f32.mrf.mxu0  ;;  %v2604_v31 = vrot.slane %v2602_v6, 5  ;;  %v2985_v2 = vrot.slane %v2852_v50, 5  ;;  %v7996_v41 = vld [vmem:[%s9990_s4 + $0x1d8] sm:$0xff]  ;;  %v2853_v9 = vld [vmem:[#allocation2 + $0x80] sm:$0x1]  ;;  %v6839_v0 = vrot.slane %v2851_v4, 9 }
 0x2e5   : > { %v2600_v14 = vrot.slane %v2599_v59, 4  ;;  %v2614_v15 = vrot.slane %v2612_v5, 5  ;;  %v2988_v39 = vrot.slane %v2853_v9, 5  ;;  %6032 = vmatpush.bf16.msra.mxu0 %v7996_v41  ;;  %v7858_v4 = vld [vmem:[#allocation4 + $0x20c] sm:$0xf] }
 0x2e6   : > { %v9256_v13 = vadd.f32 %v9189_v19, %v5610_v10  ;;  %5888 = vmatmul.bf16.gmra.mxu3 %v7101_v53  ;;  %v7988_v19 = vld [vmem:[%s9990_s4 + $0x198] sm:$0xff]  ;;  %v5484_v8 = vpop.f32.mrf.mxu2  ;;  %v2608_v10 = vrot.slane %v2606_v7, 4  ;;  %v2986_v50 = vsel %vm8855_vm14, %v6839_v0, %v2985_v2 }
 0x2e7   : > { %5943 = vmatpush.bf16.msrb.mxu1 %v7988_v19  ;;  %v5485_v55 = vadd.f32 %v9105_v51, %v5484_v8  ;;  %v2605_v29 = vsel %vm8678_vm11, %v2600_v14, %v2604_v31  ;;  %v7920_v6 = vld [vmem:[#allocation4 + $0x3fc] sm:$0xf]  ;;  %v2987_v19 = vrot.slane %v2985_v2, 4  ;;  %v7862_v8 = vld [vmem:[#allocation4 + $0x228] sm:$0xf0] }
 0x2e8   : > { %v2609_v28 = vor.u32 %v2608_v10, %v2604_v31  ;;  %2810 = vst [vmem:[#allocation4 + $0x298] sm:$0xf] %v2605_v29  ;;  %v2035_v31 = vld [vmem:[#allocation2 + $0xb8] sm:$0xf] }
 0x2e9   : > { %v5573_v11 = vpop.f32.mrf.mxu3  ;;  %v7378_v7 = vld [vmem:[#allocation4 + $0x41c] sm:$0xf0]  ;;  %v7134_v14 = vld [vmem:[#allocation4 + $0x22c] sm:$0xf0]  ;;  %3082 = vst [vmem:[#allocation4 + $0x29c] sm:$0xf] %v2986_v50 }
 0x2ea   : > { %v9273_v48 = vadd.f32 %v5573_v11, %v5485_v55  ;;  %v2610_v5 = vrot.slane %v2609_v28, 4  ;;  %v7381_v55 = vor.u32 %v7920_v6, %v7378_v7  ;;  %v2036_v11 = vld [vmem:[#allocation2 + $0xbc] sm:$0x1]  ;;  %v7137_v50 = vor.u32 %v7858_v4, %v7134_v14  ;;  %v2360_v4 = vld [vmem:[#allocation2 + $0x8c] sm:$0x1] }
 0x2eb   : > { %v5612_v53 = vpop.f32.mrf.mxu1  ;;  %v2198_v29 = vrot.slane %v2036_v11, 5  ;;  %v2294_v11 = vld [vmem:[#allocation2 + $0xc0] sm:$0xf]  ;;  %v8016_v14 = vld [vmem:[%s9992_s6 + $0x38] sm:$0xff] }
 0x2ec   : > { %v5613_v3 = vadd.f32 %v5612_v53, %v8933_v20  ;;  %v7132_v20 = vld [vmem:[#allocation4 + $0x208] sm:$0xf]  ;;  %v9280_v10 = vpop.f32.mrf.mxu0  ;;  %v2989_v53 = vsel %vm8855_vm14, %v2987_v19, %v2988_v39  ;;  %v2358_v39 = vld [vmem:[#allocation2 + $0x84] sm:$0xf]  ;;  %2326 = vst [vmem:[#allocation4 + $0x444] sm:$0xf] %v2294_v11  ;;  %6354 = vmatpush.bf16.msra.mxu3 %v8016_v14 }
 0x2ed   : > { %3083 = vst [vmem:[#allocation4 + $0x2c0] sm:$0xf] %v2989_v53  ;;  %v7133_v7 = vor.u32 %v7862_v8, %v7132_v20  ;;  %v2359_v53 = vld [vmem:[#allocation2 + $0x88] sm:$0xf]  ;;  %v2295_v20 = vld [vmem:[#allocation2 + $0xc4] sm:$0xf] }
 0x2ee   : > { %v9276_v59 = vadd.f32 %v9211_v61, %v5613_v3  ;;  %5651 = vmatmul.bf16.gmra.mxu1 %v7305_v63  ;;  %v2195_v3 = vrot.slane %v2035_v31, 5  ;;  %v2615_v61 = vsel %vm8678_vm11, %v2610_v5, %v2614_v15  ;;  %v2034_v63 = vld [vmem:[#allocation2 + $0xb4] sm:$0xe]  ;;  %v5486_v28 = vpop.f32.mrf.mxu2  ;;  %v7340_v31 = vld [vmem:[#allocation4 + $0x3b0] sm:$0xf] }
 0x2ef   : > { %2811 = vst [vmem:[#allocation4 + $0x2bc] sm:$0xf] %v2615_v61  ;;  %v6829_v2 = vrot.slane %v2034_v63, 9  ;;  %5750 = vmatmul.bf16.gmra.mxu0 %v7381_v55  ;;  %v5487_v9 = vadd.f32 %v9105_v51, %v5486_v28  ;;  %v2617_v61 = vshrl.u32 %v2358_v39, 16  ;;  %v2620_v55 = vshll.u32 %v2358_v39, 16 }
 0x2f0   : > { %v2197_v41 = vrot.slane %v2195_v3, 4  ;;  %2327 = vst [vmem:[#allocation4 + $0x468] sm:$0xf] %v2295_v20  ;;  %v2626_v28 = vshll.u32 %v2359_v53, 16  ;;  %v2854_v20 = vld [vmem:[#allocation2 + $0x84] sm:$0xe] }
 0x2f1   : > { %v5575_v6 = vpop.f32.mrf.mxu3  ;;  %v2196_v19 = vsel %vm8855_vm14, %v6829_v2, %v2195_v3  ;;  %v7915_v3 = vld [vmem:[#allocation4 + $0x3d0] sm:$0xf0]  ;;  %v2619_v2 = vrot.slane %v2617_v61, 4 }
 0x2f2   : > { %v2199_v15 = vsel %vm8855_vm14, %v2197_v41, %v2198_v29  ;;  %2262 = vst [vmem:[#allocation4 + $0x440] sm:$0xf] %v2196_v19  ;;  %v9292_v63 = vadd.f32 %v5575_v6, %v5487_v9  ;;  %v2622_v41 = vrot.slane %v2620_v55, 5  ;;  %v2630_v9 = vshrl.u32 %v2359_v53, 16  ;;  %v2855_v6 = vld [vmem:[#allocation2 + $0x88] sm:$0xf] }
 0x2f3   : > { %v5614_v0 = vpop.f32.mrf.mxu1  ;;  %2263 = vst [vmem:[#allocation4 + $0x464] sm:$0xf] %v2199_v15  ;;  %5804 = vmatmul.bf16.gmra.mxu2 %v7133_v7  ;;  %v2628_v39 = vrot.slane %v2626_v28, 5 }
 0x2f4   : > { %v5615_v5 = vadd.f32 %v5614_v0, %v8955_v52  ;;  %v9297_v52 = vpop.f32.mrf.mxu0  ;;  %v2623_v29 = vor.u32 %v2622_v41, %v2619_v2  ;;  %v7341_v0 = vor.u32 %v7915_v3, %v7340_v31  ;;  %v2632_v7 = vrot.slane %v2630_v9, 4  ;;  %v2856_v3 = vld [vmem:[#allocation2 + $0x8c] sm:$0x1]  ;;  %v7168_v9 = vld [vmem:[#allocation4 + $0x250] sm:$0xf] }
 0x2f5   : > { %v6840_v2 = vrot.slane %v2854_v20, 9 }
 0x2f6   : > { %v9295_v8 = vadd.f32 %v9228_v18, %v5615_v5  ;;  %5893 = vmatmul.bf16.gmra.mxu3 %v7137_v50  ;;  %v2636_v18 = vshll.u32 %v2360_v4, 16  ;;  %v5489_v19 = vpop.f32.mrf.mxu2  ;;  %v2624_v15 = vrot.slane %v2623_v29, 4  ;;  %v2992_v5 = vrot.slane %v2855_v6, 5  ;;  %v7929_v4 = vld [vmem:[#allocation4 + $0x444] sm:$0xf] }
 0x2f7   : > { %v5490_v61 = vadd.f32 %v9105_v51, %v5489_v19  ;;  %v2633_v31 = vor.u32 %v2632_v7, %v2628_v39  ;;  %v2995_v29 = vrot.slane %v2856_v3, 5  ;;  %v7414_v6 = vld [vmem:[#allocation4 + $0x464] sm:$0xf0]  ;;  %v7170_v7 = vld [vmem:[#allocation4 + $0x274] sm:$0xf0] }
 0x2f8   : > { %v2638_v11 = vrot.slane %v2636_v18, 5  ;;  %v2629_v53 = vsel %vm8678_vm11, %v2624_v15, %v2628_v39  ;;  %v2994_v14 = vrot.slane %v2992_v5, 4  ;;  %v7871_v18 = vld [vmem:[#allocation4 + $0x270] sm:$0xf0]  ;;  %v2993_v19 = vsel %vm8855_vm14, %v6840_v2, %v2992_v5  ;;  %v3161_v15 = vld [vmem:[#allocation2 + $0x18] sm:$0xf] }
 0x2f9   : > { %v5578_v50 = vpop.f32.mrf.mxu3  ;;  %2812 = vst [vmem:[#allocation4 + $0x2e0] sm:$0xf] %v2629_v53  ;;  %v7867_v39 = vld [vmem:[#allocation4 + $0x254] sm:$0xf]  ;;  %v3163_v53 = vld [vmem:[#allocation2 + $0x20] sm:$0x1] }
 0x2fa   : > { %v9306_v41 = vadd.f32 %v5578_v50, %v5490_v61  ;;  %v2996_v50 = vsel %vm8855_vm14, %v2994_v14, %v2995_v29  ;;  %3084 = vst [vmem:[#allocation4 + $0x2e4] sm:$0xf] %v2993_v19  ;;  %v7987_v3 = vld [vmem:[%s9990_s4 + $0x190] sm:$0xff] }
 0x2fb   : > { %v5617_v55 = vpop.f32.mrf.mxu1  ;;  %3085 = vst [vmem:[#allocation4 + $0x308] sm:$0xf] %v2996_v50  ;;  %5944 = vmatpush.bf16.msrb.mxu1 %v7987_v3  ;;  %v7995_v50 = vld [vmem:[%s9990_s4 + $0x1d0] sm:$0xff] }
 0x2fc   : > { %v5618_v33 = vadd.f32 %v5617_v55, %v8966_v22  ;;  %v2634_v22 = vrot.slane %v2633_v31, 4  ;;  %v9313_v61 = vpop.f32.mrf.mxu0  ;;  %v7417_v55 = vor.u32 %v7929_v4, %v7414_v6  ;;  %v3229_v6 = vshll.u32 %v3163_v53, 16  ;;  %6033 = vmatpush.bf16.msra.mxu0 %v7995_v50 }
 0x2fe   : > { %v9309_v28 = vadd.f32 %v9241_v47, %v5618_v33  ;;  %5656 = vmatmul.bf16.gmra.mxu1 %v7341_v0  ;;  %v3162_v33 = vld [vmem:[#allocation2 + $0x1c] sm:$0xf]  ;;  %v3210_v47 = vshrl.u32 %v3161_v15, 16  ;;  %v3213_v0 = vshll.u32 %v3161_v15, 16  ;;  %v2639_v20 = vsel %vm8678_vm11, %v2634_v22, %v2638_v11  ;;  %v5491_v14 = vpop.f32.mrf.mxu2 }
 0x2ff   : > { %v3219_v31 = vshll.u32 %v3162_v33, 16  ;;  %v3223_v5 = vshrl.u32 %v3162_v33, 16  ;;  %2813 = vst [vmem:[#allocation4 + $0x304] sm:$0xf] %v2639_v20  ;;  %5755 = vmatmul.bf16.gmra.mxu0 %v7417_v55  ;;  %v5492_v15 = vadd.f32 %v9105_v51, %v5491_v14  ;;  %v7169_v22 = vor.u32 %v7871_v18, %v7168_v9  ;;  %v3097_v33 = vld [vmem:[#allocation2 + $0x18] sm:$0xf] }
 0x300   : > { %v3212_v2 = vrot.slane %v3210_v47, 4  ;;  %v3215_v4 = vrot.slane %v3213_v0, 5  ;;  %v7173_v0 = vor.u32 %v7867_v39, %v7170_v7  ;;  %3129 = vst [vmem:[#allocation4 + $0x18] sm:$0xf] %v3097_v33  ;;  %v3231_v53 = vrot.slane %v3229_v6, 5  ;;  %v7986_v51 = vld [vmem:[%s9990_s4 + $0x188] sm:$0xff]  ;;  %6034 = vmatpush.bf16.msra.mxu0 %v7994_v27 }
 0x301   : > { %v3221_v29 = vrot.slane %v3219_v31, 5  ;;  %v3225_v19 = vrot.slane %v3223_v5, 4  ;;  %v5580_v11 = vpop.f32.mrf.mxu3  ;;  %v2361_v31 = vld [vmem:[#allocation2 + $0x90] sm:$0xf]  ;;  %v2362_v18 = vld [vmem:[#allocation2 + $0x94] sm:$0xf]  ;;  %5945 = vmatpush.bf16.msrb.mxu1 %v7986_v51 }
 0x302   : > { %v3216_v20 = vor.u32 %v3215_v4, %v3212_v2  ;;  %v9327_v5 = vadd.f32 %v5580_v11, %v5492_v15  ;;  %v7376_v2 = vld [vmem:[#allocation4 + $0x3f8] sm:$0xf]  ;;  %v2644_v39 = vshll.u32 %v2361_v31, 16  ;;  %v7924_v7 = vld [vmem:[#allocation4 + $0x418] sm:$0xf0]  ;;  %v8003_v6 = vld [vmem:[%s9990_s4 + $0x210] sm:$0xff] }
 0x303   : > { %v5619_v45 = vpop.f32.mrf.mxu1  ;;  %v3226_v55 = vor.u32 %v3225_v19, %v3221_v29  ;;  %5809 = vmatmul.bf16.gmra.mxu2 %v7169_v22  ;;  %v2650_v14 = vshll.u32 %v2362_v18, 16  ;;  %v2654_v19 = vshrl.u32 %v2362_v18, 16  ;;  %v2363_v11 = vld [vmem:[#allocation2 + $0x98] sm:$0x1]  ;;  %v7985_v22 = vld [vmem:[%s9990_s4 + $0x180] sm:$0xff] }
 0x304   : > { %v5620_v47 = vadd.f32 %v5619_v45, %v8989_v58  ;;  %10047 = vst [vmem:[#allocation30_spill] sm:$0xff] %v9327_v5  ;;  %v3217_v9 = vrot.slane %v3216_v20, 4  ;;  %v2641_v58 = vshrl.u32 %v2361_v31, 16  ;;  %v9335_v4 = vpop.f32.mrf.mxu0  ;;  %6122 = vmatpush.bf16.msra.mxu2 %v8003_v6  ;;  %v2646_v33 = vrot.slane %v2644_v39, 5  ;;  %v7993_v18 = vld [vmem:[%s9990_s4 + $0x1c0] sm:$0xff] }
 0x305   : > { %v3227_v45 = vrot.slane %v3226_v55, 4  ;;  %v2652_v20 = vrot.slane %v2650_v14, 5  ;;  %v2656_v55 = vrot.slane %v2654_v19, 4  ;;  %v2660_v31 = vshll.u32 %v2363_v11, 16  ;;  %5946 = vmatpush.bf16.msrb.mxu1 %v7985_v22  ;;  %v2857_v6 = vld [vmem:[#allocation2 + $0x90] sm:$0xe]  ;;  %6035 = vmatpush.bf16.msra.mxu0 %v7993_v18 }
 0x306   : > { %v9333_v3 = vadd.f32 %v9258_v34, %v5620_v47  ;;  %v3222_v34 = vsel %vm8678_vm11, %v3217_v9, %v3221_v29  ;;  %5898 = vmatmul.bf16.gmra.mxu3 %v7173_v0  ;;  %v2643_v50 = vrot.slane %v2641_v58, 4  ;;  %v5770_v47 = vpop.f32.mrf.mxu2  ;;  %v7377_v29 = vor.u32 %v7924_v7, %v7376_v2  ;;  %v2858_v0 = vld [vmem:[#allocation2 + $0x94] sm:$0xf]  ;;  %v2859_v2 = vld [vmem:[#allocation2 + $0x98] sm:$0x1] }
 0x307   : > { %v3232_v15 = vsel %vm8678_vm11, %v3227_v45, %v3231_v53  ;;  %3625 = vst [vmem:[#allocation4 + $0x1c] sm:$0xf] %v3222_v34  ;;  %v5771_v53 = vadd.f32 %v5770_v47, %v9138_v60  ;;  %v2999_v27 = vrot.slane %v2858_v0, 5  ;;  %v2657_v39 = vor.u32 %v2656_v55, %v2652_v20  ;;  %v7204_v22 = vld [vmem:[#allocation4 + $0x298] sm:$0xf] }
 0x308   : > { %3626 = vst [vmem:[#allocation4 + $0x40] sm:$0xf] %v3232_v15  ;;  %v2647_v45 = vor.u32 %v2646_v33, %v2643_v50  ;;  %v2662_v34 = vrot.slane %v2660_v31, 5  ;;  %v6841_v7 = vrot.slane %v2857_v6, 9  ;;  %v3164_v15 = vld [vmem:[#allocation2 + $0x24] sm:$0xf] }
 0x309   : > { %v5859_v9 = vpop.f32.mrf.mxu3  ;;  %v3001_v60 = vrot.slane %v2999_v27, 4  ;;  %v7880_v50 = vld [vmem:[#allocation4 + $0x2b8] sm:$0xf0]  ;;  %v2658_v33 = vrot.slane %v2657_v39, 4  ;;  %v3002_v47 = vrot.slane %v2859_v2, 5  ;;  %v3237_v18 = vshll.u32 %v3164_v15, 16 }
 0x30a   : > { %v9355_v14 = vadd.f32 %v5859_v9, %v5771_v53  ;;  %v2648_v19 = vrot.slane %v2647_v45, 4  ;;  %v3165_v55 = vld [vmem:[#allocation2 + $0x28] sm:$0xf]  ;;  %v7876_v31 = vld [vmem:[#allocation4 + $0x29c] sm:$0xf]  ;;  %v7205_v5 = vor.u32 %v7880_v50, %v7204_v22 }
 0x30b   : > { %v5622_v51 = vpop.f32.mrf.mxu1  ;;  %v7206_v0 = vld [vmem:[#allocation4 + $0x2bc] sm:$0xf0]  ;;  %v2663_v45 = vsel %vm8678_vm11, %v2658_v33, %v2662_v34  ;;  %v3003_v6 = vsel %vm8855_vm14, %v3001_v60, %v3002_v47  ;;  %v3239_v2 = vrot.slane %v3237_v18, 5  ;;  %v3099_v34 = vld [vmem:[#allocation2 + $0x24] sm:$0xf] }
 0x30c   : > { %v5623_v58 = vadd.f32 %v5622_v51, %v9005_v36  ;;  %10048 = vst [vmem:[#allocation31_spill] sm:$0xff] %v9355_v14  ;;  %v3000_v36 = vsel %vm8855_vm14, %v6841_v7, %v2999_v27  ;;  %v9362_v51 = vpop.f32.mrf.mxu0  ;;  %v2653_v9 = vsel %vm8678_vm11, %v2648_v19, %v2652_v20  ;;  %v3166_v27 = vld [vmem:[#allocation2 + $0x2c] sm:$0x1]  ;;  %v3243_v7 = vshll.u32 %v3165_v55, 16  ;;  %v3100_v33 = vld [vmem:[#allocation2 + $0x28] sm:$0xf] }
 0x30d   : > { %3086 = vst [vmem:[#allocation4 + $0x32c] sm:$0xf] %v3000_v36  ;;  %v3247_v20 = vshrl.u32 %v3165_v55, 16  ;;  %v3253_v19 = vshll.u32 %v3166_v27, 16  ;;  %v7412_v22 = vld [vmem:[#allocation4 + $0x440] sm:$0xf] }
 0x30e   : > { %v9358_v11 = vadd.f32 %v9280_v10, %v5623_v58  ;;  %5661 = vmatmul.bf16.gmra.mxu1 %v7377_v29  ;;  %v7796_v53 = vld [vmem:[#allocation4 + $0x1c] sm:$0xf]  ;;  %v3234_v10 = vshrl.u32 %v3164_v15, 16  ;;  %2814 = vst [vmem:[#allocation4 + $0x328] sm:$0xf] %v2653_v9  ;;  %v5772_v26 = vpop.f32.mrf.mxu2  ;;  %v3245_v60 = vrot.slane %v3243_v7, 5 }
 0x30f   : > { %v6890_v29 = vld [vmem:[#allocation4 + $0x3c] sm:$0xf0]  ;;  %2815 = vst [vmem:[#allocation4 + $0x34c] sm:$0xf] %v2663_v45  ;;  %v5773_v15 = vadd.f32 %v5772_v26, %v9157_v17  ;;  %v3255_v18 = vrot.slane %v3253_v19, 5 }
 0x310   : > { %v6893_v58 = vor.u32 %v7796_v53, %v6890_v29  ;;  %v3236_v39 = vrot.slane %v3234_v10, 4  ;;  %3087 = vst [vmem:[#allocation4 + $0x350] sm:$0xf] %v3003_v6  ;;  %v7209_v53 = vor.u32 %v7876_v31, %v7206_v0  ;;  %v3249_v10 = vrot.slane %v3247_v20, 4  ;;  %v2364_v29 = vld [vmem:[#allocation2 + $0x9c] sm:$0xf] }
 0x311   : > { %v5861_v14 = vpop.f32.mrf.mxu3  ;;  %3131 = vst [vmem:[#allocation4 + $0x60] sm:$0xf] %v3099_v34  ;;  %v2365_v6 = vld [vmem:[#allocation2 + $0xa0] sm:$0xf]  ;;  %v2665_v26 = vshrl.u32 %v2364_v29, 16  ;;  %v2668_v27 = vshll.u32 %v2364_v29, 16 }
 0x312   : > { %6036 = vmatmul.bf16.vlgmr.msra.gmra.mxu0 %v6893_v58  ;;  %v3240_v9 = vor.u32 %v3239_v2, %v3236_v39  ;;  %v9372_v45 = vadd.f32 %v5861_v14, %v5773_v15  ;;  %3132 = vst [vmem:[#allocation4 + $0x84] sm:$0xf] %v3100_v33  ;;  %v3250_v50 = vor.u32 %v3249_v10, %v3245_v60  ;;  %v2674_v58 = vshll.u32 %v2365_v6, 16  ;;  %v2366_v14 = vld [vmem:[#allocation2 + $0xa4] sm:$0x1] }
 0x313   : > { %v5624_v36 = vpop.f32.mrf.mxu1  ;;  %5814 = vmatmul.bf16.gmra.mxu2 %v7205_v5  ;;  %v2667_v39 = vrot.slane %v2665_v26, 4  ;;  %v2678_v2 = vshrl.u32 %v2365_v6, 16  ;;  %v2670_v20 = vrot.slane %v2668_v27, 5  ;;  %v2684_v33 = vshll.u32 %v2366_v14, 16  ;;  %v2860_v29 = vld [vmem:[#allocation2 + $0x9c] sm:$0xe] }
 0x314   : > { %v5625_v47 = vadd.f32 %v5624_v36, %v9020_v21  ;;  %10049 = vst [vmem:[#allocation32_spill] sm:$0xff] %v9372_v45  ;;  %v3241_v55 = vrot.slane %v3240_v9, 4  ;;  %v7933_v21 = vld [vmem:[#allocation4 + $0x460] sm:$0xf0]  ;;  %v9377_v31 = vpop.f32.mrf.mxu0  ;;  %v3251_v7 = vrot.slane %v3250_v50, 4  ;;  %v2676_v19 = vrot.slane %v2674_v58, 5 }
 0x315   : > { %v2680_v36 = vrot.slane %v2678_v2, 4  ;;  %v7413_v15 = vor.u32 %v7933_v21, %v7412_v22  ;;  %v2686_v26 = vrot.slane %v2684_v33, 5  ;;  %v2862_v50 = vld [vmem:[#allocation2 + $0xa4] sm:$0x1]  ;;  %v6842_v27 = vrot.slane %v2860_v29, 9 }
 0x316   : > { %v9375_v17 = vadd.f32 %v9297_v52, %v5625_v47  ;;  %v3246_v0 = vsel %vm8678_vm11, %v3241_v55, %v3245_v60  ;;  %5903 = vmatmul.bf16.gmra.mxu3 %v7209_v53  ;;  %v8015_v52 = vld [vmem:[%s9992_s6 + $0x30] sm:$0xff]  ;;  %v5775_v5 = vpop.f32.mrf.mxu2  ;;  %v3256_v34 = vsel %vm8678_vm11, %v3251_v7, %v3255_v18  ;;  %v2671_v53 = vor.u32 %v2670_v20, %v2667_v39  ;;  %v2861_v55 = vld [vmem:[#allocation2 + $0xa0] sm:$0xf]  ;;  %v7889_v7 = vld [vmem:[#allocation4 + $0x300] sm:$0xf0] }
 0x317   : > { %3627 = vst [vmem:[#allocation4 + $0x64] sm:$0xf] %v3246_v0  ;;  %6355 = vmatpush.bf16.msra.mxu3 %v8015_v52  ;;  %v5776_v60 = vadd.f32 %v5775_v5, %v9168_v32  ;;  %v2681_v10 = vor.u32 %v2680_v36, %v2676_v19  ;;  %v3167_v18 = vld [vmem:[#allocation2 + $0x30] sm:$0xf]  ;;  %v3168_v0 = vld [vmem:[#allocation2 + $0x34] sm:$0xf] }
 0x318   : > { %3628 = vst [vmem:[#allocation4 + $0x88] sm:$0xf] %v3256_v34  ;;  %v2672_v58 = vrot.slane %v2671_v53, 4  ;;  %v7240_v32 = vld [vmem:[#allocation4 + $0x2e0] sm:$0xf]  ;;  %v3006_v39 = vrot.slane %v2861_v55, 5 }
 0x319   : > { %v5864_v47 = vpop.f32.mrf.mxu3  ;;  %v2682_v21 = vrot.slane %v2681_v10, 4  ;;  %v3009_v2 = vrot.slane %v2862_v50, 5  ;;  %v3258_v52 = vshrl.u32 %v3167_v18, 16  ;;  %v7885_v20 = vld [vmem:[#allocation4 + $0x2e4] sm:$0xf]  ;;  %v3271_v29 = vshrl.u32 %v3168_v0, 16 }
 0x31a   : > { %v9388_v22 = vadd.f32 %v5864_v47, %v5776_v60  ;;  %v2677_v34 = vsel %vm8678_vm11, %v2672_v58, %v2676_v19  ;;  %v3008_v60 = vrot.slane %v3006_v39, 4  ;;  %v3169_v47 = vld [vmem:[#allocation2 + $0x38] sm:$0x1] }
 0x31b   : > { %v5627_v9 = vpop.f32.mrf.mxu1  ;;  %v2687_v33 = vsel %vm8678_vm11, %v2682_v21, %v2686_v26  ;;  %2816 = vst [vmem:[#allocation4 + $0x370] sm:$0xf] %v2677_v34  ;;  %v3260_v53 = vrot.slane %v3258_v52, 4  ;;  %v3277_v55 = vshll.u32 %v3169_v47, 16  ;;  %v7241_v34 = vor.u32 %v7889_v7, %v7240_v32  ;;  %v3102_v52 = vld [vmem:[#allocation2 + $0x34] sm:$0xf] }
 0x31c   : > { %v5628_v6 = vadd.f32 %v5627_v9, %v9029_v43  ;;  %10050 = vst [vmem:[#allocation33_spill] sm:$0xff] %v9388_v22  ;;  %v7242_v43 = vld [vmem:[#allocation4 + $0x304] sm:$0xf0]  ;;  %v9393_v36 = vpop.f32.mrf.mxu0  ;;  %v3261_v9 = vshll.u32 %v3167_v18, 16  ;;  %v3010_v19 = vsel %vm8855_vm14, %v3008_v60, %v3009_v2  ;;  %v3273_v47 = vrot.slane %v3271_v29, 4 }
 0x31d   : > { %2817 = vst [vmem:[#allocation4 + $0x394] sm:$0xf] %v2687_v33  ;;  %v3279_v45 = vrot.slane %v3277_v55, 5  ;;  %v2367_v22 = vld [vmem:[#allocation2 + $0xa8] sm:$0xf] }
 0x31e   : > { %v9391_v14 = vadd.f32 %v9313_v61, %v5628_v6  ;;  %5666 = vmatmul.bf16.gmra.mxu1 %v7413_v15  ;;  %v7805_v5 = vld [vmem:[#allocation4 + $0x64] sm:$0xf]  ;;  %v3267_v61 = vshll.u32 %v3168_v0, 16  ;;  %v3007_v15 = vsel %vm8855_vm14, %v6842_v27, %v3006_v39  ;;  %v3263_v10 = vrot.slane %v3261_v9, 5  ;;  %v5777_v6 = vpop.f32.mrf.mxu2  ;;  %3089 = vst [vmem:[#allocation4 + $0x398] sm:$0xf] %v3010_v19 }
 0x31f   : > { %v6926_v50 = vld [vmem:[#allocation4 + $0x84] sm:$0xf0]  ;;  %3088 = vst [vmem:[#allocation4 + $0x374] sm:$0xf] %v3007_v15  ;;  %v5778_v21 = vadd.f32 %v5777_v6, %v9187_v44  ;;  %v7245_v9 = vor.u32 %v7885_v20, %v7242_v43  ;;  %v2368_v44 = vld [vmem:[#allocation2 + $0xac] sm:$0xf] }
 0x320   : > { %v3269_v26 = vrot.slane %v3267_v61, 5  ;;  %v6929_v27 = vor.u32 %v7805_v5, %v6926_v50  ;;  %v3101_v39 = vld [vmem:[#allocation2 + $0x30] sm:$0xf]  ;;  %v3264_v33 = vor.u32 %v3263_v10, %v3260_v53  ;;  %3134 = vst [vmem:[#allocation4 + $0xcc] sm:$0xf] %v3102_v52  ;;  %v2689_v15 = vshrl.u32 %v2367_v22, 16 }
 0x321   : > { %v5866_v18 = vpop.f32.mrf.mxu3  ;;  %3133 = vst [vmem:[#allocation4 + $0xa8] sm:$0xf] %v3101_v39  ;;  %v6888_v7 = vld [vmem:[#allocation4 + $0x18] sm:$0xf]  ;;  %v2692_v60 = vshll.u32 %v2367_v22, 16  ;;  %v2698_v53 = vshll.u32 %v2368_v44, 16 }
 0x322   : > { %v9405_v2 = vadd.f32 %v5866_v18, %v5778_v21  ;;  %6041 = vmatmul.bf16.gmra.mxu0 %v6929_v27  ;;  %v3265_v61 = vrot.slane %v3264_v33, 4  ;;  %v3274_v5 = vor.u32 %v3273_v47, %v3269_v26  ;;  %v8002_v43 = vld [vmem:[%s9990_s4 + $0x208] sm:$0xff]  ;;  %v2369_v29 = vld [vmem:[#allocation2 + $0xb0] sm:$0x1]  ;;  %v2691_v55 = vrot.slane %v2689_v15, 4 }
 0x323   : > { %v5629_v58 = vpop.f32.mrf.mxu1  ;;  %5819 = vmatmul.bf16.gmra.mxu2 %v7241_v34  ;;  %v2694_v6 = vrot.slane %v2692_v60, 5  ;;  %v2700_v22 = vrot.slane %v2698_v53, 5  ;;  %v2702_v50 = vshrl.u32 %v2368_v44, 16  ;;  %v2708_v19 = vshll.u32 %v2369_v29, 16  ;;  %v2864_v27 = vld [vmem:[#allocation2 + $0xac] sm:$0xf] }
 0x324   : > { %v5630_v0 = vadd.f32 %v5629_v58, %v9046_v25  ;;  %v7800_v25 = vld [vmem:[#allocation4 + $0x38] sm:$0xf0]  ;;  %v9410_v20 = vpop.f32.mrf.mxu0  ;;  %v3270_v10 = vsel %vm8678_vm11, %v3265_v61, %v3269_v26  ;;  %6123 = vmatpush.bf16.msra.mxu2 %v8002_v43  ;;  %v2863_v47 = vld [vmem:[#allocation2 + $0xa8] sm:$0xe]  ;;  %v3013_v61 = vrot.slane %v2864_v27, 5 }
 0x325   : > { %3629 = vst [vmem:[#allocation4 + $0xac] sm:$0xf] %v3270_v10  ;;  %v6889_v21 = vor.u32 %v7800_v25, %v6888_v7  ;;  %v2695_v34 = vor.u32 %v2694_v6, %v2691_v55  ;;  %v2704_v33 = vrot.slane %v2702_v50, 4  ;;  %v7276_v15 = vld [vmem:[#allocation4 + $0x328] sm:$0xf] }
 0x326   : > { %v9408_v32 = vadd.f32 %v9335_v4, %v5630_v0  ;;  %5908 = vmatmul.bf16.gmra.mxu3 %v7245_v9  ;;  %v3275_v4 = vrot.slane %v3274_v5, 4  ;;  %v5780_v58 = vpop.f32.mrf.mxu2  ;;  %v2710_v5 = vrot.slane %v2708_v19, 5  ;;  %v2865_v60 = vld [vmem:[#allocation2 + $0xb0] sm:$0x1]  ;;  %v3170_v53 = vld [vmem:[#allocation2 + $0x3c] sm:$0xf] }
 0x327   : > { %v5781_v26 = vadd.f32 %v5780_v58, %v9207_v30  ;;  %v2696_v9 = vrot.slane %v2695_v34, 4  ;;  %v2705_v7 = vor.u32 %v2704_v33, %v2700_v22  ;;  %v7898_v30 = vld [vmem:[#allocation4 + $0x348] sm:$0xf0]  ;;  %v3016_v10 = vrot.slane %v2865_v60, 5  ;;  %v3171_v29 = vld [vmem:[#allocation2 + $0x40] sm:$0xf] }
 0x328   : > { %v3280_v18 = vsel %vm8678_vm11, %v3275_v4, %v3279_v45  ;;  %v6843_v45 = vrot.slane %v2863_v47, 9  ;;  %v7894_v55 = vld [vmem:[#allocation4 + $0x32c] sm:$0xf]  ;;  %v7278_v4 = vld [vmem:[#allocation4 + $0x34c] sm:$0xf0]  ;;  %v3291_v34 = vshll.u32 %v3171_v29, 16 }
 0x329   : > { %v5869_v52 = vpop.f32.mrf.mxu3  ;;  %3630 = vst [vmem:[#allocation4 + $0xd0] sm:$0xf] %v3280_v18  ;;  %v2701_v43 = vsel %vm8678_vm11, %v2696_v9, %v2700_v22  ;;  %v2706_v19 = vrot.slane %v2705_v7, 4  ;;  %v3172_v18 = vld [vmem:[#allocation2 + $0x44] sm:$0x1]  ;;  %v3285_v22 = vshll.u32 %v3170_v53, 16 }
 0x32a   : > { %v9421_v44 = vadd.f32 %v5869_v52, %v5781_v26  ;;  %2818 = vst [vmem:[#allocation4 + $0x3b8] sm:$0xf] %v2701_v43  ;;  %v3014_v58 = vsel %vm8855_vm14, %v6843_v45, %v3013_v61  ;;  %v3295_v26 = vshrl.u32 %v3171_v29, 16  ;;  %v3301_v52 = vshll.u32 %v3172_v18, 16 }
 0x32b   : > { %v5632_v39 = vpop.f32.mrf.mxu1  ;;  %3090 = vst [vmem:[#allocation4 + $0x3bc] sm:$0xf] %v3014_v58  ;;  %v2711_v27 = vsel %vm8678_vm11, %v2706_v19, %v2710_v5  ;;  %v3287_v47 = vrot.slane %v3285_v22, 5  ;;  %v7281_v19 = vor.u32 %v7894_v55, %v7278_v4  ;;  %v6924_v22 = vld [vmem:[#allocation4 + $0x60] sm:$0xf] }
 0x32c   : > { %v5633_v0 = vadd.f32 %v5632_v39, %v9064_v23  ;;  %v3015_v23 = vrot.slane %v3013_v61, 4  ;;  %v9428_v6 = vpop.f32.mrf.mxu0  ;;  %v7814_v50 = vld [vmem:[#allocation4 + $0xac] sm:$0xf]  ;;  %2819 = vst [vmem:[#allocation4 + $0x3dc] sm:$0xf] %v2711_v27  ;;  %v3293_v61 = vrot.slane %v3291_v34, 5 }
 0x32d   : > { %v3303_v58 = vrot.slane %v3301_v52, 5 }
 0x32e   : > { %v9424_v25 = vadd.f32 %v9362_v51, %v5633_v0  ;;  %5947 = vmatmul.bf16.vlgmr.msrb.gmra.mxu1 %v6889_v21  ;;  %v3282_v51 = vshrl.u32 %v3170_v53, 16  ;;  %v3017_v21 = vsel %vm8855_vm14, %v3015_v23, %v3016_v10  ;;  %v5782_v33 = vpop.f32.mrf.mxu2  ;;  %v7277_v0 = vor.u32 %v7898_v30, %v7276_v15  ;;  %v3103_v53 = vld [vmem:[#allocation2 + $0x3c] sm:$0xf]  ;;  %v3104_v23 = vld [vmem:[#allocation2 + $0x40] sm:$0xf] }
 0x32f   : > { %3091 = vst [vmem:[#allocation4 + $0x3e0] sm:$0xf] %v3017_v21  ;;  %v5783_v60 = vadd.f32 %v5782_v33, %v9226_v12  ;;  %v3297_v10 = vrot.slane %v3295_v26, 4  ;;  %v2371_v15 = vld [vmem:[#allocation2 + $0xb8] sm:$0xf]  ;;  %v8014_v33 = vld [vmem:[%s9992_s6 + $0x28] sm:$0xff] }
 0x330   : > { %v3284_v39 = vrot.slane %v3282_v51, 4  ;;  %v6962_v9 = vld [vmem:[#allocation4 + $0xcc] sm:$0xf0]  ;;  %3135 = vst [vmem:[#allocation4 + $0xf0] sm:$0xf] %v3103_v53  ;;  %v2722_v27 = vshll.u32 %v2371_v15, 16  ;;  %6356 = vmatpush.bf16.msra.mxu3 %v8014_v33 }
 0x331   : > { %v5871_v45 = vpop.f32.mrf.mxu3  ;;  %v6965_v43 = vor.u32 %v7814_v50, %v6962_v9  ;;  %v2370_v51 = vld [vmem:[#allocation2 + $0xb4] sm:$0xf]  ;;  %3136 = vst [vmem:[#allocation4 + $0x114] sm:$0xf] %v3104_v23  ;;  %v3298_v21 = vor.u32 %v3297_v10, %v3293_v61  ;;  %v2726_v26 = vshrl.u32 %v2371_v15, 16 }
 0x332   : > { %v3288_v29 = vor.u32 %v3287_v47, %v3284_v39  ;;  %v9438_v30 = vadd.f32 %v5871_v45, %v5783_v60  ;;  %v2713_v18 = vshrl.u32 %v2370_v51, 16  ;;  %v2716_v12 = vshll.u32 %v2370_v51, 16  ;;  %v2372_v39 = vld [vmem:[#allocation2 + $0xbc] sm:$0x1]  ;;  %v2867_v10 = vld [vmem:[#allocation2 + $0xb8] sm:$0xf] }
 0x333   : > { %v5634_v7 = vpop.f32.mrf.mxu1  ;;  %6046 = vmatmul.bf16.gmra.mxu0 %v6965_v43  ;;  %5824 = vmatmul.bf16.gmra.mxu2 %v7277_v0  ;;  %v3299_v4 = vrot.slane %v3298_v21, 4  ;;  %v2724_v47 = vrot.slane %v2722_v27, 5  ;;  %v2732_v60 = vshll.u32 %v2372_v39, 16  ;;  %v2866_v51 = vld [vmem:[#allocation2 + $0xb4] sm:$0xe]  ;;  %v3020_v15 = vrot.slane %v2867_v10, 5 }
 0x334   : > { %v5635_v5 = vadd.f32 %v5634_v7, %v9083_v35  ;;  %v3289_v34 = vrot.slane %v3288_v29, 4  ;;  %v7809_v35 = vld [vmem:[#allocation4 + $0x80] sm:$0xf0]  ;;  %v9443_v55 = vpop.f32.mrf.mxu0  ;;  %v2715_v52 = vrot.slane %v2713_v18, 4  ;;  %v2718_v9 = vrot.slane %v2716_v12, 5 }
 0x335   : > { %v2728_v7 = vrot.slane %v2726_v26, 4  ;;  %v3304_v0 = vsel %vm8678_vm11, %v3299_v4, %v3303_v58  ;;  %v6925_v43 = vor.u32 %v7809_v35, %v6924_v22  ;;  %v2868_v12 = vld [vmem:[#allocation2 + $0xbc] sm:$0x1]  ;;  %v6844_v22 = vrot.slane %v2866_v51, 9  ;;  %v3173_v26 = vld [vmem:[#allocation2 + $0x48] sm:$0xf] }
 0x336   : > { %v9441_v50 = vadd.f32 %v9377_v31, %v5635_v5  ;;  %5913 = vmatmul.bf16.gmra.mxu3 %v7281_v19  ;;  %v3294_v31 = vsel %vm8678_vm11, %v3289_v34, %v3293_v61  ;;  %v5785_v45 = vpop.f32.mrf.mxu2  ;;  %3632 = vst [vmem:[#allocation4 + $0x118] sm:$0xf] %v3304_v0  ;;  %v2719_v53 = vor.u32 %v2718_v9, %v2715_v52  ;;  %v2734_v61 = vrot.slane %v2732_v60, 5  ;;  %v3174_v35 = vld [vmem:[#allocation2 + $0x4c] sm:$0xf] }
 0x337   : > { %3631 = vst [vmem:[#allocation4 + $0xf4] sm:$0xf] %v3294_v31  ;;  %v2729_v23 = vor.u32 %v2728_v7, %v2724_v47  ;;  %v5786_v19 = vadd.f32 %v5785_v45, %v9237_v37  ;;  %v3022_v27 = vrot.slane %v3020_v15, 4  ;;  %v7312_v37 = vld [vmem:[#allocation4 + $0x370] sm:$0xf]  ;;  %v3023_v33 = vrot.slane %v2868_v12, 5 }
 0x338   : > { %v2720_v18 = vrot.slane %v2719_v53, 4  ;;  %v7907_v39 = vld [vmem:[#allocation4 + $0x390] sm:$0xf0]  ;;  %v7314_v9 = vld [vmem:[#allocation4 + $0x394] sm:$0xf0]  ;;  %v3021_v0 = vsel %vm8855_vm14, %v6844_v22, %v3020_v15  ;;  %v3309_v60 = vshll.u32 %v3173_v26, 16 }
 0x339   : > { %v5874_v29 = vpop.f32.mrf.mxu3  ;;  %v2730_v58 = vrot.slane %v2729_v23, 4  ;;  %v7903_v31 = vld [vmem:[#allocation4 + $0x374] sm:$0xf]  ;;  %v3315_v45 = vshll.u32 %v3174_v35, 16  ;;  %v3175_v53 = vld [vmem:[#allocation2 + $0x50] sm:$0x1]  ;;  %v7313_v12 = vor.u32 %v7907_v39, %v7312_v37 }
 0x33a   : > { %v9454_v34 = vadd.f32 %v5874_v29, %v5786_v19  ;;  %v2725_v52 = vsel %vm8678_vm11, %v2720_v18, %v2724_v47  ;;  %v3024_v47 = vsel %vm8855_vm14, %v3022_v27, %v3023_v33  ;;  %3092 = vst [vmem:[#allocation4 + $0x404] sm:$0xf] %v3021_v0  ;;  %v3319_v51 = vshrl.u32 %v3174_v35, 16  ;;  %v3105_v22 = vld [vmem:[#allocation2 + $0x48] sm:$0xf] }
 0x33b   : > { %v5637_v5 = vpop.f32.mrf.mxu1  ;;  %2820 = vst [vmem:[#allocation4 + $0x400] sm:$0xf] %v2725_v52  ;;  %v2373_v27 = vld [vmem:[#allocation2 + $0xc0] sm:$0xf]  ;;  %v7317_v33 = vor.u32 %v7903_v31, %v7314_v9  ;;  %v6960_v39 = vld [vmem:[#allocation4 + $0xa8] sm:$0xf] }
 0x33c   : > { %v5638_v21 = vadd.f32 %v5637_v5, %v9094_v57  ;;  %v2735_v57 = vsel %vm8678_vm11, %v2730_v58, %v2734_v61  ;;  %v9463_v7 = vpop.f32.mrf.mxu0  ;;  %v3311_v5 = vrot.slane %v3309_v60, 5  ;;  %3093 = vst [vmem:[#allocation4 + $0x428] sm:$0xf] %v3024_v47  ;;  %v3317_v61 = vrot.slane %v3315_v45, 5  ;;  %v2374_v60 = vld [vmem:[#allocation2 + $0xc4] sm:$0xf] }
 0x33d   : > { %2821 = vst [vmem:[#allocation4 + $0x424] sm:$0xf] %v2735_v57  ;;  %v6998_v23 = vld [vmem:[#allocation4 + $0x114] sm:$0xf0]  ;;  %v3321_v0 = vrot.slane %v3319_v51, 4  ;;  %v2737_v45 = vshrl.u32 %v2373_v27, 16 }
 0x33e   : > { %v9457_v4 = vadd.f32 %v9393_v36, %v5638_v21  ;;  %5952 = vmatmul.bf16.gmra.mxu1 %v6925_v43  ;;  %v3306_v36 = vshrl.u32 %v3173_v26, 16  ;;  %v7823_v43 = vld [vmem:[#allocation4 + $0xf4] sm:$0xf]  ;;  %v5787_v19 = vpop.f32.mrf.mxu2  ;;  %v3325_v21 = vshll.u32 %v3175_v53, 16  ;;  %v3106_v26 = vld [vmem:[#allocation2 + $0x4c] sm:$0xf] }
 0x33f   : > { %v7001_v29 = vor.u32 %v7823_v43, %v6998_v23  ;;  %v5788_v18 = vadd.f32 %v5787_v19, %v9256_v13  ;;  %3137 = vst [vmem:[#allocation4 + $0x138] sm:$0xf] %v3105_v22  ;;  %v2740_v13 = vshll.u32 %v2373_v27, 16  ;;  %v3322_v47 = vor.u32 %v3321_v0, %v3317_v61  ;;  %v8001_v9 = vld [vmem:[%s9990_s4 + $0x200] sm:$0xff] }
 0x340   : > { %v3308_v10 = vrot.slane %v3306_v36, 4  ;;  %v3327_v36 = vrot.slane %v3325_v21, 5  ;;  %3138 = vst [vmem:[#allocation4 + $0x15c] sm:$0xf] %v3106_v26  ;;  %v2746_v53 = vshll.u32 %v2374_v60, 16  ;;  %v2750_v23 = vshrl.u32 %v2374_v60, 16  ;;  %6124 = vmatpush.bf16.msra.mxu2 %v8001_v9 }
 0x341   : > { %v5876_v58 = vpop.f32.mrf.mxu3  ;;  %v2739_v19 = vrot.slane %v2737_v45, 4  ;;  %v2870_v26 = vld [vmem:[#allocation2 + $0xc4] sm:$0xf]  ;;  %v2869_v45 = vld [vmem:[#allocation2 + $0xc0] sm:$0xe] }
 0x342   : > { %v3312_v52 = vor.u32 %v3311_v5, %v3308_v10  ;;  %v9471_v43 = vadd.f32 %v5876_v58, %v5788_v18  ;;  %v2375_v5 = vld [vmem:[#allocation2 + $0xc8] sm:$0x1]  ;;  %v2748_v51 = vrot.slane %v2746_v53, 5  ;;  %v2752_v21 = vrot.slane %v2750_v23, 4 }
 0x343   : > { %v5639_v15 = vpop.f32.mrf.mxu1  ;;  %6051 = vmatmul.bf16.gmra.mxu0 %v7001_v29  ;;  %5829 = vmatmul.bf16.gmra.mxu2 %v7313_v12  ;;  %v2742_v29 = vrot.slane %v2740_v13, 5  ;;  %v3027_v0 = vrot.slane %v2870_v26, 5  ;;  %v6845_v53 = vrot.slane %v2869_v45, 9 }
 0x344   : > { %v5640_v57 = vadd.f32 %v5639_v15, %v9118_v16  ;;  %v3313_v35 = vrot.slane %v3312_v52, 4  ;;  %v7818_v16 = vld [vmem:[#allocation4 + $0xc8] sm:$0xf0]  ;;  %v9476_v31 = vpop.f32.mrf.mxu0  ;;  %v2756_v15 = vshll.u32 %v2375_v5, 16 }
 0x345   : > { %v6961_v58 = vor.u32 %v7818_v16, %v6960_v39  ;;  %v2743_v22 = vor.u32 %v2742_v29, %v2739_v19  ;;  %v7916_v16 = vld [vmem:[#allocation4 + $0x3d8] sm:$0xf0] }
 0x346   : > { %v9474_v37 = vadd.f32 %v9410_v20, %v5640_v57  ;;  %v3318_v10 = vsel %vm8678_vm11, %v3313_v35, %v3317_v61  ;;  %5918 = vmatmul.bf16.gmra.mxu3 %v7317_v33  ;;  %v3323_v20 = vrot.slane %v3322_v47, 4  ;;  %v5790_v18 = vpop.f32.mrf.mxu2  ;;  %v2753_v57 = vor.u32 %v2752_v21, %v2748_v51  ;;  %v2871_v47 = vld [vmem:[#allocation2 + $0xc8] sm:$0x1]  ;;  %v7912_v19 = vld [vmem:[#allocation4 + $0x3bc] sm:$0xf] }
 0x347   : > { %3633 = vst [vmem:[#allocation4 + $0x13c] sm:$0xf] %v3318_v10  ;;  %v5791_v61 = vadd.f32 %v5790_v18, %v9276_v59  ;;  %v2758_v33 = vrot.slane %v2756_v15, 5  ;;  %v2744_v35 = vrot.slane %v2743_v22, 4  ;;  %v7348_v59 = vld [vmem:[#allocation4 + $0x3b8] sm:$0xf] }
 0x348   : > { %v3328_v12 = vsel %vm8678_vm11, %v3323_v20, %v3327_v36  ;;  %v2754_v39 = vrot.slane %v2753_v57, 4  ;;  %v3176_v36 = vld [vmem:[#allocation2 + $0x54] sm:$0xf]  ;;  %v3029_v10 = vrot.slane %v3027_v0, 4  ;;  %v3030_v5 = vrot.slane %v2871_v47, 5 }
 0x349   : > { %v5879_v27 = vpop.f32.mrf.mxu3  ;;  %3634 = vst [vmem:[#allocation4 + $0x160] sm:$0xf] %v3328_v12  ;;  %v2749_v9 = vsel %vm8678_vm11, %v2744_v35, %v2748_v51  ;;  %v7350_v20 = vld [vmem:[#allocation4 + $0x3dc] sm:$0xf0]  ;;  %v3330_v18 = vshrl.u32 %v3176_v36, 16  ;;  %v7349_v47 = vor.u32 %v7916_v16, %v7348_v59 }
 0x34a   : > { %v9487_v13 = vadd.f32 %v5879_v27, %v5791_v61  ;;  %v2759_v15 = vsel %vm8678_vm11, %v2754_v39, %v2758_v33  ;;  %2822 = vst [vmem:[#allocation4 + $0x448] sm:$0xf] %v2749_v9  ;;  %v3031_v51 = vsel %vm8855_vm14, %v3029_v10, %v3030_v5  ;;  %v3178_v12 = vld [vmem:[#allocation2 + $0x5c] sm:$0x1]  ;;  %v3108_v9 = vld [vmem:[#allocation2 + $0x58] sm:$0xf] }
 0x34b   : > { %v5642_v52 = vpop.f32.mrf.mxu1  ;;  %2823 = vst [vmem:[#allocation4 + $0x46c] sm:$0xf] %v2759_v15  ;;  %v3349_v27 = vshll.u32 %v3178_v12, 16  ;;  %v7827_v59 = vld [vmem:[#allocation4 + $0x110] sm:$0xf0] }
 0x34c   : > { %v5643_v60 = vadd.f32 %v5642_v52, %v9135_v38  ;;  %v3177_v38 = vld [vmem:[#allocation2 + $0x58] sm:$0xf]  ;;  %v9494_v29 = vpop.f32.mrf.mxu0  ;;  %v3332_v52 = vrot.slane %v3330_v18, 4  ;;  %3095 = vst [vmem:[#allocation4 + $0x470] sm:$0xf] %v3031_v51 }
 0x34d   : > { %v3339_v22 = vshll.u32 %v3177_v38, 16  ;;  %v3343_v26 = vshrl.u32 %v3177_v38, 16  ;;  %v7353_v38 = vor.u32 %v7912_v19, %v7350_v20  ;;  %3140 = vst [vmem:[#allocation4 + $0x1a4] sm:$0xf] %v3108_v9  ;;  %v6996_v51 = vld [vmem:[#allocation4 + $0xf0] sm:$0xf] }
 0x34e   : > { %v9490_v23 = vadd.f32 %v9428_v6, %v5643_v60  ;;  %5957 = vmatmul.bf16.gmra.mxu1 %v6961_v58  ;;  %v7832_v21 = vld [vmem:[#allocation4 + $0x13c] sm:$0xf]  ;;  %v3028_v6 = vsel %vm8855_vm14, %v6845_v53, %v3027_v0  ;;  %v3333_v58 = vshll.u32 %v3176_v36, 16  ;;  %v5792_v57 = vpop.f32.mrf.mxu2  ;;  %v3107_v36 = vld [vmem:[#allocation2 + $0x54] sm:$0xf] }
 0x34f   : > { %3094 = vst [vmem:[#allocation4 + $0x44c] sm:$0xf] %v3028_v6  ;;  %v3341_v33 = vrot.slane %v3339_v22, 5  ;;  %v3345_v35 = vrot.slane %v3343_v26, 4  ;;  %v9503_v0 = vadd.f32 %v5792_v57, %v9295_v8  ;;  %v3351_v6 = vrot.slane %v3349_v27, 5  ;;  %v8013_v19 = vld [vmem:[%s9992_s6 + $0x20] sm:$0xff] }
 0x350   : > { %v3335_v61 = vrot.slane %v3333_v58, 5  ;;  %v7034_v60 = vld [vmem:[#allocation4 + $0x15c] sm:$0xf0]  ;;  %3139 = vst [vmem:[#allocation4 + $0x180] sm:$0xf] %v3107_v36  ;;  %v6997_v26 = vor.u32 %v7827_v59, %v6996_v51  ;;  %6357 = vmatpush.bf16.msra.mxu3 %v8013_v19 }
 0x351   : > { %v9505_v39 = vpop.f32.mrf.mxu3  ;;  %v7037_v53 = vor.u32 %v7832_v21, %v7034_v60  ;;  %v3346_v15 = vor.u32 %v3345_v35, %v3341_v33  ;;  %v3658_v21 = vld [vmem:[#allocation2 + $0x1c] sm:$0xf]  ;;  %v3657_v12 = vld [vmem:[#allocation2 + $0x18] sm:$0xe]  ;;  %v3180_v36 = vld [vmem:[#allocation2 + $0x64] sm:$0xf] }
 0x352   : > { %v3336_v10 = vor.u32 %v3335_v61, %v3332_v52  ;;  %v3659_v52 = vld [vmem:[#allocation2 + $0x20] sm:$0x1]  ;;  %v6846_v61 = vrot.slane %v3657_v12, 9 }
 0x353   : > { %v5644_v45 = vpop.f32.mrf.mxu1  ;;  %6056 = vmatmul.bf16.gmra.mxu0 %v7037_v53  ;;  %v3347_v8 = vrot.slane %v3346_v15, 4  ;;  %5834 = vmatmul.bf16.gmra.mxu2 %v7349_v47  ;;  %v3758_v35 = vrot.slane %v3659_v52, 5  ;;  %v3179_v53 = vld [vmem:[#allocation2 + $0x60] sm:$0xf] }
 0x354   : > { %v5645_v5 = vadd.f32 %v5644_v45, %v9154_v42  ;;  %v3337_v18 = vrot.slane %v3336_v10, 4  ;;  %v9513_v42 = vpop.f32.mrf.mxu0  ;;  %v3357_v15 = vshll.u32 %v3179_v53, 16 }
 0x355   : > { %v3352_v20 = vsel %vm8678_vm11, %v3347_v8, %v3351_v6  ;;  %v3367_v6 = vshrl.u32 %v3180_v36, 16 }
 0x356   : > { %v9509_v58 = vadd.f32 %v9443_v55, %v5645_v5  ;;  %v3342_v16 = vsel %vm8678_vm11, %v3337_v18, %v3341_v33  ;;  %5923 = vmatmul.bf16.gmra.mxu3 %v7353_v38  ;;  %v3755_v55 = vrot.slane %v3658_v21, 5  ;;  %3636 = vst [vmem:[#allocation4 + $0x1a8] sm:$0xf] %v3352_v20  ;;  %v5795_v22 = vpop.f32.mrf.mxu2  ;;  %v3354_v5 = vshrl.u32 %v3179_v53, 16  ;;  %v7925_v18 = vld [vmem:[#allocation4 + $0x420] sm:$0xf0] }
 0x357   : > { %3635 = vst [vmem:[#allocation4 + $0x184] sm:$0xf] %v3342_v16  ;;  %v5796_v60 = vadd.f32 %v5795_v22, %v9309_v28  ;;  %v7384_v28 = vld [vmem:[#allocation4 + $0x400] sm:$0xf]  ;;  %v3359_v21 = vrot.slane %v3357_v15, 5  ;;  %v3369_v22 = vrot.slane %v3367_v6, 4 }
 0x358   : > { %v3757_v27 = vrot.slane %v3755_v55, 4  ;;  %v3756_v47 = vsel %vm8855_vm14, %v6846_v61, %v3755_v55  ;;  %v3356_v51 = vrot.slane %v3354_v5, 4  ;;  %v3181_v16 = vld [vmem:[#allocation2 + $0x68] sm:$0x1]  ;;  %v7921_v20 = vld [vmem:[#allocation4 + $0x404] sm:$0xf] }
 0x359   : > { %v5884_v33 = vpop.f32.mrf.mxu3  ;;  %3897 = vst [vmem:[#allocation4 + $0x20] sm:$0xf] %v3756_v47  ;;  %v7386_v55 = vld [vmem:[#allocation4 + $0x424] sm:$0xf0]  ;;  %v3373_v52 = vshll.u32 %v3181_v16, 16 }
 0x35a   : > { %v9524_v9 = vadd.f32 %v5884_v33, %v5796_v60  ;;  %v3759_v10 = vsel %vm8855_vm14, %v3757_v27, %v3758_v35  ;;  %v7385_v33 = vor.u32 %v7925_v18, %v7384_v28  ;;  %v3109_v35 = vld [vmem:[#allocation2 + $0x60] sm:$0xf]  ;;  %v7836_v28 = vld [vmem:[#allocation4 + $0x158] sm:$0xf0] }
 0x35b   : > { %v5647_v57 = vpop.f32.mrf.mxu1  ;;  %3898 = vst [vmem:[#allocation4 + $0x44] sm:$0xf] %v3759_v10  ;;  %v3375_v53 = vrot.slane %v3373_v52, 5  ;;  %v7389_v10 = vor.u32 %v7921_v20, %v7386_v55 }
 0x35c   : > { %v5648_v45 = vadd.f32 %v5647_v57, %v9165_v62  ;;  %v3363_v62 = vshll.u32 %v3180_v36, 16  ;;  %v9531_v61 = vpop.f32.mrf.mxu0  ;;  %3141 = vst [vmem:[#allocation4 + $0x1c8] sm:$0xf] %v3109_v35  ;;  %v3183_v35 = vld [vmem:[#allocation2 + $0x70] sm:$0xf] }
 0x35d   : > { %v7070_v59 = vld [vmem:[#allocation4 + $0x1a4] sm:$0xf0] }
 0x35e   : > { %v9529_v38 = vadd.f32 %v9463_v7, %v5648_v45  ;;  %5962 = vmatmul.bf16.gmra.mxu1 %v6997_v26  ;;  %v7841_v8 = vld [vmem:[#allocation4 + $0x184] sm:$0xf]  ;;  %v3365_v19 = vrot.slane %v3363_v62, 5  ;;  %v5797_v7 = vpop.f32.mrf.mxu2  ;;  %v3360_v26 = vor.u32 %v3359_v21, %v3356_v51  ;;  %v3110_v45 = vld [vmem:[#allocation2 + $0x64] sm:$0xf] }
 0x35f   : > { %v7073_v12 = vor.u32 %v7841_v8, %v7070_v59  ;;  %v9534_v57 = vadd.f32 %v5797_v7, %v9333_v3  ;;  %3142 = vst [vmem:[#allocation4 + $0x1ec] sm:$0xf] %v3110_v45  ;;  %v7032_v3 = vld [vmem:[#allocation4 + $0x138] sm:$0xf]  ;;  %v3660_v51 = vld [vmem:[#allocation2 + $0x24] sm:$0xe] }
 0x360   : > { %v3370_v47 = vor.u32 %v3369_v22, %v3365_v19  ;;  %v3361_v5 = vrot.slane %v3360_v26, 4  ;;  %v3662_v59 = vld [vmem:[#allocation2 + $0x2c] sm:$0x1]  ;;  %v7033_v21 = vor.u32 %v7836_v28, %v7032_v3  ;;  %v7934_v28 = vld [vmem:[#allocation4 + $0x468] sm:$0xf0] }
 0x361   : > { %v9536_v60 = vpop.f32.mrf.mxu3  ;;  %v3765_v55 = vrot.slane %v3662_v59, 5  ;;  %v7422_v59 = vld [vmem:[#allocation4 + $0x46c] sm:$0xf0] }
 0x362   : > { %v3371_v15 = vrot.slane %v3370_v47, 4  ;;  %v3366_v6 = vsel %vm8678_vm11, %v3361_v5, %v3365_v19  ;;  %v7420_v5 = vld [vmem:[#allocation4 + $0x448] sm:$0xf] }
 0x363   : > { %v5649_v27 = vpop.f32.mrf.mxu1  ;;  %6061 = vmatmul.bf16.gmra.mxu0 %v7073_v12  ;;  %5839 = vmatmul.bf16.gmra.mxu2 %v7385_v33  ;;  %3637 = vst [vmem:[#allocation4 + $0x1cc] sm:$0xf] %v3366_v6  ;;  %v3182_v33 = vld [vmem:[#allocation2 + $0x6c] sm:$0xf] }
 0x364   : > { %v5650_v36 = vadd.f32 %v5649_v27, %v9184_v54  ;;  %v3376_v18 = vsel %vm8678_vm11, %v3371_v15, %v3375_v53  ;;  %v3661_v54 = vld [vmem:[#allocation2 + $0x28] sm:$0xf]  ;;  %v9548_v7 = vpop.f32.mrf.mxu0  ;;  %v3378_v47 = vshrl.u32 %v3182_v33, 16  ;;  %v3381_v53 = vshll.u32 %v3182_v33, 16 }
 0x365   : > { %3638 = vst [vmem:[#allocation4 + $0x1f0] sm:$0xf] %v3376_v18  ;;  %v3762_v8 = vrot.slane %v3661_v54, 5  ;;  %v3184_v18 = vld [vmem:[#allocation2 + $0x74] sm:$0x1] }
 0x366   : > { %v9540_v62 = vadd.f32 %v9476_v31, %v5650_v36  ;;  %5928 = vmatmul.bf16.gmra.mxu3 %v7389_v10  ;;  %v5800_v16 = vpop.f32.mrf.mxu2  ;;  %v6847_v31 = vrot.slane %v3660_v51, 9  ;;  %v3387_v36 = vshll.u32 %v3183_v35, 16  ;;  %v3391_v10 = vshrl.u32 %v3183_v35, 16  ;;  %v7930_v51 = vld [vmem:[#allocation4 + $0x44c] sm:$0xf] }
 0x367   : > { %v3764_v20 = vrot.slane %v3762_v8, 4  ;;  %v5801_v19 = vadd.f32 %v5800_v16, %v9358_v11  ;;  %v3380_v3 = vrot.slane %v3378_v47, 4  ;;  %v3383_v6 = vrot.slane %v3381_v53, 5 }
 0x368   : > { %v3763_v26 = vsel %vm8855_vm14, %v6847_v31, %v3762_v8  ;;  %v3389_v54 = vrot.slane %v3387_v36, 5  ;;  %v3393_v8 = vrot.slane %v3391_v10, 4  ;;  %v7425_v47 = vor.u32 %v7930_v51, %v7422_v59  ;;  %v7068_v36 = vld [vmem:[#allocation4 + $0x180] sm:$0xf]  ;;  %v7845_v10 = vld [vmem:[#allocation4 + $0x1a0] sm:$0xf0] }
 0x369   : > { %v5889_v22 = vpop.f32.mrf.mxu3  ;;  %v3766_v27 = vsel %vm8855_vm14, %v3764_v20, %v3765_v55  ;;  %3899 = vst [vmem:[#allocation4 + $0x68] sm:$0xf] %v3763_v26  ;;  %v3384_v31 = vor.u32 %v3383_v6, %v3380_v3  ;;  %v3397_v20 = vshll.u32 %v3184_v18, 16  ;;  %v3112_v26 = vld [vmem:[#allocation2 + $0x70] sm:$0xf] }
 0x36a   : > { %v9554_v45 = vadd.f32 %v5889_v22, %v5801_v19  ;;  %3900 = vst [vmem:[#allocation4 + $0x8c] sm:$0xf] %v3766_v27  ;;  %v3394_v55 = vor.u32 %v3393_v8, %v3389_v54  ;;  %v7421_v22 = vor.u32 %v7934_v28, %v7420_v5  ;;  %v3664_v3 = vld [vmem:[#allocation2 + $0x34] sm:$0xf]  ;;  %v3665_v28 = vld [vmem:[#allocation2 + $0x38] sm:$0x1] }
 0x36b   : > { %v5652_v12 = vpop.f32.mrf.mxu1  ;;  %v3385_v27 = vrot.slane %v3384_v31, 4  ;;  %v3399_v33 = vrot.slane %v3397_v20, 5  ;;  %3144 = vst [vmem:[#allocation4 + $0x234] sm:$0xf] %v3112_v26  ;;  %v3769_v6 = vrot.slane %v3664_v3, 5  ;;  %v3772_v59 = vrot.slane %v3665_v28, 5 }
 0x36c   : > { %v5653_v52 = vadd.f32 %v5652_v12, %v9204_v1  ;;  %v7850_v1 = vld [vmem:[#allocation4 + $0x1cc] sm:$0xf]  ;;  %v7106_v15 = vld [vmem:[#allocation4 + $0x1ec] sm:$0xf0]  ;;  %v3395_v53 = vrot.slane %v3394_v55, 4  ;;  %v9570_v5 = vpop.f32.mrf.mxu0 }
 0x36d   : > { %v7109_v16 = vor.u32 %v7850_v1, %v7106_v15  ;;  %v3390_v1 = vsel %vm8678_vm11, %v3385_v27, %v3389_v54  ;;  %v7069_v54 = vor.u32 %v7845_v10, %v7068_v36  ;;  %v3771_v51 = vrot.slane %v3769_v6, 4  ;;  %v3187_v3 = vld [vmem:[#allocation2 + $0x80] sm:$0x1] }
 0x36e   : > { %v9557_v11 = vadd.f32 %v9494_v29, %v5653_v52  ;;  %5967 = vmatmul.bf16.gmra.mxu1 %v7033_v21  ;;  %v5802_v29 = vpop.f32.mrf.mxu2  ;;  %v3111_v52 = vld [vmem:[#allocation2 + $0x6c] sm:$0xf]  ;;  %v3400_v15 = vsel %vm8678_vm11, %v3395_v53, %v3399_v33  ;;  %3639 = vst [vmem:[#allocation4 + $0x214] sm:$0xf] %v3390_v1  ;;  %v6896_v1 = vld [vmem:[#allocation4 + $0x20] sm:$0xf] }
 0x36f   : > { %v9560_v12 = vadd.f32 %v5802_v29, %v9375_v17  ;;  %3143 = vst [vmem:[#allocation4 + $0x210] sm:$0xf] %v3111_v52  ;;  %v3186_v52 = vld [vmem:[#allocation2 + $0x7c] sm:$0xf] }
 0x370   : > { %3640 = vst [vmem:[#allocation4 + $0x238] sm:$0xf] %v3400_v15  ;;  %v3415_v53 = vshrl.u32 %v3186_v52, 16  ;;  %v7801_v15 = vld [vmem:[#allocation4 + $0x40] sm:$0xf0] }
 0x371   : > { %v9562_v19 = vpop.f32.mrf.mxu3 }
 0x373   : > { %v5654_v21 = vpop.f32.mrf.mxu1  ;;  %6066 = vmatmul.bf16.gmra.mxu0 %v7109_v16  ;;  %5844 = vmatmul.bf16.gmra.mxu2 %v7421_v22  ;;  %v3185_v22 = vld [vmem:[#allocation2 + $0x78] sm:$0xf] }
 0x374   : > { %v5655_v35 = vadd.f32 %v5654_v21, %v9223_v24  ;;  %v8012_v24 = vld [vmem:[%s9992_s6 + $0x18] sm:$0xff]  ;;  %v3773_v21 = vsel %vm8855_vm14, %v3771_v51, %v3772_v59  ;;  %v3402_v33 = vshrl.u32 %v3185_v22, 16 }
 0x375   : > { %6358 = vmatpush.bf16.msra.mxu3 %v8012_v24  ;;  %v7859_v27 = vld [vmem:[#allocation4 + $0x214] sm:$0xf]  ;;  %3902 = vst [vmem:[#allocation4 + $0xd4] sm:$0xf] %v3773_v21  ;;  %v9588_v24 = vpop.f32.mrf.mxu0 }
 0x376   : > { %v9568_v17 = vadd.f32 %v9513_v42, %v5655_v35  ;;  %5933 = vmatmul.bf16.gmra.mxu3 %v7425_v47  ;;  %v3663_v42 = vld [vmem:[#allocation2 + $0x30] sm:$0xe]  ;;  %v5805_v18 = vpop.f32.mrf.mxu2  ;;  %v3405_v35 = vshll.u32 %v3185_v22, 16  ;;  %v3404_v36 = vrot.slane %v3402_v33, 4 }
 0x377   : > { %v6848_v8 = vrot.slane %v3663_v42, 9  ;;  %v5806_v31 = vadd.f32 %v5805_v18, %v9391_v14  ;;  %v7142_v14 = vld [vmem:[#allocation4 + $0x234] sm:$0xf0]  ;;  %v3417_v42 = vrot.slane %v3415_v53, 4  ;;  %v3666_v53 = vld [vmem:[#allocation2 + $0x3c] sm:$0xe] }
 0x378   : > { %v3407_v10 = vrot.slane %v3405_v35, 5  ;;  %v7145_v28 = vor.u32 %v7859_v27, %v7142_v14  ;;  %v7854_v14 = vld [vmem:[#allocation4 + $0x1e8] sm:$0xf0] }
 0x379   : > { %v5894_v20 = vpop.f32.mrf.mxu3  ;;  %v3770_v55 = vsel %vm8855_vm14, %v6848_v8, %v3769_v6  ;;  %v3421_v8 = vshll.u32 %v3187_v3, 16  ;;  %v6849_v3 = vrot.slane %v3666_v53, 9 }
 0x37a   : > { %v9583_v26 = vadd.f32 %v5894_v20, %v5806_v31  ;;  %3901 = vst [vmem:[#allocation4 + $0xb0] sm:$0xf] %v3770_v55  ;;  %v3408_v18 = vor.u32 %v3407_v10, %v3404_v36  ;;  %v6897_v31 = vor.u32 %v7801_v15, %v6896_v1  ;;  %v3113_v20 = vld [vmem:[#allocation2 + $0x78] sm:$0xf]  ;;  %v3668_v1 = vld [vmem:[#allocation2 + $0x44] sm:$0x1] }
 0x37b   : > { %v5657_v16 = vpop.f32.mrf.mxu1  ;;  %v3423_v21 = vrot.slane %v3421_v8, 5  ;;  %3145 = vst [vmem:[#allocation4 + $0x258] sm:$0xf] %v3113_v20 }
 0x37c   : > { %v5658_v29 = vadd.f32 %v5657_v16, %v9234_v40  ;;  %v3411_v40 = vshll.u32 %v3186_v52, 16  ;;  %v3409_v55 = vrot.slane %v3408_v18, 4 }
 0x37d   : > { %v9603_v15 = vpop.f32.mrf.mxu0 }
 0x37e   : > { %v9586_v47 = vadd.f32 %v9531_v61, %v5658_v29  ;;  %5972 = vmatmul.bf16.gmra.mxu1 %v7069_v54  ;;  %v3413_v6 = vrot.slane %v3411_v40, 5  ;;  %v5807_v51 = vpop.f32.mrf.mxu2  ;;  %v3114_v29 = vld [vmem:[#allocation2 + $0x7c] sm:$0xf]  ;;  %v3667_v40 = vld [vmem:[#allocation2 + $0x40] sm:$0xf] }
 0x37f   : > { %v9591_v54 = vadd.f32 %v5807_v51, %v9408_v32  ;;  %3146 = vst [vmem:[#allocation4 + $0x27c] sm:$0xf] %v3114_v29  ;;  %v7104_v32 = vld [vmem:[#allocation4 + $0x1c8] sm:$0xf] }
 0x380   : > { %v3418_v61 = vor.u32 %v3417_v42, %v3413_v6  ;;  %v3414_v27 = vsel %vm8678_vm11, %v3409_v55, %v3413_v6  ;;  %v7105_v10 = vor.u32 %v7854_v14, %v7104_v32  ;;  %v7810_v14 = vld [vmem:[#allocation4 + $0x88] sm:$0xf0] }
 0x381   : > { %v9593_v16 = vpop.f32.mrf.mxu3  ;;  %3641 = vst [vmem:[#allocation4 + $0x25c] sm:$0xf] %v3414_v27  ;;  %v6932_v27 = vld [vmem:[#allocation4 + $0x68] sm:$0xf] }
 0x382   : > { %v3419_v52 = vrot.slane %v3418_v61, 4 }
 0x383   : > { %v5659_v59 = vpop.f32.mrf.mxu1  ;;  %6071 = vmatmul.bf16.gmra.mxu0 %v7145_v28  ;;  %6125 = vmatmul.bf16.vlgmr.msra.gmra.mxu2 %v6897_v31  ;;  %v3189_v31 = vld [vmem:[#allocation2 + $0x88] sm:$0xf] }
 0x384   : > { %v5660_v22 = vadd.f32 %v5659_v59, %v9253_v46  ;;  %v3424_v35 = vsel %vm8678_vm11, %v3419_v52, %v3423_v21  ;;  %v3776_v46 = vrot.slane %v3667_v40, 5  ;;  %v3188_v59 = vld [vmem:[#allocation2 + $0x84] sm:$0xf]  ;;  %v3439_v52 = vshrl.u32 %v3189_v31, 16  ;;  %v3190_v40 = vld [vmem:[#allocation2 + $0x8c] sm:$0x1] }
 0x385   : > { %3642 = vst [vmem:[#allocation4 + $0x280] sm:$0xf] %v3424_v35  ;;  %v3426_v55 = vshrl.u32 %v3188_v59, 16  ;;  %v3429_v21 = vshll.u32 %v3188_v59, 16 }
 0x386   : > { %v9599_v33 = vadd.f32 %v9548_v7, %v5660_v22  ;;  %v5810_v36 = vpop.f32.mrf.mxu2  ;;  %v3778_v6 = vrot.slane %v3776_v46, 4  ;;  %v3779_v7 = vrot.slane %v3668_v1, 5  ;;  %v3777_v51 = vsel %vm8855_vm14, %v6849_v3, %v3776_v46 }
 0x387   : > { %v5811_v28 = vadd.f32 %v5810_v36, %v9424_v25  ;;  %3903 = vst [vmem:[#allocation4 + $0xf8] sm:$0xf] %v3777_v51  ;;  %v3428_v32 = vrot.slane %v3426_v55, 4  ;;  %v3431_v35 = vrot.slane %v3429_v21, 5  ;;  %v3441_v53 = vrot.slane %v3439_v52, 4 }
 0x388   : > { %v3780_v61 = vsel %vm8855_vm14, %v3778_v6, %v3779_v7  ;;  %v7868_v29 = vld [vmem:[#allocation4 + $0x25c] sm:$0xf]  ;;  %v3445_v3 = vshll.u32 %v3190_v40, 16  ;;  %v7140_v21 = vld [vmem:[#allocation4 + $0x210] sm:$0xf] }
 0x389   : > { %v5899_v18 = vpop.f32.mrf.mxu3  ;;  %3904 = vst [vmem:[#allocation4 + $0x11c] sm:$0xf] %v3780_v61  ;;  %v3432_v36 = vor.u32 %v3431_v35, %v3428_v32  ;;  %v3670_v52 = vld [vmem:[#allocation2 + $0x4c] sm:$0xf]  ;;  %v3669_v32 = vld [vmem:[#allocation2 + $0x48] sm:$0xe] }
 0x38a   : > { %v9611_v20 = vadd.f32 %v5899_v18, %v5811_v28  ;;  %v6933_v28 = vor.u32 %v7810_v14, %v6932_v27  ;;  %v3115_v18 = vld [vmem:[#allocation2 + $0x84] sm:$0xf]  ;;  %v3447_v61 = vrot.slane %v3445_v3, 5  ;;  %v3783_v27 = vrot.slane %v3670_v52, 5  ;;  %v3671_v35 = vld [vmem:[#allocation2 + $0x50] sm:$0x1] }
 0x38b   : > { %v5662_v42 = vpop.f32.mrf.mxu1  ;;  %v3433_v51 = vrot.slane %v3432_v36, 4  ;;  %3147 = vst [vmem:[#allocation4 + $0x2a0] sm:$0xf] %v3115_v18  ;;  %v6850_v40 = vrot.slane %v3669_v32, 9  ;;  %v3192_v18 = vld [vmem:[#allocation2 + $0x94] sm:$0xf] }
 0x38c   : > { %v5663_v8 = vadd.f32 %v5662_v42, %v9273_v48  ;;  %v7178_v25 = vld [vmem:[#allocation4 + $0x27c] sm:$0xf0]  ;;  %v3435_v48 = vshll.u32 %v3189_v31, 16  ;;  %v9622_v31 = vpop.f32.mrf.mxu0  ;;  %v7819_v52 = vld [vmem:[#allocation4 + $0xd0] sm:$0xf0] }
 0x38d   : > { %v7181_v1 = vor.u32 %v7868_v29, %v7178_v25  ;;  %v7863_v25 = vld [vmem:[#allocation4 + $0x230] sm:$0xf0] }
 0x38e   : > { %v9614_v22 = vadd.f32 %v9570_v5, %v5663_v8  ;;  %5977 = vmatmul.bf16.gmra.mxu1 %v7105_v10  ;;  %v3437_v46 = vrot.slane %v3435_v48, 5  ;;  %v5812_v6 = vpop.f32.mrf.mxu2  ;;  %v3116_v8 = vld [vmem:[#allocation2 + $0x88] sm:$0xf] }
 0x38f   : > { %v9617_v5 = vadd.f32 %v5812_v6, %v9441_v50  ;;  %3148 = vst [vmem:[#allocation4 + $0x2c4] sm:$0xf] %v3116_v8 }
 0x390   : > { %v3442_v7 = vor.u32 %v3441_v53, %v3437_v46  ;;  %v3438_v55 = vsel %vm8678_vm11, %v3433_v51, %v3437_v46  ;;  %v3785_v46 = vrot.slane %v3783_v27, 4  ;;  %v3786_v53 = vrot.slane %v3671_v35, 5 }
 0x391   : > { %v9619_v10 = vpop.f32.mrf.mxu3  ;;  %3643 = vst [vmem:[#allocation4 + $0x2a4] sm:$0xf] %v3438_v55  ;;  %v3459_v55 = vshll.u32 %v3192_v18, 16 }
 0x392   : > { %v3443_v29 = vrot.slane %v3442_v7, 4  ;;  %v3784_v7 = vsel %vm8855_vm14, %v6850_v40, %v3783_v27  ;;  %v3193_v27 = vld [vmem:[#allocation2 + $0x98] sm:$0x1] }
 0x393   : > { %v5664_v42 = vpop.f32.mrf.mxu1  ;;  %6076 = vmatmul.bf16.gmra.mxu0 %v7181_v1  ;;  %6130 = vmatmul.bf16.gmra.mxu2 %v6933_v28  ;;  %v3191_v28 = vld [vmem:[#allocation2 + $0x90] sm:$0xf]  ;;  %3905 = vst [vmem:[#allocation4 + $0x140] sm:$0xf] %v3784_v7  ;;  %v3461_v32 = vrot.slane %v3459_v55, 5 }
 0x394   : > { %v5665_v59 = vadd.f32 %v5664_v42, %v9292_v63  ;;  %v3448_v48 = vsel %vm8678_vm11, %v3443_v29, %v3447_v61  ;;  %v8011_v63 = vld [vmem:[%s9992_s6 + $0x10] sm:$0xff]  ;;  %v3787_v42 = vsel %vm8855_vm14, %v3785_v46, %v3786_v53  ;;  %v3450_v61 = vshrl.u32 %v3191_v28, 16 }
 0x395   : > { %3644 = vst [vmem:[#allocation4 + $0x2c8] sm:$0xf] %v3448_v48  ;;  %6359 = vmatpush.bf16.msra.mxu3 %v8011_v63  ;;  %v3469_v46 = vshll.u32 %v3193_v27, 16  ;;  %v3118_v7 = vld [vmem:[#allocation2 + $0x94] sm:$0xf] }
 0x396   : > { %v9627_v50 = vadd.f32 %v9588_v24, %v5665_v59  ;;  %v5815_v14 = vpop.f32.mrf.mxu2  ;;  %v7141_v24 = vor.u32 %v7863_v25, %v7140_v21  ;;  %v3453_v59 = vshll.u32 %v3191_v28, 16  ;;  %3906 = vst [vmem:[#allocation4 + $0x164] sm:$0xf] %v3787_v42  ;;  %v3463_v21 = vshrl.u32 %v3192_v18, 16  ;;  %v6968_v25 = vld [vmem:[#allocation4 + $0xb0] sm:$0xf] }
 0x397   : > { %v5816_v36 = vadd.f32 %v5815_v14, %v9457_v4  ;;  %v6037_v4 = vpop.f32.mrf.mxu0  ;;  %v3452_v48 = vrot.slane %v3450_v61, 4  ;;  %v3471_v28 = vrot.slane %v3469_v46, 5  ;;  %v10051_v18 = vld [vmem:[#allocation30_spill] sm:$0xff]  ;;  %3150 = vst [vmem:[#allocation4 + $0x30c] sm:$0xf] %v3118_v7 }
 0x398   : > { %v7877_v51 = vld [vmem:[#allocation4 + $0x2a4] sm:$0xf]  ;;  %v3455_v63 = vrot.slane %v3453_v59, 5  ;;  %v3465_v35 = vrot.slane %v3463_v21, 4  ;;  %v7872_v21 = vld [vmem:[#allocation4 + $0x278] sm:$0xf0] }
 0x399   : > { %v5904_v3 = vpop.f32.mrf.mxu3  ;;  %v3674_v27 = vld [vmem:[#allocation2 + $0x5c] sm:$0x1] }
 0x39a   : > { %v9640_v8 = vadd.f32 %v5904_v3, %v5816_v36  ;;  %v3456_v40 = vor.u32 %v3455_v63, %v3452_v48  ;;  %v6969_v3 = vor.u32 %v7819_v52, %v6968_v25  ;;  %v3673_v25 = vld [vmem:[#allocation2 + $0x58] sm:$0xf]  ;;  %v3672_v52 = vld [vmem:[#allocation2 + $0x54] sm:$0xe] }
 0x39b   : > { %v5667_v1 = vpop.f32.mrf.mxu1  ;;  %v3790_v63 = vrot.slane %v3673_v25, 5  ;;  %v7004_v25 = vld [vmem:[#allocation4 + $0xf8] sm:$0xf] }
 0x39c   : > { %v5668_v6 = vadd.f32 %v5667_v1, %v9306_v41  ;;  %v7214_v41 = vld [vmem:[#allocation4 + $0x2c4] sm:$0xf0]  ;;  %v3466_v1 = vor.u32 %v3465_v35, %v3461_v32  ;;  %v3457_v42 = vrot.slane %v3456_v40, 4 }
 0x39d   : > { %v7217_v14 = vor.u32 %v7877_v51, %v7214_v41  ;;  %v3792_v40 = vrot.slane %v3790_v63, 4 }
 0x39e   : > { %v9643_v29 = vadd.f32 %v9603_v15, %v5668_v6  ;;  %5982 = vmatmul.bf16.gmra.mxu1 %v7141_v24  ;;  %v5817_v53 = vpop.f32.mrf.mxu2  ;;  %v3117_v6 = vld [vmem:[#allocation2 + $0x90] sm:$0xf]  ;;  %v3467_v59 = vrot.slane %v3466_v1, 4  ;;  %v3462_v51 = vsel %vm8678_vm11, %v3457_v42, %v3461_v32  ;;  %v6851_v32 = vrot.slane %v3672_v52, 9  ;;  %v3194_v42 = vld [vmem:[#allocation2 + $0x9c] sm:$0xf] }
 0x39f   : > { %v9646_v24 = vadd.f32 %v5817_v53, %v9474_v37  ;;  %3149 = vst [vmem:[#allocation4 + $0x2e8] sm:$0xf] %v3117_v6  ;;  %v7176_v37 = vld [vmem:[#allocation4 + $0x258] sm:$0xf]  ;;  %v9658_v48 = vpop.f32.mrf.mxu0 }
 0x3a0   : > { %v3472_v55 = vsel %vm8678_vm11, %v3467_v59, %v3471_v28  ;;  %3645 = vst [vmem:[#allocation4 + $0x2ec] sm:$0xf] %v3462_v51  ;;  %v3195_v28 = vld [vmem:[#allocation2 + $0xa0] sm:$0xf]  ;;  %v3474_v59 = vshrl.u32 %v3194_v42, 16  ;;  %v3477_v51 = vshll.u32 %v3194_v42, 16 }
 0x3a1   : > { %v9648_v36 = vpop.f32.mrf.mxu3  ;;  %3646 = vst [vmem:[#allocation4 + $0x310] sm:$0xf] %v3472_v55  ;;  %v3483_v55 = vshll.u32 %v3195_v28, 16  ;;  %v3119_v42 = vld [vmem:[#allocation2 + $0x9c] sm:$0xf] }
 0x3a2   : > { %v3479_v52 = vrot.slane %v3477_v51, 5  ;;  %3151 = vst [vmem:[#allocation4 + $0x330] sm:$0xf] %v3119_v42 }
 0x3a3   : > { %v5669_v15 = vpop.f32.mrf.mxu1  ;;  %6081 = vmatmul.bf16.gmra.mxu0 %v7217_v14  ;;  %6135 = vmatmul.bf16.gmra.mxu2 %v6969_v3  ;;  %v7177_v14 = vor.u32 %v7872_v21, %v7176_v37  ;;  %v3791_v3 = vsel %vm8855_vm14, %v6851_v32, %v3790_v63  ;;  %v3487_v21 = vshrl.u32 %v3195_v28, 16  ;;  %v3476_v63 = vrot.slane %v3474_v59, 4  ;;  %v3120_v28 = vld [vmem:[#allocation2 + $0xa0] sm:$0xf] }
 0x3a4   : > { %v5670_v61 = vadd.f32 %v5669_v15, %v10051_v18  ;;  %v10052_v15 = vld [vmem:[#allocation31_spill] sm:$0xff]  ;;  %3907 = vst [vmem:[#allocation4 + $0x188] sm:$0xf] %v3791_v3  ;;  %v3485_v32 = vrot.slane %v3483_v55, 5 }
 0x3a5   : > { %3152 = vst [vmem:[#allocation4 + $0x354] sm:$0xf] %v3120_v28 }
 0x3a6   : > { %v9654_v41 = vadd.f32 %v9622_v31, %v5670_v61  ;;  %v5820_v35 = vpop.f32.mrf.mxu2  ;;  %v3793_v31 = vrot.slane %v3674_v27, 5  ;;  %v7828_v27 = vld [vmem:[#allocation4 + $0x118] sm:$0xf0] }
 0x3a7   : > { %v5821_v46 = vadd.f32 %v5820_v35, %v9490_v23  ;;  %v7886_v61 = vld [vmem:[#allocation4 + $0x2ec] sm:$0xf]  ;;  %v3196_v35 = vld [vmem:[#allocation2 + $0xa4] sm:$0x1] }
 0x3a8   : > { %v3794_v7 = vsel %vm8855_vm14, %v3792_v40, %v3793_v31  ;;  %v7250_v23 = vld [vmem:[#allocation4 + $0x30c] sm:$0xf0]  ;;  %v3489_v40 = vrot.slane %v3487_v21, 4  ;;  %v7881_v21 = vld [vmem:[#allocation4 + $0x2c0] sm:$0xf0] }
 0x3a9   : > { %v5909_v1 = vpop.f32.mrf.mxu3  ;;  %3908 = vst [vmem:[#allocation4 + $0x1ac] sm:$0xf] %v3794_v7  ;;  %v7253_v31 = vor.u32 %v7886_v61, %v7250_v23  ;;  %v7005_v7 = vor.u32 %v7828_v27, %v7004_v25  ;;  %v7212_v23 = vld [vmem:[#allocation4 + $0x2a0] sm:$0xf]  ;;  %v3675_v27 = vld [vmem:[#allocation2 + $0x60] sm:$0xe] }
 0x3aa   : > { %v9666_v18 = vadd.f32 %v5909_v1, %v5821_v46  ;;  %v3480_v46 = vor.u32 %v3479_v52, %v3476_v63  ;;  %v3490_v3 = vor.u32 %v3489_v40, %v3485_v32  ;;  %v8010_v25 = vld [vmem:[%s9992_s6 + $0x8] sm:$0xff]  ;;  %v3676_v63 = vld [vmem:[#allocation2 + $0x64] sm:$0xf] }
 0x3ab   : > { %v5948_v53 = vpop.f32.mrf.mxu1  ;;  %v3797_v52 = vrot.slane %v3676_v63, 5  ;;  %6360 = vmatpush.bf16.msra.mxu3 %v8010_v25 }
 0x3ac   : > { %v5949_v6 = vadd.f32 %v5948_v53, %v10052_v15  ;;  %10053 = vst [vmem:[#allocation30_spill] sm:$0xff] %v9666_v18  ;;  %v3493_v53 = vshll.u32 %v3196_v35, 16  ;;  %v6042_v15 = vpop.f32.mrf.mxu0  ;;  %v3481_v59 = vrot.slane %v3480_v46, 4  ;;  %v3491_v55 = vrot.slane %v3490_v3, 4  ;;  %v3677_v35 = vld [vmem:[#allocation2 + $0x68] sm:$0x1] }
 0x3ad   : > { %v3799_v46 = vrot.slane %v3797_v52, 4 }
 0x3ae   : > { %v9668_v37 = vadd.f32 %v6037_v4, %v5949_v6  ;;  %5987 = vmatmul.bf16.gmra.mxu1 %v7177_v14  ;;  %v5822_v1 = vpop.f32.mrf.mxu2  ;;  %v3495_v51 = vrot.slane %v3493_v53, 5  ;;  %v3486_v61 = vsel %vm8678_vm11, %v3481_v59, %v3485_v32  ;;  %v6852_v32 = vrot.slane %v3675_v27, 9 }
 0x3af   : > { %v9671_v4 = vadd.f32 %v5822_v1, %v9509_v58  ;;  %3647 = vst [vmem:[#allocation4 + $0x334] sm:$0xf] %v3486_v61  ;;  %v3800_v53 = vrot.slane %v3677_v35, 5  ;;  %v3197_v61 = vld [vmem:[#allocation2 + $0xa8] sm:$0xf] }
 0x3b0   : > { %v3496_v58 = vsel %vm8678_vm11, %v3491_v55, %v3495_v51  ;;  %v3798_v51 = vsel %vm8855_vm14, %v6852_v32, %v3797_v52  ;;  %v3498_v25 = vshrl.u32 %v3197_v61, 16 }
 0x3b1   : > { %v9675_v6 = vpop.f32.mrf.mxu3  ;;  %3648 = vst [vmem:[#allocation4 + $0x358] sm:$0xf] %v3496_v58  ;;  %v3801_v55 = vsel %vm8855_vm14, %v3799_v46, %v3800_v53  ;;  %v3198_v58 = vld [vmem:[#allocation2 + $0xac] sm:$0xf]  ;;  %v3199_v46 = vld [vmem:[#allocation2 + $0xb0] sm:$0x1] }
 0x3b2   : > { %10054 = vst [vmem:[#allocation31_spill] sm:$0xff] %v9675_v6  ;;  %v3507_v35 = vshll.u32 %v3198_v58, 16  ;;  %v3500_v52 = vrot.slane %v3498_v25, 4 }
 0x3b3   : > { %v9673_v14 = vpop.f32.mrf.mxu1  ;;  %6086 = vmatmul.bf16.gmra.mxu0 %v7253_v31  ;;  %6140 = vmatmul.bf16.gmra.mxu2 %v7005_v7  ;;  %v7213_v31 = vor.u32 %v7881_v21, %v7212_v23  ;;  %v10055_v7 = vld [vmem:[#allocation33_spill] sm:$0xff]  ;;  %3909 = vst [vmem:[#allocation4 + $0x1d0] sm:$0xf] %v3798_v51 }
 0x3b4   : > { %v9686_v59 = vpop.f32.mrf.mxu0  ;;  %3910 = vst [vmem:[#allocation4 + $0x1f4] sm:$0xf] %v3801_v55  ;;  %v3509_v53 = vrot.slane %v3507_v35, 5 }
 0x3b6   : > { %v5825_v40 = vpop.f32.mrf.mxu2  ;;  %v7895_v21 = vld [vmem:[#allocation4 + $0x334] sm:$0xf] }
 0x3b7   : > { %v5826_v1 = vadd.f32 %v5825_v40, %v9529_v38  ;;  %v3501_v38 = vshll.u32 %v3197_v61, 16  ;;  %v3511_v40 = vshrl.u32 %v3198_v58, 16  ;;  %v3121_v61 = vld [vmem:[#allocation2 + $0xa8] sm:$0xf]  ;;  %v3122_v58 = vld [vmem:[#allocation2 + $0xac] sm:$0xf] }
 0x3b8   : > { %v7286_v27 = vld [vmem:[#allocation4 + $0x354] sm:$0xf0]  ;;  %3153 = vst [vmem:[#allocation4 + $0x378] sm:$0xf] %v3121_v61 }
 0x3b9   : > { %v5914_v42 = vpop.f32.mrf.mxu3  ;;  %v3503_v32 = vrot.slane %v3501_v38, 5  ;;  %v3513_v18 = vrot.slane %v3511_v40, 4  ;;  %3154 = vst [vmem:[#allocation4 + $0x39c] sm:$0xf] %v3122_v58  ;;  %v7890_v40 = vld [vmem:[#allocation4 + $0x308] sm:$0xf0] }
 0x3ba   : > { %v9692_v23 = vadd.f32 %v5914_v42, %v5826_v1  ;;  %v7289_v1 = vor.u32 %v7895_v21, %v7286_v27  ;;  %v7248_v27 = vld [vmem:[#allocation4 + $0x2e8] sm:$0xf] }
 0x3bb   : > { %v5953_v3 = vpop.f32.mrf.mxu1  ;;  %v3504_v42 = vor.u32 %v3503_v32, %v3500_v52  ;;  %v3514_v6 = vor.u32 %v3513_v18, %v3509_v53  ;;  %v3678_v32 = vld [vmem:[#allocation2 + $0x6c] sm:$0xe] }
 0x3bc   : > { %v5954_v28 = vadd.f32 %v5953_v3, %v10055_v7  ;;  %10056 = vst [vmem:[#allocation33_spill] sm:$0xff] %v9692_v23  ;;  %v7040_v3 = vld [vmem:[#allocation4 + $0x140] sm:$0xf]  ;;  %v7837_v7 = vld [vmem:[#allocation4 + $0x160] sm:$0xf0]  ;;  %v3517_v23 = vshll.u32 %v3199_v46, 16  ;;  %v6047_v18 = vpop.f32.mrf.mxu0 }
 0x3bd   : > { %v7041_v55 = vor.u32 %v7837_v7, %v7040_v3  ;;  %v3505_v25 = vrot.slane %v3504_v42, 4  ;;  %v3515_v35 = vrot.slane %v3514_v6, 4  ;;  %v3679_v3 = vld [vmem:[#allocation2 + $0x70] sm:$0xf]  ;;  %v7249_v6 = vor.u32 %v7890_v40, %v7248_v27 }
 0x3be   : > { %v9694_v63 = vadd.f32 %v6042_v15, %v5954_v28  ;;  %5992 = vmatmul.bf16.gmra.mxu1 %v7213_v31  ;;  %v5827_v51 = vpop.f32.mrf.mxu2  ;;  %v3519_v38 = vrot.slane %v3517_v23, 5  ;;  %v3804_v52 = vrot.slane %v3679_v3, 5  ;;  %v3680_v23 = vld [vmem:[#allocation2 + $0x74] sm:$0x1]  ;;  %v6853_v46 = vrot.slane %v3678_v32, 9 }
 0x3bf   : > { %v9697_v15 = vadd.f32 %v5827_v51, %v9540_v62  ;;  %v3510_v21 = vsel %vm8678_vm11, %v3505_v25, %v3509_v53  ;;  %v3807_v42 = vrot.slane %v3680_v23, 5  ;;  %v7076_v23 = vld [vmem:[#allocation4 + $0x188] sm:$0xf] }
 0x3c0   : > { %v3520_v62 = vsel %vm8678_vm11, %v3515_v35, %v3519_v38  ;;  %3649 = vst [vmem:[#allocation4 + $0x37c] sm:$0xf] %v3510_v21  ;;  %v3200_v38 = vld [vmem:[#allocation2 + $0xb4] sm:$0xf]  ;;  %v3201_v35 = vld [vmem:[#allocation2 + $0xb8] sm:$0xf] }
 0x3c1   : > { %10057 = vst [vmem:[#allocation34_spill] sm:$0xff] %v9697_v15  ;;  %v9701_v28 = vpop.f32.mrf.mxu3  ;;  %v3525_v40 = vshll.u32 %v3200_v38, 16  ;;  %v3535_v32 = vshrl.u32 %v3201_v35, 16 }
 0x3c2   : > { %10058 = vst [vmem:[#allocation35_spill] sm:$0xff] %v9701_v28 }
 0x3c3   : > { %v9699_v31 = vpop.f32.mrf.mxu1  ;;  %6091 = vmatmul.bf16.gmra.mxu0 %v7289_v1  ;;  %6145 = vmatmul.bf16.gmra.mxu2 %v7041_v55  ;;  %3650 = vst [vmem:[#allocation4 + $0x3a0] sm:$0xf] %v3520_v62  ;;  %v3806_v1 = vrot.slane %v3804_v52, 4  ;;  %v3805_v55 = vsel %vm8855_vm14, %v6853_v46, %v3804_v52  ;;  %v3522_v62 = vshrl.u32 %v3200_v38, 16 }
 0x3c4   : > { %3911 = vst [vmem:[#allocation4 + $0x218] sm:$0xf] %v3805_v55  ;;  %v9717_v46 = vpop.f32.mrf.mxu0 }
 0x3c5   : > { %v3808_v25 = vsel %vm8855_vm14, %v3806_v1, %v3807_v42  ;;  %v3524_v52 = vrot.slane %v3522_v62, 4  ;;  %v7846_v1 = vld [vmem:[#allocation4 + $0x1a8] sm:$0xf0]  ;;  %v3202_v42 = vld [vmem:[#allocation2 + $0xbc] sm:$0x1] }
 0x3c6   : > { %v5830_v7 = vpop.f32.mrf.mxu2  ;;  %3912 = vst [vmem:[#allocation4 + $0x23c] sm:$0xf] %v3808_v25  ;;  %v3123_v62 = vld [vmem:[#allocation2 + $0xb4] sm:$0xf] }
 0x3c7   : > { %v5831_v53 = vadd.f32 %v5830_v7, %v9557_v11  ;;  %v7904_v27 = vld [vmem:[#allocation4 + $0x37c] sm:$0xf]  ;;  %v3527_v7 = vrot.slane %v3525_v40, 5  ;;  %v3124_v40 = vld [vmem:[#allocation2 + $0xb8] sm:$0xf] }
 0x3c8   : > { %3155 = vst [vmem:[#allocation4 + $0x3c0] sm:$0xf] %v3123_v62 }
 0x3c9   : > { %v5919_v61 = vpop.f32.mrf.mxu3  ;;  %v3528_v55 = vor.u32 %v3527_v7, %v3524_v52  ;;  %3156 = vst [vmem:[#allocation4 + $0x3e4] sm:$0xf] %v3124_v40  ;;  %v3681_v7 = vld [vmem:[#allocation2 + $0x78] sm:$0xe] }
 0x3ca   : > { %v9713_v21 = vadd.f32 %v5919_v61, %v5831_v53  ;;  %v7322_v11 = vld [vmem:[#allocation4 + $0x39c] sm:$0xf0] }
 0x3cb   : > { %v5958_v51 = vpop.f32.mrf.mxu1  ;;  %v7325_v61 = vor.u32 %v7904_v27, %v7322_v11  ;;  %v3529_v28 = vrot.slane %v3528_v55, 4  ;;  %v7284_v11 = vld [vmem:[#allocation4 + $0x330] sm:$0xf] }
 0x3cc   : > { %v5959_v58 = vadd.f32 %v5958_v51, %v9421_v44  ;;  %10059 = vst [vmem:[#allocation36_spill] sm:$0xff] %v9713_v21  ;;  %v3531_v44 = vshll.u32 %v3201_v35, 16  ;;  %v3537_v51 = vrot.slane %v3535_v32, 4  ;;  %v3541_v21 = vshll.u32 %v3202_v42, 16  ;;  %v7899_v32 = vld [vmem:[#allocation4 + $0x350] sm:$0xf0] }
 0x3cd   : > { %v7077_v35 = vor.u32 %v7846_v1, %v7076_v23  ;;  %v8009_v23 = vld [vmem:[%s9992_s6] sm:$0xff] }
 0x3ce   : > { %v9715_v3 = vadd.f32 %v6047_v18, %v5959_v58  ;;  %5997 = vmatmul.bf16.gmra.mxu1 %v7249_v6  ;;  %v3533_v53 = vrot.slane %v3531_v44, 5  ;;  %v5832_v38 = vpop.f32.mrf.mxu2  ;;  %v3543_v15 = vrot.slane %v3541_v21, 5  ;;  %v3682_v21 = vld [vmem:[#allocation2 + $0x7c] sm:$0xf]  ;;  %6361 = vmatpush.bf16.msra.mxu3 %v8009_v23  ;;  %v3683_v1 = vld [vmem:[#allocation2 + $0x80] sm:$0x1] }
 0x3cf   : > { %v9720_v6 = vadd.f32 %v5832_v38, %v9568_v17  ;;  %v3811_v52 = vrot.slane %v3682_v21, 5  ;;  %v3814_v55 = vrot.slane %v3683_v1, 5  ;;  %v7112_v1 = vld [vmem:[#allocation4 + $0x1d0] sm:$0xf] }
 0x3d0   : > { %v3538_v18 = vor.u32 %v3537_v51, %v3533_v53  ;;  %v3534_v27 = vsel %vm8678_vm11, %v3529_v28, %v3533_v53  ;;  %v6052_v51 = vpop.f32.mrf.mxu0  ;;  %v7285_v28 = vor.u32 %v7899_v32, %v7284_v11  ;;  %v6854_v53 = vrot.slane %v3681_v7, 9 }
 0x3d1   : > { %v9724_v25 = vpop.f32.mrf.mxu3  ;;  %3651 = vst [vmem:[#allocation4 + $0x3c4] sm:$0xf] %v3534_v27  ;;  %v3204_v27 = vld [vmem:[#allocation2 + $0xc4] sm:$0xf] }
 0x3d2   : > { %10060 = vst [vmem:[#allocation37_spill] sm:$0xff] %v9724_v25  ;;  %v3539_v44 = vrot.slane %v3538_v18, 4  ;;  %v3812_v62 = vsel %vm8855_vm14, %v6854_v53, %v3811_v52  ;;  %v3559_v7 = vshrl.u32 %v3204_v27, 16  ;;  %v7855_v53 = vld [vmem:[#allocation4 + $0x1f0] sm:$0xf0] }
 0x3d3   : > { %v9722_v58 = vpop.f32.mrf.mxu1  ;;  %6096 = vmatmul.bf16.gmra.mxu0 %v7325_v61  ;;  %6150 = vmatmul.bf16.gmra.mxu2 %v7077_v35  ;;  %v3813_v61 = vrot.slane %v3811_v52, 4  ;;  %3913 = vst [vmem:[#allocation4 + $0x260] sm:$0xf] %v3812_v62 }
 0x3d4   : > { %v3544_v17 = vsel %vm8678_vm11, %v3539_v44, %v3543_v15  ;;  %v3203_v44 = vld [vmem:[#allocation2 + $0xc0] sm:$0xf] }
 0x3d5   : > { %3652 = vst [vmem:[#allocation4 + $0x3e8] sm:$0xf] %v3544_v17  ;;  %v3815_v40 = vsel %vm8855_vm14, %v3813_v61, %v3814_v55  ;;  %v3546_v32 = vshrl.u32 %v3203_v44, 16  ;;  %v3549_v23 = vshll.u32 %v3203_v44, 16  ;;  %v3205_v61 = vld [vmem:[#allocation2 + $0xc8] sm:$0x1] }
 0x3d6   : > { %v5835_v42 = vpop.f32.mrf.mxu2  ;;  %3914 = vst [vmem:[#allocation4 + $0x284] sm:$0xf] %v3815_v40  ;;  %v3125_v40 = vld [vmem:[#allocation2 + $0xc0] sm:$0xf]  ;;  %v3126_v44 = vld [vmem:[#allocation2 + $0xc4] sm:$0xf] }
 0x3d7   : > { %v5836_v15 = vadd.f32 %v5835_v42, %v9586_v47  ;;  %v3548_v52 = vrot.slane %v3546_v32, 4  ;;  %v3551_v42 = vrot.slane %v3549_v23, 5  ;;  %3157 = vst [vmem:[#allocation4 + $0x408] sm:$0xf] %v3125_v40 }
 0x3d8   : > { %v7913_v11 = vld [vmem:[#allocation4 + $0x3c4] sm:$0xf]  ;;  %3158 = vst [vmem:[#allocation4 + $0x42c] sm:$0xf] %v3126_v44 }
 0x3d9   : > { %v5924_v18 = vpop.f32.mrf.mxu3 }
 0x3da   : > { %v9739_v17 = vadd.f32 %v5924_v18, %v5836_v15  ;;  %v3552_v18 = vor.u32 %v3551_v42, %v3548_v52  ;;  %v10062_v52 = vld [vmem:[#allocation28_spill] sm:$0xff] }
 0x3db   : > { %v5963_v38 = vpop.f32.mrf.mxu1 }
 0x3dc   : > { %v5964_v35 = vadd.f32 %v5963_v38, %v9454_v34  ;;  %10061 = vst [vmem:[#allocation38_spill] sm:$0xff] %v9739_v17  ;;  %v7358_v47 = vld [vmem:[#allocation4 + $0x3e4] sm:$0xf0]  ;;  %v3555_v34 = vshll.u32 %v3204_v27, 16  ;;  %v3561_v38 = vrot.slane %v3559_v7, 4  ;;  %v3565_v17 = vshll.u32 %v3205_v61, 16 }
 0x3dd   : > { %v7361_v15 = vor.u32 %v7913_v11, %v7358_v47  ;;  %v3553_v27 = vrot.slane %v3552_v18, 4  ;;  %v1419_v47 = vld [vmem:[#allocation2 + $0xcc] sm:$0xf]  ;;  %v7908_v7 = vld [vmem:[#allocation4 + $0x398] sm:$0xf0] }
 0x3de   : > { %v9741_v21 = vadd.f32 %v6052_v51, %v5964_v35  ;;  %6002 = vmatmul.bf16.gmra.mxu1 %v7285_v28  ;;  %v3557_v55 = vrot.slane %v3555_v34, 5  ;;  %v5837_v62 = vpop.f32.mrf.mxu2  ;;  %v7113_v35 = vor.u32 %v7855_v53, %v7112_v1  ;;  %v3567_v32 = vrot.slane %v3565_v17, 5  ;;  %v7320_v34 = vld [vmem:[#allocation4 + $0x378] sm:$0xf]  ;;  %v3685_v17 = vld [vmem:[#allocation2 + $0x88] sm:$0xf] }
 0x3df   : > { %v9744_v51 = vadd.f32 %v5837_v62, %v9599_v33  ;;  %v1420_v42 = vsel %vm8425_vm6, %v10062_v52, %v1419_v47  ;;  %v3818_v53 = vrot.slane %v3685_v17, 5  ;;  %v10064_v61 = vld [vmem:[#allocation29_spill] sm:$0xff]  ;;  %v3686_v18 = vld [vmem:[#allocation2 + $0x8c] sm:$0x1]  ;;  %v7321_v40 = vor.u32 %v7908_v7, %v7320_v34 }
 0x3e0   : > { %v3562_v25 = vor.u32 %v3561_v38, %v3557_v55  ;;  %v3558_v11 = vsel %vm8678_vm11, %v3553_v27, %v3557_v55  ;;  %1421 = vst [vmem:[#allocation2 + $0xcc] sm:$0xf] %v1420_v42  ;;  %v7148_v17 = vld [vmem:[#allocation4 + $0x218] sm:$0xf]  ;;  %v7864_v38 = vld [vmem:[#allocation4 + $0x238] sm:$0xf0] }
 0x3e1   : > { %v9746_v28 = vpop.f32.mrf.mxu3  ;;  %3653 = vst [vmem:[#allocation4 + $0x40c] sm:$0xf] %v3558_v11  ;;  %v3820_v27 = vrot.slane %v3818_v53, 4 }
 0x3e2   : > { %v3563_v23 = vrot.slane %v3562_v25, 4  ;;  %v1423_v25 = vld [vmem:[#allocation2 + $0xd4] sm:$0x1] }
 0x3e3   : > { %6101 = vmatmul.bf16.gmra.mxu0 %v7361_v15  ;;  %6155 = vmatmul.bf16.gmra.mxu2 %v7113_v35  ;;  %v1424_v55 = vsel %vm8385_vm2, %v10064_v61, %v1423_v25  ;;  %v3684_v15 = vld [vmem:[#allocation2 + $0x84] sm:$0xe] }
 0x3e4   : > { %v3568_v33 = vsel %vm8678_vm11, %v3563_v23, %v3567_v32  ;;  %1425 = vst [vmem:[#allocation2 + $0xd4] sm:$0x1] %v1424_v55  ;;  %v6855_v44 = vrot.slane %v3684_v15, 9  ;;  %v3821_v32 = vrot.slane %v3686_v18, 5 }
 0x3e5   : > { %3654 = vst [vmem:[#allocation4 + $0x430] sm:$0xf] %v3568_v33  ;;  %v3207_v33 = vld [vmem:[#allocation2 + $0xd0] sm:$0xf] }
 0x3e6   : > { %v5840_v62 = vpop.f32.mrf.mxu2  ;;  %v3819_v11 = vsel %vm8855_vm14, %v6855_v44, %v3818_v53  ;;  %v3822_v47 = vsel %vm8855_vm14, %v3820_v27, %v3821_v32  ;;  %v3579_v1 = vshll.u32 %v3207_v33, 16  ;;  %v3583_v42 = vshrl.u32 %v3207_v33, 16  ;;  %v3128_v33 = vld [vmem:[#allocation2 + $0xd0] sm:$0xf] }
 0x3e7   : > { %v5841_v23 = vadd.f32 %v5840_v62, %v9614_v22  ;;  %3915 = vst [vmem:[#allocation4 + $0x2a8] sm:$0xf] %v3819_v11  ;;  %v3206_v25 = vld [vmem:[#allocation2 + $0xcc] sm:$0xf]  ;;  %v7149_v11 = vor.u32 %v7864_v38, %v7148_v17 }
 0x3e8   : > { %v7922_v34 = vld [vmem:[#allocation4 + $0x40c] sm:$0xf]  ;;  %3916 = vst [vmem:[#allocation4 + $0x2cc] sm:$0xf] %v3822_v47  ;;  %v3581_v22 = vrot.slane %v3579_v1, 5  ;;  %v3585_v61 = vrot.slane %v3583_v42, 4 }
 0x3e9   : > { %v5929_v35 = vpop.f32.mrf.mxu3  ;;  %v3570_v53 = vshrl.u32 %v3206_v25, 16  ;;  %v3573_v15 = vshll.u32 %v3206_v25, 16  ;;  %v3127_v47 = vld [vmem:[#allocation2 + $0xcc] sm:$0xf]  ;;  %3160 = vst [vmem:[#allocation4 + $0x474] sm:$0xf] %v3128_v33 }
 0x3ea   : > { %v9763_v52 = vadd.f32 %v5929_v35, %v5841_v23  ;;  %v3586_v62 = vor.u32 %v3585_v61, %v3581_v22  ;;  %3159 = vst [vmem:[#allocation4 + $0x450] sm:$0xf] %v3127_v47  ;;  %v7356_v25 = vld [vmem:[#allocation4 + $0x3c0] sm:$0xf]  ;;  %v3688_v61 = vld [vmem:[#allocation2 + $0x94] sm:$0xf] }
 0x3eb   : > { %v3208_v55 = vld [vmem:[#allocation2 + $0xd4] sm:$0x1]  ;;  %v3572_v32 = vrot.slane %v3570_v53, 4  ;;  %v3575_v23 = vrot.slane %v3573_v15, 5  ;;  %v3825_v38 = vrot.slane %v3688_v61, 5 }
 0x3ec   : > { %10066 = vst [vmem:[#allocation28_spill] sm:$0xff] %v9763_v52  ;;  %v7394_v7 = vld [vmem:[#allocation4 + $0x42c] sm:$0xf0]  ;;  %v3589_v44 = vshll.u32 %v3208_v55, 16  ;;  %v3587_v1 = vrot.slane %v3586_v62, 4 }
 0x3ed   : > { %v7397_v18 = vor.u32 %v7922_v34, %v7394_v7  ;;  %v3576_v52 = vor.u32 %v3575_v23, %v3572_v32  ;;  %v3687_v55 = vld [vmem:[#allocation2 + $0x90] sm:$0xe]  ;;  %v3689_v53 = vld [vmem:[#allocation2 + $0x98] sm:$0x1]  ;;  %v7184_v47 = vld [vmem:[#allocation4 + $0x260] sm:$0xf] }
 0x3ee   : > { %6007 = vmatmul.bf16.gmra.mxu1 %v7321_v40  ;;  %v5842_v27 = vpop.f32.mrf.mxu2  ;;  %v3591_v42 = vrot.slane %v3589_v44, 5  ;;  %v3827_v44 = vrot.slane %v3825_v38, 4  ;;  %v7873_v33 = vld [vmem:[#allocation4 + $0x280] sm:$0xf0]  ;;  %v7926_v61 = vld [vmem:[#allocation4 + $0x428] sm:$0xf0] }
 0x3ef   : > { %v9766_v35 = vadd.f32 %v5842_v27, %v9627_v50  ;;  %v3577_v7 = vrot.slane %v3576_v52, 4  ;;  %v7917_v50 = vld [vmem:[#allocation4 + $0x3e0] sm:$0xf0]  ;;  %v3828_v27 = vrot.slane %v3689_v53, 5  ;;  %v3692_v53 = vld [vmem:[#allocation2 + $0xa4] sm:$0x1] }
 0x3f0   : > { %v3592_v34 = vsel %vm8678_vm11, %v3587_v1, %v3591_v42  ;;  %v7357_v62 = vor.u32 %v7917_v50, %v7356_v25  ;;  %v9784_v25 = vpop.f32.mrf.mxu0  ;;  %v7392_v50 = vld [vmem:[#allocation4 + $0x408] sm:$0xf] }
 0x3f1   : > { %v9768_v40 = vpop.f32.mrf.mxu3  ;;  %3656 = vst [vmem:[#allocation4 + $0x478] sm:$0xf] %v3592_v34  ;;  %v3582_v17 = vsel %vm8678_vm11, %v3577_v7, %v3581_v22  ;;  %v7185_v7 = vor.u32 %v7873_v33, %v7184_v47  ;;  %v7882_v47 = vld [vmem:[#allocation4 + $0x2c8] sm:$0xf0] }
 0x3f2   : > { %3655 = vst [vmem:[#allocation4 + $0x454] sm:$0xf] %v3582_v17  ;;  %v3691_v17 = vld [vmem:[#allocation2 + $0xa0] sm:$0xf] }
 0x3f3   : > { %6106 = vmatmul.bf16.gmra.mxu0 %v7397_v18  ;;  %6160 = vmatmul.bf16.gmra.mxu2 %v7149_v11  ;;  %v6856_v18 = vrot.slane %v3687_v55, 9  ;;  %v3829_v11 = vsel %vm8855_vm14, %v3827_v44, %v3828_v27  ;;  %v3690_v55 = vld [vmem:[#allocation2 + $0x9c] sm:$0xe] }
 0x3f4   : > { %3918 = vst [vmem:[#allocation4 + $0x314] sm:$0xf] %v3829_v11  ;;  %v6857_v44 = vrot.slane %v3690_v55, 9  ;;  %v7428_v55 = vld [vmem:[#allocation4 + $0x450] sm:$0xf] }
 0x3f5   : > { %v3826_v23 = vsel %vm8855_vm14, %v6856_v18, %v3825_v38  ;;  %v3832_v38 = vrot.slane %v3691_v17, 5  ;;  %v7393_v18 = vor.u32 %v7926_v61, %v7392_v50 }
 0x3f6   : > { %v5845_v15 = vpop.f32.mrf.mxu2  ;;  %3917 = vst [vmem:[#allocation4 + $0x2f0] sm:$0xf] %v3826_v23  ;;  %v10067_v23 = vld [vmem:[#allocation32_spill] sm:$0xff] }
 0x3f7   : > { %v5846_v32 = vadd.f32 %v5845_v15, %v9643_v29  ;;  %v9786_v15 = vpop.f32.mrf.mxu1  ;;  %v3834_v27 = vrot.slane %v3832_v38, 4  ;;  %v5951_v11 = vadd.f32 %v9673_v14, %v10067_v23  ;;  %v7935_v14 = vld [vmem:[#allocation4 + $0x470] sm:$0xf0] }
 0x3f8   : > { %v7430_v22 = vld [vmem:[#allocation4 + $0x474] sm:$0xf0] }
 0x3f9   : > { %v5934_v52 = vpop.f32.mrf.mxu3  ;;  %v7931_v1 = vld [vmem:[#allocation4 + $0x454] sm:$0xf]  ;;  %v6040_v33 = vadd.f32 %v9658_v48, %v5951_v11  ;;  %v3695_v48 = vld [vmem:[#allocation2 + $0xb0] sm:$0x1] }
 0x3fa   : > { %v9779_v56 = vadd.f32 %v5934_v52, %v5846_v32  ;;  %v7433_v42 = vor.u32 %v7931_v1, %v7430_v22  ;;  %v3835_v32 = vrot.slane %v3692_v53, 5  ;;  %v7220_v22 = vld [vmem:[#allocation4 + $0x2a8] sm:$0xf]  ;;  %v3694_v53 = vld [vmem:[#allocation2 + $0xac] sm:$0xf] }
 0x3fc   : > { %v3836_v52 = vsel %vm8855_vm14, %v3834_v27, %v3835_v32  ;;  %v3693_v27 = vld [vmem:[#allocation2 + $0xa8] sm:$0xe] }
 0x3fd   : > { %3920 = vst [vmem:[#allocation4 + $0x35c] sm:$0xf] %v3836_v52  ;;  %v3842_v52 = vrot.slane %v3695_v48, 5  ;;  %v3698_v48 = vld [vmem:[#allocation2 + $0xbc] sm:$0x1] }
 0x3fe   : > { %6012 = vmatmul.bf16.gmra.mxu1 %v7357_v62  ;;  %v5847_v34 = vpop.f32.mrf.mxu2 }
 0x3ff   : > { %v9782_v29 = vadd.f32 %v5847_v34, %v9654_v41  ;;  %v3833_v41 = vsel %vm8855_vm14, %v6857_v44, %v3832_v38  ;;  %v9796_v50 = vpop.f32.mrf.mxu1  ;;  %v3839_v44 = vrot.slane %v3694_v53, 5 }
 0x400   : > { %3919 = vst [vmem:[#allocation4 + $0x338] sm:$0xf] %v3833_v41 }
 0x401   : > { %v3841_v41 = vrot.slane %v3839_v44, 4 }
 0x403   : > { %6111 = vmatmul.bf16.gmra.mxu0 %v7433_v42  ;;  %6165 = vmatmul.bf16.gmra.mxu2 %v7185_v7  ;;  %v7221_v7 = vor.u32 %v7882_v47, %v7220_v22  ;;  %v3843_v11 = vsel %vm8855_vm14, %v3841_v41, %v3842_v52  ;;  %v5956_v22 = vadd.f32 %v9699_v31, %v9405_v2  ;;  %v3697_v31 = vld [vmem:[#allocation2 + $0xb8] sm:$0xf] }
 0x404   : > { %3922 = vst [vmem:[#allocation4 + $0x3a4] sm:$0xf] %v3843_v11 }
 0x406   : > { %v6126_v62 = vpop.f32.mrf.mxu2 }
 0x407   : > { %v6127_v1 = vadd.f32 %v6126_v62, %v9668_v37  ;;  %v7429_v37 = vor.u32 %v7935_v14, %v7428_v55  ;;  %v6858_v62 = vrot.slane %v3693_v27, 9  ;;  %v9806_v47 = vpop.f32.mrf.mxu1  ;;  %v3696_v27 = vld [vmem:[#allocation2 + $0xb4] sm:$0xe]  ;;  %v7292_v11 = vld [vmem:[#allocation4 + $0x338] sm:$0xf] }
 0x409   : > { %v6206_v61 = vmax.f32 %v6127_v1, 0.0  ;;  %v3840_v23 = vsel %vm8855_vm14, %v6858_v62, %v3839_v44  ;;  %v7891_v1 = vld [vmem:[#allocation4 + $0x310] sm:$0xf0]  ;;  %v3846_v44 = vrot.slane %v3697_v31, 5  ;;  %v3699_v31 = vld [vmem:[#allocation2 + $0xc0] sm:$0xe] }
 0x40a   : > { %3921 = vst [vmem:[#allocation4 + $0x380] sm:$0xf] %v3840_v23  ;;  %v5961_v23 = vadd.f32 %v9722_v58, %v9438_v30  ;;  %v3700_v30 = vld [vmem:[#allocation2 + $0xc4] sm:$0xf] }
 0x40b   : > { %v3848_v62 = vrot.slane %v3846_v44, 4  ;;  %v3853_v58 = vrot.slane %v3700_v30, 5  ;;  %v3704_v30 = vld [vmem:[#allocation2 + $0xd4] sm:$0x1] }
 0x40e   : > { %6017 = vmatmul.bf16.gmra.mxu1 %v7393_v18  ;;  %v6128_v42 = vpop.f32.mrf.mxu2  ;;  %v9798_v18 = vpop.f32.mrf.mxu0 }
 0x40f   : > { %v6129_v34 = vadd.f32 %v6128_v42, %v6040_v33  ;;  %v7256_v33 = vld [vmem:[#allocation4 + $0x2f0] sm:$0xf]  ;;  %v6045_v42 = vadd.f32 %v9686_v59, %v5956_v22  ;;  %v9812_v53 = vpop.f32.mrf.mxu1  ;;  %v6859_v59 = vrot.slane %v3696_v27, 9  ;;  %v7900_v22 = vld [vmem:[#allocation4 + $0x358] sm:$0xf0] }
 0x411   : > { %v6207_v17 = vmax.f32 %v6129_v34, 0.0  ;;  %v3847_v41 = vsel %vm8855_vm14, %v6859_v59, %v3846_v44  ;;  %v3701_v44 = vld [vmem:[#allocation2 + $0xc8] sm:$0x1] }
 0x412   : > { %3923 = vst [vmem:[#allocation4 + $0x3c8] sm:$0xf] %v3847_v41 }
 0x413   : > { %v6238_v38 = vpack.c.bf16 %v6207_v17, %v6206_v61  ;;  %6170 = vmatmul.bf16.gmra.mxu2 %v7221_v7 }
 0x415   : > { %6362 = vmatmul.bf16.vlgmr.msra.gmra.mxu3 %v6238_v38  ;;  %v7257_v38 = vor.u32 %v7891_v1, %v7256_v33  ;;  %v6050_v33 = vadd.f32 %v9717_v46, %v5961_v23  ;;  %v6860_v46 = vrot.slane %v3699_v31, 9  ;;  %v7909_v23 = vld [vmem:[#allocation4 + $0x3a0] sm:$0xf0] }
 0x416   : > { %v6131_v32 = vpop.f32.mrf.mxu2  ;;  %v9810_v7 = vpop.f32.mrf.mxu0 }
 0x417   : > { %v6132_v34 = vadd.f32 %v6131_v32, %v9694_v63  ;;  %v3849_v63 = vrot.slane %v3698_v48, 5  ;;  %v3855_v48 = vrot.slane %v3853_v58, 4  ;;  %v3854_v59 = vsel %vm8855_vm14, %v6860_v46, %v3853_v58 }
 0x418   : > { %3925 = vst [vmem:[#allocation4 + $0x410] sm:$0xf] %v3854_v59 }
 0x419   : > { %v6208_v55 = vmax.f32 %v6132_v34, 0.0  ;;  %v3850_v52 = vsel %vm8855_vm14, %v3848_v62, %v3849_v63  ;;  %v5966_v63 = vadd.f32 %v9786_v15, %v9471_v43  ;;  %v3702_v15 = vld [vmem:[#allocation2 + $0xcc] sm:$0xe] }
 0x41a   : > { %3924 = vst [vmem:[#allocation4 + $0x3ec] sm:$0xf] %v3850_v52  ;;  %v7328_v52 = vld [vmem:[#allocation4 + $0x380] sm:$0xf] }
 0x41e   : > { %6022 = vmatmul.bf16.gmra.mxu1 %v7429_v37  ;;  %v6133_v61 = vpop.f32.mrf.mxu2  ;;  %v9814_v32 = vpop.f32.mrf.mxu0 }
 0x41f   : > { %v6134_v17 = vadd.f32 %v6133_v61, %v6045_v42  ;;  %v9824_v42 = vpop.f32.mrf.mxu1 }
 0x421   : > { %v6209_v14 = vmax.f32 %v6134_v17, 0.0  ;;  %v7293_v17 = vor.u32 %v7900_v22, %v7292_v11  ;;  %v6055_v11 = vadd.f32 %v9784_v25, %v5966_v63  ;;  %v3863_v25 = vrot.slane %v3704_v30, 5 }
 0x423   : > { %6175 = vmatmul.bf16.gmra.mxu2 %v7257_v38  ;;  %v6239_v2 = vpack.c.bf16 %v6209_v14, %v6208_v55 }
 0x425   : > { %6367 = vmatmul.bf16.gmra.mxu3 %v6239_v2 }
 0x426   : > { %v6136_v37 = vpop.f32.mrf.mxu2  ;;  %v9826_v14 = vpop.f32.mrf.mxu0 }
 0x427   : > { %v6137_v1 = vadd.f32 %v6136_v37, %v9715_v3  ;;  %v3856_v3 = vrot.slane %v3701_v44, 5  ;;  %v9828_v37 = vpop.f32.mrf.mxu1  ;;  %v6861_v44 = vrot.slane %v3702_v15, 9 }
 0x429   : > { %v6210_v38 = vmax.f32 %v6137_v1, 0.0  ;;  %v3857_v62 = vsel %vm8855_vm14, %v3855_v48, %v3856_v3 }
 0x42a   : > { %3926 = vst [vmem:[#allocation4 + $0x434] sm:$0xf] %v3857_v62 }
 0x42e   : > { %v6138_v34 = vpop.f32.mrf.mxu2  ;;  %v9836_v41 = vpop.f32.mrf.mxu0 }
 0x42f   : > { %v6139_v61 = vadd.f32 %v6138_v34, %v6050_v33  ;;  %v7329_v34 = vor.u32 %v7909_v23, %v7328_v52  ;;  %v7364_v52 = vld [vmem:[#allocation4 + $0x3c8] sm:$0xf]  ;;  %v7918_v23 = vld [vmem:[#allocation4 + $0x3e8] sm:$0xf0] }
 0x431   : > { %v6211_v55 = vmax.f32 %v6139_v61, 0.0 }
 0x433   : > { %6180 = vmatmul.bf16.gmra.mxu2 %v7293_v17  ;;  %v6240_v2 = vpack.c.bf16 %v6211_v55, %v6210_v38  ;;  %v5980_v38 = vpop.f32.mrf.mxu1 }
 0x435   : > { %6372 = vmatmul.bf16.gmra.mxu3 %v6240_v2  ;;  %v3703_v2 = vld [vmem:[#allocation2 + $0xd0] sm:$0xf] }
 0x436   : > { %v6141_v27 = vpop.f32.mrf.mxu2  ;;  %v3860_v43 = vrot.slane %v3703_v2, 5  ;;  %v6069_v58 = vpop.f32.mrf.mxu0  ;;  %v7400_v2 = vld [vmem:[#allocation4 + $0x410] sm:$0xf] }
 0x437   : > { %v6142_v22 = vadd.f32 %v6141_v27, %v9741_v21  ;;  %v5882_v21 = vadd.f32 %v9505_v39, %v9503_v0  ;;  %v5969_v27 = vadd.f32 %v9796_v50, %v9487_v13  ;;  %v7365_v50 = vor.u32 %v7918_v23, %v7364_v52 }
 0x438   : > { %v3862_v46 = vrot.slane %v3860_v43, 4  ;;  %v3861_v48 = vsel %vm8855_vm14, %v6861_v44, %v3860_v43  ;;  %v7927_v43 = vld [vmem:[#allocation4 + $0x430] sm:$0xf0] }
 0x439   : > { %v6212_v61 = vmax.f32 %v6142_v22, 0.0  ;;  %v5971_v59 = vadd.f32 %v9806_v47, %v5882_v21  ;;  %3927 = vst [vmem:[#allocation4 + $0x458] sm:$0xf] %v3861_v48  ;;  %v6058_v62 = vadd.f32 %v9798_v18, %v5969_v27  ;;  %v5887_v18 = vadd.f32 %v9536_v60, %v9534_v57 }
 0x43a   : > { %v3864_v3 = vsel %vm8855_vm14, %v3862_v46, %v3863_v25  ;;  %v7401_v46 = vor.u32 %v7927_v43, %v7400_v2 }
 0x43b   : > { %3928 = vst [vmem:[#allocation4 + $0x47c] sm:$0xf] %v3864_v3  ;;  %v5983_v63 = vpop.f32.mrf.mxu1  ;;  %v6060_v0 = vadd.f32 %v9810_v7, %v5971_v59  ;;  %v5976_v7 = vadd.f32 %v9824_v42, %v5887_v18 }
 0x43d   : > { %v6065_v15 = vadd.f32 %v9826_v14, %v5976_v7 }
 0x43e   : > { %v6143_v33 = vpop.f32.mrf.mxu2  ;;  %v6072_v22 = vpop.f32.mrf.mxu0 }
 0x43f   : > { %v6144_v1 = vadd.f32 %v6143_v33, %v6055_v11 }
 0x440   : > { %v7436_v3 = vld [vmem:[#allocation4 + $0x458] sm:$0xf] }
 0x441   : > { %v6213_v17 = vmax.f32 %v6144_v1, 0.0 }
 0x442   : > { %v7936_v59 = vld [vmem:[#allocation4 + $0x478] sm:$0xf0] }
 0x443   : > { %6185 = vmatmul.bf16.gmra.mxu2 %v7329_v34  ;;  %v6241_v55 = vpack.c.bf16 %v6213_v17, %v6212_v61  ;;  %v5985_v47 = vpop.f32.mrf.mxu1  ;;  %v5974_v61 = vadd.f32 %v9812_v53, %v9524_v9  ;;  %v5892_v53 = vadd.f32 %v9562_v19, %v9560_v12 }
 0x445   : > { %6377 = vmatmul.bf16.gmra.mxu3 %v6241_v55  ;;  %v6063_v55 = vadd.f32 %v9814_v32, %v5974_v61  ;;  %v5979_v32 = vadd.f32 %v9828_v37, %v9554_v45  ;;  %v5981_v42 = vadd.f32 %v5980_v38, %v5892_v53  ;;  %v5897_v45 = vadd.f32 %v9593_v16, %v9591_v54 }
 0x446   : > { %v6146_v31 = vpop.f32.mrf.mxu2  ;;  %v6074_v17 = vpop.f32.mrf.mxu0  ;;  %v5984_v37 = vadd.f32 %v5983_v63, %v9583_v26 }
 0x447   : > { %v6147_v39 = vadd.f32 %v6146_v31, %v6058_v62  ;;  %v6068_v48 = vadd.f32 %v9836_v41, %v5979_v32  ;;  %v6070_v62 = vadd.f32 %v6069_v58, %v5981_v42  ;;  %v5986_v38 = vadd.f32 %v5985_v47, %v5897_v45 }
 0x448   : > { %v6073_v58 = vadd.f32 %v6072_v22, %v5984_v37 }
 0x449   : > { %v6214_v33 = vmax.f32 %v6147_v39, 0.0 }
 0x44b   : > { %v5988_v25 = vpop.f32.mrf.mxu1 }
 0x44c   : > { %v5989_v54 = vadd.f32 %v5988_v25, %v9611_v20  ;;  %v5907_v20 = vadd.f32 %v9648_v36, %v9646_v24 }
 0x44e   : > { %v6148_v11 = vpop.f32.mrf.mxu2  ;;  %v6077_v60 = vpop.f32.mrf.mxu0 }
 0x44f   : > { %v6149_v13 = vadd.f32 %v6148_v11, %v6060_v0  ;;  %v7437_v11 = vor.u32 %v7936_v59, %v7436_v3  ;;  %v6078_v63 = vadd.f32 %v6077_v60, %v5989_v54  ;;  %v9877_v60 = vld [vmem:[%s9993_s7] ss:$0 sm:$0xff]  ;;  %v10068_v59 = vld [vmem:[#allocation10_spill] sm:$0xff] }
 0x450   : > { %v6271_v24 = vunpack.c.h.bf16 %v10068_v59 }
 0x451   : > { %v6215_v1 = vmax.f32 %v6149_v13, 0.0 }
 0x453   : > { %v6242_v49 = vpack.c.bf16 %v6215_v1, %v6214_v33  ;;  %6190 = vmatmul.bf16.gmra.mxu2 %v7365_v50  ;;  %v5990_v14 = vpop.f32.mrf.mxu1  ;;  %v6075_v1 = vadd.f32 %v6074_v17, %v5986_v38  ;;  %v10069_v38 = vld [vmem:[#allocation31_spill] sm:$0xff] }
 0x455   : > { %6382 = vmatmul.bf16.gmra.mxu3 %v6242_v49 }
 0x456   : > { %v6151_v34 = vpop.f32.mrf.mxu2  ;;  %v6079_v23 = vpop.f32.mrf.mxu0 }
 0x457   : > { %v6152_v30 = vadd.f32 %v6151_v34, %v6063_v55 }
 0x459   : > { %v6216_v21 = vmax.f32 %v6152_v30, 0.0  ;;  %v5902_v30 = vadd.f32 %v9619_v10, %v9617_v5 }
 0x45b   : > { %v5993_v12 = vpop.f32.mrf.mxu1  ;;  %v5991_v16 = vadd.f32 %v5990_v14, %v5902_v30 }
 0x45c   : > { %v5994_v5 = vadd.f32 %v5993_v12, %v9640_v8 }
 0x45d   : > { %v6080_v47 = vadd.f32 %v6079_v23, %v5991_v16 }
 0x45e   : > { %v6153_v31 = vpop.f32.mrf.mxu2  ;;  %v6082_v41 = vpop.f32.mrf.mxu0 }
 0x45f   : > { %v6154_v44 = vadd.f32 %v6153_v31, %v6065_v15  ;;  %v6083_v42 = vadd.f32 %v6082_v41, %v5994_v5  ;;  %v10073_v5 = vld [vmem:[#allocation35_spill] sm:$0xff] }
 0x461   : > { %v6217_v27 = vmax.f32 %v6154_v44, 0.0 }
 0x463   : > { %v6243_v57 = vpack.c.bf16 %v6217_v27, %v6216_v21  ;;  %6195 = vmatmul.bf16.gmra.mxu2 %v7401_v46  ;;  %v5995_v34 = vpop.f32.mrf.mxu1  ;;  %v9869_v46 = vpop.f32.mrf.mxu3 }
 0x464   : > { %v5996_v25 = vadd.f32 %v5995_v34, %v5907_v20  ;;  %v10072_v20 = vld [vmem:[#allocation34_spill] sm:$0xff] }
 0x465   : > { %6387 = vmatmul.bf16.gmra.mxu3 %v6243_v57 }
 0x466   : > { %v6156_v9 = vpop.f32.mrf.mxu2  ;;  %v6084_v2 = vpop.f32.mrf.mxu0 }
 0x467   : > { %v6157_v52 = vadd.f32 %v6156_v9, %v6068_v48  ;;  %v6085_v48 = vadd.f32 %v6084_v2, %v5996_v25  ;;  %v10074_v25 = vld [vmem:[#allocation33_spill] sm:$0xff] }
 0x469   : > { %v6218_v13 = vmax.f32 %v6157_v52, 0.0 }
 0x46b   : > { %v5998_v26 = vpop.f32.mrf.mxu1 }
 0x46e   : > { %v6158_v0 = vpop.f32.mrf.mxu2  ;;  %v6087_v22 = vpop.f32.mrf.mxu0 }
 0x46f   : > { %v6159_v39 = vadd.f32 %v6158_v0, %v6070_v62  ;;  %v6270_v62 = vunpack.c.l.bf16 %v10068_v59 }
 0x471   : > { %v6219_v50 = vmax.f32 %v6159_v39, 0.0 }
 0x473   : > { %v6244_v33 = vpack.c.bf16 %v6219_v50, %v6218_v13  ;;  %6200 = vmatmul.bf16.gmra.mxu2 %v7437_v11  ;;  %v6000_v57 = vpop.f32.mrf.mxu1 }
 0x475   : > { %6392 = vmatmul.bf16.gmra.mxu3 %v6244_v33 }
 0x476   : > { %v6161_v19 = vpop.f32.mrf.mxu2  ;;  %v6089_v53 = vpop.f32.mrf.mxu0 }
 0x477   : > { %v6162_v49 = vadd.f32 %v6161_v19, %v6073_v58  ;;  %v5912_v58 = vadd.f32 %v10069_v38, %v9671_v4 }
 0x479   : > { %v6220_v7 = vmax.f32 %v6162_v49, 0.0 }
 0x47b   : > { %v6003_v14 = vpop.f32.mrf.mxu1 }
 0x47e   : > { %v6163_v18 = vpop.f32.mrf.mxu2  ;;  %v6092_v8 = vpop.f32.mrf.mxu0 }
 0x47f   : > { %v6164_v61 = vadd.f32 %v6163_v18, %v6075_v1  ;;  %v10070_v1 = vld [vmem:[#allocation30_spill] sm:$0xff] }
 0x480   : > { %v5999_v49 = vadd.f32 %v5998_v26, %v10070_v1 }
 0x481   : > { %v6221_v55 = vmax.f32 %v6164_v61, 0.0  ;;  %v6001_v61 = vadd.f32 %v6000_v57, %v5912_v58 }
 0x483   : > { %v6245_v43 = vpack.c.bf16 %v6221_v55, %v6220_v7  ;;  %v6005_v37 = vpop.f32.mrf.mxu1  ;;  %v6088_v55 = vadd.f32 %v6087_v22, %v5999_v49  ;;  %v6090_v2 = vadd.f32 %v6089_v53, %v6001_v61  ;;  %v10077_v61 = vld [vmem:[#allocation36_spill] sm:$0xff] }
 0x485   : > { %6397 = vmatmul.bf16.gmra.mxu3 %v6245_v43 }
 0x486   : > { %v6166_v15 = vpop.f32.mrf.mxu2  ;;  %v6094_v7 = vpop.f32.mrf.mxu0 }
 0x487   : > { %v6167_v17 = vadd.f32 %v6166_v15, %v6078_v63  ;;  %v10071_v15 = vld [vmem:[#allocation11_spill] sm:$0xff] }
 0x488   : > { %v6272_v30 = vunpack.c.l.bf16 %v10071_v15 }
 0x489   : > { %v6222_v21 = vmax.f32 %v6167_v17, 0.0 }
 0x48b   : > { %v6008_v17 = vpop.f32.mrf.mxu1 }
 0x48e   : > { %v6168_v31 = vpop.f32.mrf.mxu2  ;;  %v6097_v57 = vpop.f32.mrf.mxu0 }
 0x48f   : > { %v6169_v44 = vadd.f32 %v6168_v31, %v6080_v47  ;;  %v6273_v47 = vunpack.c.h.bf16 %v10071_v15 }
 0x491   : > { %v6223_v27 = vmax.f32 %v6169_v44, 0.0 }
 0x493   : > { %v6246_v9 = vpack.c.bf16 %v6223_v27, %v6222_v21 }
 0x495   : > { %6402 = vmatmul.bf16.gmra.mxu3 %v6246_v9 }
 0x496   : > { %v6171_v32 = vpop.f32.mrf.mxu2 }
 0x497   : > { %v6172_v3 = vadd.f32 %v6171_v32, %v6083_v42  ;;  %v6004_v42 = vadd.f32 %v6003_v14, %v10074_v25  ;;  %v5927_v25 = vadd.f32 %v9746_v28, %v9744_v51 }
 0x498   : > { %v6363_v10 = vpop.f32.mrf.mxu3 }
 0x499   : > { %v6364_v52 = vadd.f32 %v9877_v60, %v6363_v10  ;;  %v6224_v39 = vmax.f32 %v6172_v3, 0.0  ;;  %v5917_v10 = vadd.f32 %v10073_v5, %v10072_v20 }
 0x49b   : > { %v6443_v11 = vadd.f32 %v6364_v52, %v6270_v62  ;;  %v6006_v59 = vadd.f32 %v6005_v37, %v5917_v10  ;;  %v6010_v62 = vpop.f32.mrf.mxu1  ;;  %v6093_v52 = vadd.f32 %v6092_v8, %v6004_v42  ;;  %v10079_v42 = vld [vmem:[#allocation38_spill] sm:$0xff] }
 0x49d   : > { %v6475_v19 = vmax.f32 %v6443_v11, 0.0  ;;  %v6099_v11 = vpop.f32.mrf.mxu0 }
 0x49e   : > { %v6173_v23 = vpop.f32.mrf.mxu2 }
 0x49f   : > { %v6174_v0 = vadd.f32 %v6173_v23, %v6085_v48  ;;  %v6095_v23 = vadd.f32 %v6094_v7, %v6006_v59  ;;  %v6009_v7 = vadd.f32 %v6008_v17, %v10077_v61 }
 0x4a0   : > { %v6365_v36 = vpop.f32.mrf.mxu3 }
 0x4a1   : > { %v6225_v13 = vmax.f32 %v6174_v0, 0.0  ;;  %v6366_v50 = vadd.f32 %v9877_v60, %v6365_v36 }
 0x4a3   : > { %v6247_v33 = vpack.c.bf16 %v6225_v13, %v6224_v39  ;;  %v6444_v12 = vadd.f32 %v6366_v50, %v6271_v24  ;;  %v10075_v24 = vld [vmem:[#allocation12_spill] sm:$0xff]  ;;  %v6013_v38 = vpop.f32.mrf.mxu1 }
 0x4a4   : > { %v6274_v36 = vunpack.c.l.bf16 %v10075_v24 }
 0x4a5   : > { %v6476_v45 = vmax.f32 %v6444_v12, 0.0  ;;  %6407 = vmatmul.bf16.gmra.mxu3 %v6247_v33  ;;  %v6275_v33 = vunpack.c.h.bf16 %v10075_v24 }
 0x4a6   : > { %v6176_v41 = vpop.f32.mrf.mxu2 }
 0x4a7   : > { %v8020_v34 = vpack.c.bf16 %v6476_v45, %v6475_v19  ;;  %v6177_v43 = vadd.f32 %v6176_v41, %v6088_v55 }
 0x4a8   : > { %v6368_v18 = vpop.f32.mrf.mxu3 }
 0x4a9   : > { %8021 = vst [vmem:[%s8269_s19] sm:$0xff] %v8020_v34   ;;  %v6369_v54 = vadd.f32 %v9877_v60, %v6368_v18  ;;  %v6226_v31 = vmax.f32 %v6177_v43, 0.0  ;;  %v10076_v34 = vld [vmem:[#allocation37_spill] sm:$0xff] }
 0x4aa   : > { %v5922_v18 = vadd.f32 %v10076_v34, %v9720_v6  ;;  %v5932_v34 = vadd.f32 %v9768_v40, %v9766_v35 }
 0x4ab   : > { %v6445_v26 = vadd.f32 %v6369_v54, %v6272_v30  ;;  %v6098_v30 = vadd.f32 %v6097_v57, %v6009_v7 }
 0x4ac   : > { %v6011_v15 = vadd.f32 %v6010_v62, %v5922_v18  ;;  %v10081_v18 = vld [vmem:[#allocation28_spill] sm:$0xff] }
 0x4ad   : > { %v6477_v9 = vmax.f32 %v6445_v26, 0.0 }
 0x4ae   : > { %v6178_v16 = vpop.f32.mrf.mxu2  ;;  %v6100_v54 = vadd.f32 %v6099_v11, %v6011_v15 }
 0x4af   : > { %v6179_v63 = vadd.f32 %v6178_v16, %v6090_v2  ;;  %v6102_v2 = vpop.f32.mrf.mxu0 }
 0x4b0   : > { %v6370_v4 = vpop.f32.mrf.mxu3 }
 0x4b1   : > { %v6227_v44 = vmax.f32 %v6179_v63, 0.0  ;;  %v6371_v21 = vadd.f32 %v9877_v60, %v6370_v4  ;;  %v10078_v63 = vld [vmem:[#allocation13_spill] sm:$0xff] }
 0x4b3   : > { %v6248_v27 = vpack.c.bf16 %v6227_v44, %v6226_v31  ;;  %v6446_v22 = vadd.f32 %v6371_v21, %v6273_v47  ;;  %v6276_v47 = vunpack.c.l.bf16 %v10078_v63  ;;  %v6015_v31 = vpop.f32.mrf.mxu1  ;;  %v6277_v21 = vunpack.c.h.bf16 %v10078_v63 }
 0x4b5   : > { %v6478_v53 = vmax.f32 %v6446_v22, 0.0  ;;  %6412 = vmatmul.bf16.gmra.mxu3 %v6248_v27 }
 0x4b6   : > { %v6181_v32 = vpop.f32.mrf.mxu2 }
 0x4b7   : > { %v8025_v48 = vpack.c.bf16 %v6478_v53, %v6477_v9  ;;  %v6182_v0 = vadd.f32 %v6181_v32, %v6093_v52  ;;  %v6104_v53 = vpop.f32.mrf.mxu0  ;;  %v6016_v52 = vadd.f32 %v6015_v31, %v5927_v25 }
 0x4b8   : > { %v6373_v3 = vpop.f32.mrf.mxu3 }
 0x4b9   : > { %8098 = vst [vmem:[%s8269_s19 + $0x8] sm:$0xff] %v8025_v48   ;;  %v6374_v39 = vadd.f32 %v9877_v60, %v6373_v3  ;;  %v6228_v19 = vmax.f32 %v6182_v0, 0.0  ;;  %v6014_v48 = vadd.f32 %v6013_v38, %v10079_v42  ;;  %v6105_v24 = vadd.f32 %v6104_v53, %v6016_v52  ;;  %v10083_v52 = vld [vmem:[#allocation16_spill] sm:$0xff] }
 0x4bb   : > { %v6447_v14 = vadd.f32 %v6374_v39, %v6274_v36  ;;  %v6018_v59 = vpop.f32.mrf.mxu1  ;;  %v10080_v39 = vld [vmem:[#allocation14_spill] sm:$0xff] }
 0x4bc   : > { %v6278_v11 = vunpack.c.l.bf16 %v10080_v39  ;;  %v6019_v61 = vadd.f32 %v6018_v59, %v10081_v18 }
 0x4bd   : > { %v6479_v58 = vmax.f32 %v6447_v14, 0.0 }
 0x4be   : > { %v6183_v13 = vpop.f32.mrf.mxu2 }
 0x4bf   : > { %v6184_v50 = vadd.f32 %v6183_v13, %v6095_v23  ;;  %v6103_v23 = vadd.f32 %v6102_v2, %v6014_v48  ;;  %v6107_v0 = vpop.f32.mrf.mxu0 }
 0x4c0   : > { %v6375_v12 = vpop.f32.mrf.mxu3 }
 0x4c1   : > { %v6229_v45 = vmax.f32 %v6184_v50, 0.0  ;;  %v6376_v37 = vadd.f32 %v9877_v60, %v6375_v12  ;;  %v6279_v12 = vunpack.c.h.bf16 %v10080_v39  ;;  %v6283_v39 = vunpack.c.h.bf16 %v10083_v52 }
 0x4c3   : > { %v6249_v41 = vpack.c.bf16 %v6229_v45, %v6228_v19  ;;  %v6448_v8 = vadd.f32 %v6376_v37, %v6275_v33  ;;  %v6020_v37 = vpop.f32.mrf.mxu1 }
 0x4c4   : > { %v6021_v2 = vadd.f32 %v6020_v37, %v5932_v34 }
 0x4c5   : > { %v6480_v1 = vmax.f32 %v6448_v8, 0.0  ;;  %6417 = vmatmul.bf16.gmra.mxu3 %v6249_v41 }
 0x4c6   : > { %v6186_v49 = vpop.f32.mrf.mxu2 }
 0x4c7   : > { %v8030_v55 = vpack.c.bf16 %v6480_v1, %v6479_v58  ;;  %v6187_v16 = vadd.f32 %v6186_v49, %v6098_v30  ;;  %v6109_v1 = vpop.f32.mrf.mxu0 }
 0x4c8   : > { %v6378_v43 = vpop.f32.mrf.mxu3  ;;  %v6110_v30 = vadd.f32 %v6109_v1, %v6021_v2 }
 0x4c9   : > { %8099 = vst [vmem:[%s8269_s19 + $0x10] sm:$0xff] %v8030_v55   ;;  %v6379_v4 = vadd.f32 %v9877_v60, %v6378_v43  ;;  %v6230_v27 = vmax.f32 %v6187_v16, 0.0  ;;  %v6108_v43 = vadd.f32 %v6107_v0, %v6019_v61  ;;  %v10082_v16 = vld [vmem:[#allocation15_spill] sm:$0xff] }
 0x4ca   : > { %v6280_v63 = vunpack.c.l.bf16 %v10082_v16 }
 0x4cb   : > { %v6449_v17 = vadd.f32 %v6379_v4, %v6276_v47  ;;  %v6023_v15 = vpop.f32.mrf.mxu1 }
 0x4cd   : > { %v6481_v20 = vmax.f32 %v6449_v17, 0.0 }
 0x4ce   : > { %v6188_v26 = vpop.f32.mrf.mxu2 }
 0x4cf   : > { %v6189_v44 = vadd.f32 %v6188_v26, %v6100_v54  ;;  %v6281_v26 = vunpack.c.h.bf16 %v10082_v16 }
 0x4d0   : > { %v6380_v6 = vpop.f32.mrf.mxu3 }
 0x4d1   : > { %v6231_v22 = vmax.f32 %v6189_v44, 0.0  ;;  %v6381_v9 = vadd.f32 %v9877_v60, %v6380_v6  ;;  %v6112_v44 = vpop.f32.mrf.mxu0 }
 0x4d3   : > { %v6250_v57 = vpack.c.bf16 %v6231_v22, %v6230_v27  ;;  %v6450_v32 = vadd.f32 %v6381_v9, %v6277_v21 }
 0x4d5   : > { %v6482_v5 = vmax.f32 %v6450_v32, 0.0  ;;  %6422 = vmatmul.bf16.gmra.mxu3 %v6250_v57  ;;  %v6025_v57 = vpop.f32.mrf.mxu1 }
 0x4d6   : > { %v6191_v10 = vpop.f32.mrf.mxu2 }
 0x4d7   : > { %v8035_v3 = vpack.c.bf16 %v6482_v5, %v6481_v20  ;;  %v6192_v36 = vadd.f32 %v6191_v10, %v6103_v23  ;;  %v5937_v20 = vadd.f32 %v9869_v46, %v9782_v29  ;;  %v6024_v5 = vadd.f32 %v6023_v15, %v9779_v56 }
 0x4d8   : > { %v6383_v62 = vpop.f32.mrf.mxu3  ;;  %v6282_v23 = vunpack.c.l.bf16 %v10083_v52 }
 0x4d9   : > { %8100 = vst [vmem:[%s8269_s19 + $0x18] sm:$0xff] %v8035_v3   ;;  %v6384_v13 = vadd.f32 %v9877_v60, %v6383_v62  ;;  %v6232_v28 = vmax.f32 %v6192_v36, 0.0  ;;  %v6026_v42 = vadd.f32 %v6025_v57, %v5937_v20  ;;  %v6114_v48 = vpop.f32.mrf.mxu0  ;;  %v6113_v3 = vadd.f32 %v6112_v44, %v6024_v5 }
 0x4db   : > { %v6451_v19 = vadd.f32 %v6384_v13, %v6278_v11  ;;  %v6115_v59 = vadd.f32 %v6114_v48, %v6026_v42 }
 0x4dd   : > { %v6483_v38 = vmax.f32 %v6451_v19, 0.0 }
 0x4de   : > { %v6193_v50 = vpop.f32.mrf.mxu2 }
 0x4df   : > { %v6194_v33 = vadd.f32 %v6193_v50, %v6105_v24 }
 0x4e0   : > { %v6385_v51 = vpop.f32.mrf.mxu3 }
 0x4e1   : > { %v6233_v14 = vmax.f32 %v6194_v33, 0.0  ;;  %v6386_v45 = vadd.f32 %v9877_v60, %v6385_v51 }
 0x4e3   : > { %v6251_v41 = vpack.c.bf16 %v6233_v14, %v6232_v28  ;;  %v6452_v8 = vadd.f32 %v6386_v45, %v6279_v12  ;;  %v10084_v14 = vld [vmem:[#allocation17_spill] sm:$0xff] }
 0x4e4   : > { %v6284_v45 = vunpack.c.l.bf16 %v10084_v14 }
 0x4e5   : > { %v6484_v58 = vmax.f32 %v6452_v8, 0.0  ;;  %6427 = vmatmul.bf16.gmra.mxu3 %v6251_v41  ;;  %v6285_v41 = vunpack.c.h.bf16 %v10084_v14 }
 0x4e6   : > { %v6196_v49 = vpop.f32.mrf.mxu2 }
 0x4e7   : > { %v8040_v7 = vpack.c.bf16 %v6484_v58, %v6483_v38  ;;  %v6197_v54 = vadd.f32 %v6196_v49, %v6108_v43 }
 0x4e8   : > { %v6388_v55 = vpop.f32.mrf.mxu3 }
 0x4e9   : > { %8101 = vst [vmem:[%s8269_s19 + $0x20] sm:$0xff] %v8040_v7   ;;  %v6389_v47 = vadd.f32 %v9877_v60, %v6388_v55  ;;  %v6234_v40 = vmax.f32 %v6197_v54, 0.0  ;;  %v10085_v7 = vld [vmem:[#allocation18_spill] sm:$0xff] }
 0x4ea   : > { %v6286_v55 = vunpack.c.l.bf16 %v10085_v7  ;;  %v6287_v43 = vunpack.c.h.bf16 %v10085_v7 }
 0x4eb   : > { %v6453_v21 = vadd.f32 %v6389_v47, %v6280_v63 }
 0x4ed   : > { %v6485_v9 = vmax.f32 %v6453_v21, 0.0 }
 0x4ee   : > { %v6198_v4 = vpop.f32.mrf.mxu2 }
 0x4ef   : > { %v6199_v31 = vadd.f32 %v6198_v4, %v6110_v30 }
 0x4f0   : > { %v6390_v35 = vpop.f32.mrf.mxu3 }
 0x4f1   : > { %v6235_v6 = vmax.f32 %v6199_v31, 0.0  ;;  %v6391_v27 = vadd.f32 %v9877_v60, %v6390_v35 }
 0x4f3   : > { %v6252_v17 = vpack.c.bf16 %v6235_v6, %v6234_v40  ;;  %v6454_v22 = vadd.f32 %v6391_v27, %v6281_v26  ;;  %v10086_v26 = vld [vmem:[#allocation19_spill] sm:$0xff] }
 0x4f4   : > { %v6288_v44 = vunpack.c.l.bf16 %v10086_v26  ;;  %v6289_v40 = vunpack.c.h.bf16 %v10086_v26 }
 0x4f5   : > { %v6486_v53 = vmax.f32 %v6454_v22, 0.0  ;;  %6432 = vmatmul.bf16.gmra.mxu3 %v6252_v17 }
 0x4f6   : > { %v6201_v32 = vpop.f32.mrf.mxu2 }
 0x4f7   : > { %v8045_v10 = vpack.c.bf16 %v6486_v53, %v6485_v9  ;;  %v6202_v62 = vadd.f32 %v6201_v32, %v6113_v3  ;;  %v10087_v32 = vld [vmem:[#allocation20_spill] sm:$0xff] }
 0x4f8   : > { %v6393_v25 = vpop.f32.mrf.mxu3  ;;  %v6290_v20 = vunpack.c.l.bf16 %v10087_v32 }
 0x4f9   : > { %8102 = vst [vmem:[%s8269_s19 + $0x28] sm:$0xff] %v8045_v10   ;;  %v6394_v0 = vadd.f32 %v9877_v60, %v6393_v25  ;;  %v6236_v46 = vmax.f32 %v6202_v62, 0.0  ;;  %v6291_v10 = vunpack.c.h.bf16 %v10087_v32 }
 0x4fb   : > { %v6455_v56 = vadd.f32 %v6394_v0, %v6282_v23  ;;  %v10088_v0 = vld [vmem:[#allocation21_spill] sm:$0xff] }
 0x4fd   : > { %v6487_v12 = vmax.f32 %v6455_v56, 0.0 }
 0x4fe   : > { %v6203_v24 = vpop.f32.mrf.mxu2 }
 0x4ff   : > { %v6204_v36 = vadd.f32 %v6203_v24, %v6115_v59  ;;  %v6292_v24 = vunpack.c.l.bf16 %v10088_v0 }
 0x500   : > { %v6395_v29 = vpop.f32.mrf.mxu3 }
 0x501   : > { %v6237_v11 = vmax.f32 %v6204_v36, 0.0  ;;  %v6396_v13 = vadd.f32 %v9877_v60, %v6395_v29 }
 0x503   : > { %v6253_v50 = vpack.c.bf16 %v6237_v11, %v6236_v46  ;;  %v6456_v33 = vadd.f32 %v6396_v13, %v6283_v39  ;;  %v6293_v39 = vunpack.c.h.bf16 %v10088_v0 }
 0x505   : > { %v6488_v51 = vmax.f32 %v6456_v33, 0.0  ;;  %6437 = vmatmul.bf16.gmra.mxu3 %v6253_v50 }
 0x507   : > { %v8050_v28 = vpack.c.bf16 %v6488_v51, %v6487_v12  ;;  %v10089_v51 = vld [vmem:[#allocation22_spill] sm:$0xff] }
 0x508   : > { %v6398_v19 = vpop.f32.mrf.mxu3  ;;  %v6295_v14 = vunpack.c.h.bf16 %v10089_v51 }
 0x509   : > { %8103 = vst [vmem:[%s8269_s19 + $0x30] sm:$0xff] %v8050_v28   ;;  %v6399_v37 = vadd.f32 %v9877_v60, %v6398_v19  ;;  %v6294_v28 = vunpack.c.l.bf16 %v10089_v51 }
 0x50b   : > { %v6457_v38 = vadd.f32 %v6399_v37, %v6284_v45 }
 0x50d   : > { %v6489_v49 = vmax.f32 %v6457_v38, 0.0 }
 0x510   : > { %v6400_v8 = vpop.f32.mrf.mxu3 }
 0x511   : > { %v6401_v58 = vadd.f32 %v9877_v60, %v6400_v8 }
 0x513   : > { %v6458_v1 = vadd.f32 %v6401_v58, %v6285_v41 }
 0x515   : > { %v6490_v34 = vmax.f32 %v6458_v1, 0.0 }
 0x517   : > { %v8055_v18 = vpack.c.bf16 %v6490_v34, %v6489_v49  ;;  %v10090_v34 = vld [vmem:[#allocation23_spill] sm:$0xff] }
 0x518   : > { %v6403_v61 = vpop.f32.mrf.mxu3  ;;  %v6297_v7 = vunpack.c.h.bf16 %v10090_v34 }
 0x519   : > { %8104 = vst [vmem:[%s8269_s19 + $0x38] sm:$0xff] %v8055_v18   ;;  %v6404_v2 = vadd.f32 %v9877_v60, %v6403_v61  ;;  %v6296_v18 = vunpack.c.l.bf16 %v10090_v34 }
 0x51b   : > { %v6459_v30 = vadd.f32 %v6404_v2, %v6286_v55 }
 0x51d   : > { %v6491_v63 = vmax.f32 %v6459_v30, 0.0 }
 0x520   : > { %v6405_v15 = vpop.f32.mrf.mxu3 }
 0x521   : > { %v6406_v54 = vadd.f32 %v9877_v60, %v6405_v15 }
 0x523   : > { %v6460_v16 = vadd.f32 %v6406_v54, %v6287_v43 }
 0x525   : > { %v6492_v47 = vmax.f32 %v6460_v16, 0.0 }
 0x527   : > { %v8060_v4 = vpack.c.bf16 %v6492_v47, %v6491_v63  ;;  %v10091_v47 = vld [vmem:[#allocation24_spill] sm:$0xff] }
 0x528   : > { %v6408_v31 = vpop.f32.mrf.mxu3  ;;  %v6299_v26 = vunpack.c.h.bf16 %v10091_v47 }
 0x529   : > { %8105 = vst [vmem:[%s8269_s19 + $0x40] sm:$0xff] %v8060_v4   ;;  %v6409_v35 = vadd.f32 %v9877_v60, %v6408_v31  ;;  %v6298_v4 = vunpack.c.l.bf16 %v10091_v47 }
 0x52b   : > { %v6461_v6 = vadd.f32 %v6409_v35, %v6288_v44 }
 0x52d   : > { %v6493_v22 = vmax.f32 %v6461_v6, 0.0 }
 0x530   : > { %v6410_v21 = vpop.f32.mrf.mxu3 }
 0x531   : > { %v6411_v27 = vadd.f32 %v9877_v60, %v6410_v21 }
 0x533   : > { %v6462_v17 = vadd.f32 %v6411_v27, %v6289_v40 }
 0x535   : > { %v6494_v9 = vmax.f32 %v6462_v17, 0.0 }
 0x537   : > { %v8065_v53 = vpack.c.bf16 %v6494_v9, %v6493_v22  ;;  %v10092_v9 = vld [vmem:[#allocation25_spill] sm:$0xff] }
 0x538   : > { %v6413_v57 = vpop.f32.mrf.mxu3  ;;  %v6301_v32 = vunpack.c.h.bf16 %v10092_v9 }
 0x539   : > { %8106 = vst [vmem:[%s8269_s19 + $0x48] sm:$0xff] %v8065_v53   ;;  %v6414_v5 = vadd.f32 %v9877_v60, %v6413_v57  ;;  %v6300_v53 = vunpack.c.l.bf16 %v10092_v9 }
 0x53b   : > { %v6463_v42 = vadd.f32 %v6414_v5, %v6290_v20 }
 0x53d   : > { %v6495_v59 = vmax.f32 %v6463_v42, 0.0 }
 0x540   : > { %v6415_v25 = vpop.f32.mrf.mxu3 }
 0x541   : > { %v6416_v48 = vadd.f32 %v9877_v60, %v6415_v25 }
 0x543   : > { %v6464_v3 = vadd.f32 %v6416_v48, %v6291_v10 }
 0x545   : > { %v6496_v62 = vmax.f32 %v6464_v3, 0.0 }
 0x547   : > { %v8070_v52 = vpack.c.bf16 %v6496_v62, %v6495_v59 }
 0x548   : > { %v6418_v23 = vpop.f32.mrf.mxu3 }
 0x549   : > { %8107 = vst [vmem:[%s8269_s19 + $0x50] sm:$0xff] %v8070_v52   ;;  %v6419_v36 = vadd.f32 %v9877_v60, %v6418_v23 }
 0x54b   : > { %v6465_v46 = vadd.f32 %v6419_v36, %v6292_v24 }
 0x54d   : > { %v6497_v13 = vmax.f32 %v6465_v46, 0.0 }
 0x550   : > { %v6420_v29 = vpop.f32.mrf.mxu3 }
 0x551   : > { %v6421_v56 = vadd.f32 %v9877_v60, %v6420_v29 }
 0x553   : > { %v6466_v11 = vadd.f32 %v6421_v56, %v6293_v39 }
 0x555   : > { %v6498_v50 = vmax.f32 %v6466_v11, 0.0 }
 0x557   : > { %v8075_v33 = vpack.c.bf16 %v6498_v50, %v6497_v13 }
 0x558   : > { %v6423_v12 = vpop.f32.mrf.mxu3 }
 0x559   : > { %8108 = vst [vmem:[%s8269_s19 + $0x58] sm:$0xff] %v8075_v33   ;;  %v6424_v19 = vadd.f32 %v9877_v60, %v6423_v12 }
 0x55b   : > { %v6467_v37 = vadd.f32 %v6424_v19, %v6294_v28 }
 0x55d   : > { %v6499_v38 = vmax.f32 %v6467_v37, 0.0 }
 0x560   : > { %v6425_v45 = vpop.f32.mrf.mxu3 }
 0x561   : > { %v6426_v41 = vadd.f32 %v9877_v60, %v6425_v45 }
 0x563   : > { %v6468_v8 = vadd.f32 %v6426_v41, %v6295_v14 }
 0x565   : > { %v6500_v58 = vmax.f32 %v6468_v8, 0.0 }
 0x567   : > { %v8080_v1 = vpack.c.bf16 %v6500_v58, %v6499_v38 }
 0x568   : > { %v6428_v49 = vpop.f32.mrf.mxu3 }
 0x569   : > { %8109 = vst [vmem:[%s8269_s19 + $0x60] sm:$0xff] %v8080_v1   ;;  %v6429_v61 = vadd.f32 %v9877_v60, %v6428_v49 }
 0x56b   : > { %v6469_v2 = vadd.f32 %v6429_v61, %v6296_v18 }
 0x56d   : > { %v6501_v30 = vmax.f32 %v6469_v2, 0.0 }
 0x570   : > { %v6430_v55 = vpop.f32.mrf.mxu3 }
 0x571   : > { %v6431_v43 = vadd.f32 %v9877_v60, %v6430_v55 }
 0x573   : > { %v6470_v15 = vadd.f32 %v6431_v43, %v6297_v7 }
 0x575   : > { %v6502_v54 = vmax.f32 %v6470_v15, 0.0 }
 0x577   : > { %v8085_v16 = vpack.c.bf16 %v6502_v54, %v6501_v30 }
 0x578   : > { %v6433_v63 = vpop.f32.mrf.mxu3 }
 0x579   : > { %8110 = vst [vmem:[%s8269_s19 + $0x68] sm:$0xff] %v8085_v16   ;;  %v6434_v31 = vadd.f32 %v9877_v60, %v6433_v63 }
 0x57b   : > { %v6471_v35 = vadd.f32 %v6434_v31, %v6298_v4 }
 0x57d   : > { %v6503_v6 = vmax.f32 %v6471_v35, 0.0 }
 0x580   : > { %v6435_v44 = vpop.f32.mrf.mxu3 }
 0x581   : > { %v6436_v40 = vadd.f32 %v9877_v60, %v6435_v44 }
 0x583   : > { %v6472_v21 = vadd.f32 %v6436_v40, %v6299_v26 }
 0x585   : > { %v6504_v27 = vmax.f32 %v6472_v21, 0.0 }
 0x587   : > { %v8090_v17 = vpack.c.bf16 %v6504_v27, %v6503_v6 }
 0x588   : > { %v6438_v22 = vpop.f32.mrf.mxu3 }
 0x589   : > { %8111 = vst [vmem:[%s8269_s19 + $0x70] sm:$0xff] %v8090_v17   ;;  %v6439_v57 = vadd.f32 %v9877_v60, %v6438_v22 }
 0x58b   : > { %v6473_v5 = vadd.f32 %v6439_v57, %v6300_v53 }
 0x58d   : > { %v6505_v42 = vmax.f32 %v6473_v5, 0.0 }
 0x590   : > { %v6440_v20 = vpop.f32.mrf.mxu3 }
 0x591   : > { %v6441_v10 = vadd.f32 %v9877_v60, %v6440_v20 }
 0x593   : > { %v6474_v25 = vadd.f32 %v6441_v10, %v6301_v32 }
 0x595   : > { %v6506_v48 = vmax.f32 %v6474_v25, 0.0 }
 0x597   : > { %v8095_v3 = vpack.c.bf16 %v6506_v48, %v6505_v42 }
 0x599   : > { %8112 = vst [vmem:[%s8269_s19 + $0x78] sm:$0xff] %v8095_v3  }
 0x59a PF: > { %s18_s29 = sadd.s32 1, %s8192_s29   ;;  %s10093_s27 = smov %s8188_s28 }
 0x59b   : > { %p15_p5 = scmp.ge.s32.totalorder %s18_s29, 4   ;;  %s10094_s28 = smov %s10096_s30 }
 0x59d   :  { %17 = sbr.rel (!%p15_p5) target bundleno = 2 (0x2), region = 162 }
 0x5a2   :  { %6603 = vsyncmov [#allocation5] }
 0x5a5   :  { %s6604_s9 = vpop.sfrf %6603 }
 0x5a6   :  { %p7760_p6 = scmp.ne.s32.totalorder %s6604_s9, 0 }
 0x5a8   :  { %6608 = shalt.err (%p7760_p6)  }
 0x5a9   :  { %6610 = vsyncmov [#allocation5 + $0x1] }
 0x5ac   :  { %s6611_s10 = vpop.sfrf %6610 }
 0x5ad   :  { %p7761_p7 = scmp.ne.s32.totalorder %s6611_s10, 0 }
 0x5af   :  { %6615 = shalt.err (%p7761_p7)  }

</bundles_post_ra>
